<compile_context>
chip_gen: v6e
topology: v6e:2x2x1
jax: 0.10.0
libtpu: 0.0.40
codegen_flags: <defaults>
</compile_context>

<pallas_src>
import functools

import jax
import jax.numpy as jnp
from jax.experimental import pallas as pl
from jax.experimental.pallas import tpu as pltpu

NEG_SLOPE = 0.2
BN_EPS = 1e-5


def _lrelu(y):
    return jnp.where(y >= 0, y, NEG_SLOPE * y)


# ---------------------------------------------------------------------------
# Pallas kernels
# ---------------------------------------------------------------------------
def _conv_lrelu_kernel(p_ref, w_ref, o_ref):
    """Transposed conv-as-matmul + fused LeakyReLU (no-BN stage).

    p_ref: (K, tm) bf16 patches, w_ref: (Cout, K) bf16,
    o_ref: (Cout, tm) bf16 -> lane-dense store (last dim is the big M tile)."""
    y = jnp.dot(w_ref[...], p_ref[...], preferred_element_type=jnp.float32)
    o_ref[...] = _lrelu(y).astype(o_ref.dtype)


def _conv_stats_kernel(p_ref, w_ref, y_ref, st_ref):
    """Transposed conv-as-matmul + per-block channel sum / sum-of-squares partials.

    Each grid block writes its own (Cout, 2) partial -> no cross-iteration accumulator,
    so the M grid axis stays 'parallel' (v7x megacore sharding). y is stored bf16; the
    stats come from the f32 MXU accumulator before the cast (lane-axis XLU reduce)."""
    y = jnp.dot(w_ref[...], p_ref[...], preferred_element_type=jnp.float32)
    y_ref[...] = y.astype(y_ref.dtype)
    s = jnp.sum(y, axis=1, keepdims=True)        # (Cout, 1)
    q = jnp.sum(y * y, axis=1, keepdims=True)    # (Cout, 1)
    st_ref[...] = jnp.concatenate([s, q], axis=1)[None]   # (1, Cout, 2)


# ---------------------------------------------------------------------------
# Glue (plain JAX): transposed im2col, tile picking
# ---------------------------------------------------------------------------
def _im2col_t(a, k=4, s=2, p=1):
    """a: (C, N, H, W) -> transposed patches (k*k*C, N*Ho*Wo); K order = (tap, c).

    Any elementwise op producing `a` (e.g. the previous stage's BN affine + LReLU)
    fuses into this pad/gather in XLA, so it costs no extra HBM round trip."""
    C, N, H, W = a.shape
    ap = jnp.pad(a, ((0, 0), (0, 0), (p, p), (p, p)))
    Ho = (H + 2 * p - k) // s + 1
    Wo = (W + 2 * p - k) // s + 1
    taps = []
    for kh in range(k):
        for kw in range(k):
            taps.append(ap[:, :, kh: kh + s * (Ho - 1) + 1: s,
                               kw: kw + s * (Wo - 1) + 1: s])
    patches = jnp.stack(taps, axis=0)            # (k*k, C, N, Ho, Wo)
    return patches.reshape(k * k * C, N * Ho * Wo), (N, Ho, Wo)


def _pick_tile_m(M, K, patch_buf_budget=4 << 20):
    """Largest lane-dense (multiple-of-128) tile dividing M that keeps >= 2 grid
    blocks (so both v7x TensorCores get work on the 'parallel' axis) and bounds the
    bf16 patch block to ~4 MiB per pipeline buffer. Falls back to one full block."""
    best = 0
    t = 128
    while t <= M // 2:
        if M % t == 0 and 2 * K * t <= patch_buf_budget:
            best = t
        t += 128
    return best if best else M


# ---------------------------------------------------------------------------
# Conv stages
# ---------------------------------------------------------------------------
def conv_lrelu(patches_t, w_t):
    """Stage without batch-norm: conv + LeakyReLU in a single fused Pallas pass."""
    K, M = patches_t.shape
    Cout = w_t.shape[0]
    tm = _pick_tile_m(M, K)
    return pl.pallas_call(
        _conv_lrelu_kernel,
        out_shape=jax.ShapeDtypeStruct((Cout, M), jnp.bfloat16),
        grid=(M // tm,),
        in_specs=[pl.BlockSpec((K, tm), lambda i: (0, i)),
                  pl.BlockSpec((Cout, K), lambda i: (0, 0))],
        out_specs=pl.BlockSpec((Cout, tm), lambda i: (0, i)),
        compiler_params=pltpu.CompilerParams(
            dimension_semantics=("parallel",)),
    )(patches_t, w_t)


def conv_bn(patches_t, w_t, gamma, beta):
    """Stage with batch-norm: conv + per-block stats in Pallas. Returns the raw bf16
    conv output y (Cout, M) and the per-channel BN (scale, shift); the affine + LReLU
    is applied lazily by the caller so XLA fuses it into the next stage's im2col."""
    K, M = patches_t.shape
    Cout = w_t.shape[0]
    tm = _pick_tile_m(M, K)
    G = M // tm

    y, stats = pl.pallas_call(
        _conv_stats_kernel,
        out_shape=(jax.ShapeDtypeStruct((Cout, M), jnp.bfloat16),
                   jax.ShapeDtypeStruct((G, Cout, 2), jnp.float32)),
        grid=(G,),
        in_specs=[pl.BlockSpec((K, tm), lambda i: (0, i)),
                  pl.BlockSpec((Cout, K), lambda i: (0, 0))],
        out_specs=(pl.BlockSpec((Cout, tm), lambda i: (0, i)),
                   pl.BlockSpec((1, Cout, 2), lambda i: (i, 0, 0))),
        compiler_params=pltpu.CompilerParams(
            dimension_semantics=("parallel",)),
    )(patches_t, w_t)

    # Batch-norm statistics (training mode, biased variance), all in f32.
    # TODO(synk): single-pass E[x^2]-E[x]^2 can lose accuracy when |mean| >> std;
    #             the clamp avoids NaNs but a Welford-style pass would be more robust.
    csum = jnp.sum(stats[:, :, 0], axis=0)
    cssq = jnp.sum(stats[:, :, 1], axis=0)
    mean = csum / M
    var = jnp.maximum(cssq / M - mean * mean, 0.0)
    scale = gamma * jax.lax.rsqrt(var + BN_EPS)
    shift = beta - mean * scale
    return y, scale, shift


def _bn_lrelu(y_cm, scale, shift, out_dtype=jnp.bfloat16):
    """Per-channel BN affine + LeakyReLU on a (Cout, M) tensor (plain XLA elementwise;
    fuses into the consumer's pad/gather)."""
    a = y_cm.astype(jnp.float32) * scale[:, None] + shift[:, None]
    return _lrelu(a).astype(out_dtype)


# ---------------------------------------------------------------------------
# Parameters & forward
# ---------------------------------------------------------------------------
def init_params(key, conv_dim):
    D = conv_dim
    ks = jax.random.split(key, 12)

    def conv_w(k, cin, cout):
        # PyTorch Conv2d weight (Cout, Cin, kh, kw) -> (Cout, kh*kw*Cin) bf16,
        # column order (tap, cin) matching the transposed im2col K order.
        w = 0.02 * jax.random.normal(k, (cout, cin, 4, 4), jnp.float32)
        return jnp.transpose(w, (0, 2, 3, 1)).reshape(cout, 16 * cin).astype(jnp.bfloat16)

    C4 = 8 * D
    params = {
        "w1": conv_w(ks[0], 3, D),
        "w2": conv_w(ks[1], D, 2 * D),
        "g2": 1.0 + 0.1 * jax.random.normal(ks[2], (2 * D,), jnp.float32),
        "b2": 0.1 * jax.random.normal(ks[3], (2 * D,), jnp.float32),
        "w3": conv_w(ks[4], 2 * D, 4 * D),
        "g3": 1.0 + 0.1 * jax.random.normal(ks[5], (4 * D,), jnp.float32),
        "b3": 0.1 * jax.random.normal(ks[6], (4 * D,), jnp.float32),
        "w4": conv_w(ks[7], 4 * D, 8 * D),
        "g4": 1.0 + 0.1 * jax.random.normal(ks[8], (8 * D,), jnp.float32),
        "b4": 0.1 * jax.random.normal(ks[9], (8 * D,), jnp.float32),
        # nn.Linear(C4*16*16, 1) weight stored transposed (in_features, 1). The PyTorch
        # flatten order (c, h, w) matches the channel-major activation layout directly,
        # so no permutation is needed at init or runtime.
        "w_out": 0.02 * jax.random.normal(ks[10], (C4 * 16 * 16, 1), jnp.float32),
        "b_out": 0.02 * jax.random.normal(ks[11], (1,), jnp.float32),
    }
    return params


def discriminator_forward(x_nchw, params, *, conv_dim):
    D = conv_dim
    # NCHW (PyTorch) -> channel-major (C, N, H, W), bf16 for the MXU / HBM streams.
    x = jnp.transpose(x_nchw, (1, 0, 2, 3)).astype(jnp.bfloat16)

    # Stage 1 (3 -> D): conv + LeakyReLU fused in the Pallas kernel (no BN).
    p, (N, Ho, Wo) = _im2col_t(x)
    a = conv_lrelu(p, params["w1"]).reshape(D, N, Ho, Wo)

    # Stage 2 (D -> 2D): conv + stats; BN affine + LReLU deferred into stage-3 im2col.
    p, (N, Ho, Wo) = _im2col_t(a)
    y, sc, sh = conv_bn(p, params["w2"], params["g2"], params["b2"])
    a = _bn_lrelu(y, sc, sh).reshape(2 * D, N, Ho, Wo)

    # Stage 3 (2D -> 4D).
    p, (N, Ho, Wo) = _im2col_t(a)
    y, sc, sh = conv_bn(p, params["w3"], params["g3"], params["b3"])
    a = _bn_lrelu(y, sc, sh).reshape(4 * D, N, Ho, Wo)

    # Stage 4 (4D -> 8D): final BN affine + LReLU is a tiny XLA elementwise in f32.
    p, (N, Ho, Wo) = _im2col_t(a)
    y, sc, sh = conv_bn(p, params["w4"], params["g4"], params["b4"])
    a = _bn_lrelu(y, sc, sh, out_dtype=jnp.float32)          # (8D, N*Ho*Wo)

    # Output nn.Linear (~65 KFLOP): plain XLA — a dedicated pallas_call plus an HBM
    # transpose would cost more than the compute itself.
    C4 = 8 * D
    flat = jnp.transpose(a.reshape(C4, N, Ho * Wo), (1, 0, 2)).reshape(N, C4 * Ho * Wo)
    return flat @ params["w_out"] + params["b_out"]


if __name__ == "__main__":
    conv_dim = 8
    key = jax.random.PRNGKey(0)
    k_x, k_p = jax.random.split(key)

    # The Linear's conv_dim*8*16*16 input implies 256x256 images
    # (four stride-2 convs -> 16x16 spatial before the flatten).
    x = jax.random.normal(k_x, (2, 3, 256, 256), jnp.float32)
    params = init_params(k_p, conv_dim)

    fwd = jax.jit(functools.partial(discriminator_forward, conv_dim=conv_dim))
    out = fwd(x, params)
    jax.block_until_ready(out)

    assert out.shape == (2, 1), out.shape
    assert bool(jnp.all(jnp.isfinite(out)))
    print("KERNEL_OK")
</pallas_src>

<mosaic_0001>
module attributes {stable_mosaic.version = 11 : i64} {
  func.func @_conv_lrelu_kernel(%arg0: i32, %arg1: memref<48x16384xbf16, #tpu.memory_space<vmem>>, %arg2: memref<8x48xbf16, #tpu.memory_space<vmem>>, %arg3: memref<8x16384xbf16, #tpu.memory_space<vmem>>) attributes {dimension_semantics = [#tpu.dimension_semantics<parallel>], iteration_bounds = array<i64: 2>, scalar_prefetch = 0 : i64, scratch_operands = 0 : i64, tpu.core_type = #tpu.core_type<tc>, window_params = [{transform_indices = @transform_0, window_bounds = array<i64: 48, 16384>}, {pipeline_mode = #tpu.pipeline_mode<synchronous>, transform_indices = @transform_1, window_bounds = array<i64: 8, 48>}, {transform_indices = @transform_2, window_bounds = array<i64: 8, 16384>}]} {
    %c0 = arith.constant 0 : index
    %c0_0 = arith.constant 0 : index
    %0 = vector.load %arg2[%c0, %c0_0] : memref<8x48xbf16, #tpu.memory_space<vmem>>, vector<8x48xbf16>
    %c0_1 = arith.constant 0 : index
    %c0_2 = arith.constant 0 : index
    %1 = vector.load %arg1[%c0_1, %c0_2] : memref<48x16384xbf16, #tpu.memory_space<vmem>>, vector<48x16384xbf16>
    %cst = arith.constant dense<0.000000e+00> : vector<8x16384xf32>
    %2 = tpu.matmul %0, %1, %cst {dimension_numbers = #tpu.dot_dimension_numbers<[1], [0], [0], [1], [0, 0, 1, 1], [], []>} : vector<8x48xbf16>, vector<48x16384xbf16>, vector<8x16384xf32> -> vector<8x16384xf32>
    %cst_3 = arith.constant 0.000000e+00 : f32
    %3 = vector.broadcast %cst_3 : f32 to vector<8x16384xf32>
    %4 = arith.cmpf oge, %2, %3 : vector<8x16384xf32>
    %cst_4 = arith.constant 2.000000e-01 : f32
    %5 = vector.broadcast %cst_4 : f32 to vector<8x16384xf32>
    %6 = arith.mulf %5, %2 : vector<8x16384xf32>
    %7 = arith.select %4, %2, %6 : vector<8x16384xi1>, vector<8x16384xf32>
    %8 = arith.truncf %7 : vector<8x16384xf32> to vector<8x16384xbf16>
    %c0_5 = arith.constant 0 : index
    %c0_6 = arith.constant 0 : index
    %9 = vector.load %arg3[%c0_5, %c0_6] : memref<8x16384xbf16, #tpu.memory_space<vmem>>, vector<8x16384xbf16>
    tpu.vector_store %arg3[%c0_5, %c0_6], %8 {strides = array<i32>} : memref<8x16384xbf16, #tpu.memory_space<vmem>>, vector<8x16384xbf16>,
    return
  }
  func.func @transform_0(%arg0: i32) -> (i32, i32) {
    %c0_i32 = arith.constant 0 : i32
    %c0_i32_0 = arith.constant 0 : i32
    return %c0_i32, %arg0 : i32, i32
  }
  func.func @transform_1(%arg0: i32) -> (i32, i32) {
    %c0_i32 = arith.constant 0 : i32
    %c0_i32_0 = arith.constant 0 : i32
    %c0_i32_1 = arith.constant 0 : i32
    return %c0_i32, %c0_i32_0 : i32, i32
  }
  func.func @transform_2(%arg0: i32) -> (i32, i32) {
    %c0_i32 = arith.constant 0 : i32
    %c0_i32_0 = arith.constant 0 : i32
    return %c0_i32, %arg0 : i32, i32
  }
}

module attributes {stable_mosaic.version = 11 : i64} {
  func.func @_conv_stats_kernel(%arg0: i32, %arg1: memref<128x4096xbf16, #tpu.memory_space<vmem>>, %arg2: memref<16x128xbf16, #tpu.memory_space<vmem>>, %arg3: memref<16x4096xbf16, #tpu.memory_space<vmem>>, %arg4: memref<1x16x2xf32, #tpu.memory_space<vmem>>) attributes {dimension_semantics = [#tpu.dimension_semantics<parallel>], iteration_bounds = array<i64: 2>, scalar_prefetch = 0 : i64, scratch_operands = 0 : i64, tpu.core_type = #tpu.core_type<tc>, window_params = [{transform_indices = @transform_0, window_bounds = array<i64: 128, 4096>}, {pipeline_mode = #tpu.pipeline_mode<synchronous>, transform_indices = @transform_1, window_bounds = array<i64: 16, 128>}, {transform_indices = @transform_2, window_bounds = array<i64: 16, 4096>}, {transform_indices = @transform_3, window_bounds = array<i64: 1, 16, 2>}]} {
    %c0 = arith.constant 0 : index
    %c0_0 = arith.constant 0 : index
    %0 = vector.load %arg2[%c0, %c0_0] : memref<16x128xbf16, #tpu.memory_space<vmem>>, vector<16x128xbf16>
    %c0_1 = arith.constant 0 : index
    %c0_2 = arith.constant 0 : index
    %1 = vector.load %arg1[%c0_1, %c0_2] : memref<128x4096xbf16, #tpu.memory_space<vmem>>, vector<128x4096xbf16>
    %cst = arith.constant dense<0.000000e+00> : vector<16x4096xf32>
    %2 = tpu.matmul %0, %1, %cst {dimension_numbers = #tpu.dot_dimension_numbers<[1], [0], [0], [1], [0, 0, 1, 1], [], []>} : vector<16x128xbf16>, vector<128x4096xbf16>, vector<16x4096xf32> -> vector<16x4096xf32>
    %3 = arith.truncf %2 : vector<16x4096xf32> to vector<16x4096xbf16>
    %c0_3 = arith.constant 0 : index
    %c0_4 = arith.constant 0 : index
    %4 = vector.load %arg3[%c0_3, %c0_4] : memref<16x4096xbf16, #tpu.memory_space<vmem>>, vector<16x4096xbf16>
    tpu.vector_store %arg3[%c0_3, %c0_4], %3 {strides = array<i32>} : memref<16x4096xbf16, #tpu.memory_space<vmem>>, vector<16x4096xbf16>,
    %cst_5 = arith.constant dense<0.000000e+00> : vector<16xf32>
    %5 = vector.multi_reduction <add>, %2, %cst_5 [1] : vector<16x4096xf32> to vector<16xf32>
    %6 = vector.shape_cast %5 : vector<16xf32> to vector<16x1xf32>
    %7 = arith.mulf %2, %2 : vector<16x4096xf32>
    %cst_6 = arith.constant dense<0.000000e+00> : vector<16xf32>
    %8 = vector.multi_reduction <add>, %7, %cst_6 [1] : vector<16x4096xf32> to vector<16xf32>
    %9 = vector.shape_cast %8 : vector<16xf32> to vector<16x1xf32>
    %10 = tpu.concatenate %6, %9 in 1 : vector<16x1xf32>, vector<16x1xf32> -> vector<16x2xf32>
    %11 = vector.shape_cast %10 : vector<16x2xf32> to vector<1x16x2xf32>
    %c0_7 = arith.constant 0 : index
    %c0_8 = arith.constant 0 : index
    %c0_9 = arith.constant 0 : index
    %12 = vector.load %arg4[%c0_7, %c0_8, %c0_9] : memref<1x16x2xf32, #tpu.memory_space<vmem>>, vector<1x16x2xf32>
    tpu.vector_store %arg4[%c0_7, %c0_8, %c0_9], %11 {strides = array<i32>} : memref<1x16x2xf32, #tpu.memory_space<vmem>>, vector<1x16x2xf32>,
    return
  }
  func.func @transform_0(%arg0: i32) -> (i32, i32) {
    %c0_i32 = arith.constant 0 : i32
    %c0_i32_0 = arith.constant 0 : i32
    return %c0_i32, %arg0 : i32, i32
  }
  func.func @transform_1(%arg0: i32) -> (i32, i32) {
    %c0_i32 = arith.constant 0 : i32
    %c0_i32_0 = arith.constant 0 : i32
    %c0_i32_1 = arith.constant 0 : i32
    return %c0_i32, %c0_i32_0 : i32, i32
  }
  func.func @transform_2(%arg0: i32) -> (i32, i32) {
    %c0_i32 = arith.constant 0 : i32
    %c0_i32_0 = arith.constant 0 : i32
    return %c0_i32, %arg0 : i32, i32
  }
  func.func @transform_3(%arg0: i32) -> (i32, i32, i32) {
    %c0_i32 = arith.constant 0 : i32
    %c0_i32_0 = arith.constant 0 : i32
    %c0_i32_1 = arith.constant 0 : i32
    return %arg0, %c0_i32, %c0_i32_0 : i32, i32, i32
  }
}

module attributes {stable_mosaic.version = 11 : i64} {
  func.func @_conv_stats_kernel(%arg0: i32, %arg1: memref<256x1024xbf16, #tpu.memory_space<vmem>>, %arg2: memref<32x256xbf16, #tpu.memory_space<vmem>>, %arg3: memref<32x1024xbf16, #tpu.memory_space<vmem>>, %arg4: memref<1x32x2xf32, #tpu.memory_space<vmem>>) attributes {dimension_semantics = [#tpu.dimension_semantics<parallel>], iteration_bounds = array<i64: 2>, scalar_prefetch = 0 : i64, scratch_operands = 0 : i64, tpu.core_type = #tpu.core_type<tc>, window_params = [{transform_indices = @transform_0, window_bounds = array<i64: 256, 1024>}, {pipeline_mode = #tpu.pipeline_mode<synchronous>, transform_indices = @transform_1, window_bounds = array<i64: 32, 256>}, {transform_indices = @transform_2, window_bounds = array<i64: 32, 1024>}, {transform_indices = @transform_3, window_bounds = array<i64: 1, 32, 2>}]} {
    %c0 = arith.constant 0 : index
    %c0_0 = arith.constant 0 : index
    %0 = vector.load %arg2[%c0, %c0_0] : memref<32x256xbf16, #tpu.memory_space<vmem>>, vector<32x256xbf16>
    %c0_1 = arith.constant 0 : index
    %c0_2 = arith.constant 0 : index
    %1 = vector.load %arg1[%c0_1, %c0_2] : memref<256x1024xbf16, #tpu.memory_space<vmem>>, vector<256x1024xbf16>
    %cst = arith.constant dense<0.000000e+00> : vector<32x1024xf32>
    %2 = tpu.matmul %0, %1, %cst {dimension_numbers = #tpu.dot_dimension_numbers<[1], [0], [0], [1], [0, 0, 1, 1], [], []>} : vector<32x256xbf16>, vector<256x1024xbf16>, vector<32x1024xf32> -> vector<32x1024xf32>
    %3 = arith.truncf %2 : vector<32x1024xf32> to vector<32x1024xbf16>
    %c0_3 = arith.constant 0 : index
    %c0_4 = arith.constant 0 : index
    %4 = vector.load %arg3[%c0_3, %c0_4] : memref<32x1024xbf16, #tpu.memory_space<vmem>>, vector<32x1024xbf16>
    tpu.vector_store %arg3[%c0_3, %c0_4], %3 {strides = array<i32>} : memref<32x1024xbf16, #tpu.memory_space<vmem>>, vector<32x1024xbf16>,
    %cst_5 = arith.constant dense<0.000000e+00> : vector<32xf32>
    %5 = vector.multi_reduction <add>, %2, %cst_5 [1] : vector<32x1024xf32> to vector<32xf32>
    %6 = vector.shape_cast %5 : vector<32xf32> to vector<32x1xf32>
    %7 = arith.mulf %2, %2 : vector<32x1024xf32>
    %cst_6 = arith.constant dense<0.000000e+00> : vector<32xf32>
    %8 = vector.multi_reduction <add>, %7, %cst_6 [1] : vector<32x1024xf32> to vector<32xf32>
    %9 = vector.shape_cast %8 : vector<32xf32> to vector<32x1xf32>
    %10 = tpu.concatenate %6, %9 in 1 : vector<32x1xf32>, vector<32x1xf32> -> vector<32x2xf32>
    %11 = vector.shape_cast %10 : vector<32x2xf32> to vector<1x32x2xf32>
    %c0_7 = arith.constant 0 : index
    %c0_8 = arith.constant 0 : index
    %c0_9 = arith.constant 0 : index
    %12 = vector.load %arg4[%c0_7, %c0_8, %c0_9] : memref<1x32x2xf32, #tpu.memory_space<vmem>>, vector<1x32x2xf32>
    tpu.vector_store %arg4[%c0_7, %c0_8, %c0_9], %11 {strides = array<i32>} : memref<1x32x2xf32, #tpu.memory_space<vmem>>, vector<1x32x2xf32>,
    return
  }
  func.func @transform_0(%arg0: i32) -> (i32, i32) {
    %c0_i32 = arith.constant 0 : i32
    %c0_i32_0 = arith.constant 0 : i32
    return %c0_i32, %arg0 : i32, i32
  }
  func.func @transform_1(%arg0: i32) -> (i32, i32) {
    %c0_i32 = arith.constant 0 : i32
    %c0_i32_0 = arith.constant 0 : i32
    %c0_i32_1 = arith.constant 0 : i32
    return %c0_i32, %c0_i32_0 : i32, i32
  }
  func.func @transform_2(%arg0: i32) -> (i32, i32) {
    %c0_i32 = arith.constant 0 : i32
    %c0_i32_0 = arith.constant 0 : i32
    return %c0_i32, %arg0 : i32, i32
  }
  func.func @transform_3(%arg0: i32) -> (i32, i32, i32) {
    %c0_i32 = arith.constant 0 : i32
    %c0_i32_0 = arith.constant 0 : i32
    %c0_i32_1 = arith.constant 0 : i32
    return %arg0, %c0_i32, %c0_i32_0 : i32, i32, i32
  }
}

module attributes {stable_mosaic.version = 11 : i64} {
  func.func @_conv_stats_kernel(%arg0: i32, %arg1: memref<512x256xbf16, #tpu.memory_space<vmem>>, %arg2: memref<64x512xbf16, #tpu.memory_space<vmem>>, %arg3: memref<64x256xbf16, #tpu.memory_space<vmem>>, %arg4: memref<1x64x2xf32, #tpu.memory_space<vmem>>) attributes {dimension_semantics = [#tpu.dimension_semantics<parallel>], iteration_bounds = array<i64: 2>, scalar_prefetch = 0 : i64, scratch_operands = 0 : i64, tpu.core_type = #tpu.core_type<tc>, window_params = [{transform_indices = @transform_0, window_bounds = array<i64: 512, 256>}, {pipeline_mode = #tpu.pipeline_mode<synchronous>, transform_indices = @transform_1, window_bounds = array<i64: 64, 512>}, {transform_indices = @transform_2, window_bounds = array<i64: 64, 256>}, {transform_indices = @transform_3, window_bounds = array<i64: 1, 64, 2>}]} {
    %c0 = arith.constant 0 : index
    %c0_0 = arith.constant 0 : index
    %0 = vector.load %arg2[%c0, %c0_0] : memref<64x512xbf16, #tpu.memory_space<vmem>>, vector<64x512xbf16>
    %c0_1 = arith.constant 0 : index
    %c0_2 = arith.constant 0 : index
    %1 = vector.load %arg1[%c0_1, %c0_2] : memref<512x256xbf16, #tpu.memory_space<vmem>>, vector<512x256xbf16>
    %cst = arith.constant dense<0.000000e+00> : vector<64x256xf32>
    %2 = tpu.matmul %0, %1, %cst {dimension_numbers = #tpu.dot_dimension_numbers<[1], [0], [0], [1], [0, 0, 1, 1], [], []>} : vector<64x512xbf16>, vector<512x256xbf16>, vector<64x256xf32> -> vector<64x256xf32>
    %3 = arith.truncf %2 : vector<64x256xf32> to vector<64x256xbf16>
    %c0_3 = arith.constant 0 : index
    %c0_4 = arith.constant 0 : index
    %4 = vector.load %arg3[%c0_3, %c0_4] : memref<64x256xbf16, #tpu.memory_space<vmem>>, vector<64x256xbf16>
    tpu.vector_store %arg3[%c0_3, %c0_4], %3 {strides = array<i32>} : memref<64x256xbf16, #tpu.memory_space<vmem>>, vector<64x256xbf16>,
    %cst_5 = arith.constant dense<0.000000e+00> : vector<64xf32>
    %5 = vector.multi_reduction <add>, %2, %cst_5 [1] : vector<64x256xf32> to vector<64xf32>
    %6 = vector.shape_cast %5 : vector<64xf32> to vector<64x1xf32>
    %7 = arith.mulf %2, %2 : vector<64x256xf32>
    %cst_6 = arith.constant dense<0.000000e+00> : vector<64xf32>
    %8 = vector.multi_reduction <add>, %7, %cst_6 [1] : vector<64x256xf32> to vector<64xf32>
    %9 = vector.shape_cast %8 : vector<64xf32> to vector<64x1xf32>
    %10 = tpu.concatenate %6, %9 in 1 : vector<64x1xf32>, vector<64x1xf32> -> vector<64x2xf32>
    %11 = vector.shape_cast %10 : vector<64x2xf32> to vector<1x64x2xf32>
    %c0_7 = arith.constant 0 : index
    %c0_8 = arith.constant 0 : index
    %c0_9 = arith.constant 0 : index
    %12 = vector.load %arg4[%c0_7, %c0_8, %c0_9] : memref<1x64x2xf32, #tpu.memory_space<vmem>>, vector<1x64x2xf32>
    tpu.vector_store %arg4[%c0_7, %c0_8, %c0_9], %11 {strides = array<i32>} : memref<1x64x2xf32, #tpu.memory_space<vmem>>, vector<1x64x2xf32>,
    return
  }
  func.func @transform_0(%arg0: i32) -> (i32, i32) {
    %c0_i32 = arith.constant 0 : i32
    %c0_i32_0 = arith.constant 0 : i32
    return %c0_i32, %arg0 : i32, i32
  }
  func.func @transform_1(%arg0: i32) -> (i32, i32) {
    %c0_i32 = arith.constant 0 : i32
    %c0_i32_0 = arith.constant 0 : i32
    %c0_i32_1 = arith.constant 0 : i32
    return %c0_i32, %c0_i32_0 : i32, i32
  }
  func.func @transform_2(%arg0: i32) -> (i32, i32) {
    %c0_i32 = arith.constant 0 : i32
    %c0_i32_0 = arith.constant 0 : i32
    return %c0_i32, %arg0 : i32, i32
  }
  func.func @transform_3(%arg0: i32) -> (i32, i32, i32) {
    %c0_i32 = arith.constant 0 : i32
    %c0_i32_0 = arith.constant 0 : i32
    %c0_i32_1 = arith.constant 0 : i32
    return %arg0, %c0_i32, %c0_i32_0 : i32, i32, i32
  }
}

</mosaic_0001>

<bundles_post_ra>
// kernel: discriminator_forward.4
= control target key start
LH: loop header
LB: loop body
LE: loop exit
PB: predicated region body
PF: predicated region fallthrough
CT: control target
= control target key end

     0   :  { %s7546_s9 = smov 0   ;;  %s7548_s10 = smov 0   ;;  %s9063_s0 = inlined_call_operand.vmem [shape: bf16[48,32768], index: 0, kind: input, shape index: {}]   ;;  %s9064_s1 = inlined_call_operand.vmem [shape: bf16[8,48], index: 1, kind: input, shape index: {}]   ;;  %s9065_s2 = inlined_call_operand.vmem [shape: bf16[8,32768], index: 2, kind: output, shape index: {}]  }
   0x1   :  { %s7550_s11 = smov 0  }
   0x2 LB: > { %s6888_s12 = sadd.s32 4294967295, %s7528_s11   ;;  %s7563_s13 = sadd.s32 1, %s7528_s11   ;;  %s7528_s11 = sphi %s7550_s11, %s9068_s11   ;;  %s7524_s10 = sphi %s7548_s10, %s9067_s10   ;;  %s7520_s9 = sphi %s7546_s9, %s9066_s9  }
   0x3   : > { %s16_s14 = ssub.s32 %s7528_s11, %s7563_s13  ;;  %s19_s15 = sadd.s32 1, %s7524_s10 }
   0x4   : > { %p17_p0 = scmp.eq.s32.totalorder %s16_s14, 0  ;;  %p26_p1 = scmp.ne.s32.totalorder %s7524_s10, %s7520_s9 }
   0x5   : > { %p27_p2 = scmp.eq.s32.totalorder %s7528_s11, 0  ;;  %p6891_p4 = scmp.ge.s32.totalorder %s7528_s11, 2 }
   0x6   : > { %s7572_s16 = scalar_select %p17_p0, %s7524_s10, %s19_s15  }
   0x7   : > { %p28_p3 = por %p27_p2, %p26_p1  ;;  %102 = sbr.rel (%p6891_p4) target bundleno = 209 (0xd1), region = 20 }
   0xc   : > { %105 = sbr.rel (!%p28_p3) target bundleno = 209 (0xd1), region = 24  ;;  %s107_s17 = sand.u32 (%p28_p3), 1, %s7524_s10  }
   0xd   : > { %s7411_s18 = sshll.u32 (%p28_p3), %s7528_s11, 9  ;;  %s7476_s19 = smul.u32 (%p28_p3), 3072, %s107_s17 }
   0xe   : > { %s7580_s22 = scalar_lea.vmem (%p28_p3), %s9063_s0, %s7411_s18 }
   0xf   : > { %v125_v0 = vld [vmem:[%s7580_s22] sm:$0xff] (%p28_p3)  ;;  %v127_v1 = vld [vmem:[%s7580_s22 + $0x8] sm:$0xff] (%p28_p3)  ;;  %v129_v2 = vld [vmem:[%s7580_s22 + $0x10] sm:$0xff] (%p28_p3)  ;;  %s7588_s23 = scalar_lea.vmem (%p28_p3), [#allocation2], %s7476_s19 }
  0x10   : > { %v131_v3 = vld [vmem:[%s7580_s22 + $0x18] sm:$0xff] (%p28_p3)  ;;  %v133_v4 = vld [vmem:[%s7580_s22 + $0x20] sm:$0xff] (%p28_p3)  ;;  %v135_v5 = vld [vmem:[%s7580_s22 + $0x28] sm:$0xff] (%p28_p3)  ;;  %126 = vst [vmem:[%s7588_s23] sm:$0xff] (%p28_p3), %v125_v0 }
  0x11   : > { %128 = vst [vmem:[%s7588_s23 + $0x8] sm:$0xff] %v127_v1  ;;  %130 = vst [vmem:[%s7588_s23 + $0x10] sm:$0xff] %v129_v2  ;;  %v137_v6 = vld [vmem:[%s7580_s22 + $0x30] sm:$0xff]  ;;  %v139_v7 = vld [vmem:[%s7580_s22 + $0x38] sm:$0xff] }
  0x12   : > { %132 = vst [vmem:[%s7588_s23 + $0x18] sm:$0xff] %v131_v3  ;;  %134 = vst [vmem:[%s7588_s23 + $0x20] sm:$0xff] %v133_v4  ;;  %v141_v8 = vld [vmem:[%s7580_s22 + $0x40] sm:$0xff]  ;;  %v143_v9 = vld [vmem:[%s7580_s22 + $0x48] sm:$0xff] }
  0x13   : > { %136 = vst [vmem:[%s7588_s23 + $0x28] sm:$0xff] %v135_v5  ;;  %138 = vst [vmem:[%s7588_s23 + $0x30] sm:$0xff] %v137_v6  ;;  %v145_v10 = vld [vmem:[%s7580_s22 + $0x50] sm:$0xff]  ;;  %v147_v11 = vld [vmem:[%s7580_s22 + $0x58] sm:$0xff] }
  0x14   : > { %140 = vst [vmem:[%s7588_s23 + $0x38] sm:$0xff] %v139_v7  ;;  %142 = vst [vmem:[%s7588_s23 + $0x40] sm:$0xff] %v141_v8  ;;  %v149_v12 = vld [vmem:[%s7580_s22 + $0x60] sm:$0xff]  ;;  %v151_v13 = vld [vmem:[%s7580_s22 + $0x68] sm:$0xff] }
  0x15   : > { %144 = vst [vmem:[%s7588_s23 + $0x48] sm:$0xff] %v143_v9  ;;  %146 = vst [vmem:[%s7588_s23 + $0x50] sm:$0xff] %v145_v10  ;;  %v153_v14 = vld [vmem:[%s7580_s22 + $0x70] sm:$0xff]  ;;  %v155_v15 = vld [vmem:[%s7580_s22 + $0x78] sm:$0xff] }
  0x16   : > { %148 = vst [vmem:[%s7588_s23 + $0x58] sm:$0xff] %v147_v11  ;;  %150 = vst [vmem:[%s7588_s23 + $0x60] sm:$0xff] %v149_v12  ;;  %v157_v16 = vld [vmem:[%s7580_s22 + $0x80] sm:$0xff]  ;;  %v159_v17 = vld [vmem:[%s7580_s22 + $0x88] sm:$0xff] }
  0x17   : > { %152 = vst [vmem:[%s7588_s23 + $0x68] sm:$0xff] %v151_v13  ;;  %154 = vst [vmem:[%s7588_s23 + $0x70] sm:$0xff] %v153_v14  ;;  %v161_v18 = vld [vmem:[%s7580_s22 + $0x90] sm:$0xff]  ;;  %v163_v19 = vld [vmem:[%s7580_s22 + $0x98] sm:$0xff] }
  0x18   : > { %156 = vst [vmem:[%s7588_s23 + $0x78] sm:$0xff] %v155_v15  ;;  %158 = vst [vmem:[%s7588_s23 + $0x80] sm:$0xff] %v157_v16  ;;  %v165_v20 = vld [vmem:[%s7580_s22 + $0xa0] sm:$0xff]  ;;  %v167_v21 = vld [vmem:[%s7580_s22 + $0xa8] sm:$0xff] }
  0x19   : > { %160 = vst [vmem:[%s7588_s23 + $0x88] sm:$0xff] %v159_v17  ;;  %162 = vst [vmem:[%s7588_s23 + $0x90] sm:$0xff] %v161_v18  ;;  %v169_v22 = vld [vmem:[%s7580_s22 + $0xb0] sm:$0xff]  ;;  %v171_v23 = vld [vmem:[%s7580_s22 + $0xb8] sm:$0xff] }
  0x1a   : > { %164 = vst [vmem:[%s7588_s23 + $0x98] sm:$0xff] %v163_v19  ;;  %166 = vst [vmem:[%s7588_s23 + $0xa0] sm:$0xff] %v165_v20  ;;  %v173_v24 = vld [vmem:[%s7580_s22 + $0xc0] sm:$0xff]  ;;  %v175_v25 = vld [vmem:[%s7580_s22 + $0xc8] sm:$0xff] }
  0x1b   : > { %168 = vst [vmem:[%s7588_s23 + $0xa8] sm:$0xff] %v167_v21  ;;  %170 = vst [vmem:[%s7588_s23 + $0xb0] sm:$0xff] %v169_v22  ;;  %v177_v26 = vld [vmem:[%s7580_s22 + $0xd0] sm:$0xff]  ;;  %v179_v27 = vld [vmem:[%s7580_s22 + $0xd8] sm:$0xff] }
  0x1c   : > { %172 = vst [vmem:[%s7588_s23 + $0xb8] sm:$0xff] %v171_v23  ;;  %174 = vst [vmem:[%s7588_s23 + $0xc0] sm:$0xff] %v173_v24  ;;  %v181_v28 = vld [vmem:[%s7580_s22 + $0xe0] sm:$0xff]  ;;  %v183_v29 = vld [vmem:[%s7580_s22 + $0xe8] sm:$0xff] }
  0x1d   : > { %176 = vst [vmem:[%s7588_s23 + $0xc8] sm:$0xff] %v175_v25  ;;  %178 = vst [vmem:[%s7588_s23 + $0xd0] sm:$0xff] %v177_v26  ;;  %v185_v30 = vld [vmem:[%s7580_s22 + $0xf0] sm:$0xff]  ;;  %v187_v31 = vld [vmem:[%s7580_s22 + $0xf8] sm:$0xff] }
  0x1e   : > { %180 = vst [vmem:[%s7588_s23 + $0xd8] sm:$0xff] %v179_v27  ;;  %182 = vst [vmem:[%s7588_s23 + $0xe0] sm:$0xff] %v181_v28  ;;  %v189_v32 = vld [vmem:[%s7580_s22 + $0x100] sm:$0xff]  ;;  %v191_v33 = vld [vmem:[%s7580_s22 + $0x108] sm:$0xff] }
  0x1f   : > { %184 = vst [vmem:[%s7588_s23 + $0xe8] sm:$0xff] %v183_v29  ;;  %186 = vst [vmem:[%s7588_s23 + $0xf0] sm:$0xff] %v185_v30  ;;  %v193_v34 = vld [vmem:[%s7580_s22 + $0x110] sm:$0xff]  ;;  %v195_v35 = vld [vmem:[%s7580_s22 + $0x118] sm:$0xff] }
  0x20   : > { %188 = vst [vmem:[%s7588_s23 + $0xf8] sm:$0xff] %v187_v31  ;;  %190 = vst [vmem:[%s7588_s23 + $0x100] sm:$0xff] %v189_v32  ;;  %v197_v36 = vld [vmem:[%s7580_s22 + $0x120] sm:$0xff]  ;;  %v199_v37 = vld [vmem:[%s7580_s22 + $0x128] sm:$0xff] }
  0x21   : > { %192 = vst [vmem:[%s7588_s23 + $0x108] sm:$0xff] %v191_v33  ;;  %194 = vst [vmem:[%s7588_s23 + $0x110] sm:$0xff] %v193_v34  ;;  %v201_v38 = vld [vmem:[%s7580_s22 + $0x130] sm:$0xff]  ;;  %v203_v39 = vld [vmem:[%s7580_s22 + $0x138] sm:$0xff] }
  0x22   : > { %196 = vst [vmem:[%s7588_s23 + $0x118] sm:$0xff] %v195_v35  ;;  %198 = vst [vmem:[%s7588_s23 + $0x120] sm:$0xff] %v197_v36  ;;  %v205_v40 = vld [vmem:[%s7580_s22 + $0x140] sm:$0xff]  ;;  %v207_v41 = vld [vmem:[%s7580_s22 + $0x148] sm:$0xff] }
  0x23   : > { %200 = vst [vmem:[%s7588_s23 + $0x128] sm:$0xff] %v199_v37  ;;  %202 = vst [vmem:[%s7588_s23 + $0x130] sm:$0xff] %v201_v38  ;;  %v209_v42 = vld [vmem:[%s7580_s22 + $0x150] sm:$0xff]  ;;  %v211_v43 = vld [vmem:[%s7580_s22 + $0x158] sm:$0xff] }
  0x24   : > { %204 = vst [vmem:[%s7588_s23 + $0x138] sm:$0xff] %v203_v39  ;;  %206 = vst [vmem:[%s7588_s23 + $0x140] sm:$0xff] %v205_v40  ;;  %v213_v44 = vld [vmem:[%s7580_s22 + $0x160] sm:$0xff]  ;;  %v215_v45 = vld [vmem:[%s7580_s22 + $0x168] sm:$0xff] }
  0x25   : > { %208 = vst [vmem:[%s7588_s23 + $0x148] sm:$0xff] %v207_v41  ;;  %210 = vst [vmem:[%s7588_s23 + $0x150] sm:$0xff] %v209_v42  ;;  %v217_v46 = vld [vmem:[%s7580_s22 + $0x170] sm:$0xff]  ;;  %v219_v47 = vld [vmem:[%s7580_s22 + $0x178] sm:$0xff] }
  0x26   : > { %212 = vst [vmem:[%s7588_s23 + $0x158] sm:$0xff] %v211_v43  ;;  %214 = vst [vmem:[%s7588_s23 + $0x160] sm:$0xff] %v213_v44  ;;  %v221_v48 = vld [vmem:[%s7580_s22 + $0x180] sm:$0xff]  ;;  %v223_v49 = vld [vmem:[%s7580_s22 + $0x188] sm:$0xff] }
  0x27   : > { %216 = vst [vmem:[%s7588_s23 + $0x168] sm:$0xff] %v215_v45  ;;  %218 = vst [vmem:[%s7588_s23 + $0x170] sm:$0xff] %v217_v46  ;;  %v225_v50 = vld [vmem:[%s7580_s22 + $0x190] sm:$0xff]  ;;  %v227_v51 = vld [vmem:[%s7580_s22 + $0x198] sm:$0xff] }
  0x28   : > { %220 = vst [vmem:[%s7588_s23 + $0x178] sm:$0xff] %v219_v47  ;;  %222 = vst [vmem:[%s7588_s23 + $0x180] sm:$0xff] %v221_v48  ;;  %v229_v52 = vld [vmem:[%s7580_s22 + $0x1a0] sm:$0xff]  ;;  %v231_v53 = vld [vmem:[%s7580_s22 + $0x1a8] sm:$0xff] }
  0x29   : > { %224 = vst [vmem:[%s7588_s23 + $0x188] sm:$0xff] %v223_v49  ;;  %226 = vst [vmem:[%s7588_s23 + $0x190] sm:$0xff] %v225_v50  ;;  %v233_v54 = vld [vmem:[%s7580_s22 + $0x1b0] sm:$0xff]  ;;  %v235_v55 = vld [vmem:[%s7580_s22 + $0x1b8] sm:$0xff] }
  0x2a   : > { %228 = vst [vmem:[%s7588_s23 + $0x198] sm:$0xff] %v227_v51  ;;  %230 = vst [vmem:[%s7588_s23 + $0x1a0] sm:$0xff] %v229_v52  ;;  %v237_v56 = vld [vmem:[%s7580_s22 + $0x1c0] sm:$0xff]  ;;  %v239_v57 = vld [vmem:[%s7580_s22 + $0x1c8] sm:$0xff] }
  0x2b   : > { %232 = vst [vmem:[%s7588_s23 + $0x1a8] sm:$0xff] %v231_v53  ;;  %234 = vst [vmem:[%s7588_s23 + $0x1b0] sm:$0xff] %v233_v54  ;;  %v241_v58 = vld [vmem:[%s7580_s22 + $0x1d0] sm:$0xff]  ;;  %v243_v59 = vld [vmem:[%s7580_s22 + $0x1d8] sm:$0xff] }
  0x2c   : > { %236 = vst [vmem:[%s7588_s23 + $0x1b8] sm:$0xff] %v235_v55  ;;  %238 = vst [vmem:[%s7588_s23 + $0x1c0] sm:$0xff] %v237_v56  ;;  %v245_v60 = vld [vmem:[%s7580_s22 + $0x1e0] sm:$0xff]  ;;  %v247_v61 = vld [vmem:[%s7580_s22 + $0x1e8] sm:$0xff] }
  0x2d   : > { %240 = vst [vmem:[%s7588_s23 + $0x1c8] sm:$0xff] %v239_v57  ;;  %242 = vst [vmem:[%s7588_s23 + $0x1d0] sm:$0xff] %v241_v58  ;;  %v249_v62 = vld [vmem:[%s7580_s22 + $0x1f0] sm:$0xff]  ;;  %v251_v63 = vld [vmem:[%s7580_s22 + $0x1f8] sm:$0xff] }
  0x2e   : > { %244 = vst [vmem:[%s7588_s23 + $0x1d8] sm:$0xff] %v243_v59  ;;  %246 = vst [vmem:[%s7588_s23 + $0x1e0] sm:$0xff] %v245_v60  ;;  %v253_v0 = vld [vmem:[%s7580_s22 + $0x400] sm:$0xff]  ;;  %v255_v1 = vld [vmem:[%s7580_s22 + $0x408] sm:$0xff] }
  0x2f   : > { %248 = vst [vmem:[%s7588_s23 + $0x1e8] sm:$0xff] %v247_v61  ;;  %250 = vst [vmem:[%s7588_s23 + $0x1f0] sm:$0xff] %v249_v62  ;;  %v257_v2 = vld [vmem:[%s7580_s22 + $0x410] sm:$0xff]  ;;  %v259_v3 = vld [vmem:[%s7580_s22 + $0x418] sm:$0xff] }
  0x30   : > { %252 = vst [vmem:[%s7588_s23 + $0x1f8] sm:$0xff] %v251_v63  ;;  %254 = vst [vmem:[%s7588_s23 + $0x200] sm:$0xff] %v253_v0  ;;  %v261_v4 = vld [vmem:[%s7580_s22 + $0x420] sm:$0xff]  ;;  %v263_v5 = vld [vmem:[%s7580_s22 + $0x428] sm:$0xff] }
  0x31   : > { %256 = vst [vmem:[%s7588_s23 + $0x208] sm:$0xff] %v255_v1  ;;  %258 = vst [vmem:[%s7588_s23 + $0x210] sm:$0xff] %v257_v2  ;;  %v265_v6 = vld [vmem:[%s7580_s22 + $0x430] sm:$0xff]  ;;  %v267_v7 = vld [vmem:[%s7580_s22 + $0x438] sm:$0xff] }
  0x32   : > { %260 = vst [vmem:[%s7588_s23 + $0x218] sm:$0xff] %v259_v3  ;;  %262 = vst [vmem:[%s7588_s23 + $0x220] sm:$0xff] %v261_v4  ;;  %v269_v8 = vld [vmem:[%s7580_s22 + $0x440] sm:$0xff]  ;;  %v271_v9 = vld [vmem:[%s7580_s22 + $0x448] sm:$0xff] }
  0x33   : > { %264 = vst [vmem:[%s7588_s23 + $0x228] sm:$0xff] %v263_v5  ;;  %266 = vst [vmem:[%s7588_s23 + $0x230] sm:$0xff] %v265_v6  ;;  %v273_v10 = vld [vmem:[%s7580_s22 + $0x450] sm:$0xff]  ;;  %v275_v11 = vld [vmem:[%s7580_s22 + $0x458] sm:$0xff] }
  0x34   : > { %268 = vst [vmem:[%s7588_s23 + $0x238] sm:$0xff] %v267_v7  ;;  %270 = vst [vmem:[%s7588_s23 + $0x240] sm:$0xff] %v269_v8  ;;  %v277_v12 = vld [vmem:[%s7580_s22 + $0x460] sm:$0xff]  ;;  %v279_v13 = vld [vmem:[%s7580_s22 + $0x468] sm:$0xff] }
  0x35   : > { %272 = vst [vmem:[%s7588_s23 + $0x248] sm:$0xff] %v271_v9  ;;  %274 = vst [vmem:[%s7588_s23 + $0x250] sm:$0xff] %v273_v10  ;;  %v281_v14 = vld [vmem:[%s7580_s22 + $0x470] sm:$0xff]  ;;  %v283_v15 = vld [vmem:[%s7580_s22 + $0x478] sm:$0xff] }
  0x36   : > { %276 = vst [vmem:[%s7588_s23 + $0x258] sm:$0xff] %v275_v11  ;;  %278 = vst [vmem:[%s7588_s23 + $0x260] sm:$0xff] %v277_v12  ;;  %v285_v16 = vld [vmem:[%s7580_s22 + $0x480] sm:$0xff]  ;;  %v287_v17 = vld [vmem:[%s7580_s22 + $0x488] sm:$0xff] }
  0x37   : > { %280 = vst [vmem:[%s7588_s23 + $0x268] sm:$0xff] %v279_v13  ;;  %282 = vst [vmem:[%s7588_s23 + $0x270] sm:$0xff] %v281_v14  ;;  %v289_v18 = vld [vmem:[%s7580_s22 + $0x490] sm:$0xff]  ;;  %v291_v19 = vld [vmem:[%s7580_s22 + $0x498] sm:$0xff] }
  0x38   : > { %284 = vst [vmem:[%s7588_s23 + $0x278] sm:$0xff] %v283_v15  ;;  %286 = vst [vmem:[%s7588_s23 + $0x280] sm:$0xff] %v285_v16  ;;  %v293_v20 = vld [vmem:[%s7580_s22 + $0x4a0] sm:$0xff]  ;;  %v295_v21 = vld [vmem:[%s7580_s22 + $0x4a8] sm:$0xff] }
  0x39   : > { %288 = vst [vmem:[%s7588_s23 + $0x288] sm:$0xff] %v287_v17  ;;  %290 = vst [vmem:[%s7588_s23 + $0x290] sm:$0xff] %v289_v18  ;;  %v297_v22 = vld [vmem:[%s7580_s22 + $0x4b0] sm:$0xff]  ;;  %v299_v23 = vld [vmem:[%s7580_s22 + $0x4b8] sm:$0xff] }
  0x3a   : > { %292 = vst [vmem:[%s7588_s23 + $0x298] sm:$0xff] %v291_v19  ;;  %294 = vst [vmem:[%s7588_s23 + $0x2a0] sm:$0xff] %v293_v20  ;;  %v301_v24 = vld [vmem:[%s7580_s22 + $0x4c0] sm:$0xff]  ;;  %v303_v25 = vld [vmem:[%s7580_s22 + $0x4c8] sm:$0xff] }
  0x3b   : > { %296 = vst [vmem:[%s7588_s23 + $0x2a8] sm:$0xff] %v295_v21  ;;  %298 = vst [vmem:[%s7588_s23 + $0x2b0] sm:$0xff] %v297_v22  ;;  %v305_v26 = vld [vmem:[%s7580_s22 + $0x4d0] sm:$0xff]  ;;  %v307_v27 = vld [vmem:[%s7580_s22 + $0x4d8] sm:$0xff] }
  0x3c   : > { %300 = vst [vmem:[%s7588_s23 + $0x2b8] sm:$0xff] %v299_v23  ;;  %302 = vst [vmem:[%s7588_s23 + $0x2c0] sm:$0xff] %v301_v24  ;;  %v309_v28 = vld [vmem:[%s7580_s22 + $0x4e0] sm:$0xff]  ;;  %v311_v29 = vld [vmem:[%s7580_s22 + $0x4e8] sm:$0xff] }
  0x3d   : > { %304 = vst [vmem:[%s7588_s23 + $0x2c8] sm:$0xff] %v303_v25  ;;  %306 = vst [vmem:[%s7588_s23 + $0x2d0] sm:$0xff] %v305_v26  ;;  %v313_v30 = vld [vmem:[%s7580_s22 + $0x4f0] sm:$0xff]  ;;  %v315_v31 = vld [vmem:[%s7580_s22 + $0x4f8] sm:$0xff] }
  0x3e   : > { %308 = vst [vmem:[%s7588_s23 + $0x2d8] sm:$0xff] %v307_v27  ;;  %310 = vst [vmem:[%s7588_s23 + $0x2e0] sm:$0xff] %v309_v28  ;;  %v317_v32 = vld [vmem:[%s7580_s22 + $0x500] sm:$0xff]  ;;  %v319_v33 = vld [vmem:[%s7580_s22 + $0x508] sm:$0xff] }
  0x3f   : > { %312 = vst [vmem:[%s7588_s23 + $0x2e8] sm:$0xff] %v311_v29  ;;  %314 = vst [vmem:[%s7588_s23 + $0x2f0] sm:$0xff] %v313_v30  ;;  %v321_v34 = vld [vmem:[%s7580_s22 + $0x510] sm:$0xff]  ;;  %v323_v35 = vld [vmem:[%s7580_s22 + $0x518] sm:$0xff] }
  0x40   : > { %316 = vst [vmem:[%s7588_s23 + $0x2f8] sm:$0xff] %v315_v31  ;;  %318 = vst [vmem:[%s7588_s23 + $0x300] sm:$0xff] %v317_v32  ;;  %v325_v36 = vld [vmem:[%s7580_s22 + $0x520] sm:$0xff]  ;;  %v327_v37 = vld [vmem:[%s7580_s22 + $0x528] sm:$0xff] }
  0x41   : > { %320 = vst [vmem:[%s7588_s23 + $0x308] sm:$0xff] %v319_v33  ;;  %322 = vst [vmem:[%s7588_s23 + $0x310] sm:$0xff] %v321_v34  ;;  %v329_v38 = vld [vmem:[%s7580_s22 + $0x530] sm:$0xff]  ;;  %v331_v39 = vld [vmem:[%s7580_s22 + $0x538] sm:$0xff] }
  0x42   : > { %324 = vst [vmem:[%s7588_s23 + $0x318] sm:$0xff] %v323_v35  ;;  %326 = vst [vmem:[%s7588_s23 + $0x320] sm:$0xff] %v325_v36  ;;  %v333_v40 = vld [vmem:[%s7580_s22 + $0x540] sm:$0xff]  ;;  %v335_v41 = vld [vmem:[%s7580_s22 + $0x548] sm:$0xff] }
  0x43   : > { %328 = vst [vmem:[%s7588_s23 + $0x328] sm:$0xff] %v327_v37  ;;  %330 = vst [vmem:[%s7588_s23 + $0x330] sm:$0xff] %v329_v38  ;;  %v337_v42 = vld [vmem:[%s7580_s22 + $0x550] sm:$0xff]  ;;  %v339_v43 = vld [vmem:[%s7580_s22 + $0x558] sm:$0xff] }
  0x44   : > { %332 = vst [vmem:[%s7588_s23 + $0x338] sm:$0xff] %v331_v39  ;;  %334 = vst [vmem:[%s7588_s23 + $0x340] sm:$0xff] %v333_v40  ;;  %v341_v44 = vld [vmem:[%s7580_s22 + $0x560] sm:$0xff]  ;;  %v343_v45 = vld [vmem:[%s7580_s22 + $0x568] sm:$0xff] }
  0x45   : > { %336 = vst [vmem:[%s7588_s23 + $0x348] sm:$0xff] %v335_v41  ;;  %338 = vst [vmem:[%s7588_s23 + $0x350] sm:$0xff] %v337_v42  ;;  %v345_v46 = vld [vmem:[%s7580_s22 + $0x570] sm:$0xff]  ;;  %v347_v47 = vld [vmem:[%s7580_s22 + $0x578] sm:$0xff] }
  0x46   : > { %340 = vst [vmem:[%s7588_s23 + $0x358] sm:$0xff] %v339_v43  ;;  %342 = vst [vmem:[%s7588_s23 + $0x360] sm:$0xff] %v341_v44  ;;  %v349_v48 = vld [vmem:[%s7580_s22 + $0x580] sm:$0xff]  ;;  %v351_v49 = vld [vmem:[%s7580_s22 + $0x588] sm:$0xff] }
  0x47   : > { %344 = vst [vmem:[%s7588_s23 + $0x368] sm:$0xff] %v343_v45  ;;  %346 = vst [vmem:[%s7588_s23 + $0x370] sm:$0xff] %v345_v46  ;;  %v353_v50 = vld [vmem:[%s7580_s22 + $0x590] sm:$0xff]  ;;  %v355_v51 = vld [vmem:[%s7580_s22 + $0x598] sm:$0xff] }
  0x48   : > { %348 = vst [vmem:[%s7588_s23 + $0x378] sm:$0xff] %v347_v47  ;;  %350 = vst [vmem:[%s7588_s23 + $0x380] sm:$0xff] %v349_v48  ;;  %v357_v52 = vld [vmem:[%s7580_s22 + $0x5a0] sm:$0xff]  ;;  %v359_v53 = vld [vmem:[%s7580_s22 + $0x5a8] sm:$0xff] }
  0x49   : > { %352 = vst [vmem:[%s7588_s23 + $0x388] sm:$0xff] %v351_v49  ;;  %354 = vst [vmem:[%s7588_s23 + $0x390] sm:$0xff] %v353_v50  ;;  %v361_v54 = vld [vmem:[%s7580_s22 + $0x5b0] sm:$0xff]  ;;  %v363_v55 = vld [vmem:[%s7580_s22 + $0x5b8] sm:$0xff] }
  0x4a   : > { %356 = vst [vmem:[%s7588_s23 + $0x398] sm:$0xff] %v355_v51  ;;  %358 = vst [vmem:[%s7588_s23 + $0x3a0] sm:$0xff] %v357_v52  ;;  %v365_v56 = vld [vmem:[%s7580_s22 + $0x5c0] sm:$0xff]  ;;  %v367_v57 = vld [vmem:[%s7580_s22 + $0x5c8] sm:$0xff] }
  0x4b   : > { %360 = vst [vmem:[%s7588_s23 + $0x3a8] sm:$0xff] %v359_v53  ;;  %362 = vst [vmem:[%s7588_s23 + $0x3b0] sm:$0xff] %v361_v54  ;;  %v369_v58 = vld [vmem:[%s7580_s22 + $0x5d0] sm:$0xff]  ;;  %v371_v59 = vld [vmem:[%s7580_s22 + $0x5d8] sm:$0xff] }
  0x4c   : > { %364 = vst [vmem:[%s7588_s23 + $0x3b8] sm:$0xff] %v363_v55  ;;  %366 = vst [vmem:[%s7588_s23 + $0x3c0] sm:$0xff] %v365_v56  ;;  %v373_v60 = vld [vmem:[%s7580_s22 + $0x5e0] sm:$0xff]  ;;  %v375_v61 = vld [vmem:[%s7580_s22 + $0x5e8] sm:$0xff] }
  0x4d   : > { %368 = vst [vmem:[%s7588_s23 + $0x3c8] sm:$0xff] %v367_v57  ;;  %370 = vst [vmem:[%s7588_s23 + $0x3d0] sm:$0xff] %v369_v58  ;;  %v377_v62 = vld [vmem:[%s7580_s22 + $0x5f0] sm:$0xff]  ;;  %v379_v63 = vld [vmem:[%s7580_s22 + $0x5f8] sm:$0xff] }
  0x4e   : > { %372 = vst [vmem:[%s7588_s23 + $0x3d8] sm:$0xff] %v371_v59  ;;  %374 = vst [vmem:[%s7588_s23 + $0x3e0] sm:$0xff] %v373_v60  ;;  %v381_v0 = vld [vmem:[%s7580_s22 + $0x800] sm:$0xff]  ;;  %v383_v1 = vld [vmem:[%s7580_s22 + $0x808] sm:$0xff] }
  0x4f   : > { %376 = vst [vmem:[%s7588_s23 + $0x3e8] sm:$0xff] %v375_v61  ;;  %378 = vst [vmem:[%s7588_s23 + $0x3f0] sm:$0xff] %v377_v62  ;;  %v385_v2 = vld [vmem:[%s7580_s22 + $0x810] sm:$0xff]  ;;  %v387_v3 = vld [vmem:[%s7580_s22 + $0x818] sm:$0xff] }
  0x50   : > { %380 = vst [vmem:[%s7588_s23 + $0x3f8] sm:$0xff] %v379_v63  ;;  %382 = vst [vmem:[%s7588_s23 + $0x400] sm:$0xff] %v381_v0  ;;  %v389_v4 = vld [vmem:[%s7580_s22 + $0x820] sm:$0xff]  ;;  %v391_v5 = vld [vmem:[%s7580_s22 + $0x828] sm:$0xff] }
  0x51   : > { %384 = vst [vmem:[%s7588_s23 + $0x408] sm:$0xff] %v383_v1  ;;  %386 = vst [vmem:[%s7588_s23 + $0x410] sm:$0xff] %v385_v2  ;;  %v393_v6 = vld [vmem:[%s7580_s22 + $0x830] sm:$0xff]  ;;  %v395_v7 = vld [vmem:[%s7580_s22 + $0x838] sm:$0xff] }
  0x52   : > { %388 = vst [vmem:[%s7588_s23 + $0x418] sm:$0xff] %v387_v3  ;;  %390 = vst [vmem:[%s7588_s23 + $0x420] sm:$0xff] %v389_v4  ;;  %v397_v8 = vld [vmem:[%s7580_s22 + $0x840] sm:$0xff]  ;;  %v399_v9 = vld [vmem:[%s7580_s22 + $0x848] sm:$0xff] }
  0x53   : > { %392 = vst [vmem:[%s7588_s23 + $0x428] sm:$0xff] %v391_v5  ;;  %394 = vst [vmem:[%s7588_s23 + $0x430] sm:$0xff] %v393_v6  ;;  %v401_v10 = vld [vmem:[%s7580_s22 + $0x850] sm:$0xff]  ;;  %v403_v11 = vld [vmem:[%s7580_s22 + $0x858] sm:$0xff] }
  0x54   : > { %396 = vst [vmem:[%s7588_s23 + $0x438] sm:$0xff] %v395_v7  ;;  %398 = vst [vmem:[%s7588_s23 + $0x440] sm:$0xff] %v397_v8  ;;  %v405_v12 = vld [vmem:[%s7580_s22 + $0x860] sm:$0xff]  ;;  %v407_v13 = vld [vmem:[%s7580_s22 + $0x868] sm:$0xff] }
  0x55   : > { %400 = vst [vmem:[%s7588_s23 + $0x448] sm:$0xff] %v399_v9  ;;  %402 = vst [vmem:[%s7588_s23 + $0x450] sm:$0xff] %v401_v10  ;;  %v409_v14 = vld [vmem:[%s7580_s22 + $0x870] sm:$0xff]  ;;  %v411_v15 = vld [vmem:[%s7580_s22 + $0x878] sm:$0xff] }
  0x56   : > { %404 = vst [vmem:[%s7588_s23 + $0x458] sm:$0xff] %v403_v11  ;;  %406 = vst [vmem:[%s7588_s23 + $0x460] sm:$0xff] %v405_v12  ;;  %v413_v16 = vld [vmem:[%s7580_s22 + $0x880] sm:$0xff]  ;;  %v415_v17 = vld [vmem:[%s7580_s22 + $0x888] sm:$0xff] }
  0x57   : > { %408 = vst [vmem:[%s7588_s23 + $0x468] sm:$0xff] %v407_v13  ;;  %410 = vst [vmem:[%s7588_s23 + $0x470] sm:$0xff] %v409_v14  ;;  %v417_v18 = vld [vmem:[%s7580_s22 + $0x890] sm:$0xff]  ;;  %v419_v19 = vld [vmem:[%s7580_s22 + $0x898] sm:$0xff] }
  0x58   : > { %412 = vst [vmem:[%s7588_s23 + $0x478] sm:$0xff] %v411_v15  ;;  %414 = vst [vmem:[%s7588_s23 + $0x480] sm:$0xff] %v413_v16  ;;  %v421_v20 = vld [vmem:[%s7580_s22 + $0x8a0] sm:$0xff]  ;;  %v423_v21 = vld [vmem:[%s7580_s22 + $0x8a8] sm:$0xff] }
  0x59   : > { %416 = vst [vmem:[%s7588_s23 + $0x488] sm:$0xff] %v415_v17  ;;  %418 = vst [vmem:[%s7588_s23 + $0x490] sm:$0xff] %v417_v18  ;;  %v425_v22 = vld [vmem:[%s7580_s22 + $0x8b0] sm:$0xff]  ;;  %v427_v23 = vld [vmem:[%s7580_s22 + $0x8b8] sm:$0xff] }
  0x5a   : > { %420 = vst [vmem:[%s7588_s23 + $0x498] sm:$0xff] %v419_v19  ;;  %422 = vst [vmem:[%s7588_s23 + $0x4a0] sm:$0xff] %v421_v20  ;;  %v429_v24 = vld [vmem:[%s7580_s22 + $0x8c0] sm:$0xff]  ;;  %v431_v25 = vld [vmem:[%s7580_s22 + $0x8c8] sm:$0xff] }
  0x5b   : > { %424 = vst [vmem:[%s7588_s23 + $0x4a8] sm:$0xff] %v423_v21  ;;  %426 = vst [vmem:[%s7588_s23 + $0x4b0] sm:$0xff] %v425_v22  ;;  %v433_v26 = vld [vmem:[%s7580_s22 + $0x8d0] sm:$0xff]  ;;  %v435_v27 = vld [vmem:[%s7580_s22 + $0x8d8] sm:$0xff] }
  0x5c   : > { %428 = vst [vmem:[%s7588_s23 + $0x4b8] sm:$0xff] %v427_v23  ;;  %430 = vst [vmem:[%s7588_s23 + $0x4c0] sm:$0xff] %v429_v24  ;;  %v437_v28 = vld [vmem:[%s7580_s22 + $0x8e0] sm:$0xff]  ;;  %v439_v29 = vld [vmem:[%s7580_s22 + $0x8e8] sm:$0xff] }
  0x5d   : > { %432 = vst [vmem:[%s7588_s23 + $0x4c8] sm:$0xff] %v431_v25  ;;  %434 = vst [vmem:[%s7588_s23 + $0x4d0] sm:$0xff] %v433_v26  ;;  %v441_v30 = vld [vmem:[%s7580_s22 + $0x8f0] sm:$0xff]  ;;  %v443_v31 = vld [vmem:[%s7580_s22 + $0x8f8] sm:$0xff] }
  0x5e   : > { %436 = vst [vmem:[%s7588_s23 + $0x4d8] sm:$0xff] %v435_v27  ;;  %438 = vst [vmem:[%s7588_s23 + $0x4e0] sm:$0xff] %v437_v28  ;;  %v445_v32 = vld [vmem:[%s7580_s22 + $0x900] sm:$0xff]  ;;  %v447_v33 = vld [vmem:[%s7580_s22 + $0x908] sm:$0xff] }
  0x5f   : > { %440 = vst [vmem:[%s7588_s23 + $0x4e8] sm:$0xff] %v439_v29  ;;  %442 = vst [vmem:[%s7588_s23 + $0x4f0] sm:$0xff] %v441_v30  ;;  %v449_v34 = vld [vmem:[%s7580_s22 + $0x910] sm:$0xff]  ;;  %v451_v35 = vld [vmem:[%s7580_s22 + $0x918] sm:$0xff] }
  0x60   : > { %444 = vst [vmem:[%s7588_s23 + $0x4f8] sm:$0xff] %v443_v31  ;;  %446 = vst [vmem:[%s7588_s23 + $0x500] sm:$0xff] %v445_v32  ;;  %v453_v36 = vld [vmem:[%s7580_s22 + $0x920] sm:$0xff]  ;;  %v455_v37 = vld [vmem:[%s7580_s22 + $0x928] sm:$0xff] }
  0x61   : > { %448 = vst [vmem:[%s7588_s23 + $0x508] sm:$0xff] %v447_v33  ;;  %450 = vst [vmem:[%s7588_s23 + $0x510] sm:$0xff] %v449_v34  ;;  %v457_v38 = vld [vmem:[%s7580_s22 + $0x930] sm:$0xff]  ;;  %v459_v39 = vld [vmem:[%s7580_s22 + $0x938] sm:$0xff] }
  0x62   : > { %452 = vst [vmem:[%s7588_s23 + $0x518] sm:$0xff] %v451_v35  ;;  %454 = vst [vmem:[%s7588_s23 + $0x520] sm:$0xff] %v453_v36  ;;  %v461_v40 = vld [vmem:[%s7580_s22 + $0x940] sm:$0xff]  ;;  %v463_v41 = vld [vmem:[%s7580_s22 + $0x948] sm:$0xff] }
  0x63   : > { %456 = vst [vmem:[%s7588_s23 + $0x528] sm:$0xff] %v455_v37  ;;  %458 = vst [vmem:[%s7588_s23 + $0x530] sm:$0xff] %v457_v38  ;;  %v465_v42 = vld [vmem:[%s7580_s22 + $0x950] sm:$0xff]  ;;  %v467_v43 = vld [vmem:[%s7580_s22 + $0x958] sm:$0xff] }
  0x64   : > { %460 = vst [vmem:[%s7588_s23 + $0x538] sm:$0xff] %v459_v39  ;;  %462 = vst [vmem:[%s7588_s23 + $0x540] sm:$0xff] %v461_v40  ;;  %v469_v44 = vld [vmem:[%s7580_s22 + $0x960] sm:$0xff]  ;;  %v471_v45 = vld [vmem:[%s7580_s22 + $0x968] sm:$0xff] }
  0x65   : > { %464 = vst [vmem:[%s7588_s23 + $0x548] sm:$0xff] %v463_v41  ;;  %466 = vst [vmem:[%s7588_s23 + $0x550] sm:$0xff] %v465_v42  ;;  %v473_v46 = vld [vmem:[%s7580_s22 + $0x970] sm:$0xff]  ;;  %v475_v47 = vld [vmem:[%s7580_s22 + $0x978] sm:$0xff] }
  0x66   : > { %468 = vst [vmem:[%s7588_s23 + $0x558] sm:$0xff] %v467_v43  ;;  %470 = vst [vmem:[%s7588_s23 + $0x560] sm:$0xff] %v469_v44  ;;  %v477_v48 = vld [vmem:[%s7580_s22 + $0x980] sm:$0xff]  ;;  %v479_v49 = vld [vmem:[%s7580_s22 + $0x988] sm:$0xff] }
  0x67   : > { %472 = vst [vmem:[%s7588_s23 + $0x568] sm:$0xff] %v471_v45  ;;  %474 = vst [vmem:[%s7588_s23 + $0x570] sm:$0xff] %v473_v46  ;;  %v481_v50 = vld [vmem:[%s7580_s22 + $0x990] sm:$0xff]  ;;  %v483_v51 = vld [vmem:[%s7580_s22 + $0x998] sm:$0xff] }
  0x68   : > { %476 = vst [vmem:[%s7588_s23 + $0x578] sm:$0xff] %v475_v47  ;;  %478 = vst [vmem:[%s7588_s23 + $0x580] sm:$0xff] %v477_v48  ;;  %v485_v52 = vld [vmem:[%s7580_s22 + $0x9a0] sm:$0xff]  ;;  %v487_v53 = vld [vmem:[%s7580_s22 + $0x9a8] sm:$0xff] }
  0x69   : > { %480 = vst [vmem:[%s7588_s23 + $0x588] sm:$0xff] %v479_v49  ;;  %482 = vst [vmem:[%s7588_s23 + $0x590] sm:$0xff] %v481_v50  ;;  %v489_v54 = vld [vmem:[%s7580_s22 + $0x9b0] sm:$0xff]  ;;  %v491_v55 = vld [vmem:[%s7580_s22 + $0x9b8] sm:$0xff] }
  0x6a   : > { %484 = vst [vmem:[%s7588_s23 + $0x598] sm:$0xff] %v483_v51  ;;  %486 = vst [vmem:[%s7588_s23 + $0x5a0] sm:$0xff] %v485_v52  ;;  %v493_v56 = vld [vmem:[%s7580_s22 + $0x9c0] sm:$0xff]  ;;  %v495_v57 = vld [vmem:[%s7580_s22 + $0x9c8] sm:$0xff] }
  0x6b   : > { %488 = vst [vmem:[%s7588_s23 + $0x5a8] sm:$0xff] %v487_v53  ;;  %490 = vst [vmem:[%s7588_s23 + $0x5b0] sm:$0xff] %v489_v54  ;;  %v497_v58 = vld [vmem:[%s7580_s22 + $0x9d0] sm:$0xff]  ;;  %v499_v59 = vld [vmem:[%s7580_s22 + $0x9d8] sm:$0xff] }
  0x6c   : > { %492 = vst [vmem:[%s7588_s23 + $0x5b8] sm:$0xff] %v491_v55  ;;  %494 = vst [vmem:[%s7588_s23 + $0x5c0] sm:$0xff] %v493_v56  ;;  %v501_v60 = vld [vmem:[%s7580_s22 + $0x9e0] sm:$0xff]  ;;  %v503_v61 = vld [vmem:[%s7580_s22 + $0x9e8] sm:$0xff] }
  0x6d   : > { %496 = vst [vmem:[%s7588_s23 + $0x5c8] sm:$0xff] %v495_v57  ;;  %498 = vst [vmem:[%s7588_s23 + $0x5d0] sm:$0xff] %v497_v58  ;;  %v505_v62 = vld [vmem:[%s7580_s22 + $0x9f0] sm:$0xff]  ;;  %v507_v63 = vld [vmem:[%s7580_s22 + $0x9f8] sm:$0xff] }
  0x6e   : > { %500 = vst [vmem:[%s7588_s23 + $0x5d8] sm:$0xff] %v499_v59  ;;  %502 = vst [vmem:[%s7588_s23 + $0x5e0] sm:$0xff] %v501_v60  ;;  %v509_v0 = vld [vmem:[%s7580_s22 + $0xc00] sm:$0xff]  ;;  %v511_v1 = vld [vmem:[%s7580_s22 + $0xc08] sm:$0xff] }
  0x6f   : > { %504 = vst [vmem:[%s7588_s23 + $0x5e8] sm:$0xff] %v503_v61  ;;  %506 = vst [vmem:[%s7588_s23 + $0x5f0] sm:$0xff] %v505_v62  ;;  %v513_v2 = vld [vmem:[%s7580_s22 + $0xc10] sm:$0xff]  ;;  %v515_v3 = vld [vmem:[%s7580_s22 + $0xc18] sm:$0xff] }
  0x70   : > { %508 = vst [vmem:[%s7588_s23 + $0x5f8] sm:$0xff] %v507_v63  ;;  %510 = vst [vmem:[%s7588_s23 + $0x600] sm:$0xff] %v509_v0  ;;  %v517_v4 = vld [vmem:[%s7580_s22 + $0xc20] sm:$0xff]  ;;  %v519_v5 = vld [vmem:[%s7580_s22 + $0xc28] sm:$0xff] }
  0x71   : > { %512 = vst [vmem:[%s7588_s23 + $0x608] sm:$0xff] %v511_v1  ;;  %514 = vst [vmem:[%s7588_s23 + $0x610] sm:$0xff] %v513_v2  ;;  %v521_v6 = vld [vmem:[%s7580_s22 + $0xc30] sm:$0xff]  ;;  %v523_v7 = vld [vmem:[%s7580_s22 + $0xc38] sm:$0xff] }
  0x72   : > { %516 = vst [vmem:[%s7588_s23 + $0x618] sm:$0xff] %v515_v3  ;;  %518 = vst [vmem:[%s7588_s23 + $0x620] sm:$0xff] %v517_v4  ;;  %v525_v8 = vld [vmem:[%s7580_s22 + $0xc40] sm:$0xff]  ;;  %v527_v9 = vld [vmem:[%s7580_s22 + $0xc48] sm:$0xff] }
  0x73   : > { %520 = vst [vmem:[%s7588_s23 + $0x628] sm:$0xff] %v519_v5  ;;  %522 = vst [vmem:[%s7588_s23 + $0x630] sm:$0xff] %v521_v6  ;;  %v529_v10 = vld [vmem:[%s7580_s22 + $0xc50] sm:$0xff]  ;;  %v531_v11 = vld [vmem:[%s7580_s22 + $0xc58] sm:$0xff] }
  0x74   : > { %524 = vst [vmem:[%s7588_s23 + $0x638] sm:$0xff] %v523_v7  ;;  %526 = vst [vmem:[%s7588_s23 + $0x640] sm:$0xff] %v525_v8  ;;  %v533_v12 = vld [vmem:[%s7580_s22 + $0xc60] sm:$0xff]  ;;  %v535_v13 = vld [vmem:[%s7580_s22 + $0xc68] sm:$0xff] }
  0x75   : > { %528 = vst [vmem:[%s7588_s23 + $0x648] sm:$0xff] %v527_v9  ;;  %530 = vst [vmem:[%s7588_s23 + $0x650] sm:$0xff] %v529_v10  ;;  %v537_v14 = vld [vmem:[%s7580_s22 + $0xc70] sm:$0xff]  ;;  %v539_v15 = vld [vmem:[%s7580_s22 + $0xc78] sm:$0xff] }
  0x76   : > { %532 = vst [vmem:[%s7588_s23 + $0x658] sm:$0xff] %v531_v11  ;;  %534 = vst [vmem:[%s7588_s23 + $0x660] sm:$0xff] %v533_v12  ;;  %v541_v16 = vld [vmem:[%s7580_s22 + $0xc80] sm:$0xff]  ;;  %v543_v17 = vld [vmem:[%s7580_s22 + $0xc88] sm:$0xff] }
  0x77   : > { %536 = vst [vmem:[%s7588_s23 + $0x668] sm:$0xff] %v535_v13  ;;  %538 = vst [vmem:[%s7588_s23 + $0x670] sm:$0xff] %v537_v14  ;;  %v545_v18 = vld [vmem:[%s7580_s22 + $0xc90] sm:$0xff]  ;;  %v547_v19 = vld [vmem:[%s7580_s22 + $0xc98] sm:$0xff] }
  0x78   : > { %540 = vst [vmem:[%s7588_s23 + $0x678] sm:$0xff] %v539_v15  ;;  %542 = vst [vmem:[%s7588_s23 + $0x680] sm:$0xff] %v541_v16  ;;  %v549_v20 = vld [vmem:[%s7580_s22 + $0xca0] sm:$0xff]  ;;  %v551_v21 = vld [vmem:[%s7580_s22 + $0xca8] sm:$0xff] }
  0x79   : > { %544 = vst [vmem:[%s7588_s23 + $0x688] sm:$0xff] %v543_v17  ;;  %546 = vst [vmem:[%s7588_s23 + $0x690] sm:$0xff] %v545_v18  ;;  %v553_v22 = vld [vmem:[%s7580_s22 + $0xcb0] sm:$0xff]  ;;  %v555_v23 = vld [vmem:[%s7580_s22 + $0xcb8] sm:$0xff] }
  0x7a   : > { %548 = vst [vmem:[%s7588_s23 + $0x698] sm:$0xff] %v547_v19  ;;  %550 = vst [vmem:[%s7588_s23 + $0x6a0] sm:$0xff] %v549_v20  ;;  %v557_v24 = vld [vmem:[%s7580_s22 + $0xcc0] sm:$0xff]  ;;  %v559_v25 = vld [vmem:[%s7580_s22 + $0xcc8] sm:$0xff] }
  0x7b   : > { %552 = vst [vmem:[%s7588_s23 + $0x6a8] sm:$0xff] %v551_v21  ;;  %554 = vst [vmem:[%s7588_s23 + $0x6b0] sm:$0xff] %v553_v22  ;;  %v561_v26 = vld [vmem:[%s7580_s22 + $0xcd0] sm:$0xff]  ;;  %v563_v27 = vld [vmem:[%s7580_s22 + $0xcd8] sm:$0xff] }
  0x7c   : > { %556 = vst [vmem:[%s7588_s23 + $0x6b8] sm:$0xff] %v555_v23  ;;  %558 = vst [vmem:[%s7588_s23 + $0x6c0] sm:$0xff] %v557_v24  ;;  %v565_v28 = vld [vmem:[%s7580_s22 + $0xce0] sm:$0xff]  ;;  %v567_v29 = vld [vmem:[%s7580_s22 + $0xce8] sm:$0xff] }
  0x7d   : > { %560 = vst [vmem:[%s7588_s23 + $0x6c8] sm:$0xff] %v559_v25  ;;  %562 = vst [vmem:[%s7588_s23 + $0x6d0] sm:$0xff] %v561_v26  ;;  %v569_v30 = vld [vmem:[%s7580_s22 + $0xcf0] sm:$0xff]  ;;  %v571_v31 = vld [vmem:[%s7580_s22 + $0xcf8] sm:$0xff] }
  0x7e   : > { %564 = vst [vmem:[%s7588_s23 + $0x6d8] sm:$0xff] %v563_v27  ;;  %566 = vst [vmem:[%s7588_s23 + $0x6e0] sm:$0xff] %v565_v28  ;;  %v573_v32 = vld [vmem:[%s7580_s22 + $0xd00] sm:$0xff]  ;;  %v575_v33 = vld [vmem:[%s7580_s22 + $0xd08] sm:$0xff] }
  0x7f   : > { %568 = vst [vmem:[%s7588_s23 + $0x6e8] sm:$0xff] %v567_v29  ;;  %570 = vst [vmem:[%s7588_s23 + $0x6f0] sm:$0xff] %v569_v30  ;;  %v577_v34 = vld [vmem:[%s7580_s22 + $0xd10] sm:$0xff]  ;;  %v579_v35 = vld [vmem:[%s7580_s22 + $0xd18] sm:$0xff] }
  0x80   : > { %572 = vst [vmem:[%s7588_s23 + $0x6f8] sm:$0xff] %v571_v31  ;;  %574 = vst [vmem:[%s7588_s23 + $0x700] sm:$0xff] %v573_v32  ;;  %v581_v36 = vld [vmem:[%s7580_s22 + $0xd20] sm:$0xff]  ;;  %v583_v37 = vld [vmem:[%s7580_s22 + $0xd28] sm:$0xff] }
  0x81   : > { %576 = vst [vmem:[%s7588_s23 + $0x708] sm:$0xff] %v575_v33  ;;  %578 = vst [vmem:[%s7588_s23 + $0x710] sm:$0xff] %v577_v34  ;;  %v585_v38 = vld [vmem:[%s7580_s22 + $0xd30] sm:$0xff]  ;;  %v587_v39 = vld [vmem:[%s7580_s22 + $0xd38] sm:$0xff] }
  0x82   : > { %580 = vst [vmem:[%s7588_s23 + $0x718] sm:$0xff] %v579_v35  ;;  %582 = vst [vmem:[%s7588_s23 + $0x720] sm:$0xff] %v581_v36  ;;  %v589_v40 = vld [vmem:[%s7580_s22 + $0xd40] sm:$0xff]  ;;  %v591_v41 = vld [vmem:[%s7580_s22 + $0xd48] sm:$0xff] }
  0x83   : > { %584 = vst [vmem:[%s7588_s23 + $0x728] sm:$0xff] %v583_v37  ;;  %586 = vst [vmem:[%s7588_s23 + $0x730] sm:$0xff] %v585_v38  ;;  %v593_v42 = vld [vmem:[%s7580_s22 + $0xd50] sm:$0xff]  ;;  %v595_v43 = vld [vmem:[%s7580_s22 + $0xd58] sm:$0xff] }
  0x84   : > { %588 = vst [vmem:[%s7588_s23 + $0x738] sm:$0xff] %v587_v39  ;;  %590 = vst [vmem:[%s7588_s23 + $0x740] sm:$0xff] %v589_v40  ;;  %v597_v44 = vld [vmem:[%s7580_s22 + $0xd60] sm:$0xff]  ;;  %v599_v45 = vld [vmem:[%s7580_s22 + $0xd68] sm:$0xff] }
  0x85   : > { %592 = vst [vmem:[%s7588_s23 + $0x748] sm:$0xff] %v591_v41  ;;  %594 = vst [vmem:[%s7588_s23 + $0x750] sm:$0xff] %v593_v42  ;;  %v601_v46 = vld [vmem:[%s7580_s22 + $0xd70] sm:$0xff]  ;;  %v603_v47 = vld [vmem:[%s7580_s22 + $0xd78] sm:$0xff] }
  0x86   : > { %596 = vst [vmem:[%s7588_s23 + $0x758] sm:$0xff] %v595_v43  ;;  %598 = vst [vmem:[%s7588_s23 + $0x760] sm:$0xff] %v597_v44  ;;  %v605_v48 = vld [vmem:[%s7580_s22 + $0xd80] sm:$0xff]  ;;  %v607_v49 = vld [vmem:[%s7580_s22 + $0xd88] sm:$0xff] }
  0x87   : > { %600 = vst [vmem:[%s7588_s23 + $0x768] sm:$0xff] %v599_v45  ;;  %602 = vst [vmem:[%s7588_s23 + $0x770] sm:$0xff] %v601_v46  ;;  %v609_v50 = vld [vmem:[%s7580_s22 + $0xd90] sm:$0xff]  ;;  %v611_v51 = vld [vmem:[%s7580_s22 + $0xd98] sm:$0xff] }
  0x88   : > { %604 = vst [vmem:[%s7588_s23 + $0x778] sm:$0xff] %v603_v47  ;;  %606 = vst [vmem:[%s7588_s23 + $0x780] sm:$0xff] %v605_v48  ;;  %v613_v52 = vld [vmem:[%s7580_s22 + $0xda0] sm:$0xff]  ;;  %v615_v53 = vld [vmem:[%s7580_s22 + $0xda8] sm:$0xff] }
  0x89   : > { %608 = vst [vmem:[%s7588_s23 + $0x788] sm:$0xff] %v607_v49  ;;  %610 = vst [vmem:[%s7588_s23 + $0x790] sm:$0xff] %v609_v50  ;;  %v617_v54 = vld [vmem:[%s7580_s22 + $0xdb0] sm:$0xff]  ;;  %v619_v55 = vld [vmem:[%s7580_s22 + $0xdb8] sm:$0xff] }
  0x8a   : > { %612 = vst [vmem:[%s7588_s23 + $0x798] sm:$0xff] %v611_v51  ;;  %614 = vst [vmem:[%s7588_s23 + $0x7a0] sm:$0xff] %v613_v52  ;;  %v621_v56 = vld [vmem:[%s7580_s22 + $0xdc0] sm:$0xff]  ;;  %v623_v57 = vld [vmem:[%s7580_s22 + $0xdc8] sm:$0xff] }
  0x8b   : > { %616 = vst [vmem:[%s7588_s23 + $0x7a8] sm:$0xff] %v615_v53  ;;  %618 = vst [vmem:[%s7588_s23 + $0x7b0] sm:$0xff] %v617_v54  ;;  %v625_v58 = vld [vmem:[%s7580_s22 + $0xdd0] sm:$0xff]  ;;  %v627_v59 = vld [vmem:[%s7580_s22 + $0xdd8] sm:$0xff] }
  0x8c   : > { %620 = vst [vmem:[%s7588_s23 + $0x7b8] sm:$0xff] %v619_v55  ;;  %622 = vst [vmem:[%s7588_s23 + $0x7c0] sm:$0xff] %v621_v56  ;;  %v629_v60 = vld [vmem:[%s7580_s22 + $0xde0] sm:$0xff]  ;;  %v631_v61 = vld [vmem:[%s7580_s22 + $0xde8] sm:$0xff] }
  0x8d   : > { %624 = vst [vmem:[%s7588_s23 + $0x7c8] sm:$0xff] %v623_v57  ;;  %626 = vst [vmem:[%s7588_s23 + $0x7d0] sm:$0xff] %v625_v58  ;;  %v633_v62 = vld [vmem:[%s7580_s22 + $0xdf0] sm:$0xff]  ;;  %v635_v63 = vld [vmem:[%s7580_s22 + $0xdf8] sm:$0xff] }
  0x8e   : > { %628 = vst [vmem:[%s7588_s23 + $0x7d8] sm:$0xff] %v627_v59  ;;  %630 = vst [vmem:[%s7588_s23 + $0x7e0] sm:$0xff] %v629_v60  ;;  %v637_v0 = vld [vmem:[%s7580_s22 + $0x1000] sm:$0xff]  ;;  %v639_v1 = vld [vmem:[%s7580_s22 + $0x1008] sm:$0xff] }
  0x8f   : > { %632 = vst [vmem:[%s7588_s23 + $0x7e8] sm:$0xff] %v631_v61  ;;  %634 = vst [vmem:[%s7588_s23 + $0x7f0] sm:$0xff] %v633_v62  ;;  %v641_v2 = vld [vmem:[%s7580_s22 + $0x1010] sm:$0xff]  ;;  %v643_v3 = vld [vmem:[%s7580_s22 + $0x1018] sm:$0xff] }
  0x90   : > { %636 = vst [vmem:[%s7588_s23 + $0x7f8] sm:$0xff] %v635_v63  ;;  %638 = vst [vmem:[%s7588_s23 + $0x800] sm:$0xff] %v637_v0  ;;  %v645_v4 = vld [vmem:[%s7580_s22 + $0x1020] sm:$0xff]  ;;  %v647_v5 = vld [vmem:[%s7580_s22 + $0x1028] sm:$0xff] }
  0x91   : > { %640 = vst [vmem:[%s7588_s23 + $0x808] sm:$0xff] %v639_v1  ;;  %642 = vst [vmem:[%s7588_s23 + $0x810] sm:$0xff] %v641_v2  ;;  %v649_v6 = vld [vmem:[%s7580_s22 + $0x1030] sm:$0xff]  ;;  %v651_v7 = vld [vmem:[%s7580_s22 + $0x1038] sm:$0xff] }
  0x92   : > { %644 = vst [vmem:[%s7588_s23 + $0x818] sm:$0xff] %v643_v3  ;;  %646 = vst [vmem:[%s7588_s23 + $0x820] sm:$0xff] %v645_v4  ;;  %v653_v8 = vld [vmem:[%s7580_s22 + $0x1040] sm:$0xff]  ;;  %v655_v9 = vld [vmem:[%s7580_s22 + $0x1048] sm:$0xff] }
  0x93   : > { %648 = vst [vmem:[%s7588_s23 + $0x828] sm:$0xff] %v647_v5  ;;  %650 = vst [vmem:[%s7588_s23 + $0x830] sm:$0xff] %v649_v6  ;;  %v657_v10 = vld [vmem:[%s7580_s22 + $0x1050] sm:$0xff]  ;;  %v659_v11 = vld [vmem:[%s7580_s22 + $0x1058] sm:$0xff] }
  0x94   : > { %652 = vst [vmem:[%s7588_s23 + $0x838] sm:$0xff] %v651_v7  ;;  %654 = vst [vmem:[%s7588_s23 + $0x840] sm:$0xff] %v653_v8  ;;  %v661_v12 = vld [vmem:[%s7580_s22 + $0x1060] sm:$0xff]  ;;  %v663_v13 = vld [vmem:[%s7580_s22 + $0x1068] sm:$0xff] }
  0x95   : > { %656 = vst [vmem:[%s7588_s23 + $0x848] sm:$0xff] %v655_v9  ;;  %658 = vst [vmem:[%s7588_s23 + $0x850] sm:$0xff] %v657_v10  ;;  %v665_v14 = vld [vmem:[%s7580_s22 + $0x1070] sm:$0xff]  ;;  %v667_v15 = vld [vmem:[%s7580_s22 + $0x1078] sm:$0xff] }
  0x96   : > { %660 = vst [vmem:[%s7588_s23 + $0x858] sm:$0xff] %v659_v11  ;;  %662 = vst [vmem:[%s7588_s23 + $0x860] sm:$0xff] %v661_v12  ;;  %v669_v16 = vld [vmem:[%s7580_s22 + $0x1080] sm:$0xff]  ;;  %v671_v17 = vld [vmem:[%s7580_s22 + $0x1088] sm:$0xff] }
  0x97   : > { %664 = vst [vmem:[%s7588_s23 + $0x868] sm:$0xff] %v663_v13  ;;  %666 = vst [vmem:[%s7588_s23 + $0x870] sm:$0xff] %v665_v14  ;;  %v673_v18 = vld [vmem:[%s7580_s22 + $0x1090] sm:$0xff]  ;;  %v675_v19 = vld [vmem:[%s7580_s22 + $0x1098] sm:$0xff] }
  0x98   : > { %668 = vst [vmem:[%s7588_s23 + $0x878] sm:$0xff] %v667_v15  ;;  %670 = vst [vmem:[%s7588_s23 + $0x880] sm:$0xff] %v669_v16  ;;  %v677_v20 = vld [vmem:[%s7580_s22 + $0x10a0] sm:$0xff]  ;;  %v679_v21 = vld [vmem:[%s7580_s22 + $0x10a8] sm:$0xff] }
  0x99   : > { %672 = vst [vmem:[%s7588_s23 + $0x888] sm:$0xff] %v671_v17  ;;  %674 = vst [vmem:[%s7588_s23 + $0x890] sm:$0xff] %v673_v18  ;;  %v681_v22 = vld [vmem:[%s7580_s22 + $0x10b0] sm:$0xff]  ;;  %v683_v23 = vld [vmem:[%s7580_s22 + $0x10b8] sm:$0xff] }
  0x9a   : > { %676 = vst [vmem:[%s7588_s23 + $0x898] sm:$0xff] %v675_v19  ;;  %678 = vst [vmem:[%s7588_s23 + $0x8a0] sm:$0xff] %v677_v20  ;;  %v685_v24 = vld [vmem:[%s7580_s22 + $0x10c0] sm:$0xff]  ;;  %v687_v25 = vld [vmem:[%s7580_s22 + $0x10c8] sm:$0xff] }
  0x9b   : > { %680 = vst [vmem:[%s7588_s23 + $0x8a8] sm:$0xff] %v679_v21  ;;  %682 = vst [vmem:[%s7588_s23 + $0x8b0] sm:$0xff] %v681_v22  ;;  %v689_v26 = vld [vmem:[%s7580_s22 + $0x10d0] sm:$0xff]  ;;  %v691_v27 = vld [vmem:[%s7580_s22 + $0x10d8] sm:$0xff] }
  0x9c   : > { %684 = vst [vmem:[%s7588_s23 + $0x8b8] sm:$0xff] %v683_v23  ;;  %686 = vst [vmem:[%s7588_s23 + $0x8c0] sm:$0xff] %v685_v24  ;;  %v693_v28 = vld [vmem:[%s7580_s22 + $0x10e0] sm:$0xff]  ;;  %v695_v29 = vld [vmem:[%s7580_s22 + $0x10e8] sm:$0xff] }
  0x9d   : > { %688 = vst [vmem:[%s7588_s23 + $0x8c8] sm:$0xff] %v687_v25  ;;  %690 = vst [vmem:[%s7588_s23 + $0x8d0] sm:$0xff] %v689_v26  ;;  %v697_v30 = vld [vmem:[%s7580_s22 + $0x10f0] sm:$0xff]  ;;  %v699_v31 = vld [vmem:[%s7580_s22 + $0x10f8] sm:$0xff] }
  0x9e   : > { %692 = vst [vmem:[%s7588_s23 + $0x8d8] sm:$0xff] %v691_v27  ;;  %694 = vst [vmem:[%s7588_s23 + $0x8e0] sm:$0xff] %v693_v28  ;;  %v701_v32 = vld [vmem:[%s7580_s22 + $0x1100] sm:$0xff]  ;;  %v703_v33 = vld [vmem:[%s7580_s22 + $0x1108] sm:$0xff] }
  0x9f   : > { %696 = vst [vmem:[%s7588_s23 + $0x8e8] sm:$0xff] %v695_v29  ;;  %698 = vst [vmem:[%s7588_s23 + $0x8f0] sm:$0xff] %v697_v30  ;;  %v705_v34 = vld [vmem:[%s7580_s22 + $0x1110] sm:$0xff]  ;;  %v707_v35 = vld [vmem:[%s7580_s22 + $0x1118] sm:$0xff] }
  0xa0   : > { %700 = vst [vmem:[%s7588_s23 + $0x8f8] sm:$0xff] %v699_v31  ;;  %702 = vst [vmem:[%s7588_s23 + $0x900] sm:$0xff] %v701_v32  ;;  %v709_v36 = vld [vmem:[%s7580_s22 + $0x1120] sm:$0xff]  ;;  %v711_v37 = vld [vmem:[%s7580_s22 + $0x1128] sm:$0xff] }
  0xa1   : > { %704 = vst [vmem:[%s7588_s23 + $0x908] sm:$0xff] %v703_v33  ;;  %706 = vst [vmem:[%s7588_s23 + $0x910] sm:$0xff] %v705_v34  ;;  %v713_v38 = vld [vmem:[%s7580_s22 + $0x1130] sm:$0xff]  ;;  %v715_v39 = vld [vmem:[%s7580_s22 + $0x1138] sm:$0xff] }
  0xa2   : > { %708 = vst [vmem:[%s7588_s23 + $0x918] sm:$0xff] %v707_v35  ;;  %710 = vst [vmem:[%s7588_s23 + $0x920] sm:$0xff] %v709_v36  ;;  %v717_v40 = vld [vmem:[%s7580_s22 + $0x1140] sm:$0xff]  ;;  %v719_v41 = vld [vmem:[%s7580_s22 + $0x1148] sm:$0xff] }
  0xa3   : > { %712 = vst [vmem:[%s7588_s23 + $0x928] sm:$0xff] %v711_v37  ;;  %714 = vst [vmem:[%s7588_s23 + $0x930] sm:$0xff] %v713_v38  ;;  %v721_v42 = vld [vmem:[%s7580_s22 + $0x1150] sm:$0xff]  ;;  %v723_v43 = vld [vmem:[%s7580_s22 + $0x1158] sm:$0xff] }
  0xa4   : > { %716 = vst [vmem:[%s7588_s23 + $0x938] sm:$0xff] %v715_v39  ;;  %718 = vst [vmem:[%s7588_s23 + $0x940] sm:$0xff] %v717_v40  ;;  %v725_v44 = vld [vmem:[%s7580_s22 + $0x1160] sm:$0xff]  ;;  %v727_v45 = vld [vmem:[%s7580_s22 + $0x1168] sm:$0xff] }
  0xa5   : > { %720 = vst [vmem:[%s7588_s23 + $0x948] sm:$0xff] %v719_v41  ;;  %722 = vst [vmem:[%s7588_s23 + $0x950] sm:$0xff] %v721_v42  ;;  %v729_v46 = vld [vmem:[%s7580_s22 + $0x1170] sm:$0xff]  ;;  %v731_v47 = vld [vmem:[%s7580_s22 + $0x1178] sm:$0xff] }
  0xa6   : > { %724 = vst [vmem:[%s7588_s23 + $0x958] sm:$0xff] %v723_v43  ;;  %726 = vst [vmem:[%s7588_s23 + $0x960] sm:$0xff] %v725_v44  ;;  %v733_v48 = vld [vmem:[%s7580_s22 + $0x1180] sm:$0xff]  ;;  %v735_v49 = vld [vmem:[%s7580_s22 + $0x1188] sm:$0xff] }
  0xa7   : > { %728 = vst [vmem:[%s7588_s23 + $0x968] sm:$0xff] %v727_v45  ;;  %730 = vst [vmem:[%s7588_s23 + $0x970] sm:$0xff] %v729_v46  ;;  %v737_v50 = vld [vmem:[%s7580_s22 + $0x1190] sm:$0xff]  ;;  %v739_v51 = vld [vmem:[%s7580_s22 + $0x1198] sm:$0xff] }
  0xa8   : > { %732 = vst [vmem:[%s7588_s23 + $0x978] sm:$0xff] %v731_v47  ;;  %734 = vst [vmem:[%s7588_s23 + $0x980] sm:$0xff] %v733_v48  ;;  %v741_v52 = vld [vmem:[%s7580_s22 + $0x11a0] sm:$0xff]  ;;  %v743_v53 = vld [vmem:[%s7580_s22 + $0x11a8] sm:$0xff] }
  0xa9   : > { %736 = vst [vmem:[%s7588_s23 + $0x988] sm:$0xff] %v735_v49  ;;  %738 = vst [vmem:[%s7588_s23 + $0x990] sm:$0xff] %v737_v50  ;;  %v745_v54 = vld [vmem:[%s7580_s22 + $0x11b0] sm:$0xff]  ;;  %v747_v55 = vld [vmem:[%s7580_s22 + $0x11b8] sm:$0xff] }
  0xaa   : > { %740 = vst [vmem:[%s7588_s23 + $0x998] sm:$0xff] %v739_v51  ;;  %742 = vst [vmem:[%s7588_s23 + $0x9a0] sm:$0xff] %v741_v52  ;;  %v749_v56 = vld [vmem:[%s7580_s22 + $0x11c0] sm:$0xff]  ;;  %v751_v57 = vld [vmem:[%s7580_s22 + $0x11c8] sm:$0xff] }
  0xab   : > { %744 = vst [vmem:[%s7588_s23 + $0x9a8] sm:$0xff] %v743_v53  ;;  %746 = vst [vmem:[%s7588_s23 + $0x9b0] sm:$0xff] %v745_v54  ;;  %v753_v58 = vld [vmem:[%s7580_s22 + $0x11d0] sm:$0xff]  ;;  %v755_v59 = vld [vmem:[%s7580_s22 + $0x11d8] sm:$0xff] }
  0xac   : > { %748 = vst [vmem:[%s7588_s23 + $0x9b8] sm:$0xff] %v747_v55  ;;  %750 = vst [vmem:[%s7588_s23 + $0x9c0] sm:$0xff] %v749_v56  ;;  %v757_v60 = vld [vmem:[%s7580_s22 + $0x11e0] sm:$0xff]  ;;  %v759_v61 = vld [vmem:[%s7580_s22 + $0x11e8] sm:$0xff] }
  0xad   : > { %752 = vst [vmem:[%s7588_s23 + $0x9c8] sm:$0xff] %v751_v57  ;;  %754 = vst [vmem:[%s7588_s23 + $0x9d0] sm:$0xff] %v753_v58  ;;  %v761_v62 = vld [vmem:[%s7580_s22 + $0x11f0] sm:$0xff]  ;;  %v763_v63 = vld [vmem:[%s7580_s22 + $0x11f8] sm:$0xff] }
  0xae   : > { %756 = vst [vmem:[%s7588_s23 + $0x9d8] sm:$0xff] %v755_v59  ;;  %758 = vst [vmem:[%s7588_s23 + $0x9e0] sm:$0xff] %v757_v60  ;;  %v765_v0 = vld [vmem:[%s7580_s22 + $0x1400] sm:$0xff]  ;;  %v767_v1 = vld [vmem:[%s7580_s22 + $0x1408] sm:$0xff] }
  0xaf   : > { %760 = vst [vmem:[%s7588_s23 + $0x9e8] sm:$0xff] %v759_v61  ;;  %762 = vst [vmem:[%s7588_s23 + $0x9f0] sm:$0xff] %v761_v62  ;;  %v769_v2 = vld [vmem:[%s7580_s22 + $0x1410] sm:$0xff]  ;;  %v771_v3 = vld [vmem:[%s7580_s22 + $0x1418] sm:$0xff] }
  0xb0   : > { %764 = vst [vmem:[%s7588_s23 + $0x9f8] sm:$0xff] %v763_v63  ;;  %766 = vst [vmem:[%s7588_s23 + $0xa00] sm:$0xff] %v765_v0  ;;  %v773_v4 = vld [vmem:[%s7580_s22 + $0x1420] sm:$0xff]  ;;  %v775_v5 = vld [vmem:[%s7580_s22 + $0x1428] sm:$0xff] }
  0xb1   : > { %768 = vst [vmem:[%s7588_s23 + $0xa08] sm:$0xff] %v767_v1  ;;  %770 = vst [vmem:[%s7588_s23 + $0xa10] sm:$0xff] %v769_v2  ;;  %v777_v6 = vld [vmem:[%s7580_s22 + $0x1430] sm:$0xff]  ;;  %v779_v7 = vld [vmem:[%s7580_s22 + $0x1438] sm:$0xff] }
  0xb2   : > { %772 = vst [vmem:[%s7588_s23 + $0xa18] sm:$0xff] %v771_v3  ;;  %774 = vst [vmem:[%s7588_s23 + $0xa20] sm:$0xff] %v773_v4  ;;  %v781_v8 = vld [vmem:[%s7580_s22 + $0x1440] sm:$0xff]  ;;  %v783_v9 = vld [vmem:[%s7580_s22 + $0x1448] sm:$0xff] }
  0xb3   : > { %776 = vst [vmem:[%s7588_s23 + $0xa28] sm:$0xff] %v775_v5  ;;  %778 = vst [vmem:[%s7588_s23 + $0xa30] sm:$0xff] %v777_v6  ;;  %v785_v10 = vld [vmem:[%s7580_s22 + $0x1450] sm:$0xff]  ;;  %v787_v11 = vld [vmem:[%s7580_s22 + $0x1458] sm:$0xff] }
  0xb4   : > { %780 = vst [vmem:[%s7588_s23 + $0xa38] sm:$0xff] %v779_v7  ;;  %782 = vst [vmem:[%s7588_s23 + $0xa40] sm:$0xff] %v781_v8  ;;  %v789_v12 = vld [vmem:[%s7580_s22 + $0x1460] sm:$0xff]  ;;  %v791_v13 = vld [vmem:[%s7580_s22 + $0x1468] sm:$0xff] }
  0xb5   : > { %784 = vst [vmem:[%s7588_s23 + $0xa48] sm:$0xff] %v783_v9  ;;  %786 = vst [vmem:[%s7588_s23 + $0xa50] sm:$0xff] %v785_v10  ;;  %v793_v14 = vld [vmem:[%s7580_s22 + $0x1470] sm:$0xff]  ;;  %v795_v15 = vld [vmem:[%s7580_s22 + $0x1478] sm:$0xff] }
  0xb6   : > { %788 = vst [vmem:[%s7588_s23 + $0xa58] sm:$0xff] %v787_v11  ;;  %790 = vst [vmem:[%s7588_s23 + $0xa60] sm:$0xff] %v789_v12  ;;  %v797_v16 = vld [vmem:[%s7580_s22 + $0x1480] sm:$0xff]  ;;  %v799_v17 = vld [vmem:[%s7580_s22 + $0x1488] sm:$0xff] }
  0xb7   : > { %792 = vst [vmem:[%s7588_s23 + $0xa68] sm:$0xff] %v791_v13  ;;  %794 = vst [vmem:[%s7588_s23 + $0xa70] sm:$0xff] %v793_v14  ;;  %v801_v18 = vld [vmem:[%s7580_s22 + $0x1490] sm:$0xff]  ;;  %v803_v19 = vld [vmem:[%s7580_s22 + $0x1498] sm:$0xff] }
  0xb8   : > { %796 = vst [vmem:[%s7588_s23 + $0xa78] sm:$0xff] %v795_v15  ;;  %798 = vst [vmem:[%s7588_s23 + $0xa80] sm:$0xff] %v797_v16  ;;  %v805_v20 = vld [vmem:[%s7580_s22 + $0x14a0] sm:$0xff]  ;;  %v807_v21 = vld [vmem:[%s7580_s22 + $0x14a8] sm:$0xff] }
  0xb9   : > { %800 = vst [vmem:[%s7588_s23 + $0xa88] sm:$0xff] %v799_v17  ;;  %802 = vst [vmem:[%s7588_s23 + $0xa90] sm:$0xff] %v801_v18  ;;  %v809_v22 = vld [vmem:[%s7580_s22 + $0x14b0] sm:$0xff]  ;;  %v811_v23 = vld [vmem:[%s7580_s22 + $0x14b8] sm:$0xff] }
  0xba   : > { %804 = vst [vmem:[%s7588_s23 + $0xa98] sm:$0xff] %v803_v19  ;;  %806 = vst [vmem:[%s7588_s23 + $0xaa0] sm:$0xff] %v805_v20  ;;  %v813_v24 = vld [vmem:[%s7580_s22 + $0x14c0] sm:$0xff]  ;;  %v815_v25 = vld [vmem:[%s7580_s22 + $0x14c8] sm:$0xff] }
  0xbb   : > { %808 = vst [vmem:[%s7588_s23 + $0xaa8] sm:$0xff] %v807_v21  ;;  %810 = vst [vmem:[%s7588_s23 + $0xab0] sm:$0xff] %v809_v22  ;;  %v817_v26 = vld [vmem:[%s7580_s22 + $0x14d0] sm:$0xff]  ;;  %v819_v27 = vld [vmem:[%s7580_s22 + $0x14d8] sm:$0xff] }
  0xbc   : > { %812 = vst [vmem:[%s7588_s23 + $0xab8] sm:$0xff] %v811_v23  ;;  %814 = vst [vmem:[%s7588_s23 + $0xac0] sm:$0xff] %v813_v24  ;;  %v821_v28 = vld [vmem:[%s7580_s22 + $0x14e0] sm:$0xff]  ;;  %v823_v29 = vld [vmem:[%s7580_s22 + $0x14e8] sm:$0xff] }
  0xbd   : > { %816 = vst [vmem:[%s7588_s23 + $0xac8] sm:$0xff] %v815_v25  ;;  %818 = vst [vmem:[%s7588_s23 + $0xad0] sm:$0xff] %v817_v26  ;;  %v825_v30 = vld [vmem:[%s7580_s22 + $0x14f0] sm:$0xff]  ;;  %v827_v31 = vld [vmem:[%s7580_s22 + $0x14f8] sm:$0xff] }
  0xbe   : > { %820 = vst [vmem:[%s7588_s23 + $0xad8] sm:$0xff] %v819_v27  ;;  %822 = vst [vmem:[%s7588_s23 + $0xae0] sm:$0xff] %v821_v28  ;;  %v829_v32 = vld [vmem:[%s7580_s22 + $0x1500] sm:$0xff]  ;;  %v831_v33 = vld [vmem:[%s7580_s22 + $0x1508] sm:$0xff] }
  0xbf   : > { %824 = vst [vmem:[%s7588_s23 + $0xae8] sm:$0xff] %v823_v29  ;;  %826 = vst [vmem:[%s7588_s23 + $0xaf0] sm:$0xff] %v825_v30  ;;  %v833_v34 = vld [vmem:[%s7580_s22 + $0x1510] sm:$0xff]  ;;  %v835_v35 = vld [vmem:[%s7580_s22 + $0x1518] sm:$0xff] }
  0xc0   : > { %828 = vst [vmem:[%s7588_s23 + $0xaf8] sm:$0xff] %v827_v31  ;;  %830 = vst [vmem:[%s7588_s23 + $0xb00] sm:$0xff] %v829_v32  ;;  %v837_v36 = vld [vmem:[%s7580_s22 + $0x1520] sm:$0xff]  ;;  %v839_v37 = vld [vmem:[%s7580_s22 + $0x1528] sm:$0xff] }
  0xc1   : > { %832 = vst [vmem:[%s7588_s23 + $0xb08] sm:$0xff] %v831_v33  ;;  %834 = vst [vmem:[%s7588_s23 + $0xb10] sm:$0xff] %v833_v34  ;;  %v841_v38 = vld [vmem:[%s7580_s22 + $0x1530] sm:$0xff]  ;;  %v843_v39 = vld [vmem:[%s7580_s22 + $0x1538] sm:$0xff] }
  0xc2   : > { %836 = vst [vmem:[%s7588_s23 + $0xb18] sm:$0xff] %v835_v35  ;;  %838 = vst [vmem:[%s7588_s23 + $0xb20] sm:$0xff] %v837_v36  ;;  %v845_v40 = vld [vmem:[%s7580_s22 + $0x1540] sm:$0xff]  ;;  %v847_v41 = vld [vmem:[%s7580_s22 + $0x1548] sm:$0xff] }
  0xc3   : > { %840 = vst [vmem:[%s7588_s23 + $0xb28] sm:$0xff] %v839_v37  ;;  %842 = vst [vmem:[%s7588_s23 + $0xb30] sm:$0xff] %v841_v38  ;;  %v849_v42 = vld [vmem:[%s7580_s22 + $0x1550] sm:$0xff]  ;;  %v851_v43 = vld [vmem:[%s7580_s22 + $0x1558] sm:$0xff] }
  0xc4   : > { %844 = vst [vmem:[%s7588_s23 + $0xb38] sm:$0xff] %v843_v39  ;;  %846 = vst [vmem:[%s7588_s23 + $0xb40] sm:$0xff] %v845_v40  ;;  %v853_v44 = vld [vmem:[%s7580_s22 + $0x1560] sm:$0xff]  ;;  %v855_v45 = vld [vmem:[%s7580_s22 + $0x1568] sm:$0xff] }
  0xc5   : > { %848 = vst [vmem:[%s7588_s23 + $0xb48] sm:$0xff] %v847_v41  ;;  %850 = vst [vmem:[%s7588_s23 + $0xb50] sm:$0xff] %v849_v42  ;;  %v857_v46 = vld [vmem:[%s7580_s22 + $0x1570] sm:$0xff]  ;;  %v859_v47 = vld [vmem:[%s7580_s22 + $0x1578] sm:$0xff] }
  0xc6   : > { %852 = vst [vmem:[%s7588_s23 + $0xb58] sm:$0xff] %v851_v43  ;;  %854 = vst [vmem:[%s7588_s23 + $0xb60] sm:$0xff] %v853_v44  ;;  %v861_v48 = vld [vmem:[%s7580_s22 + $0x1580] sm:$0xff]  ;;  %v863_v49 = vld [vmem:[%s7580_s22 + $0x1588] sm:$0xff] }
  0xc7   : > { %856 = vst [vmem:[%s7588_s23 + $0xb68] sm:$0xff] %v855_v45  ;;  %858 = vst [vmem:[%s7588_s23 + $0xb70] sm:$0xff] %v857_v46  ;;  %v865_v50 = vld [vmem:[%s7580_s22 + $0x1590] sm:$0xff]  ;;  %v867_v51 = vld [vmem:[%s7580_s22 + $0x1598] sm:$0xff] }
  0xc8   : > { %860 = vst [vmem:[%s7588_s23 + $0xb78] sm:$0xff] %v859_v47  ;;  %862 = vst [vmem:[%s7588_s23 + $0xb80] sm:$0xff] %v861_v48  ;;  %v869_v52 = vld [vmem:[%s7580_s22 + $0x15a0] sm:$0xff]  ;;  %v871_v53 = vld [vmem:[%s7580_s22 + $0x15a8] sm:$0xff] }
  0xc9   : > { %864 = vst [vmem:[%s7588_s23 + $0xb88] sm:$0xff] %v863_v49  ;;  %866 = vst [vmem:[%s7588_s23 + $0xb90] sm:$0xff] %v865_v50  ;;  %v873_v54 = vld [vmem:[%s7580_s22 + $0x15b0] sm:$0xff]  ;;  %v875_v55 = vld [vmem:[%s7580_s22 + $0x15b8] sm:$0xff] }
  0xca   : > { %868 = vst [vmem:[%s7588_s23 + $0xb98] sm:$0xff] %v867_v51  ;;  %870 = vst [vmem:[%s7588_s23 + $0xba0] sm:$0xff] %v869_v52  ;;  %v877_v56 = vld [vmem:[%s7580_s22 + $0x15c0] sm:$0xff]  ;;  %v879_v57 = vld [vmem:[%s7580_s22 + $0x15c8] sm:$0xff] }
  0xcb   : > { %872 = vst [vmem:[%s7588_s23 + $0xba8] sm:$0xff] %v871_v53  ;;  %874 = vst [vmem:[%s7588_s23 + $0xbb0] sm:$0xff] %v873_v54  ;;  %v881_v58 = vld [vmem:[%s7580_s22 + $0x15d0] sm:$0xff]  ;;  %v883_v59 = vld [vmem:[%s7580_s22 + $0x15d8] sm:$0xff] }
  0xcc   : > { %876 = vst [vmem:[%s7588_s23 + $0xbb8] sm:$0xff] %v875_v55  ;;  %878 = vst [vmem:[%s7588_s23 + $0xbc0] sm:$0xff] %v877_v56  ;;  %v885_v60 = vld [vmem:[%s7580_s22 + $0x15e0] sm:$0xff]  ;;  %v887_v61 = vld [vmem:[%s7580_s22 + $0x15e8] sm:$0xff] }
  0xcd   : > { %880 = vst [vmem:[%s7588_s23 + $0xbc8] sm:$0xff] %v879_v57  ;;  %882 = vst [vmem:[%s7588_s23 + $0xbd0] sm:$0xff] %v881_v58  ;;  %v889_v62 = vld [vmem:[%s7580_s22 + $0x15f0] sm:$0xff]  ;;  %v891_v63 = vld [vmem:[%s7580_s22 + $0x15f8] sm:$0xff] }
  0xce   : > { %884 = vst [vmem:[%s7588_s23 + $0xbd8] sm:$0xff] %v883_v59  ;;  %886 = vst [vmem:[%s7588_s23 + $0xbe0] sm:$0xff] %v885_v60 }
  0xcf   : > { %888 = vst [vmem:[%s7588_s23 + $0xbe8] sm:$0xff] %v887_v61  ;;  %890 = vst [vmem:[%s7588_s23 + $0xbf0] sm:$0xff] %v889_v62 }
  0xd0   : > { %892 = vst [vmem:[%s7588_s23 + $0xbf8] sm:$0xff] %v891_v63 }
  0xd1 PF: > { %p6894_p5 = scmp.ge.s32.totalorder %s7528_s11, 1  ;;  %p897_p6 = scmp.lt.s32.totalorder %s7528_s11, 3 }
  0xd3   : > { %p898_p7 = pnand %p6894_p5, %p897_p6 }
  0xd4   : > { %s904_s24 = sand.u32 (!%p898_p7), 1, %s7520_s9   ;;  %s6895_s3 = sshll.u32 (!%p898_p7), %s6888_s12, 7 }
  0xd5   : > { %901 = sbr.rel (%p898_p7) target bundleno = 807 (0x327), region = 47  ;;  %p927_p8 = scmp.lt.s32.totalorder (!%p898_p7), %s6895_s3, 255 }
  0xd6   : > { %s7477_s25 = smul.u32 (!%p898_p7), 3072, %s904_s24 }
  0xd8   : > { %s8357_s26 = scalar_lea.vmem (!%p898_p7), [#allocation2], %s7477_s25 }
  0xda   : > { %v7530_v0 = vmov 0   ;;  %v1190_v1 = vld [vmem:[%s8357_s26 + $0x800] sm:$0xff]  ;;  %v1191_v3 = vld [vmem:[%s8357_s26 + $0x808] sm:$0xff]  ;;  %v1192_v23 = vld [vmem:[%s8357_s26 + $0x810] sm:$0xff]  ;;  %vm3238_vm0 = vcmask 392192   ;;  %s9070_s3 = smov (!%p927_p8, %s6895_s3), 255 }
  0xdb   : > { %3274 = vmatprep.mubr.bf16.mxu0 %v7530_v0  ;;  %3315 = vmatprep.mubr.bf16.mxu1 %v7530_v0  ;;  %v1254_v2 = vld [vmem:[%s8357_s26 + $0xa00] sm:$0xff]  ;;  %v1255_v5 = vld [vmem:[%s8357_s26 + $0xa08] sm:$0xff]  ;;  %v1256_v24 = vld [vmem:[%s8357_s26 + $0xa10] sm:$0xff]  ;;  %s6896_s4 = sshll.u32 %s9070_s3, 2 }
  0xdc   : > { %v7154_v4 = vcombine.high %v1190_v1, %v1254_v2  ;;  %v7153_v6 = vcombine.low %v1190_v1, %v1254_v2  ;;  %v1062_v7 = vld [vmem:[%s8357_s26 + $0x400] sm:$0xff]  ;;  %v7156_v9 = vcombine.high %v1191_v3, %v1255_v5  ;;  %v7155_v10 = vcombine.low %v1191_v3, %v1255_v5  ;;  %v1063_v12 = vld [vmem:[%s8357_s26 + $0x408] sm:$0xff]  ;;  %v1193_v25 = vld [vmem:[%s8357_s26 + $0x818] sm:$0xff]  ;;  %s8700_s7 = scalar_lea.vmem %s9065_s2, %s6896_s4 }
  0xdd   : > { %v1126_v8 = vld [vmem:[%s8357_s26 + $0x600] sm:$0xff]  ;;  %v1127_v13 = vld [vmem:[%s8357_s26 + $0x608] sm:$0xff]  ;;  %v1257_v26 = vld [vmem:[%s8357_s26 + $0xa18] sm:$0xff]  ;;  %v7158_v29 = vcombine.high %v1192_v23, %v1256_v24  ;;  %v7157_v36 = vcombine.low %v1192_v23, %v1256_v24 }
  0xde   : > { %v7026_v11 = vcombine.high %v1062_v7, %v1126_v8  ;;  %v934_v14 = vld [vmem:[%s8357_s26] sm:$0xff]  ;;  %3252 = vmatprep.subr.bf16.mxu0 %v7154_v4  ;;  %v7028_v15 = vcombine.high %v1063_v12, %v1127_v13  ;;  %v935_v17 = vld [vmem:[%s8357_s26 + $0x8] sm:$0xff]  ;;  %3293 = vmatprep.subr.bf16.mxu1 %v7156_v9  ;;  %v7025_v19 = vcombine.low %v1062_v7, %v1126_v8  ;;  %v1064_v31 = vld [vmem:[%s8357_s26 + $0x410] sm:$0xff] }
  0xdf   : > { %v998_v16 = vld [vmem:[%s8357_s26 + $0x200] sm:$0xff]  ;;  %v999_v18 = vld [vmem:[%s8357_s26 + $0x208] sm:$0xff]  ;;  %3253 = vmatpush1.bf16.msra.mxu0 %v7153_v6  ;;  %3294 = vmatpush1.bf16.msra.mxu1 %v7155_v10  ;;  %v7027_v20 = vcombine.low %v1063_v12, %v1127_v13  ;;  %v7160_v30 = vcombine.high %v1193_v25, %v1257_v26  ;;  %v1128_v32 = vld [vmem:[%s8357_s26 + $0x610] sm:$0xff]  ;;  %v7159_v37 = vcombine.low %v1193_v25, %v1257_v26 }
  0xe0   : > { %3254 = vmatprep.subr.bf16.mxu0 %v7026_v11  ;;  %v6898_v21 = vcombine.high %v934_v14, %v998_v16  ;;  %3295 = vmatprep.subr.bf16.mxu1 %v7028_v15  ;;  %v6900_v22 = vcombine.high %v935_v17, %v999_v18  ;;  %v6897_v27 = vcombine.low %v934_v14, %v998_v16  ;;  %v1065_v33 = vld [vmem:[%s8357_s26 + $0x418] sm:$0xff]  ;;  %v8382_v35 = vld [vmem:[%s9064_s1] sm:$0xf]  ;;  %v936_v40 = vld [vmem:[%s8357_s26 + $0x10] sm:$0xff] }
  0xe1   : > { %v6899_v28 = vcombine.low %v935_v17, %v999_v18  ;;  %v1129_v34 = vld [vmem:[%s8357_s26 + $0x618] sm:$0xff]  ;;  %v7030_v38 = vcombine.high %v1064_v31, %v1128_v32  ;;  %v1000_v41 = vld [vmem:[%s8357_s26 + $0x210] sm:$0xff]  ;;  %v7029_v44 = vcombine.low %v1064_v31, %v1128_v32  ;;  %v1194_v48 = vld [vmem:[%s8357_s26 + $0x820] sm:$0xff] }
  0xe2   : > { %v7032_v39 = vcombine.high %v1065_v33, %v1129_v34  ;;  %v937_v42 = vld [vmem:[%s8357_s26 + $0x18] sm:$0xff]  ;;  %v7031_v45 = vcombine.low %v1065_v33, %v1129_v34  ;;  %v6902_v46 = vcombine.high %v936_v40, %v1000_v41  ;;  %v1258_v49 = vld [vmem:[%s8357_s26 + $0xa20] sm:$0xff]  ;;  %v1195_v50 = vld [vmem:[%s8357_s26 + $0x828] sm:$0xff]  ;;  %v6901_v52 = vcombine.low %v936_v40, %v1000_v41 }
  0xe3   : > { %3255 = vmatpush1.bf16.msra.mxu0 %v7025_v19  ;;  %3296 = vmatpush1.bf16.msra.mxu1 %v7027_v20  ;;  %v1001_v43 = vld [vmem:[%s8357_s26 + $0x218] sm:$0xff]  ;;  %v1259_v51 = vld [vmem:[%s8357_s26 + $0xa28] sm:$0xff]  ;;  %v7162_v54 = vcombine.high %v1194_v48, %v1258_v49  ;;  %v1066_v56 = vld [vmem:[%s8357_s26 + $0x420] sm:$0xff]  ;;  %v7161_v60 = vcombine.low %v1194_v48, %v1258_v49 }
  0xe4   : > { %3256 = vmatprep.subr.bf16.mxu0 %v6898_v21  ;;  %3297 = vmatprep.subr.bf16.mxu1 %v6900_v22  ;;  %v6904_v47 = vcombine.high %v937_v42, %v1001_v43  ;;  %v6903_v53 = vcombine.low %v937_v42, %v1001_v43  ;;  %v7164_v55 = vcombine.high %v1195_v50, %v1259_v51  ;;  %v1130_v57 = vld [vmem:[%s8357_s26 + $0x620] sm:$0xff]  ;;  %v1067_v58 = vld [vmem:[%s8357_s26 + $0x428] sm:$0xff]  ;;  %v1196_v9 = vld [vmem:[%s8357_s26 + $0x830] sm:$0xff] }
  0xe5   : > { %v1131_v59 = vld [vmem:[%s8357_s26 + $0x628] sm:$0xff]  ;;  %v7163_v61 = vcombine.low %v1195_v50, %v1259_v51  ;;  %v7034_v62 = vcombine.high %v1066_v56, %v1130_v57  ;;  %v938_v1 = vld [vmem:[%s8357_s26 + $0x20] sm:$0xff]  ;;  %v7033_v5 = vcombine.low %v1066_v56, %v1130_v57  ;;  %v1260_v10 = vld [vmem:[%s8357_s26 + $0xa30] sm:$0xff] }
  0xe6   : > { %v7036_v63 = vcombine.high %v1067_v58, %v1131_v59  ;;  %v1002_v2 = vld [vmem:[%s8357_s26 + $0x220] sm:$0xff]  ;;  %v939_v3 = vld [vmem:[%s8357_s26 + $0x28] sm:$0xff]  ;;  %v7035_v6 = vcombine.low %v1067_v58, %v1131_v59  ;;  %v1197_v11 = vld [vmem:[%s8357_s26 + $0x838] sm:$0xff]  ;;  %v7166_v15 = vcombine.high %v1196_v9, %v1260_v10  ;;  %v7165_v21 = vcombine.low %v1196_v9, %v1260_v10 }
  0xe7   : > { %3257 = vmatpush1.bf16.msra.mxu0 %v6897_v27  ;;  %3298 = vmatpush1.bf16.msra.mxu1 %v6899_v28  ;;  %v1003_v4 = vld [vmem:[%s8357_s26 + $0x228] sm:$0xff]  ;;  %v6906_v7 = vcombine.high %v938_v1, %v1002_v2  ;;  %v1261_v12 = vld [vmem:[%s8357_s26 + $0xa38] sm:$0xff]  ;;  %v6905_v13 = vcombine.low %v938_v1, %v1002_v2  ;;  %v1068_v17 = vld [vmem:[%s8357_s26 + $0x430] sm:$0xff] }
  0xe8   : > { %3334 = vmatprep.subr.bf16.mxu0 %v7158_v29  ;;  %3375 = vmatprep.subr.bf16.mxu1 %v7160_v30  ;;  %v6908_v8 = vcombine.high %v939_v3, %v1003_v4  ;;  %v6907_v14 = vcombine.low %v939_v3, %v1003_v4  ;;  %v7168_v16 = vcombine.high %v1197_v11, %v1261_v12  ;;  %v1132_v18 = vld [vmem:[%s8357_s26 + $0x630] sm:$0xff]  ;;  %v1069_v19 = vld [vmem:[%s8357_s26 + $0x438] sm:$0xff]  ;;  %v1198_v33 = vld [vmem:[%s8357_s26 + $0x840] sm:$0xff] }
  0xe9   : > { %v1133_v20 = vld [vmem:[%s8357_s26 + $0x638] sm:$0xff]  ;;  %v7167_v22 = vcombine.low %v1197_v11, %v1261_v12  ;;  %v7038_v23 = vcombine.high %v1068_v17, %v1132_v18  ;;  %v940_v25 = vld [vmem:[%s8357_s26 + $0x30] sm:$0xff]  ;;  %v7037_v29 = vcombine.low %v1068_v17, %v1132_v18  ;;  %v1262_v34 = vld [vmem:[%s8357_s26 + $0xa40] sm:$0xff] }
  0xea   : > { %7281 = vmatmul.mubr.msk.bf16.vlgmr.msra.gmra.mxu0 %vm3238_vm0, %v8382_v35  ;;  %7282 = vmatmul.mubr.msk.bf16.vlgmr.msra.gmra.mxu1 %vm3238_vm0, %v8382_v35  ;;  %v7040_v24 = vcombine.high %v1069_v19, %v1133_v20  ;;  %v1004_v26 = vld [vmem:[%s8357_s26 + $0x230] sm:$0xff]  ;;  %v941_v27 = vld [vmem:[%s8357_s26 + $0x38] sm:$0xff]  ;;  %v7039_v30 = vcombine.low %v1069_v19, %v1133_v20  ;;  %v7170_v40 = vcombine.high %v1198_v33, %v1262_v34  ;;  %v1070_v42 = vld [vmem:[%s8357_s26 + $0x440] sm:$0xff] }
  0xeb   : > { %3335 = vmatpush1.bf16.msra.mxu0 %v7157_v36  ;;  %3376 = vmatpush1.bf16.msra.mxu1 %v7159_v37  ;;  %v1005_v28 = vld [vmem:[%s8357_s26 + $0x238] sm:$0xff]  ;;  %v6910_v31 = vcombine.high %v940_v25, %v1004_v26  ;;  %v1199_v36 = vld [vmem:[%s8357_s26 + $0x848] sm:$0xff]  ;;  %v1134_v43 = vld [vmem:[%s8357_s26 + $0x640] sm:$0xff] }
  0xec   : > { %3336 = vmatprep.subr.bf16.mxu0 %v7030_v38  ;;  %3377 = vmatprep.subr.bf16.mxu1 %v7032_v39  ;;  %v6912_v32 = vcombine.high %v941_v27, %v1005_v28  ;;  %v1263_v37 = vld [vmem:[%s8357_s26 + $0xa48] sm:$0xff]  ;;  %v6909_v38 = vcombine.low %v940_v25, %v1004_v26  ;;  %v6911_v39 = vcombine.low %v941_v27, %v1005_v28  ;;  %v942_v50 = vld [vmem:[%s8357_s26 + $0x40] sm:$0xff]  ;;  %v1200_v58 = vld [vmem:[%s8357_s26 + $0x850] sm:$0xff] }
  0xed   : > { %3356 = vmatprep.mubr.bf16.mxu0 %v7530_v0  ;;  %3397 = vmatprep.mubr.bf16.mxu1 %v7530_v0  ;;  %v7172_v41 = vcombine.high %v1199_v36, %v1263_v37  ;;  %v7042_v48 = vcombine.high %v1070_v42, %v1134_v43  ;;  %v1006_v51 = vld [vmem:[%s8357_s26 + $0x240] sm:$0xff]  ;;  %v1264_v59 = vld [vmem:[%s8357_s26 + $0xa50] sm:$0xff] }
  0xee   : > { %v6914_v56 = vcombine.high %v942_v50, %v1006_v51  ;;  %v7174_v1 = vcombine.high %v1200_v58, %v1264_v59  ;;  %v1072_v3 = vld [vmem:[%s8357_s26 + $0x450] sm:$0xff]  ;;  %v1202_v19 = vld [vmem:[%s8357_s26 + $0x860] sm:$0xff] }
  0xef   : > { %3337 = vmatpush1.bf16.msra.mxu0 %v7029_v44  ;;  %3378 = vmatpush1.bf16.msra.mxu1 %v7031_v45  ;;  %v1071_v44 = vld [vmem:[%s8357_s26 + $0x448] sm:$0xff]  ;;  %v1136_v4 = vld [vmem:[%s8357_s26 + $0x650] sm:$0xff]  ;;  %v1266_v20 = vld [vmem:[%s8357_s26 + $0xa60] sm:$0xff] }
  0xf0   : > { %3338 = vmatprep.subr.bf16.mxu0 %v6902_v46  ;;  %3379 = vmatprep.subr.bf16.mxu1 %v6904_v47  ;;  %v1135_v45 = vld [vmem:[%s8357_s26 + $0x648] sm:$0xff]  ;;  %v7169_v46 = vcombine.low %v1198_v33, %v1262_v34  ;;  %v7171_v47 = vcombine.low %v1199_v36, %v1263_v37  ;;  %v7046_v9 = vcombine.high %v1072_v3, %v1136_v4  ;;  %v944_v11 = vld [vmem:[%s8357_s26 + $0x50] sm:$0xff]  ;;  %v1074_v27 = vld [vmem:[%s8357_s26 + $0x460] sm:$0xff] }
  0xf1   : > { %v7044_v49 = vcombine.high %v1071_v44, %v1135_v45  ;;  %v1008_v12 = vld [vmem:[%s8357_s26 + $0x250] sm:$0xff]  ;;  %v7178_v25 = vcombine.high %v1202_v19, %v1266_v20  ;;  %v1138_v28 = vld [vmem:[%s8357_s26 + $0x660] sm:$0xff] }
  0xf2   : > { %v6918_v17 = vcombine.high %v944_v11, %v1008_v12  ;;  %v7050_v33 = vcombine.high %v1074_v27, %v1138_v28  ;;  %v946_v36 = vld [vmem:[%s8357_s26 + $0x60] sm:$0xff] }
  0xf3   : > { %3339 = vmatpush1.bf16.msra.mxu0 %v6901_v52  ;;  %3380 = vmatpush1.bf16.msra.mxu1 %v6903_v53  ;;  %v943_v52 = vld [vmem:[%s8357_s26 + $0x48] sm:$0xff]  ;;  %v1010_v37 = vld [vmem:[%s8357_s26 + $0x260] sm:$0xff] }
  0xf4   : > { %3416 = vmatprep.subr.bf16.mxu0 %v7162_v54  ;;  %3457 = vmatprep.subr.bf16.mxu1 %v7164_v55  ;;  %v1007_v53 = vld [vmem:[%s8357_s26 + $0x248] sm:$0xff]  ;;  %v7041_v54 = vcombine.low %v1070_v42, %v1134_v43  ;;  %v7043_v55 = vcombine.low %v1071_v44, %v1135_v45  ;;  %v6922_v42 = vcombine.high %v946_v36, %v1010_v37  ;;  %v1204_v44 = vld [vmem:[%s8357_s26 + $0x870] sm:$0xff] }
  0xf5   : > { %v6916_v57 = vcombine.high %v943_v52, %v1007_v53  ;;  %v1268_v45 = vld [vmem:[%s8357_s26 + $0xa70] sm:$0xff] }
  0xf6   : > { %7283 = vmatmul.mubr.msk.bf16.vlgmr.msra.gmra.mxu0 %vm3238_vm0, %v8382_v35  ;;  %7284 = vmatmul.mubr.msk.bf16.vlgmr.msra.gmra.mxu1 %vm3238_vm0, %v8382_v35 }
  0xf7   : > { %3417 = vmatpush1.bf16.msra.mxu0 %v7161_v60  ;;  %3458 = vmatpush1.bf16.msra.mxu1 %v7163_v61  ;;  %v1201_v60 = vld [vmem:[%s8357_s26 + $0x858] sm:$0xff] }
  0xf8   : > { %3418 = vmatprep.subr.bf16.mxu0 %v7034_v62  ;;  %3459 = vmatprep.subr.bf16.mxu1 %v7036_v63  ;;  %v1265_v61 = vld [vmem:[%s8357_s26 + $0xa58] sm:$0xff]  ;;  %v6913_v62 = vcombine.low %v942_v50, %v1006_v51  ;;  %v6915_v63 = vcombine.low %v943_v52, %v1007_v53  ;;  %v7182_v50 = vcombine.high %v1204_v44, %v1268_v45  ;;  %v1076_v52 = vld [vmem:[%s8357_s26 + $0x470] sm:$0xff] }
  0xf9   : > { %3438 = vmatprep.mubr.bf16.mxu0 %v7530_v0  ;;  %3479 = vmatprep.mubr.bf16.mxu1 %v7530_v0  ;;  %v7176_v2 = vcombine.high %v1201_v60, %v1265_v61  ;;  %v1140_v53 = vld [vmem:[%s8357_s26 + $0x670] sm:$0xff] }
  0xfb   : > { %3419 = vmatpush1.bf16.msra.mxu0 %v7033_v5  ;;  %3460 = vmatpush1.bf16.msra.mxu1 %v7035_v6  ;;  %v1073_v5 = vld [vmem:[%s8357_s26 + $0x458] sm:$0xff] }
  0xfc   : > { %3420 = vmatprep.subr.bf16.mxu0 %v6906_v7  ;;  %3461 = vmatprep.subr.bf16.mxu1 %v6908_v8  ;;  %v1137_v6 = vld [vmem:[%s8357_s26 + $0x658] sm:$0xff]  ;;  %v7173_v7 = vcombine.low %v1200_v58, %v1264_v59  ;;  %v7175_v8 = vcombine.low %v1201_v60, %v1265_v61  ;;  %v7054_v58 = vcombine.high %v1076_v52, %v1140_v53  ;;  %v948_v60 = vld [vmem:[%s8357_s26 + $0x70] sm:$0xff] }
  0xfd   : > { %v7048_v10 = vcombine.high %v1073_v5, %v1137_v6  ;;  %v1012_v61 = vld [vmem:[%s8357_s26 + $0x270] sm:$0xff] }
  0xff   : > { %3421 = vmatpush1.bf16.msra.mxu0 %v6905_v13  ;;  %3462 = vmatpush1.bf16.msra.mxu1 %v6907_v14  ;;  %v945_v13 = vld [vmem:[%s8357_s26 + $0x58] sm:$0xff] }
 0x100   : > { %3498 = vmatprep.subr.bf16.mxu0 %v7166_v15  ;;  %3539 = vmatprep.subr.bf16.mxu1 %v7168_v16  ;;  %v1009_v14 = vld [vmem:[%s8357_s26 + $0x258] sm:$0xff]  ;;  %v7045_v15 = vcombine.low %v1072_v3, %v1136_v4  ;;  %v7047_v16 = vcombine.low %v1073_v5, %v1137_v6  ;;  %v6926_v3 = vcombine.high %v948_v60, %v1012_v61  ;;  %v1206_v5 = vld [vmem:[%s8357_s26 + $0x880] sm:$0xff] }
 0x101   : > { %v6920_v18 = vcombine.high %v945_v13, %v1009_v14  ;;  %v1270_v6 = vld [vmem:[%s8357_s26 + $0xa80] sm:$0xff] }
 0x102   : > { %7285 = vmatmul.mubr.msk.bf16.vlgmr.msra.gmra.mxu0 %vm3238_vm0, %v8382_v35  ;;  %7286 = vmatmul.mubr.msk.bf16.vlgmr.msra.gmra.mxu1 %vm3238_vm0, %v8382_v35 }
 0x103   : > { %3499 = vmatpush1.bf16.msra.mxu0 %v7165_v21  ;;  %3540 = vmatpush1.bf16.msra.mxu1 %v7167_v22  ;;  %v1203_v21 = vld [vmem:[%s8357_s26 + $0x868] sm:$0xff] }
 0x104   : > { %3500 = vmatprep.subr.bf16.mxu0 %v7038_v23  ;;  %3541 = vmatprep.subr.bf16.mxu1 %v7040_v24  ;;  %v1267_v22 = vld [vmem:[%s8357_s26 + $0xa68] sm:$0xff]  ;;  %v6917_v23 = vcombine.low %v944_v11, %v1008_v12  ;;  %v6919_v24 = vcombine.low %v945_v13, %v1009_v14  ;;  %v7186_v11 = vcombine.high %v1206_v5, %v1270_v6  ;;  %v1078_v13 = vld [vmem:[%s8357_s26 + $0x480] sm:$0xff] }
 0x105   : > { %3520 = vmatprep.mubr.bf16.mxu0 %v7530_v0  ;;  %3561 = vmatprep.mubr.bf16.mxu1 %v7530_v0  ;;  %v7180_v26 = vcombine.high %v1203_v21, %v1267_v22  ;;  %v1142_v14 = vld [vmem:[%s8357_s26 + $0x680] sm:$0xff] }
 0x107   : > { %3501 = vmatpush1.bf16.msra.mxu0 %v7037_v29  ;;  %3542 = vmatpush1.bf16.msra.mxu1 %v7039_v30  ;;  %v1075_v29 = vld [vmem:[%s8357_s26 + $0x468] sm:$0xff] }
 0x108   : > { %3502 = vmatprep.subr.bf16.mxu0 %v6910_v31  ;;  %3543 = vmatprep.subr.bf16.mxu1 %v6912_v32  ;;  %v1139_v30 = vld [vmem:[%s8357_s26 + $0x668] sm:$0xff]  ;;  %v7177_v31 = vcombine.low %v1202_v19, %v1266_v20  ;;  %v7179_v32 = vcombine.low %v1203_v21, %v1267_v22  ;;  %v7058_v19 = vcombine.high %v1078_v13, %v1142_v14  ;;  %v950_v21 = vld [vmem:[%s8357_s26 + $0x80] sm:$0xff] }
 0x109   : > { %v7052_v34 = vcombine.high %v1075_v29, %v1139_v30  ;;  %v1014_v22 = vld [vmem:[%s8357_s26 + $0x280] sm:$0xff] }
 0x10b   : > { %3503 = vmatpush1.bf16.msra.mxu0 %v6909_v38  ;;  %3544 = vmatpush1.bf16.msra.mxu1 %v6911_v39  ;;  %v947_v38 = vld [vmem:[%s8357_s26 + $0x68] sm:$0xff] }
 0x10c   : > { %3580 = vmatprep.subr.bf16.mxu0 %v7170_v40  ;;  %3621 = vmatprep.subr.bf16.mxu1 %v7172_v41  ;;  %v1011_v39 = vld [vmem:[%s8357_s26 + $0x268] sm:$0xff]  ;;  %v7049_v40 = vcombine.low %v1074_v27, %v1138_v28  ;;  %v7051_v41 = vcombine.low %v1075_v29, %v1139_v30  ;;  %v6930_v27 = vcombine.high %v950_v21, %v1014_v22  ;;  %v1208_v29 = vld [vmem:[%s8357_s26 + $0x890] sm:$0xff] }
 0x10d   : > { %v6924_v43 = vcombine.high %v947_v38, %v1011_v39  ;;  %v1272_v30 = vld [vmem:[%s8357_s26 + $0xa90] sm:$0xff] }
 0x10e   : > { %7287 = vmatmul.mubr.msk.bf16.vlgmr.msra.gmra.mxu0 %vm3238_vm0, %v8382_v35  ;;  %7288 = vmatmul.mubr.msk.bf16.vlgmr.msra.gmra.mxu1 %vm3238_vm0, %v8382_v35 }
 0x10f   : > { %3581 = vmatpush1.bf16.msra.mxu0 %v7169_v46  ;;  %3622 = vmatpush1.bf16.msra.mxu1 %v7171_v47  ;;  %v1205_v46 = vld [vmem:[%s8357_s26 + $0x878] sm:$0xff] }
 0x110   : > { %3582 = vmatprep.subr.bf16.mxu0 %v7042_v48  ;;  %3623 = vmatprep.subr.bf16.mxu1 %v7044_v49  ;;  %v1269_v47 = vld [vmem:[%s8357_s26 + $0xa78] sm:$0xff]  ;;  %v6921_v48 = vcombine.low %v946_v36, %v1010_v37  ;;  %v6923_v49 = vcombine.low %v947_v38, %v1011_v39  ;;  %v7190_v36 = vcombine.high %v1208_v29, %v1272_v30  ;;  %v1080_v38 = vld [vmem:[%s8357_s26 + $0x490] sm:$0xff] }
 0x111   : > { %3602 = vmatprep.mubr.bf16.mxu0 %v7530_v0  ;;  %3643 = vmatprep.mubr.bf16.mxu1 %v7530_v0  ;;  %v7184_v51 = vcombine.high %v1205_v46, %v1269_v47  ;;  %v1144_v39 = vld [vmem:[%s8357_s26 + $0x690] sm:$0xff] }
 0x113   : > { %3583 = vmatpush1.bf16.msra.mxu0 %v7041_v54  ;;  %3624 = vmatpush1.bf16.msra.mxu1 %v7043_v55  ;;  %v1077_v54 = vld [vmem:[%s8357_s26 + $0x478] sm:$0xff] }
 0x114   : > { %3584 = vmatprep.subr.bf16.mxu0 %v6914_v56  ;;  %3625 = vmatprep.subr.bf16.mxu1 %v6916_v57  ;;  %v1141_v55 = vld [vmem:[%s8357_s26 + $0x678] sm:$0xff]  ;;  %v7181_v56 = vcombine.low %v1204_v44, %v1268_v45  ;;  %v7183_v57 = vcombine.low %v1205_v46, %v1269_v47  ;;  %v7062_v44 = vcombine.high %v1080_v38, %v1144_v39  ;;  %v952_v46 = vld [vmem:[%s8357_s26 + $0x90] sm:$0xff] }
 0x115   : > { %v7056_v59 = vcombine.high %v1077_v54, %v1141_v55  ;;  %v1016_v47 = vld [vmem:[%s8357_s26 + $0x290] sm:$0xff] }
 0x117   : > { %3585 = vmatpush1.bf16.msra.mxu0 %v6913_v62  ;;  %3626 = vmatpush1.bf16.msra.mxu1 %v6915_v63  ;;  %v949_v62 = vld [vmem:[%s8357_s26 + $0x78] sm:$0xff] }
 0x118   : > { %3662 = vmatprep.subr.bf16.mxu0 %v7174_v1  ;;  %3703 = vmatprep.subr.bf16.mxu1 %v7176_v2  ;;  %v1013_v63 = vld [vmem:[%s8357_s26 + $0x278] sm:$0xff]  ;;  %v7053_v1 = vcombine.low %v1076_v52, %v1140_v53  ;;  %v7055_v2 = vcombine.low %v1077_v54, %v1141_v55  ;;  %v6934_v52 = vcombine.high %v952_v46, %v1016_v47  ;;  %v1210_v54 = vld [vmem:[%s8357_s26 + $0x8a0] sm:$0xff] }
 0x119   : > { %v6928_v4 = vcombine.high %v949_v62, %v1013_v63  ;;  %v1274_v55 = vld [vmem:[%s8357_s26 + $0xaa0] sm:$0xff] }
 0x11a   : > { %7289 = vmatmul.mubr.msk.bf16.vlgmr.msra.gmra.mxu0 %vm3238_vm0, %v8382_v35  ;;  %7290 = vmatmul.mubr.msk.bf16.vlgmr.msra.gmra.mxu1 %vm3238_vm0, %v8382_v35 }
 0x11b   : > { %3663 = vmatpush1.bf16.msra.mxu0 %v7173_v7  ;;  %3704 = vmatpush1.bf16.msra.mxu1 %v7175_v8  ;;  %v1207_v7 = vld [vmem:[%s8357_s26 + $0x888] sm:$0xff] }
 0x11c   : > { %3664 = vmatprep.subr.bf16.mxu0 %v7046_v9  ;;  %3705 = vmatprep.subr.bf16.mxu1 %v7048_v10  ;;  %v1271_v8 = vld [vmem:[%s8357_s26 + $0xa88] sm:$0xff]  ;;  %v6925_v9 = vcombine.low %v948_v60, %v1012_v61  ;;  %v6927_v10 = vcombine.low %v949_v62, %v1013_v63  ;;  %v7194_v60 = vcombine.high %v1210_v54, %v1274_v55  ;;  %v1082_v62 = vld [vmem:[%s8357_s26 + $0x4a0] sm:$0xff] }
 0x11d   : > { %3684 = vmatprep.mubr.bf16.mxu0 %v7530_v0  ;;  %3725 = vmatprep.mubr.bf16.mxu1 %v7530_v0  ;;  %v7188_v12 = vcombine.high %v1207_v7, %v1271_v8  ;;  %v1146_v63 = vld [vmem:[%s8357_s26 + $0x6a0] sm:$0xff] }
 0x11f   : > { %3665 = vmatpush1.bf16.msra.mxu0 %v7045_v15  ;;  %3706 = vmatpush1.bf16.msra.mxu1 %v7047_v16  ;;  %v1079_v15 = vld [vmem:[%s8357_s26 + $0x488] sm:$0xff] }
 0x120   : > { %3666 = vmatprep.subr.bf16.mxu0 %v6918_v17  ;;  %3707 = vmatprep.subr.bf16.mxu1 %v6920_v18  ;;  %v1143_v16 = vld [vmem:[%s8357_s26 + $0x688] sm:$0xff]  ;;  %v7185_v17 = vcombine.low %v1206_v5, %v1270_v6  ;;  %v7187_v18 = vcombine.low %v1207_v7, %v1271_v8  ;;  %v7066_v5 = vcombine.high %v1082_v62, %v1146_v63  ;;  %v954_v7 = vld [vmem:[%s8357_s26 + $0xa0] sm:$0xff] }
 0x121   : > { %v7060_v20 = vcombine.high %v1079_v15, %v1143_v16  ;;  %v1018_v8 = vld [vmem:[%s8357_s26 + $0x2a0] sm:$0xff] }
 0x123   : > { %3667 = vmatpush1.bf16.msra.mxu0 %v6917_v23  ;;  %3708 = vmatpush1.bf16.msra.mxu1 %v6919_v24  ;;  %v951_v23 = vld [vmem:[%s8357_s26 + $0x88] sm:$0xff] }
 0x124   : > { %3744 = vmatprep.subr.bf16.mxu0 %v7178_v25  ;;  %3785 = vmatprep.subr.bf16.mxu1 %v7180_v26  ;;  %v1015_v24 = vld [vmem:[%s8357_s26 + $0x288] sm:$0xff]  ;;  %v7057_v25 = vcombine.low %v1078_v13, %v1142_v14  ;;  %v7059_v26 = vcombine.low %v1079_v15, %v1143_v16  ;;  %v6938_v13 = vcombine.high %v954_v7, %v1018_v8  ;;  %v1212_v15 = vld [vmem:[%s8357_s26 + $0x8b0] sm:$0xff] }
 0x125   : > { %v6932_v28 = vcombine.high %v951_v23, %v1015_v24  ;;  %v1276_v16 = vld [vmem:[%s8357_s26 + $0xab0] sm:$0xff] }
 0x126   : > { %7291 = vmatmul.mubr.msk.bf16.vlgmr.msra.gmra.mxu0 %vm3238_vm0, %v8382_v35  ;;  %7292 = vmatmul.mubr.msk.bf16.vlgmr.msra.gmra.mxu1 %vm3238_vm0, %v8382_v35 }
 0x127   : > { %3745 = vmatpush1.bf16.msra.mxu0 %v7177_v31  ;;  %3786 = vmatpush1.bf16.msra.mxu1 %v7179_v32  ;;  %v1209_v31 = vld [vmem:[%s8357_s26 + $0x898] sm:$0xff] }
 0x128   : > { %3746 = vmatprep.subr.bf16.mxu0 %v7050_v33  ;;  %3787 = vmatprep.subr.bf16.mxu1 %v7052_v34  ;;  %v1273_v32 = vld [vmem:[%s8357_s26 + $0xa98] sm:$0xff]  ;;  %v6929_v33 = vcombine.low %v950_v21, %v1014_v22  ;;  %v6931_v34 = vcombine.low %v951_v23, %v1015_v24  ;;  %v7198_v21 = vcombine.high %v1212_v15, %v1276_v16  ;;  %v1084_v23 = vld [vmem:[%s8357_s26 + $0x4b0] sm:$0xff] }
 0x129   : > { %3766 = vmatprep.mubr.bf16.mxu0 %v7530_v0  ;;  %3807 = vmatprep.mubr.bf16.mxu1 %v7530_v0  ;;  %v7192_v37 = vcombine.high %v1209_v31, %v1273_v32  ;;  %v1148_v24 = vld [vmem:[%s8357_s26 + $0x6b0] sm:$0xff] }
 0x12b   : > { %3747 = vmatpush1.bf16.msra.mxu0 %v7049_v40  ;;  %3788 = vmatpush1.bf16.msra.mxu1 %v7051_v41  ;;  %v1081_v40 = vld [vmem:[%s8357_s26 + $0x498] sm:$0xff] }
 0x12c   : > { %3748 = vmatprep.subr.bf16.mxu0 %v6922_v42  ;;  %3789 = vmatprep.subr.bf16.mxu1 %v6924_v43  ;;  %v1145_v41 = vld [vmem:[%s8357_s26 + $0x698] sm:$0xff]  ;;  %v7189_v42 = vcombine.low %v1208_v29, %v1272_v30  ;;  %v7191_v43 = vcombine.low %v1209_v31, %v1273_v32  ;;  %v7070_v29 = vcombine.high %v1084_v23, %v1148_v24  ;;  %v956_v31 = vld [vmem:[%s8357_s26 + $0xb0] sm:$0xff] }
 0x12d   : > { %v7064_v45 = vcombine.high %v1081_v40, %v1145_v41  ;;  %v1020_v32 = vld [vmem:[%s8357_s26 + $0x2b0] sm:$0xff] }
 0x12f   : > { %3749 = vmatpush1.bf16.msra.mxu0 %v6921_v48  ;;  %3790 = vmatpush1.bf16.msra.mxu1 %v6923_v49  ;;  %v953_v48 = vld [vmem:[%s8357_s26 + $0x98] sm:$0xff] }
 0x130   : > { %3826 = vmatprep.subr.bf16.mxu0 %v7182_v50  ;;  %3867 = vmatprep.subr.bf16.mxu1 %v7184_v51  ;;  %v1017_v49 = vld [vmem:[%s8357_s26 + $0x298] sm:$0xff]  ;;  %v7061_v50 = vcombine.low %v1080_v38, %v1144_v39  ;;  %v7063_v51 = vcombine.low %v1081_v40, %v1145_v41  ;;  %v6942_v38 = vcombine.high %v956_v31, %v1020_v32  ;;  %v1214_v40 = vld [vmem:[%s8357_s26 + $0x8c0] sm:$0xff] }
 0x131   : > { %v6936_v53 = vcombine.high %v953_v48, %v1017_v49  ;;  %v1278_v41 = vld [vmem:[%s8357_s26 + $0xac0] sm:$0xff] }
 0x132   : > { %7293 = vmatmul.mubr.msk.bf16.vlgmr.msra.gmra.mxu0 %vm3238_vm0, %v8382_v35  ;;  %7294 = vmatmul.mubr.msk.bf16.vlgmr.msra.gmra.mxu1 %vm3238_vm0, %v8382_v35 }
 0x133   : > { %3827 = vmatpush1.bf16.msra.mxu0 %v7181_v56  ;;  %3868 = vmatpush1.bf16.msra.mxu1 %v7183_v57  ;;  %v1211_v56 = vld [vmem:[%s8357_s26 + $0x8a8] sm:$0xff] }
 0x134   : > { %3828 = vmatprep.subr.bf16.mxu0 %v7054_v58  ;;  %3869 = vmatprep.subr.bf16.mxu1 %v7056_v59  ;;  %v1275_v57 = vld [vmem:[%s8357_s26 + $0xaa8] sm:$0xff]  ;;  %v6933_v58 = vcombine.low %v952_v46, %v1016_v47  ;;  %v6935_v59 = vcombine.low %v953_v48, %v1017_v49  ;;  %v7202_v46 = vcombine.high %v1214_v40, %v1278_v41  ;;  %v1086_v48 = vld [vmem:[%s8357_s26 + $0x4c0] sm:$0xff] }
 0x135   : > { %3848 = vmatprep.mubr.bf16.mxu0 %v7530_v0  ;;  %3889 = vmatprep.mubr.bf16.mxu1 %v7530_v0  ;;  %v7196_v61 = vcombine.high %v1211_v56, %v1275_v57  ;;  %v1150_v49 = vld [vmem:[%s8357_s26 + $0x6c0] sm:$0xff] }
 0x137   : > { %3829 = vmatpush1.bf16.msra.mxu0 %v7053_v1  ;;  %3870 = vmatpush1.bf16.msra.mxu1 %v7055_v2  ;;  %v1083_v1 = vld [vmem:[%s8357_s26 + $0x4a8] sm:$0xff] }
 0x138   : > { %3830 = vmatprep.subr.bf16.mxu0 %v6926_v3  ;;  %3871 = vmatprep.subr.bf16.mxu1 %v6928_v4  ;;  %v1147_v2 = vld [vmem:[%s8357_s26 + $0x6a8] sm:$0xff]  ;;  %v7193_v3 = vcombine.low %v1210_v54, %v1274_v55  ;;  %v7195_v4 = vcombine.low %v1211_v56, %v1275_v57  ;;  %v7074_v54 = vcombine.high %v1086_v48, %v1150_v49  ;;  %v958_v56 = vld [vmem:[%s8357_s26 + $0xc0] sm:$0xff] }
 0x139   : > { %v7068_v6 = vcombine.high %v1083_v1, %v1147_v2  ;;  %v1022_v57 = vld [vmem:[%s8357_s26 + $0x2c0] sm:$0xff] }
 0x13b   : > { %3831 = vmatpush1.bf16.msra.mxu0 %v6925_v9  ;;  %3872 = vmatpush1.bf16.msra.mxu1 %v6927_v10  ;;  %v955_v9 = vld [vmem:[%s8357_s26 + $0xa8] sm:$0xff] }
 0x13c   : > { %3908 = vmatprep.subr.bf16.mxu0 %v7186_v11  ;;  %3949 = vmatprep.subr.bf16.mxu1 %v7188_v12  ;;  %v1019_v10 = vld [vmem:[%s8357_s26 + $0x2a8] sm:$0xff]  ;;  %v7065_v11 = vcombine.low %v1082_v62, %v1146_v63  ;;  %v7067_v12 = vcombine.low %v1083_v1, %v1147_v2  ;;  %v6946_v62 = vcombine.high %v958_v56, %v1022_v57  ;;  %v1216_v1 = vld [vmem:[%s8357_s26 + $0x8d0] sm:$0xff] }
 0x13d   : > { %v6940_v14 = vcombine.high %v955_v9, %v1019_v10  ;;  %v1280_v2 = vld [vmem:[%s8357_s26 + $0xad0] sm:$0xff] }
 0x13e   : > { %7295 = vmatmul.mubr.msk.bf16.vlgmr.msra.gmra.mxu0 %vm3238_vm0, %v8382_v35  ;;  %7296 = vmatmul.mubr.msk.bf16.vlgmr.msra.gmra.mxu1 %vm3238_vm0, %v8382_v35 }
 0x13f   : > { %3909 = vmatpush1.bf16.msra.mxu0 %v7185_v17  ;;  %3950 = vmatpush1.bf16.msra.mxu1 %v7187_v18  ;;  %v1213_v17 = vld [vmem:[%s8357_s26 + $0x8b8] sm:$0xff] }
 0x140   : > { %3910 = vmatprep.subr.bf16.mxu0 %v7058_v19  ;;  %3951 = vmatprep.subr.bf16.mxu1 %v7060_v20  ;;  %v1277_v18 = vld [vmem:[%s8357_s26 + $0xab8] sm:$0xff]  ;;  %v6937_v19 = vcombine.low %v954_v7, %v1018_v8  ;;  %v6939_v20 = vcombine.low %v955_v9, %v1019_v10  ;;  %v7206_v7 = vcombine.high %v1216_v1, %v1280_v2  ;;  %v1088_v9 = vld [vmem:[%s8357_s26 + $0x4d0] sm:$0xff] }
 0x141   : > { %3930 = vmatprep.mubr.bf16.mxu0 %v7530_v0  ;;  %3971 = vmatprep.mubr.bf16.mxu1 %v7530_v0  ;;  %v7200_v22 = vcombine.high %v1213_v17, %v1277_v18  ;;  %v1152_v10 = vld [vmem:[%s8357_s26 + $0x6d0] sm:$0xff] }
 0x143   : > { %3911 = vmatpush1.bf16.msra.mxu0 %v7057_v25  ;;  %3952 = vmatpush1.bf16.msra.mxu1 %v7059_v26  ;;  %v1085_v25 = vld [vmem:[%s8357_s26 + $0x4b8] sm:$0xff] }
 0x144   : > { %3912 = vmatprep.subr.bf16.mxu0 %v6930_v27  ;;  %3953 = vmatprep.subr.bf16.mxu1 %v6932_v28  ;;  %v1149_v26 = vld [vmem:[%s8357_s26 + $0x6b8] sm:$0xff]  ;;  %v7197_v27 = vcombine.low %v1212_v15, %v1276_v16  ;;  %v7199_v28 = vcombine.low %v1213_v17, %v1277_v18  ;;  %v7078_v15 = vcombine.high %v1088_v9, %v1152_v10  ;;  %v960_v17 = vld [vmem:[%s8357_s26 + $0xd0] sm:$0xff] }
 0x145   : > { %v7072_v30 = vcombine.high %v1085_v25, %v1149_v26  ;;  %v1024_v18 = vld [vmem:[%s8357_s26 + $0x2d0] sm:$0xff] }
 0x147   : > { %3913 = vmatpush1.bf16.msra.mxu0 %v6929_v33  ;;  %3954 = vmatpush1.bf16.msra.mxu1 %v6931_v34  ;;  %v957_v33 = vld [vmem:[%s8357_s26 + $0xb8] sm:$0xff] }
 0x148   : > { %3990 = vmatprep.subr.bf16.mxu0 %v7190_v36  ;;  %4031 = vmatprep.subr.bf16.mxu1 %v7192_v37  ;;  %v1021_v34 = vld [vmem:[%s8357_s26 + $0x2b8] sm:$0xff]  ;;  %v7069_v36 = vcombine.low %v1084_v23, %v1148_v24  ;;  %v7071_v37 = vcombine.low %v1085_v25, %v1149_v26  ;;  %v6950_v23 = vcombine.high %v960_v17, %v1024_v18  ;;  %v1218_v25 = vld [vmem:[%s8357_s26 + $0x8e0] sm:$0xff] }
 0x149   : > { %v6944_v39 = vcombine.high %v957_v33, %v1021_v34  ;;  %v1282_v26 = vld [vmem:[%s8357_s26 + $0xae0] sm:$0xff] }
 0x14a   : > { %7297 = vmatmul.mubr.msk.bf16.vlgmr.msra.gmra.mxu0 %vm3238_vm0, %v8382_v35  ;;  %7298 = vmatmul.mubr.msk.bf16.vlgmr.msra.gmra.mxu1 %vm3238_vm0, %v8382_v35 }
 0x14b   : > { %3991 = vmatpush1.bf16.msra.mxu0 %v7189_v42  ;;  %4032 = vmatpush1.bf16.msra.mxu1 %v7191_v43  ;;  %v1215_v42 = vld [vmem:[%s8357_s26 + $0x8c8] sm:$0xff] }
 0x14c   : > { %3992 = vmatprep.subr.bf16.mxu0 %v7062_v44  ;;  %4033 = vmatprep.subr.bf16.mxu1 %v7064_v45  ;;  %v1279_v43 = vld [vmem:[%s8357_s26 + $0xac8] sm:$0xff]  ;;  %v6941_v44 = vcombine.low %v956_v31, %v1020_v32  ;;  %v6943_v45 = vcombine.low %v957_v33, %v1021_v34  ;;  %v1090_v32 = vld [vmem:[%s8357_s26 + $0x4e0] sm:$0xff] }
 0x14d   : > { %4012 = vmatprep.mubr.bf16.mxu0 %v7530_v0  ;;  %4053 = vmatprep.mubr.bf16.mxu1 %v7530_v0  ;;  %v7204_v47 = vcombine.high %v1215_v42, %v1279_v43  ;;  %v1154_v33 = vld [vmem:[%s8357_s26 + $0x6e0] sm:$0xff]  ;;  %v1091_v34 = vld [vmem:[%s8357_s26 + $0x4e8] sm:$0xff] }
 0x14f   : > { %3993 = vmatpush1.bf16.msra.mxu0 %v7061_v50  ;;  %4034 = vmatpush1.bf16.msra.mxu1 %v7063_v51  ;;  %v1087_v50 = vld [vmem:[%s8357_s26 + $0x4c8] sm:$0xff] }
 0x150   : > { %3994 = vmatprep.subr.bf16.mxu0 %v6934_v52  ;;  %4035 = vmatprep.subr.bf16.mxu1 %v6936_v53  ;;  %v1151_v51 = vld [vmem:[%s8357_s26 + $0x6c8] sm:$0xff]  ;;  %v7201_v52 = vcombine.low %v1214_v40, %v1278_v41  ;;  %v7203_v53 = vcombine.low %v1215_v42, %v1279_v43  ;;  %v962_v41 = vld [vmem:[%s8357_s26 + $0xe0] sm:$0xff] }
 0x151   : > { %v7076_v55 = vcombine.high %v1087_v50, %v1151_v51  ;;  %v1026_v42 = vld [vmem:[%s8357_s26 + $0x2e0] sm:$0xff] }
 0x152   : > { %v8623_v43 = vld [vmem:[%s9064_s1] sm:$0xf] }
 0x153   : > { %3995 = vmatpush1.bf16.msra.mxu0 %v6933_v58  ;;  %4036 = vmatpush1.bf16.msra.mxu1 %v6935_v59  ;;  %v959_v58 = vld [vmem:[%s8357_s26 + $0xc8] sm:$0xff] }
 0x154   : > { %4072 = vmatprep.subr.bf16.mxu0 %v7194_v60  ;;  %4113 = vmatprep.subr.bf16.mxu1 %v7196_v61  ;;  %v1023_v59 = vld [vmem:[%s8357_s26 + $0x2c8] sm:$0xff]  ;;  %v7073_v60 = vcombine.low %v1086_v48, %v1150_v49  ;;  %v7075_v61 = vcombine.low %v1087_v50, %v1151_v51  ;;  %v6954_v48 = vcombine.high %v962_v41, %v1026_v42  ;;  %v1220_v50 = vld [vmem:[%s8357_s26 + $0x8f0] sm:$0xff] }
 0x155   : > { %v6948_v63 = vcombine.high %v959_v58, %v1023_v59  ;;  %v1284_v51 = vld [vmem:[%s8357_s26 + $0xaf0] sm:$0xff] }
 0x156   : > { %7299 = vmatmul.mubr.msk.bf16.vlgmr.msra.gmra.mxu0 %vm3238_vm0, %v8382_v35  ;;  %7300 = vmatmul.mubr.msk.bf16.vlgmr.msra.gmra.mxu1 %vm3238_vm0, %v8382_v35 }
 0x157   : > { %4073 = vmatpush1.bf16.msra.mxu0 %v7193_v3  ;;  %4114 = vmatpush1.bf16.msra.mxu1 %v7195_v4  ;;  %v1217_v3 = vld [vmem:[%s8357_s26 + $0x8d8] sm:$0xff] }
 0x158   : > { %4074 = vmatprep.subr.bf16.mxu0 %v7066_v5  ;;  %4115 = vmatprep.subr.bf16.mxu1 %v7068_v6  ;;  %v1281_v4 = vld [vmem:[%s8357_s26 + $0xad8] sm:$0xff]  ;;  %v6945_v5 = vcombine.low %v958_v56, %v1022_v57  ;;  %v6947_v6 = vcombine.low %v959_v58, %v1023_v59  ;;  %v7214_v56 = vcombine.high %v1220_v50, %v1284_v51  ;;  %v1092_v58 = vld [vmem:[%s8357_s26 + $0x4f0] sm:$0xff] }
 0x159   : > { %4094 = vmatprep.mubr.bf16.mxu0 %v7530_v0  ;;  %4135 = vmatprep.mubr.bf16.mxu1 %v7530_v0  ;;  %v7208_v8 = vcombine.high %v1217_v3, %v1281_v4  ;;  %v1156_v59 = vld [vmem:[%s8357_s26 + $0x6f0] sm:$0xff] }
 0x15b   : > { %4075 = vmatpush1.bf16.msra.mxu0 %v7065_v11  ;;  %4116 = vmatpush1.bf16.msra.mxu1 %v7067_v12  ;;  %v1089_v11 = vld [vmem:[%s8357_s26 + $0x4d8] sm:$0xff] }
 0x15c   : > { %4076 = vmatprep.subr.bf16.mxu0 %v6938_v13  ;;  %4117 = vmatprep.subr.bf16.mxu1 %v6940_v14  ;;  %v1153_v12 = vld [vmem:[%s8357_s26 + $0x6d8] sm:$0xff]  ;;  %v7205_v13 = vcombine.low %v1216_v1, %v1280_v2  ;;  %v7207_v14 = vcombine.low %v1217_v3, %v1281_v4  ;;  %v7086_v1 = vcombine.high %v1092_v58, %v1156_v59  ;;  %v964_v3 = vld [vmem:[%s8357_s26 + $0xf0] sm:$0xff] }
 0x15d   : > { %v7080_v16 = vcombine.high %v1089_v11, %v1153_v12  ;;  %v1028_v4 = vld [vmem:[%s8357_s26 + $0x2f0] sm:$0xff] }
 0x15f   : > { %4077 = vmatpush1.bf16.msra.mxu0 %v6937_v19  ;;  %4118 = vmatpush1.bf16.msra.mxu1 %v6939_v20  ;;  %v961_v19 = vld [vmem:[%s8357_s26 + $0xd8] sm:$0xff] }
 0x160   : > { %4154 = vmatprep.subr.bf16.mxu0 %v7198_v21  ;;  %4195 = vmatprep.subr.bf16.mxu1 %v7200_v22  ;;  %v1025_v20 = vld [vmem:[%s8357_s26 + $0x2d8] sm:$0xff]  ;;  %v7077_v21 = vcombine.low %v1088_v9, %v1152_v10  ;;  %v7079_v22 = vcombine.low %v1089_v11, %v1153_v12  ;;  %v6958_v9 = vcombine.high %v964_v3, %v1028_v4  ;;  %v1222_v11 = vld [vmem:[%s8357_s26 + $0x900] sm:$0xff] }
 0x161   : > { %v6952_v24 = vcombine.high %v961_v19, %v1025_v20  ;;  %v1286_v12 = vld [vmem:[%s8357_s26 + $0xb00] sm:$0xff] }
 0x162   : > { %7301 = vmatmul.mubr.msk.bf16.vlgmr.msra.gmra.mxu0 %vm3238_vm0, %v8382_v35  ;;  %7302 = vmatmul.mubr.msk.bf16.vlgmr.msra.gmra.mxu1 %vm3238_vm0, %v8382_v35 }
 0x163   : > { %4155 = vmatpush1.bf16.msra.mxu0 %v7197_v27  ;;  %4196 = vmatpush1.bf16.msra.mxu1 %v7199_v28  ;;  %v1219_v27 = vld [vmem:[%s8357_s26 + $0x8e8] sm:$0xff]  ;;  %v6949_v28 = vcombine.low %v960_v17, %v1024_v18  ;;  %v7218_v17 = vcombine.high %v1222_v11, %v1286_v12 }
 0x164   : > { %4156 = vmatprep.subr.bf16.mxu0 %v7070_v29  ;;  %4197 = vmatprep.subr.bf16.mxu1 %v7072_v30  ;;  %v6951_v29 = vcombine.low %v961_v19, %v1025_v20  ;;  %v7210_v30 = vcombine.high %v1218_v25, %v1282_v26  ;;  %v1094_v19 = vld [vmem:[%s8357_s26 + $0x500] sm:$0xff] }
 0x165   : > { %4176 = vmatprep.mubr.bf16.mxu0 %v7530_v0  ;;  %4217 = vmatprep.mubr.bf16.mxu1 %v7530_v0  ;;  %v1158_v20 = vld [vmem:[%s8357_s26 + $0x700] sm:$0xff] }
 0x167   : > { %4157 = vmatpush1.bf16.msra.mxu0 %v7069_v36  ;;  %4198 = vmatpush1.bf16.msra.mxu1 %v7071_v37  ;;  %v1155_v36 = vld [vmem:[%s8357_s26 + $0x6e8] sm:$0xff]  ;;  %v7209_v37 = vcombine.low %v1218_v25, %v1282_v26  ;;  %v7090_v25 = vcombine.high %v1094_v19, %v1158_v20 }
 0x168   : > { %4158 = vmatprep.subr.bf16.mxu0 %v6942_v38  ;;  %4199 = vmatprep.subr.bf16.mxu1 %v6944_v39  ;;  %v7082_v39 = vcombine.high %v1090_v32, %v1154_v33  ;;  %v7084_v40 = vcombine.high %v1091_v34, %v1155_v36 }
 0x16b   : > { %4159 = vmatpush1.bf16.msra.mxu0 %v6941_v44  ;;  %4200 = vmatpush1.bf16.msra.mxu1 %v6943_v45  ;;  %v963_v44 = vld [vmem:[%s8357_s26 + $0xe8] sm:$0xff] }
 0x16c   : > { %4236 = vmatprep.subr.bf16.mxu0 %v7202_v46  ;;  %4277 = vmatprep.subr.bf16.mxu1 %v7204_v47  ;;  %v1027_v45 = vld [vmem:[%s8357_s26 + $0x2e8] sm:$0xff]  ;;  %v7081_v46 = vcombine.low %v1090_v32, %v1154_v33  ;;  %v7083_v47 = vcombine.low %v1091_v34, %v1155_v36  ;;  %v1224_v34 = vld [vmem:[%s8357_s26 + $0x910] sm:$0xff] }
 0x16d   : > { %v6956_v49 = vcombine.high %v963_v44, %v1027_v45  ;;  %v1288_v36 = vld [vmem:[%s8357_s26 + $0xb10] sm:$0xff] }
 0x16e   : > { %7303 = vmatmul.mubr.msk.bf16.vlgmr.msra.gmra.mxu0 %vm3238_vm0, %v8382_v35  ;;  %7304 = vmatmul.mubr.msk.bf16.vlgmr.msra.gmra.mxu1 %vm3238_vm0, %v8382_v35 }
 0x16f   : > { %4237 = vmatpush1.bf16.msra.mxu0 %v7201_v52  ;;  %4278 = vmatpush1.bf16.msra.mxu1 %v7203_v53  ;;  %v1221_v52 = vld [vmem:[%s8357_s26 + $0x8f8] sm:$0xff] }
 0x170   : > { %4238 = vmatprep.subr.bf16.mxu0 %v7074_v54  ;;  %4279 = vmatprep.subr.bf16.mxu1 %v7076_v55  ;;  %v1285_v53 = vld [vmem:[%s8357_s26 + $0xaf8] sm:$0xff]  ;;  %v6953_v54 = vcombine.low %v962_v41, %v1026_v42  ;;  %v6955_v55 = vcombine.low %v963_v44, %v1027_v45  ;;  %v7222_v41 = vcombine.high %v1224_v34, %v1288_v36  ;;  %v1096_v44 = vld [vmem:[%s8357_s26 + $0x510] sm:$0xff] }
 0x171   : > { %4258 = vmatprep.mubr.bf16.mxu0 %v7530_v0  ;;  %4299 = vmatprep.mubr.bf16.mxu1 %v7530_v0  ;;  %v7216_v57 = vcombine.high %v1221_v52, %v1285_v53  ;;  %v1160_v45 = vld [vmem:[%s8357_s26 + $0x710] sm:$0xff] }
 0x173   : > { %4239 = vmatpush1.bf16.msra.mxu0 %v7073_v60  ;;  %4280 = vmatpush1.bf16.msra.mxu1 %v7075_v61  ;;  %v1093_v60 = vld [vmem:[%s8357_s26 + $0x4f8] sm:$0xff] }
 0x174   : > { %4240 = vmatprep.subr.bf16.mxu0 %v6946_v62  ;;  %4281 = vmatprep.subr.bf16.mxu1 %v6948_v63  ;;  %v1157_v61 = vld [vmem:[%s8357_s26 + $0x6f8] sm:$0xff]  ;;  %v7213_v62 = vcombine.low %v1220_v50, %v1284_v51  ;;  %v7215_v63 = vcombine.low %v1221_v52, %v1285_v53  ;;  %v7094_v50 = vcombine.high %v1096_v44, %v1160_v45  ;;  %v968_v52 = vld [vmem:[%s8357_s26 + $0x110] sm:$0xff] }
 0x175   : > { %v7088_v2 = vcombine.high %v1093_v60, %v1157_v61  ;;  %v1032_v53 = vld [vmem:[%s8357_s26 + $0x310] sm:$0xff] }
 0x177   : > { %4241 = vmatpush1.bf16.msra.mxu0 %v6945_v5  ;;  %4282 = vmatpush1.bf16.msra.mxu1 %v6947_v6  ;;  %v965_v5 = vld [vmem:[%s8357_s26 + $0xf8] sm:$0xff] }
 0x178   : > { %4318 = vmatprep.subr.bf16.mxu0 %v7206_v7  ;;  %4359 = vmatprep.subr.bf16.mxu1 %v7208_v8  ;;  %v1029_v6 = vld [vmem:[%s8357_s26 + $0x2f8] sm:$0xff]  ;;  %v7085_v7 = vcombine.low %v1092_v58, %v1156_v59  ;;  %v7087_v8 = vcombine.low %v1093_v60, %v1157_v61  ;;  %v7093_v59 = vcombine.low %v1096_v44, %v1160_v45  ;;  %v1228_v44 = vld [vmem:[%s8357_s26 + $0x930] sm:$0xff] }
 0x179   : > { %v6960_v10 = vcombine.high %v965_v5, %v1029_v6  ;;  %v1292_v45 = vld [vmem:[%s8357_s26 + $0xb30] sm:$0xff] }
 0x17a   : > { %7305 = vmatmul.mubr.msk.bf16.vlgmr.msra.gmra.mxu0 %vm3238_vm0, %v8382_v35  ;;  %7306 = vmatmul.mubr.msk.bf16.vlgmr.msra.gmra.mxu1 %vm3238_vm0, %v8382_v35  ;;  %v1283_v35 = vld [vmem:[%s8357_s26 + $0xae8] sm:$0xff] }
 0x17b   : > { %4319 = vmatpush1.bf16.msra.mxu0 %v7205_v13  ;;  %4360 = vmatpush1.bf16.msra.mxu1 %v7207_v14  ;;  %v7212_v31 = vcombine.high %v1219_v27, %v1283_v35  ;;  %v7211_v38 = vcombine.low %v1219_v27, %v1283_v35  ;;  %v1223_v13 = vld [vmem:[%s8357_s26 + $0x908] sm:$0xff]  ;;  %v966_v27 = vld [vmem:[%s8357_s26 + $0x100] sm:$0xff] }
 0x17c   : > { %4320 = vmatprep.subr.bf16.mxu0 %v7078_v15  ;;  %4361 = vmatprep.subr.bf16.mxu1 %v7080_v16  ;;  %v1287_v14 = vld [vmem:[%s8357_s26 + $0xb08] sm:$0xff]  ;;  %v6957_v15 = vcombine.low %v964_v3, %v1028_v4  ;;  %v6959_v16 = vcombine.low %v965_v5, %v1029_v6  ;;  %v1030_v35 = vld [vmem:[%s8357_s26 + $0x300] sm:$0xff] }
 0x17d   : > { %4340 = vmatprep.mubr.bf16.mxu0 %v7530_v0  ;;  %4381 = vmatprep.mubr.bf16.mxu1 %v7530_v0  ;;  %v7220_v18 = vcombine.high %v1223_v13, %v1287_v14  ;;  %v6962_v32 = vcombine.high %v966_v27, %v1030_v35 }
 0x17f   : > { %4321 = vmatpush1.bf16.msra.mxu0 %v7077_v21  ;;  %4362 = vmatpush1.bf16.msra.mxu1 %v7079_v22  ;;  %v1095_v21 = vld [vmem:[%s8357_s26 + $0x508] sm:$0xff] }
 0x180   : > { %4322 = vmatprep.subr.bf16.mxu0 %v6950_v23  ;;  %4363 = vmatprep.subr.bf16.mxu1 %v6952_v24  ;;  %v1159_v22 = vld [vmem:[%s8357_s26 + $0x708] sm:$0xff]  ;;  %v7217_v23 = vcombine.low %v1222_v11, %v1286_v12  ;;  %v7219_v24 = vcombine.low %v1223_v13, %v1287_v14 }
 0x181   : > { %v7092_v26 = vcombine.high %v1095_v21, %v1159_v22 }
 0x183   : > { %4323 = vmatpush1.bf16.msra.mxu0 %v6949_v28  ;;  %4364 = vmatpush1.bf16.msra.mxu1 %v6951_v29  ;;  %v967_v28 = vld [vmem:[%s8357_s26 + $0x108] sm:$0xff] }
 0x184   : > { %4400 = vmatprep.subr.bf16.mxu0 %v7210_v30  ;;  %4441 = vmatprep.subr.bf16.mxu1 %v7212_v31  ;;  %v1031_v29 = vld [vmem:[%s8357_s26 + $0x308] sm:$0xff]  ;;  %v7089_v30 = vcombine.low %v1094_v19, %v1158_v20  ;;  %v7091_v31 = vcombine.low %v1095_v21, %v1159_v22 }
 0x185   : > { %v6964_v33 = vcombine.high %v967_v28, %v1031_v29 }
 0x186   : > { %7307 = vmatmul.mubr.msk.bf16.vlgmr.msra.gmra.mxu0 %vm3238_vm0, %v8623_v43  ;;  %7308 = vmatmul.mubr.msk.bf16.vlgmr.msra.gmra.mxu1 %vm3238_vm0, %v8623_v43 }
 0x187   : > { %4401 = vmatpush1.bf16.msra.mxu0 %v7209_v37  ;;  %4442 = vmatpush1.bf16.msra.mxu1 %v7211_v38  ;;  %v1225_v37 = vld [vmem:[%s8357_s26 + $0x918] sm:$0xff] }
 0x188   : > { %4402 = vmatprep.subr.bf16.mxu0 %v7082_v39  ;;  %4443 = vmatprep.subr.bf16.mxu1 %v7084_v40  ;;  %v1289_v38 = vld [vmem:[%s8357_s26 + $0xb18] sm:$0xff]  ;;  %v6961_v39 = vcombine.low %v966_v27, %v1030_v35  ;;  %v6963_v40 = vcombine.low %v967_v28, %v1031_v29 }
 0x189   : > { %4422 = vmatprep.mubr.bf16.mxu0 %v7530_v0  ;;  %4463 = vmatprep.mubr.bf16.mxu1 %v7530_v0  ;;  %v7224_v42 = vcombine.high %v1225_v37, %v1289_v38 }
 0x18b   : > { %4403 = vmatpush1.bf16.msra.mxu0 %v7081_v46  ;;  %4444 = vmatpush1.bf16.msra.mxu1 %v7083_v47  ;;  %v1097_v46 = vld [vmem:[%s8357_s26 + $0x518] sm:$0xff] }
 0x18c   : > { %4404 = vmatprep.subr.bf16.mxu0 %v6954_v48  ;;  %4445 = vmatprep.subr.bf16.mxu1 %v6956_v49  ;;  %v1161_v47 = vld [vmem:[%s8357_s26 + $0x718] sm:$0xff]  ;;  %v7221_v48 = vcombine.low %v1224_v34, %v1288_v36  ;;  %v7223_v49 = vcombine.low %v1225_v37, %v1289_v38  ;;  %v1035_v34 = vld [vmem:[%s8357_s26 + $0x328] sm:$0xff] }
 0x18d   : > { %v7096_v51 = vcombine.high %v1097_v46, %v1161_v47 }
 0x18f   : > { %4405 = vmatpush1.bf16.msra.mxu0 %v6953_v54  ;;  %4446 = vmatpush1.bf16.msra.mxu1 %v6955_v55  ;;  %v969_v55 = vld [vmem:[%s8357_s26 + $0x118] sm:$0xff] }
 0x190   : > { %4482 = vmatprep.subr.bf16.mxu0 %v7214_v56  ;;  %4523 = vmatprep.subr.bf16.mxu1 %v7216_v57  ;;  %v1033_v56 = vld [vmem:[%s8357_s26 + $0x318] sm:$0xff] }
 0x191   : > { %v6968_v5 = vcombine.high %v969_v55, %v1033_v56  ;;  %v6967_v14 = vcombine.low %v969_v55, %v1033_v56 }
 0x192   : > { %7309 = vmatmul.mubr.msk.bf16.vlgmr.msra.gmra.mxu0 %vm3238_vm0, %v8623_v43  ;;  %7310 = vmatmul.mubr.msk.bf16.vlgmr.msra.gmra.mxu1 %vm3238_vm0, %v8623_v43 }
 0x193   : > { %4483 = vmatpush1.bf16.msra.mxu0 %v7213_v62  ;;  %4524 = vmatpush1.bf16.msra.mxu1 %v7215_v63  ;;  %v7095_v62 = vcombine.low %v1097_v46, %v1161_v47  ;;  %v6966_v63 = vcombine.high %v968_v52, %v1032_v53 }
 0x194   : > { %4484 = vmatprep.subr.bf16.mxu0 %v7086_v1  ;;  %4525 = vmatprep.subr.bf16.mxu1 %v7088_v2  ;;  %v1226_v1 = vld [vmem:[%s8357_s26 + $0x920] sm:$0xff] }
 0x195   : > { %4504 = vmatprep.mubr.bf16.mxu0 %v7530_v0  ;;  %4545 = vmatprep.mubr.bf16.mxu1 %v7530_v0  ;;  %v1290_v2 = vld [vmem:[%s8357_s26 + $0xb20] sm:$0xff] }
 0x196   : > { %v7225_v27 = vcombine.low %v1226_v1, %v1290_v2 }
 0x197   : > { %4485 = vmatpush1.bf16.msra.mxu0 %v7085_v7  ;;  %4526 = vmatpush1.bf16.msra.mxu1 %v7087_v8  ;;  %v6965_v8 = vcombine.low %v968_v52, %v1032_v53  ;;  %v1229_v52 = vld [vmem:[%s8357_s26 + $0x938] sm:$0xff] }
 0x198   : > { %4486 = vmatprep.subr.bf16.mxu0 %v6958_v9  ;;  %4527 = vmatprep.subr.bf16.mxu1 %v6960_v10  ;;  %v1227_v9 = vld [vmem:[%s8357_s26 + $0x928] sm:$0xff]  ;;  %v1293_v53 = vld [vmem:[%s8357_s26 + $0xb38] sm:$0xff] }
 0x199   : > { %v1291_v10 = vld [vmem:[%s8357_s26 + $0xb28] sm:$0xff] }
 0x19a   : > { %v7228_v22 = vcombine.high %v1227_v9, %v1291_v10  ;;  %v7227_v35 = vcombine.low %v1227_v9, %v1291_v10 }
 0x19b   : > { %4487 = vmatpush1.bf16.msra.mxu0 %v6957_v15  ;;  %4528 = vmatpush1.bf16.msra.mxu1 %v6959_v16  ;;  %v7226_v15 = vcombine.high %v1226_v1, %v1290_v2  ;;  %v7232_v2 = vcombine.high %v1229_v52, %v1293_v53 }
 0x19c   : > { %4564 = vmatprep.subr.bf16.mxu0 %v7218_v17  ;;  %4605 = vmatprep.subr.bf16.mxu1 %v7220_v18 }
 0x19e   : > { %7311 = vmatmul.mubr.msk.bf16.vlgmr.msra.gmra.mxu0 %vm3238_vm0, %v8623_v43  ;;  %7312 = vmatmul.mubr.msk.bf16.vlgmr.msra.gmra.mxu1 %vm3238_vm0, %v8623_v43 }
 0x19f   : > { %4565 = vmatpush1.bf16.msra.mxu0 %v7217_v23  ;;  %4606 = vmatpush1.bf16.msra.mxu1 %v7219_v24  ;;  %v1098_v23 = vld [vmem:[%s8357_s26 + $0x520] sm:$0xff] }
 0x1a0   : > { %4566 = vmatprep.subr.bf16.mxu0 %v7090_v25  ;;  %4607 = vmatprep.subr.bf16.mxu1 %v7092_v26  ;;  %v1162_v24 = vld [vmem:[%s8357_s26 + $0x720] sm:$0xff]  ;;  %v1099_v25 = vld [vmem:[%s8357_s26 + $0x528] sm:$0xff] }
 0x1a1   : > { %4586 = vmatprep.mubr.bf16.mxu0 %v7530_v0  ;;  %4627 = vmatprep.mubr.bf16.mxu1 %v7530_v0  ;;  %v1163_v26 = vld [vmem:[%s8357_s26 + $0x728] sm:$0xff]  ;;  %v7098_v28 = vcombine.high %v1098_v23, %v1162_v24  ;;  %v7097_v38 = vcombine.low %v1098_v23, %v1162_v24  ;;  %v1230_v23 = vld [vmem:[%s8357_s26 + $0x940] sm:$0xff] }
 0x1a2   : > { %v7100_v29 = vcombine.high %v1099_v25, %v1163_v26  ;;  %v1294_v24 = vld [vmem:[%s8357_s26 + $0xb40] sm:$0xff] }
 0x1a3   : > { %4567 = vmatpush1.bf16.msra.mxu0 %v7089_v30  ;;  %4608 = vmatpush1.bf16.msra.mxu1 %v7091_v31  ;;  %v970_v30 = vld [vmem:[%s8357_s26 + $0x120] sm:$0xff] }
 0x1a4   : > { %4568 = vmatprep.subr.bf16.mxu0 %v6962_v32  ;;  %4609 = vmatprep.subr.bf16.mxu1 %v6964_v33  ;;  %v1034_v31 = vld [vmem:[%s8357_s26 + $0x320] sm:$0xff]  ;;  %v971_v33 = vld [vmem:[%s8357_s26 + $0x128] sm:$0xff] }
 0x1a7   : > { %4569 = vmatpush1.bf16.msra.mxu0 %v6961_v39  ;;  %4610 = vmatpush1.bf16.msra.mxu1 %v6963_v40 }
 0x1a8   : > { %4646 = vmatprep.subr.bf16.mxu0 %v7222_v41  ;;  %4687 = vmatprep.subr.bf16.mxu1 %v7224_v42  ;;  %v7099_v41 = vcombine.low %v1099_v25, %v1163_v26  ;;  %v6970_v42 = vcombine.high %v970_v30, %v1034_v31 }
 0x1aa   : > { %v3276_v54 = vpop.f32.mrf.mxu0  ;;  %7313 = vmatmul.mubr.msk.bf16.vlgmr.msra.gmra.mxu0 %vm3238_vm0, %v8623_v43  ;;  %v3317_v58 = vpop.f32.mrf.mxu1  ;;  %7314 = vmatmul.mubr.msk.bf16.vlgmr.msra.gmra.mxu1 %vm3238_vm0, %v8623_v43 }
 0x1ab   : > { %v5994_v57 = vmul.f32 0.2, %v3276_v54  ;;  %4647 = vmatpush1.bf16.msra.mxu0 %v7221_v48  ;;  %vm5866_vm1 = vcmp.ge.f32.partialorder %v3276_v54, 0.0  ;;  %v5996_v60 = vmul.f32 0.2, %v3317_v58  ;;  %4688 = vmatpush1.bf16.msra.mxu1 %v7223_v49  ;;  %vm5868_vm2 = vcmp.ge.f32.partialorder %v3317_v58, 0.0 }
 0x1ac   : > { %v3278_v61 = vpop.f32.mrf.mxu0  ;;  %4648 = vmatprep.subr.bf16.mxu0 %v7094_v50  ;;  %v3319_v4 = vpop.f32.mrf.mxu1  ;;  %4689 = vmatprep.subr.bf16.mxu1 %v7096_v51  ;;  %v6972_v48 = vcombine.high %v971_v33, %v1035_v34  ;;  %v6969_v51 = vcombine.low %v970_v30, %v1034_v31  ;;  %v1231_v30 = vld [vmem:[%s8357_s26 + $0x948] sm:$0xff] }
 0x1ad   : > { %vm5867_vm3 = vcmp.ge.f32.partialorder %v3278_v61, 0.0  ;;  %v5995_v3 = vmul.f32 0.2, %v3278_v61  ;;  %4668 = vmatprep.mubr.bf16.mxu0 %v7530_v0  ;;  %vm5869_vm4 = vcmp.ge.f32.partialorder %v3319_v4, 0.0  ;;  %v5997_v6 = vmul.f32 0.2, %v3319_v4  ;;  %4709 = vmatprep.mubr.bf16.mxu1 %v7530_v0 }
 0x1ae   : > { %v3280_v7 = vpop.f32.mrf.mxu0  ;;  %v6122_v11 = vsel %vm5866_vm1, %v3276_v54, %v5994_v57  ;;  %v3321_v13 = vpop.f32.mrf.mxu1  ;;  %v6124_v16 = vsel %vm5868_vm2, %v3317_v58, %v5996_v60  ;;  %v6971_v57 = vcombine.low %v971_v33, %v1035_v34  ;;  %v7230_v58 = vcombine.high %v1228_v44, %v1292_v45  ;;  %v1295_v31 = vld [vmem:[%s8357_s26 + $0xb48] sm:$0xff] }
 0x1af   : > { %v6123_v12 = vsel %vm5867_vm3, %v3278_v61, %v5995_v3  ;;  %4649 = vmatpush1.bf16.msra.mxu0 %v7093_v59  ;;  %v6125_v18 = vsel %vm5869_vm4, %v3319_v4, %v5997_v6  ;;  %4690 = vmatpush1.bf16.msra.mxu1 %v7095_v62  ;;  %v1100_v3 = vld [vmem:[%s8357_s26 + $0x530] sm:$0xff]  ;;  %v1165_v6 = vld [vmem:[%s8357_s26 + $0x738] sm:$0xff]  ;;  %v7229_v7 = vcombine.low %v1228_v44, %v1292_v45 }
 0x1b0   : > { %v7412_v17 = vpack.c.bf16 %v6123_v12, %v6122_v11  ;;  %v3281_v19 = vpop.f32.mrf.mxu0  ;;  %4650 = vmatprep.subr.bf16.mxu0 %v6966_v63  ;;  %v7413_v20 = vpack.c.bf16 %v6125_v18, %v6124_v16  ;;  %v3322_v21 = vpop.f32.mrf.mxu1  ;;  %4691 = vmatprep.subr.bf16.mxu1 %v6968_v5  ;;  %v1164_v4 = vld [vmem:[%s8357_s26 + $0x730] sm:$0xff]  ;;  %v1101_v5 = vld [vmem:[%s8357_s26 + $0x538] sm:$0xff]  ;;  %v7236_v45 = vcombine.high %v1231_v30, %v1295_v31 }
 0x1b1   : > { %v7102_v9 = vcombine.high %v1100_v3, %v1164_v4  ;;  %v7104_v10 = vcombine.high %v1101_v5, %v1165_v6  ;;  %v972_v11 = vld [vmem:[%s8357_s26 + $0x130] sm:$0xff]  ;;  %v7101_v18 = vcombine.low %v1100_v3, %v1164_v4  ;;  %v7103_v21 = vcombine.low %v1101_v5, %v1165_v6 }
 0x1b2   : > { %6762 = vst [vmem:[%s8700_s7] sm:$0xff] %v7412_v17  ;;  %6763 = vst [vmem:[%s8700_s7 + $0x8] sm:$0xff] %v7413_v20  ;;  %v1036_v12 = vld [vmem:[%s8357_s26 + $0x330] sm:$0xff] }
 0x1b3   : > { %4651 = vmatpush1.bf16.msra.mxu0 %v6965_v8  ;;  %4692 = vmatpush1.bf16.msra.mxu1 %v6967_v14  ;;  %v7231_v8 = vcombine.low %v1229_v52, %v1293_v53  ;;  %v973_v14 = vld [vmem:[%s8357_s26 + $0x138] sm:$0xff]  ;;  %v1232_v3 = vld [vmem:[%s8357_s26 + $0x950] sm:$0xff] }
 0x1b4   : > { %4728 = vmatprep.subr.bf16.mxu0 %v7226_v15  ;;  %4769 = vmatprep.subr.bf16.mxu1 %v7228_v22  ;;  %v1037_v15 = vld [vmem:[%s8357_s26 + $0x338] sm:$0xff]  ;;  %v6974_v22 = vcombine.high %v972_v11, %v1036_v12  ;;  %v1296_v4 = vld [vmem:[%s8357_s26 + $0xb50] sm:$0xff] }
 0x1b6   : > { %v3358_v32 = vpop.f32.mrf.mxu0  ;;  %7315 = vmatmul.mubr.msk.bf16.vlgmr.msra.gmra.mxu0 %vm3238_vm0, %v8623_v43  ;;  %v3399_v37 = vpop.f32.mrf.mxu1  ;;  %7316 = vmatmul.mubr.msk.bf16.vlgmr.msra.gmra.mxu1 %vm3238_vm0, %v8623_v43 }
 0x1b7   : > { %v5998_v36 = vmul.f32 0.2, %v3358_v32  ;;  %4729 = vmatpush1.bf16.msra.mxu0 %v7225_v27  ;;  %vm5870_vm5 = vcmp.ge.f32.partialorder %v3358_v32, 0.0  ;;  %v6000_v39 = vmul.f32 0.2, %v3399_v37  ;;  %4770 = vmatpush1.bf16.msra.mxu1 %v7227_v35  ;;  %vm5872_vm6 = vcmp.ge.f32.partialorder %v3399_v37, 0.0 }
 0x1b8   : > { %v3360_v40 = vpop.f32.mrf.mxu0  ;;  %4730 = vmatprep.subr.bf16.mxu0 %v7098_v28  ;;  %v3401_v47 = vpop.f32.mrf.mxu1  ;;  %4771 = vmatprep.subr.bf16.mxu1 %v7100_v29  ;;  %v6976_v27 = vcombine.high %v973_v14, %v1037_v15  ;;  %v6973_v29 = vcombine.low %v972_v11, %v1036_v12  ;;  %v1233_v11 = vld [vmem:[%s8357_s26 + $0x958] sm:$0xff] }
 0x1b9   : > { %vm5871_vm7 = vcmp.ge.f32.partialorder %v3360_v40, 0.0  ;;  %v5999_v46 = vmul.f32 0.2, %v3360_v40  ;;  %4750 = vmatprep.mubr.bf16.mxu0 %v7530_v0  ;;  %vm5873_vm8 = vcmp.ge.f32.partialorder %v3401_v47, 0.0  ;;  %v6001_v49 = vmul.f32 0.2, %v3401_v47  ;;  %4791 = vmatprep.mubr.bf16.mxu1 %v7530_v0 }
 0x1ba   : > { %v3362_v50 = vpop.f32.mrf.mxu0  ;;  %v6126_v54 = vsel %vm5870_vm5, %v3358_v32, %v5998_v36  ;;  %v3403_v56 = vpop.f32.mrf.mxu1  ;;  %v6128_v59 = vsel %vm5872_vm6, %v3399_v37, %v6000_v39  ;;  %v6975_v36 = vcombine.low %v973_v14, %v1037_v15  ;;  %v7234_v37 = vcombine.high %v1230_v23, %v1294_v24  ;;  %v1297_v12 = vld [vmem:[%s8357_s26 + $0xb58] sm:$0xff] }
 0x1bb   : > { %v6127_v55 = vsel %vm5871_vm7, %v3360_v40, %v5999_v46  ;;  %4731 = vmatpush1.bf16.msra.mxu0 %v7097_v38  ;;  %v6129_v61 = vsel %vm5873_vm8, %v3401_v47, %v6001_v49  ;;  %4772 = vmatpush1.bf16.msra.mxu1 %v7099_v41  ;;  %v1102_v46 = vld [vmem:[%s8357_s26 + $0x540] sm:$0xff]  ;;  %v1167_v49 = vld [vmem:[%s8357_s26 + $0x748] sm:$0xff]  ;;  %v7233_v50 = vcombine.low %v1230_v23, %v1294_v24 }
 0x1bc   : > { %v7414_v60 = vpack.c.bf16 %v6127_v55, %v6126_v54  ;;  %v3363_v62 = vpop.f32.mrf.mxu0  ;;  %4732 = vmatprep.subr.bf16.mxu0 %v6970_v42  ;;  %v7415_v63 = vpack.c.bf16 %v6129_v61, %v6128_v59  ;;  %v3404_v1 = vpop.f32.mrf.mxu1  ;;  %4773 = vmatprep.subr.bf16.mxu1 %v6972_v48  ;;  %v1166_v47 = vld [vmem:[%s8357_s26 + $0x740] sm:$0xff]  ;;  %v1103_v48 = vld [vmem:[%s8357_s26 + $0x548] sm:$0xff]  ;;  %v7240_v24 = vcombine.high %v1233_v11, %v1297_v12 }
 0x1bd   : > { %v7106_v52 = vcombine.high %v1102_v46, %v1166_v47  ;;  %v7108_v53 = vcombine.high %v1103_v48, %v1167_v49  ;;  %v974_v54 = vld [vmem:[%s8357_s26 + $0x140] sm:$0xff]  ;;  %v7105_v61 = vcombine.low %v1102_v46, %v1166_v47  ;;  %v7107_v1 = vcombine.low %v1103_v48, %v1167_v49 }
 0x1be   : > { %6764 = vst [vmem:[%s8700_s7 + $0x10] sm:$0xff] %v7414_v60  ;;  %6765 = vst [vmem:[%s8700_s7 + $0x18] sm:$0xff] %v7415_v63  ;;  %v1038_v55 = vld [vmem:[%s8357_s26 + $0x340] sm:$0xff] }
 0x1bf   : > { %4733 = vmatpush1.bf16.msra.mxu0 %v6969_v51  ;;  %4774 = vmatpush1.bf16.msra.mxu1 %v6971_v57  ;;  %v7235_v51 = vcombine.low %v1231_v30, %v1295_v31  ;;  %v975_v57 = vld [vmem:[%s8357_s26 + $0x148] sm:$0xff]  ;;  %v1234_v46 = vld [vmem:[%s8357_s26 + $0x960] sm:$0xff] }
 0x1c0   : > { %4810 = vmatprep.subr.bf16.mxu0 %v7230_v58  ;;  %4851 = vmatprep.subr.bf16.mxu1 %v7232_v2  ;;  %v1039_v58 = vld [vmem:[%s8357_s26 + $0x348] sm:$0xff]  ;;  %v6978_v2 = vcombine.high %v974_v54, %v1038_v55  ;;  %v1298_v47 = vld [vmem:[%s8357_s26 + $0xb60] sm:$0xff] }
 0x1c2   : > { %v3440_v13 = vpop.f32.mrf.mxu0  ;;  %7317 = vmatmul.mubr.msk.bf16.vlgmr.msra.gmra.mxu0 %vm3238_vm0, %v8623_v43  ;;  %v3481_v17 = vpop.f32.mrf.mxu1  ;;  %7318 = vmatmul.mubr.msk.bf16.vlgmr.msra.gmra.mxu1 %vm3238_vm0, %v8623_v43 }
 0x1c3   : > { %v6002_v16 = vmul.f32 0.2, %v3440_v13  ;;  %4811 = vmatpush1.bf16.msra.mxu0 %v7229_v7  ;;  %vm5874_vm9 = vcmp.ge.f32.partialorder %v3440_v13, 0.0  ;;  %v6004_v19 = vmul.f32 0.2, %v3481_v17  ;;  %4852 = vmatpush1.bf16.msra.mxu1 %v7231_v8  ;;  %vm5876_vm10 = vcmp.ge.f32.partialorder %v3481_v17, 0.0 }
 0x1c4   : > { %v3442_v20 = vpop.f32.mrf.mxu0  ;;  %4812 = vmatprep.subr.bf16.mxu0 %v7102_v9  ;;  %v3483_v26 = vpop.f32.mrf.mxu1  ;;  %4853 = vmatprep.subr.bf16.mxu1 %v7104_v10  ;;  %v6980_v7 = vcombine.high %v975_v57, %v1039_v58  ;;  %v6977_v10 = vcombine.low %v974_v54, %v1038_v55  ;;  %v1235_v54 = vld [vmem:[%s8357_s26 + $0x968] sm:$0xff] }
 0x1c5   : > { %vm5875_vm11 = vcmp.ge.f32.partialorder %v3442_v20, 0.0  ;;  %v6003_v25 = vmul.f32 0.2, %v3442_v20  ;;  %4832 = vmatprep.mubr.bf16.mxu0 %v7530_v0  ;;  %vm5877_vm12 = vcmp.ge.f32.partialorder %v3483_v26, 0.0  ;;  %v6005_v35 = vmul.f32 0.2, %v3483_v26  ;;  %4873 = vmatprep.mubr.bf16.mxu1 %v7530_v0 }
 0x1c6   : > { %v3444_v28 = vpop.f32.mrf.mxu0  ;;  %v6130_v32 = vsel %vm5874_vm9, %v3440_v13, %v6002_v16  ;;  %v3485_v34 = vpop.f32.mrf.mxu1  ;;  %v6132_v38 = vsel %vm5876_vm10, %v3481_v17, %v6004_v19  ;;  %v6979_v16 = vcombine.low %v975_v57, %v1039_v58  ;;  %v7238_v17 = vcombine.high %v1232_v3, %v1296_v4  ;;  %v1299_v55 = vld [vmem:[%s8357_s26 + $0xb68] sm:$0xff] }
 0x1c7   : > { %v6131_v33 = vsel %vm5875_vm11, %v3442_v20, %v6003_v25  ;;  %4813 = vmatpush1.bf16.msra.mxu0 %v7101_v18  ;;  %v6133_v40 = vsel %vm5877_vm12, %v3483_v26, %v6005_v35  ;;  %4854 = vmatpush1.bf16.msra.mxu1 %v7103_v21  ;;  %v1104_v25 = vld [vmem:[%s8357_s26 + $0x550] sm:$0xff]  ;;  %v1169_v35 = vld [vmem:[%s8357_s26 + $0x758] sm:$0xff]  ;;  %v7237_v28 = vcombine.low %v1232_v3, %v1296_v4 }
 0x1c8   : > { %v7416_v39 = vpack.c.bf16 %v6131_v33, %v6130_v32  ;;  %v3445_v41 = vpop.f32.mrf.mxu0  ;;  %4814 = vmatprep.subr.bf16.mxu0 %v6974_v22  ;;  %v7417_v42 = vpack.c.bf16 %v6133_v40, %v6132_v38  ;;  %v3486_v44 = vpop.f32.mrf.mxu1  ;;  %4855 = vmatprep.subr.bf16.mxu1 %v6976_v27  ;;  %v1168_v26 = vld [vmem:[%s8357_s26 + $0x750] sm:$0xff]  ;;  %v1105_v27 = vld [vmem:[%s8357_s26 + $0x558] sm:$0xff]  ;;  %v7244_v4 = vcombine.high %v1235_v54, %v1299_v55 }
 0x1c9   : > { %v7110_v30 = vcombine.high %v1104_v25, %v1168_v26  ;;  %v7112_v31 = vcombine.high %v1105_v27, %v1169_v35  ;;  %v976_v32 = vld [vmem:[%s8357_s26 + $0x150] sm:$0xff]  ;;  %v7109_v40 = vcombine.low %v1104_v25, %v1168_v26  ;;  %v7111_v44 = vcombine.low %v1105_v27, %v1169_v35 }
 0x1ca   : > { %6766 = vst [vmem:[%s8700_s7 + $0x20] sm:$0xff] %v7416_v39  ;;  %6767 = vst [vmem:[%s8700_s7 + $0x28] sm:$0xff] %v7417_v42  ;;  %v1040_v33 = vld [vmem:[%s8357_s26 + $0x350] sm:$0xff] }
 0x1cb   : > { %4815 = vmatpush1.bf16.msra.mxu0 %v6973_v29  ;;  %4856 = vmatpush1.bf16.msra.mxu1 %v6975_v36  ;;  %v7239_v29 = vcombine.low %v1233_v11, %v1297_v12  ;;  %v977_v36 = vld [vmem:[%s8357_s26 + $0x158] sm:$0xff]  ;;  %v1236_v25 = vld [vmem:[%s8357_s26 + $0x970] sm:$0xff] }
 0x1cc   : > { %4892 = vmatprep.subr.bf16.mxu0 %v7234_v37  ;;  %4933 = vmatprep.subr.bf16.mxu1 %v7236_v45  ;;  %v1041_v37 = vld [vmem:[%s8357_s26 + $0x358] sm:$0xff]  ;;  %v6982_v45 = vcombine.high %v976_v32, %v1040_v33  ;;  %v1300_v26 = vld [vmem:[%s8357_s26 + $0xb70] sm:$0xff] }
 0x1ce   : > { %v3522_v56 = vpop.f32.mrf.mxu0  ;;  %7319 = vmatmul.mubr.msk.bf16.vlgmr.msra.gmra.mxu0 %vm3238_vm0, %v8623_v43  ;;  %v3563_v60 = vpop.f32.mrf.mxu1  ;;  %7320 = vmatmul.mubr.msk.bf16.vlgmr.msra.gmra.mxu1 %vm3238_vm0, %v8623_v43 }
 0x1cf   : > { %v6006_v59 = vmul.f32 0.2, %v3522_v56  ;;  %4893 = vmatpush1.bf16.msra.mxu0 %v7233_v50  ;;  %vm5878_vm13 = vcmp.ge.f32.partialorder %v3522_v56, 0.0  ;;  %v6008_v62 = vmul.f32 0.2, %v3563_v60  ;;  %4934 = vmatpush1.bf16.msra.mxu1 %v7235_v51  ;;  %vm5880_vm14 = vcmp.ge.f32.partialorder %v3563_v60, 0.0 }
 0x1d0   : > { %v3524_v63 = vpop.f32.mrf.mxu0  ;;  %4894 = vmatprep.subr.bf16.mxu0 %v7106_v52  ;;  %v3565_v6 = vpop.f32.mrf.mxu1  ;;  %4935 = vmatprep.subr.bf16.mxu1 %v7108_v53  ;;  %v6984_v50 = vcombine.high %v977_v36, %v1041_v37  ;;  %v6981_v53 = vcombine.low %v976_v32, %v1040_v33  ;;  %v1237_v32 = vld [vmem:[%s8357_s26 + $0x978] sm:$0xff] }
 0x1d1   : > { %vm5879_vm15 = vcmp.ge.f32.partialorder %v3524_v63, 0.0  ;;  %v6007_v5 = vmul.f32 0.2, %v3524_v63  ;;  %4914 = vmatprep.mubr.bf16.mxu0 %v7530_v0  ;;  %vm5881_vm1 = vcmp.ge.f32.partialorder %v3565_v6, 0.0  ;;  %v6009_v8 = vmul.f32 0.2, %v3565_v6  ;;  %4955 = vmatprep.mubr.bf16.mxu1 %v7530_v0 }
 0x1d2   : > { %v3526_v9 = vpop.f32.mrf.mxu0  ;;  %v6134_v13 = vsel %vm5878_vm13, %v3522_v56, %v6006_v59  ;;  %v3567_v15 = vpop.f32.mrf.mxu1  ;;  %v6136_v18 = vsel %vm5880_vm14, %v3563_v60, %v6008_v62  ;;  %v6983_v59 = vcombine.low %v977_v36, %v1041_v37  ;;  %v7242_v60 = vcombine.high %v1234_v46, %v1298_v47  ;;  %v1301_v33 = vld [vmem:[%s8357_s26 + $0xb78] sm:$0xff] }
 0x1d3   : > { %v6135_v14 = vsel %vm5879_vm15, %v3524_v63, %v6007_v5  ;;  %4895 = vmatpush1.bf16.msra.mxu0 %v7105_v61  ;;  %v6137_v20 = vsel %vm5881_vm1, %v3565_v6, %v6009_v8  ;;  %4936 = vmatpush1.bf16.msra.mxu1 %v7107_v1  ;;  %v1106_v5 = vld [vmem:[%s8357_s26 + $0x560] sm:$0xff]  ;;  %v1171_v8 = vld [vmem:[%s8357_s26 + $0x768] sm:$0xff]  ;;  %v7241_v9 = vcombine.low %v1234_v46, %v1298_v47 }
 0x1d4   : > { %v7418_v19 = vpack.c.bf16 %v6135_v14, %v6134_v13  ;;  %v3527_v21 = vpop.f32.mrf.mxu0  ;;  %4896 = vmatprep.subr.bf16.mxu0 %v6978_v2  ;;  %v7419_v22 = vpack.c.bf16 %v6137_v20, %v6136_v18  ;;  %v3568_v23 = vpop.f32.mrf.mxu1  ;;  %4937 = vmatprep.subr.bf16.mxu1 %v6980_v7  ;;  %v1170_v6 = vld [vmem:[%s8357_s26 + $0x760] sm:$0xff]  ;;  %v1107_v7 = vld [vmem:[%s8357_s26 + $0x568] sm:$0xff]  ;;  %v7248_v47 = vcombine.high %v1237_v32, %v1301_v33 }
 0x1d5   : > { %v7114_v11 = vcombine.high %v1106_v5, %v1170_v6  ;;  %v7116_v12 = vcombine.high %v1107_v7, %v1171_v8  ;;  %v978_v13 = vld [vmem:[%s8357_s26 + $0x160] sm:$0xff]  ;;  %v7113_v20 = vcombine.low %v1106_v5, %v1170_v6  ;;  %v7115_v23 = vcombine.low %v1107_v7, %v1171_v8 }
 0x1d6   : > { %6768 = vst [vmem:[%s8700_s7 + $0x30] sm:$0xff] %v7418_v19  ;;  %6769 = vst [vmem:[%s8700_s7 + $0x38] sm:$0xff] %v7419_v22  ;;  %v1042_v14 = vld [vmem:[%s8357_s26 + $0x360] sm:$0xff] }
 0x1d7   : > { %4897 = vmatpush1.bf16.msra.mxu0 %v6977_v10  ;;  %4938 = vmatpush1.bf16.msra.mxu1 %v6979_v16  ;;  %v7243_v10 = vcombine.low %v1235_v54, %v1299_v55  ;;  %v979_v16 = vld [vmem:[%s8357_s26 + $0x168] sm:$0xff]  ;;  %v1238_v5 = vld [vmem:[%s8357_s26 + $0x980] sm:$0xff] }
 0x1d8   : > { %4974 = vmatprep.subr.bf16.mxu0 %v7238_v17  ;;  %5015 = vmatprep.subr.bf16.mxu1 %v7240_v24  ;;  %v1043_v17 = vld [vmem:[%s8357_s26 + $0x368] sm:$0xff]  ;;  %v6986_v24 = vcombine.high %v978_v13, %v1042_v14  ;;  %v1302_v6 = vld [vmem:[%s8357_s26 + $0xb80] sm:$0xff] }
 0x1da   : > { %v3604_v34 = vpop.f32.mrf.mxu0  ;;  %7321 = vmatmul.mubr.msk.bf16.vlgmr.msra.gmra.mxu0 %vm3238_vm0, %v8623_v43  ;;  %v3645_v39 = vpop.f32.mrf.mxu1  ;;  %7322 = vmatmul.mubr.msk.bf16.vlgmr.msra.gmra.mxu1 %vm3238_vm0, %v8623_v43 }
 0x1db   : > { %v6010_v38 = vmul.f32 0.2, %v3604_v34  ;;  %4975 = vmatpush1.bf16.msra.mxu0 %v7237_v28  ;;  %vm5882_vm2 = vcmp.ge.f32.partialorder %v3604_v34, 0.0  ;;  %v6012_v41 = vmul.f32 0.2, %v3645_v39  ;;  %5016 = vmatpush1.bf16.msra.mxu1 %v7239_v29  ;;  %vm5884_vm3 = vcmp.ge.f32.partialorder %v3645_v39, 0.0 }
 0x1dc   : > { %v3606_v42 = vpop.f32.mrf.mxu0  ;;  %4976 = vmatprep.subr.bf16.mxu0 %v7110_v30  ;;  %v3647_v49 = vpop.f32.mrf.mxu1  ;;  %5017 = vmatprep.subr.bf16.mxu1 %v7112_v31  ;;  %v6988_v28 = vcombine.high %v979_v16, %v1043_v17  ;;  %v6985_v31 = vcombine.low %v978_v13, %v1042_v14  ;;  %v1239_v13 = vld [vmem:[%s8357_s26 + $0x988] sm:$0xff] }
 0x1dd   : > { %vm5883_vm4 = vcmp.ge.f32.partialorder %v3606_v42, 0.0  ;;  %v6011_v48 = vmul.f32 0.2, %v3606_v42  ;;  %4996 = vmatprep.mubr.bf16.mxu0 %v7530_v0  ;;  %vm5885_vm5 = vcmp.ge.f32.partialorder %v3647_v49, 0.0  ;;  %v6013_v51 = vmul.f32 0.2, %v3647_v49  ;;  %5037 = vmatprep.mubr.bf16.mxu1 %v7530_v0 }
 0x1de   : > { %v3608_v52 = vpop.f32.mrf.mxu0  ;;  %v6138_v56 = vsel %vm5882_vm2, %v3604_v34, %v6010_v38  ;;  %v3649_v58 = vpop.f32.mrf.mxu1  ;;  %v6140_v61 = vsel %vm5884_vm3, %v3645_v39, %v6012_v41  ;;  %v6987_v38 = vcombine.low %v979_v16, %v1043_v17  ;;  %v7246_v39 = vcombine.high %v1236_v25, %v1300_v26  ;;  %v1303_v14 = vld [vmem:[%s8357_s26 + $0xb88] sm:$0xff] }
 0x1df   : > { %v6139_v57 = vsel %vm5883_vm4, %v3606_v42, %v6011_v48  ;;  %4977 = vmatpush1.bf16.msra.mxu0 %v7109_v40  ;;  %v6141_v63 = vsel %vm5885_vm5, %v3647_v49, %v6013_v51  ;;  %5018 = vmatpush1.bf16.msra.mxu1 %v7111_v44  ;;  %v1108_v48 = vld [vmem:[%s8357_s26 + $0x570] sm:$0xff]  ;;  %v1173_v51 = vld [vmem:[%s8357_s26 + $0x778] sm:$0xff]  ;;  %v7245_v52 = vcombine.low %v1236_v25, %v1300_v26 }
 0x1e0   : > { %v7420_v62 = vpack.c.bf16 %v6139_v57, %v6138_v56  ;;  %v3609_v1 = vpop.f32.mrf.mxu0  ;;  %4978 = vmatprep.subr.bf16.mxu0 %v6982_v45  ;;  %v7421_v2 = vpack.c.bf16 %v6141_v63, %v6140_v61  ;;  %v3650_v3 = vpop.f32.mrf.mxu1  ;;  %5019 = vmatprep.subr.bf16.mxu1 %v6984_v50  ;;  %v1172_v49 = vld [vmem:[%s8357_s26 + $0x770] sm:$0xff]  ;;  %v1109_v50 = vld [vmem:[%s8357_s26 + $0x578] sm:$0xff]  ;;  %v8829_v63 = vld [vmem:[%s9064_s1] sm:$0xf]  ;;  %v7252_v26 = vcombine.high %v1239_v13, %v1303_v14 }
 0x1e1   : > { %v7118_v54 = vcombine.high %v1108_v48, %v1172_v49  ;;  %v7120_v55 = vcombine.high %v1109_v50, %v1173_v51  ;;  %v980_v56 = vld [vmem:[%s8357_s26 + $0x170] sm:$0xff]  ;;  %v7117_v1 = vcombine.low %v1108_v48, %v1172_v49  ;;  %v7119_v3 = vcombine.low %v1109_v50, %v1173_v51 }
 0x1e2   : > { %6770 = vst [vmem:[%s8700_s7 + $0x40] sm:$0xff] %v7420_v62  ;;  %6771 = vst [vmem:[%s8700_s7 + $0x48] sm:$0xff] %v7421_v2  ;;  %v1044_v57 = vld [vmem:[%s8357_s26 + $0x370] sm:$0xff] }
 0x1e3   : > { %4979 = vmatpush1.bf16.msra.mxu0 %v6981_v53  ;;  %5020 = vmatpush1.bf16.msra.mxu1 %v6983_v59  ;;  %v7247_v53 = vcombine.low %v1237_v32, %v1301_v33  ;;  %v981_v59 = vld [vmem:[%s8357_s26 + $0x178] sm:$0xff]  ;;  %v1240_v48 = vld [vmem:[%s8357_s26 + $0x990] sm:$0xff] }
 0x1e4   : > { %5056 = vmatprep.subr.bf16.mxu0 %v7242_v60  ;;  %5097 = vmatprep.subr.bf16.mxu1 %v7244_v4  ;;  %v1045_v60 = vld [vmem:[%s8357_s26 + $0x378] sm:$0xff]  ;;  %v6990_v4 = vcombine.high %v980_v56, %v1044_v57  ;;  %v1304_v49 = vld [vmem:[%s8357_s26 + $0xb90] sm:$0xff] }
 0x1e6   : > { %v3686_v15 = vpop.f32.mrf.mxu0  ;;  %7323 = vmatmul.mubr.msk.bf16.vlgmr.msra.gmra.mxu0 %vm3238_vm0, %v8623_v43  ;;  %v3727_v19 = vpop.f32.mrf.mxu1  ;;  %7324 = vmatmul.mubr.msk.bf16.vlgmr.msra.gmra.mxu1 %vm3238_vm0, %v8623_v43 }
 0x1e7   : > { %v6014_v18 = vmul.f32 0.2, %v3686_v15  ;;  %5057 = vmatpush1.bf16.msra.mxu0 %v7241_v9  ;;  %vm5886_vm6 = vcmp.ge.f32.partialorder %v3686_v15, 0.0  ;;  %v6016_v21 = vmul.f32 0.2, %v3727_v19  ;;  %5098 = vmatpush1.bf16.msra.mxu1 %v7243_v10  ;;  %vm5888_vm7 = vcmp.ge.f32.partialorder %v3727_v19, 0.0 }
 0x1e8   : > { %v3688_v22 = vpop.f32.mrf.mxu0  ;;  %5058 = vmatprep.subr.bf16.mxu0 %v7114_v11  ;;  %v3729_v35 = vpop.f32.mrf.mxu1  ;;  %5099 = vmatprep.subr.bf16.mxu1 %v7116_v12  ;;  %v6992_v9 = vcombine.high %v981_v59, %v1045_v60  ;;  %v6989_v12 = vcombine.low %v980_v56, %v1044_v57  ;;  %v1241_v56 = vld [vmem:[%s8357_s26 + $0x998] sm:$0xff] }
 0x1e9   : > { %vm5887_vm8 = vcmp.ge.f32.partialorder %v3688_v22, 0.0  ;;  %v6015_v27 = vmul.f32 0.2, %v3688_v22  ;;  %5078 = vmatprep.mubr.bf16.mxu0 %v7530_v0  ;;  %vm5889_vm9 = vcmp.ge.f32.partialorder %v3729_v35, 0.0  ;;  %v6017_v29 = vmul.f32 0.2, %v3729_v35  ;;  %5119 = vmatprep.mubr.bf16.mxu1 %v7530_v0 }
 0x1ea   : > { %v3690_v30 = vpop.f32.mrf.mxu0  ;;  %v6142_v34 = vsel %vm5886_vm6, %v3686_v15, %v6014_v18  ;;  %v3731_v37 = vpop.f32.mrf.mxu1  ;;  %v6144_v40 = vsel %vm5888_vm7, %v3727_v19, %v6016_v21  ;;  %v6991_v18 = vcombine.low %v981_v59, %v1045_v60  ;;  %v7250_v19 = vcombine.high %v1238_v5, %v1302_v6  ;;  %v1305_v57 = vld [vmem:[%s8357_s26 + $0xb98] sm:$0xff] }
 0x1eb   : > { %v6143_v36 = vsel %vm5887_vm8, %v3688_v22, %v6015_v27  ;;  %5059 = vmatpush1.bf16.msra.mxu0 %v7113_v20  ;;  %v6145_v42 = vsel %vm5889_vm9, %v3729_v35, %v6017_v29  ;;  %5100 = vmatpush1.bf16.msra.mxu1 %v7115_v23  ;;  %v1110_v27 = vld [vmem:[%s8357_s26 + $0x580] sm:$0xff]  ;;  %v1175_v29 = vld [vmem:[%s8357_s26 + $0x788] sm:$0xff]  ;;  %v7249_v30 = vcombine.low %v1238_v5, %v1302_v6 }
 0x1ec   : > { %v7422_v41 = vpack.c.bf16 %v6143_v36, %v6142_v34  ;;  %v3691_v44 = vpop.f32.mrf.mxu0  ;;  %5060 = vmatprep.subr.bf16.mxu0 %v6986_v24  ;;  %v7423_v45 = vpack.c.bf16 %v6145_v42, %v6144_v40  ;;  %v3732_v46 = vpop.f32.mrf.mxu1  ;;  %5101 = vmatprep.subr.bf16.mxu1 %v6988_v28  ;;  %v1174_v35 = vld [vmem:[%s8357_s26 + $0x780] sm:$0xff]  ;;  %v1111_v28 = vld [vmem:[%s8357_s26 + $0x588] sm:$0xff]  ;;  %v7256_v6 = vcombine.high %v1241_v56, %v1305_v57 }
 0x1ed   : > { %v7122_v32 = vcombine.high %v1110_v27, %v1174_v35  ;;  %v7124_v33 = vcombine.high %v1111_v28, %v1175_v29  ;;  %v982_v34 = vld [vmem:[%s8357_s26 + $0x180] sm:$0xff]  ;;  %v7121_v42 = vcombine.low %v1110_v27, %v1174_v35  ;;  %v7123_v46 = vcombine.low %v1111_v28, %v1175_v29 }
 0x1ee   : > { %6772 = vst [vmem:[%s8700_s7 + $0x50] sm:$0xff] %v7422_v41  ;;  %6773 = vst [vmem:[%s8700_s7 + $0x58] sm:$0xff] %v7423_v45  ;;  %v1046_v36 = vld [vmem:[%s8357_s26 + $0x380] sm:$0xff] }
 0x1ef   : > { %5061 = vmatpush1.bf16.msra.mxu0 %v6985_v31  ;;  %5102 = vmatpush1.bf16.msra.mxu1 %v6987_v38  ;;  %v7251_v31 = vcombine.low %v1239_v13, %v1303_v14  ;;  %v983_v38 = vld [vmem:[%s8357_s26 + $0x188] sm:$0xff]  ;;  %v1242_v27 = vld [vmem:[%s8357_s26 + $0x9a0] sm:$0xff] }
 0x1f0   : > { %5138 = vmatprep.subr.bf16.mxu0 %v7246_v39  ;;  %5179 = vmatprep.subr.bf16.mxu1 %v7248_v47  ;;  %v1047_v39 = vld [vmem:[%s8357_s26 + $0x388] sm:$0xff]  ;;  %v6994_v47 = vcombine.high %v982_v34, %v1046_v36  ;;  %v1306_v35 = vld [vmem:[%s8357_s26 + $0xba0] sm:$0xff] }
 0x1f2   : > { %v3768_v58 = vpop.f32.mrf.mxu0  ;;  %7325 = vmatmul.mubr.msk.bf16.vlgmr.msra.gmra.mxu0 %vm3238_vm0, %v8623_v43  ;;  %v3809_v62 = vpop.f32.mrf.mxu1  ;;  %7326 = vmatmul.mubr.msk.bf16.vlgmr.msra.gmra.mxu1 %vm3238_vm0, %v8829_v63 }
 0x1f3   : > { %v6018_v61 = vmul.f32 0.2, %v3768_v58  ;;  %5139 = vmatpush1.bf16.msra.mxu0 %v7245_v52  ;;  %vm5890_vm10 = vcmp.ge.f32.partialorder %v3768_v58, 0.0  ;;  %v6020_v2 = vmul.f32 0.2, %v3809_v62  ;;  %5180 = vmatpush1.bf16.msra.mxu1 %v7247_v53  ;;  %vm5892_vm11 = vcmp.ge.f32.partialorder %v3809_v62, 0.0 }
 0x1f4   : > { %v3770_v43 = vpop.f32.mrf.mxu0  ;;  %5140 = vmatprep.subr.bf16.mxu0 %v7118_v54  ;;  %v3811_v8 = vpop.f32.mrf.mxu1  ;;  %5181 = vmatprep.subr.bf16.mxu1 %v7120_v55  ;;  %v6996_v52 = vcombine.high %v983_v38, %v1047_v39  ;;  %v6993_v55 = vcombine.low %v982_v34, %v1046_v36  ;;  %v1243_v34 = vld [vmem:[%s8357_s26 + $0x9a8] sm:$0xff] }
 0x1f5   : > { %vm5891_vm12 = vcmp.ge.f32.partialorder %v3770_v43, 0.0  ;;  %v6019_v7 = vmul.f32 0.2, %v3770_v43  ;;  %5160 = vmatprep.mubr.bf16.mxu0 %v7530_v0  ;;  %vm5893_vm13 = vcmp.ge.f32.partialorder %v3811_v8, 0.0  ;;  %v6021_v10 = vmul.f32 0.2, %v3811_v8  ;;  %5201 = vmatprep.mubr.bf16.mxu1 %v7530_v0 }
 0x1f6   : > { %v3772_v11 = vpop.f32.mrf.mxu0  ;;  %v6146_v15 = vsel %vm5890_vm10, %v3768_v58, %v6018_v61  ;;  %v3813_v17 = vpop.f32.mrf.mxu1  ;;  %v6148_v20 = vsel %vm5892_vm11, %v3809_v62, %v6020_v2  ;;  %v6995_v61 = vcombine.low %v983_v38, %v1047_v39  ;;  %v7254_v62 = vcombine.high %v1240_v48, %v1304_v49  ;;  %v1307_v36 = vld [vmem:[%s8357_s26 + $0xba8] sm:$0xff] }
 0x1f7   : > { %v6147_v16 = vsel %vm5891_vm12, %v3770_v43, %v6019_v7  ;;  %5141 = vmatpush1.bf16.msra.mxu0 %v7117_v1  ;;  %v6149_v22 = vsel %vm5893_vm13, %v3811_v8, %v6021_v10  ;;  %5182 = vmatpush1.bf16.msra.mxu1 %v7119_v3  ;;  %v1112_v7 = vld [vmem:[%s8357_s26 + $0x590] sm:$0xff]  ;;  %v1177_v10 = vld [vmem:[%s8357_s26 + $0x798] sm:$0xff]  ;;  %v7253_v11 = vcombine.low %v1240_v48, %v1304_v49 }
 0x1f8   : > { %v7424_v21 = vpack.c.bf16 %v6147_v16, %v6146_v15  ;;  %v3773_v23 = vpop.f32.mrf.mxu0  ;;  %5142 = vmatprep.subr.bf16.mxu0 %v6990_v4  ;;  %v7425_v24 = vpack.c.bf16 %v6149_v22, %v6148_v20  ;;  %v3814_v25 = vpop.f32.mrf.mxu1  ;;  %5183 = vmatprep.subr.bf16.mxu1 %v6992_v9  ;;  %v1176_v8 = vld [vmem:[%s8357_s26 + $0x790] sm:$0xff]  ;;  %v1113_v9 = vld [vmem:[%s8357_s26 + $0x598] sm:$0xff]  ;;  %v7260_v49 = vcombine.high %v1243_v34, %v1307_v36 }
 0x1f9   : > { %v7126_v13 = vcombine.high %v1112_v7, %v1176_v8  ;;  %v7128_v14 = vcombine.high %v1113_v9, %v1177_v10  ;;  %v984_v15 = vld [vmem:[%s8357_s26 + $0x190] sm:$0xff]  ;;  %v7125_v22 = vcombine.low %v1112_v7, %v1176_v8  ;;  %v7127_v25 = vcombine.low %v1113_v9, %v1177_v10 }
 0x1fa   : > { %6774 = vst [vmem:[%s8700_s7 + $0x60] sm:$0xff] %v7424_v21  ;;  %6775 = vst [vmem:[%s8700_s7 + $0x68] sm:$0xff] %v7425_v24  ;;  %v1048_v16 = vld [vmem:[%s8357_s26 + $0x390] sm:$0xff] }
 0x1fb   : > { %5143 = vmatpush1.bf16.msra.mxu0 %v6989_v12  ;;  %5184 = vmatpush1.bf16.msra.mxu1 %v6991_v18  ;;  %v7255_v12 = vcombine.low %v1241_v56, %v1305_v57  ;;  %v985_v18 = vld [vmem:[%s8357_s26 + $0x198] sm:$0xff]  ;;  %v1244_v7 = vld [vmem:[%s8357_s26 + $0x9b0] sm:$0xff] }
 0x1fc   : > { %5220 = vmatprep.subr.bf16.mxu0 %v7250_v19  ;;  %5261 = vmatprep.subr.bf16.mxu1 %v7252_v26  ;;  %v1049_v19 = vld [vmem:[%s8357_s26 + $0x398] sm:$0xff]  ;;  %v6998_v26 = vcombine.high %v984_v15, %v1048_v16  ;;  %v1308_v8 = vld [vmem:[%s8357_s26 + $0xbb0] sm:$0xff] }
 0x1fe   : > { %v3850_v37 = vpop.f32.mrf.mxu0  ;;  %7327 = vmatmul.mubr.msk.bf16.vlgmr.msra.gmra.mxu0 %vm3238_vm0, %v8829_v63  ;;  %v3891_v41 = vpop.f32.mrf.mxu1  ;;  %7328 = vmatmul.mubr.msk.bf16.vlgmr.msra.gmra.mxu1 %vm3238_vm0, %v8829_v63 }
 0x1ff   : > { %v6022_v40 = vmul.f32 0.2, %v3850_v37  ;;  %5221 = vmatpush1.bf16.msra.mxu0 %v7249_v30  ;;  %vm5894_vm14 = vcmp.ge.f32.partialorder %v3850_v37, 0.0  ;;  %v6024_v44 = vmul.f32 0.2, %v3891_v41  ;;  %5262 = vmatpush1.bf16.msra.mxu1 %v7251_v31  ;;  %vm5896_vm15 = vcmp.ge.f32.partialorder %v3891_v41, 0.0 }
 0x200   : > { %v3852_v45 = vpop.f32.mrf.mxu0  ;;  %5222 = vmatprep.subr.bf16.mxu0 %v7122_v32  ;;  %v3893_v51 = vpop.f32.mrf.mxu1  ;;  %5263 = vmatprep.subr.bf16.mxu1 %v7124_v33  ;;  %v7000_v30 = vcombine.high %v985_v18, %v1049_v19  ;;  %v6997_v33 = vcombine.low %v984_v15, %v1048_v16  ;;  %v1245_v15 = vld [vmem:[%s8357_s26 + $0x9b8] sm:$0xff] }
 0x201   : > { %vm5895_vm1 = vcmp.ge.f32.partialorder %v3852_v45, 0.0  ;;  %v6023_v50 = vmul.f32 0.2, %v3852_v45  ;;  %5242 = vmatprep.mubr.bf16.mxu0 %v7530_v0  ;;  %vm5897_vm2 = vcmp.ge.f32.partialorder %v3893_v51, 0.0  ;;  %v6025_v53 = vmul.f32 0.2, %v3893_v51  ;;  %5283 = vmatprep.mubr.bf16.mxu1 %v7530_v0 }
 0x202   : > { %v3854_v54 = vpop.f32.mrf.mxu0  ;;  %v6150_v58 = vsel %vm5894_vm14, %v3850_v37, %v6022_v40  ;;  %v3895_v60 = vpop.f32.mrf.mxu1  ;;  %v6152_v1 = vsel %vm5896_vm15, %v3891_v41, %v6024_v44  ;;  %v6999_v40 = vcombine.low %v985_v18, %v1049_v19  ;;  %v7258_v41 = vcombine.high %v1242_v27, %v1306_v35  ;;  %v1309_v16 = vld [vmem:[%s8357_s26 + $0xbb8] sm:$0xff] }
 0x203   : > { %v6151_v59 = vsel %vm5895_vm1, %v3852_v45, %v6023_v50  ;;  %5223 = vmatpush1.bf16.msra.mxu0 %v7121_v42  ;;  %v6153_v43 = vsel %vm5897_vm2, %v3893_v51, %v6025_v53  ;;  %5264 = vmatpush1.bf16.msra.mxu1 %v7123_v46  ;;  %v1114_v50 = vld [vmem:[%s8357_s26 + $0x5a0] sm:$0xff]  ;;  %v1179_v53 = vld [vmem:[%s8357_s26 + $0x7a8] sm:$0xff]  ;;  %v7257_v54 = vcombine.low %v1242_v27, %v1306_v35 }
 0x204   : > { %v7426_v2 = vpack.c.bf16 %v6151_v59, %v6150_v58  ;;  %v3855_v3 = vpop.f32.mrf.mxu0  ;;  %5224 = vmatprep.subr.bf16.mxu0 %v6994_v47  ;;  %v7427_v4 = vpack.c.bf16 %v6153_v43, %v6152_v1  ;;  %v3896_v5 = vpop.f32.mrf.mxu1  ;;  %5265 = vmatprep.subr.bf16.mxu1 %v6996_v52  ;;  %v1178_v51 = vld [vmem:[%s8357_s26 + $0x7a0] sm:$0xff]  ;;  %v1115_v52 = vld [vmem:[%s8357_s26 + $0x5a8] sm:$0xff]  ;;  %v7264_v35 = vcombine.high %v1245_v15, %v1309_v16 }
 0x205   : > { %v7130_v56 = vcombine.high %v1114_v50, %v1178_v51  ;;  %v7132_v57 = vcombine.high %v1115_v52, %v1179_v53  ;;  %v986_v58 = vld [vmem:[%s8357_s26 + $0x1a0] sm:$0xff]  ;;  %v7129_v43 = vcombine.low %v1114_v50, %v1178_v51  ;;  %v7131_v5 = vcombine.low %v1115_v52, %v1179_v53 }
 0x206   : > { %6776 = vst [vmem:[%s8700_s7 + $0x70] sm:$0xff] %v7426_v2  ;;  %6777 = vst [vmem:[%s8700_s7 + $0x78] sm:$0xff] %v7427_v4  ;;  %v1050_v59 = vld [vmem:[%s8357_s26 + $0x3a0] sm:$0xff] }
 0x207   : > { %5225 = vmatpush1.bf16.msra.mxu0 %v6993_v55  ;;  %5266 = vmatpush1.bf16.msra.mxu1 %v6995_v61  ;;  %v7259_v55 = vcombine.low %v1243_v34, %v1307_v36  ;;  %v987_v61 = vld [vmem:[%s8357_s26 + $0x1a8] sm:$0xff]  ;;  %v1246_v50 = vld [vmem:[%s8357_s26 + $0x9c0] sm:$0xff] }
 0x208   : > { %5302 = vmatprep.subr.bf16.mxu0 %v7254_v62  ;;  %5343 = vmatprep.subr.bf16.mxu1 %v7256_v6  ;;  %v1051_v62 = vld [vmem:[%s8357_s26 + $0x3a8] sm:$0xff]  ;;  %v7002_v6 = vcombine.high %v986_v58, %v1050_v59  ;;  %v1310_v51 = vld [vmem:[%s8357_s26 + $0xbc0] sm:$0xff] }
 0x20a   : > { %v3932_v17 = vpop.f32.mrf.mxu0  ;;  %7329 = vmatmul.mubr.msk.bf16.vlgmr.msra.gmra.mxu0 %vm3238_vm0, %v8829_v63  ;;  %v3973_v21 = vpop.f32.mrf.mxu1  ;;  %7330 = vmatmul.mubr.msk.bf16.vlgmr.msra.gmra.mxu1 %vm3238_vm0, %v8829_v63 }
 0x20b   : > { %v6026_v20 = vmul.f32 0.2, %v3932_v17  ;;  %5303 = vmatpush1.bf16.msra.mxu0 %v7253_v11  ;;  %vm5898_vm3 = vcmp.ge.f32.partialorder %v3932_v17, 0.0  ;;  %v6028_v23 = vmul.f32 0.2, %v3973_v21  ;;  %5344 = vmatpush1.bf16.msra.mxu1 %v7255_v12  ;;  %vm5900_vm4 = vcmp.ge.f32.partialorder %v3973_v21, 0.0 }
 0x20c   : > { %v3934_v24 = vpop.f32.mrf.mxu0  ;;  %5304 = vmatprep.subr.bf16.mxu0 %v7126_v13  ;;  %v3975_v29 = vpop.f32.mrf.mxu1  ;;  %5345 = vmatprep.subr.bf16.mxu1 %v7128_v14  ;;  %v7004_v11 = vcombine.high %v987_v61, %v1051_v62  ;;  %v7001_v14 = vcombine.low %v986_v58, %v1050_v59  ;;  %v1247_v58 = vld [vmem:[%s8357_s26 + $0x9c8] sm:$0xff] }
 0x20d   : > { %vm5899_vm5 = vcmp.ge.f32.partialorder %v3934_v24, 0.0  ;;  %v6027_v28 = vmul.f32 0.2, %v3934_v24  ;;  %5324 = vmatprep.mubr.bf16.mxu0 %v7530_v0  ;;  %vm5901_vm6 = vcmp.ge.f32.partialorder %v3975_v29, 0.0  ;;  %v6029_v31 = vmul.f32 0.2, %v3975_v29  ;;  %5365 = vmatprep.mubr.bf16.mxu1 %v7530_v0 }
 0x20e   : > { %v3936_v32 = vpop.f32.mrf.mxu0  ;;  %v6154_v37 = vsel %vm5898_vm3, %v3932_v17, %v6026_v20  ;;  %v3977_v39 = vpop.f32.mrf.mxu1  ;;  %v6156_v42 = vsel %vm5900_vm4, %v3973_v21, %v6028_v23  ;;  %v7003_v20 = vcombine.low %v987_v61, %v1051_v62  ;;  %v7262_v21 = vcombine.high %v1244_v7, %v1308_v8  ;;  %v1311_v59 = vld [vmem:[%s8357_s26 + $0xbc8] sm:$0xff] }
 0x20f   : > { %v6155_v38 = vsel %vm5899_vm5, %v3934_v24, %v6027_v28  ;;  %5305 = vmatpush1.bf16.msra.mxu0 %v7125_v22  ;;  %v6157_v45 = vsel %vm5901_vm6, %v3975_v29, %v6029_v31  ;;  %5346 = vmatpush1.bf16.msra.mxu1 %v7127_v25  ;;  %v1116_v28 = vld [vmem:[%s8357_s26 + $0x5b0] sm:$0xff]  ;;  %v1181_v31 = vld [vmem:[%s8357_s26 + $0x7b8] sm:$0xff]  ;;  %v7261_v32 = vcombine.low %v1244_v7, %v1308_v8 }
 0x210   : > { %v7428_v44 = vpack.c.bf16 %v6155_v38, %v6154_v37  ;;  %v3937_v46 = vpop.f32.mrf.mxu0  ;;  %5306 = vmatprep.subr.bf16.mxu0 %v6998_v26  ;;  %v7429_v47 = vpack.c.bf16 %v6157_v45, %v6156_v42  ;;  %v3978_v48 = vpop.f32.mrf.mxu1  ;;  %5347 = vmatprep.subr.bf16.mxu1 %v7000_v30  ;;  %v1180_v29 = vld [vmem:[%s8357_s26 + $0x7b0] sm:$0xff]  ;;  %v1117_v30 = vld [vmem:[%s8357_s26 + $0x5b8] sm:$0xff]  ;;  %v7268_v8 = vcombine.high %v1247_v58, %v1311_v59 }
 0x211   : > { %v7134_v34 = vcombine.high %v1116_v28, %v1180_v29  ;;  %v7136_v36 = vcombine.high %v1117_v30, %v1181_v31  ;;  %v988_v37 = vld [vmem:[%s8357_s26 + $0x1b0] sm:$0xff]  ;;  %v7133_v45 = vcombine.low %v1116_v28, %v1180_v29  ;;  %v7135_v48 = vcombine.low %v1117_v30, %v1181_v31 }
 0x212   : > { %6778 = vst [vmem:[%s8700_s7 + $0x80] sm:$0xff] %v7428_v44  ;;  %6779 = vst [vmem:[%s8700_s7 + $0x88] sm:$0xff] %v7429_v47  ;;  %v1052_v38 = vld [vmem:[%s8357_s26 + $0x3b0] sm:$0xff] }
 0x213   : > { %5307 = vmatpush1.bf16.msra.mxu0 %v6997_v33  ;;  %5348 = vmatpush1.bf16.msra.mxu1 %v6999_v40  ;;  %v7263_v33 = vcombine.low %v1245_v15, %v1309_v16  ;;  %v989_v40 = vld [vmem:[%s8357_s26 + $0x1b8] sm:$0xff]  ;;  %v1248_v28 = vld [vmem:[%s8357_s26 + $0x9d0] sm:$0xff] }
 0x214   : > { %5384 = vmatprep.subr.bf16.mxu0 %v7258_v41  ;;  %5425 = vmatprep.subr.bf16.mxu1 %v7260_v49  ;;  %v1053_v41 = vld [vmem:[%s8357_s26 + $0x3b8] sm:$0xff]  ;;  %v7006_v49 = vcombine.high %v988_v37, %v1052_v38  ;;  %v1312_v29 = vld [vmem:[%s8357_s26 + $0xbd0] sm:$0xff] }
 0x216   : > { %v4014_v60 = vpop.f32.mrf.mxu0  ;;  %7331 = vmatmul.mubr.msk.bf16.vlgmr.msra.gmra.mxu0 %vm3238_vm0, %v8829_v63  ;;  %v4055_v2 = vpop.f32.mrf.mxu1  ;;  %7332 = vmatmul.mubr.msk.bf16.vlgmr.msra.gmra.mxu1 %vm3238_vm0, %v8829_v63 }
 0x217   : > { %v6030_v1 = vmul.f32 0.2, %v4014_v60  ;;  %5385 = vmatpush1.bf16.msra.mxu0 %v7257_v54  ;;  %vm5902_vm7 = vcmp.ge.f32.partialorder %v4014_v60, 0.0  ;;  %v6032_v3 = vmul.f32 0.2, %v4055_v2  ;;  %5426 = vmatpush1.bf16.msra.mxu1 %v7259_v55  ;;  %vm5904_vm8 = vcmp.ge.f32.partialorder %v4055_v2, 0.0 }
 0x218   : > { %v4016_v4 = vpop.f32.mrf.mxu0  ;;  %5386 = vmatprep.subr.bf16.mxu0 %v7130_v56  ;;  %v4057_v10 = vpop.f32.mrf.mxu1  ;;  %5427 = vmatprep.subr.bf16.mxu1 %v7132_v57  ;;  %v7008_v54 = vcombine.high %v989_v40, %v1053_v41  ;;  %v7005_v57 = vcombine.low %v988_v37, %v1052_v38  ;;  %v1249_v37 = vld [vmem:[%s8357_s26 + $0x9d8] sm:$0xff] }
 0x219   : > { %vm5903_vm9 = vcmp.ge.f32.partialorder %v4016_v4, 0.0  ;;  %v6031_v9 = vmul.f32 0.2, %v4016_v4  ;;  %5406 = vmatprep.mubr.bf16.mxu0 %v7530_v0  ;;  %vm5905_vm10 = vcmp.ge.f32.partialorder %v4057_v10, 0.0  ;;  %v6033_v12 = vmul.f32 0.2, %v4057_v10  ;;  %5447 = vmatprep.mubr.bf16.mxu1 %v7530_v0 }
 0x21a   : > { %v4018_v13 = vpop.f32.mrf.mxu0  ;;  %v6158_v17 = vsel %vm5902_vm7, %v4014_v60, %v6030_v1  ;;  %v4059_v19 = vpop.f32.mrf.mxu1  ;;  %v6160_v22 = vsel %vm5904_vm8, %v4055_v2, %v6032_v3  ;;  %v7007_v1 = vcombine.low %v989_v40, %v1053_v41  ;;  %v7266_v2 = vcombine.high %v1246_v50, %v1310_v51  ;;  %v1313_v38 = vld [vmem:[%s8357_s26 + $0xbd8] sm:$0xff] }
 0x21b   : > { %v6159_v18 = vsel %vm5903_vm9, %v4016_v4, %v6031_v9  ;;  %5387 = vmatpush1.bf16.msra.mxu0 %v7129_v43  ;;  %v6161_v24 = vsel %vm5905_vm10, %v4057_v10, %v6033_v12  ;;  %5428 = vmatpush1.bf16.msra.mxu1 %v7131_v5  ;;  %v1118_v9 = vld [vmem:[%s8357_s26 + $0x5c0] sm:$0xff]  ;;  %v1183_v12 = vld [vmem:[%s8357_s26 + $0x7c8] sm:$0xff]  ;;  %v7265_v13 = vcombine.low %v1246_v50, %v1310_v51 }
 0x21c   : > { %v7430_v23 = vpack.c.bf16 %v6159_v18, %v6158_v17  ;;  %v4019_v25 = vpop.f32.mrf.mxu0  ;;  %5388 = vmatprep.subr.bf16.mxu0 %v7002_v6  ;;  %v7431_v26 = vpack.c.bf16 %v6161_v24, %v6160_v22  ;;  %v4060_v27 = vpop.f32.mrf.mxu1  ;;  %5429 = vmatprep.subr.bf16.mxu1 %v7004_v11  ;;  %v1182_v10 = vld [vmem:[%s8357_s26 + $0x7c0] sm:$0xff]  ;;  %v1119_v11 = vld [vmem:[%s8357_s26 + $0x5c8] sm:$0xff]  ;;  %v7272_v51 = vcombine.high %v1249_v37, %v1313_v38 }
 0x21d   : > { %v7138_v15 = vcombine.high %v1118_v9, %v1182_v10  ;;  %v7140_v16 = vcombine.high %v1119_v11, %v1183_v12  ;;  %v990_v17 = vld [vmem:[%s8357_s26 + $0x1c0] sm:$0xff]  ;;  %v7137_v24 = vcombine.low %v1118_v9, %v1182_v10  ;;  %v7139_v27 = vcombine.low %v1119_v11, %v1183_v12 }
 0x21e   : > { %6780 = vst [vmem:[%s8700_s7 + $0x90] sm:$0xff] %v7430_v23  ;;  %6781 = vst [vmem:[%s8700_s7 + $0x98] sm:$0xff] %v7431_v26  ;;  %v1054_v18 = vld [vmem:[%s8357_s26 + $0x3c0] sm:$0xff] }
 0x21f   : > { %5389 = vmatpush1.bf16.msra.mxu0 %v7001_v14  ;;  %5430 = vmatpush1.bf16.msra.mxu1 %v7003_v20  ;;  %v7267_v14 = vcombine.low %v1247_v58, %v1311_v59  ;;  %v991_v20 = vld [vmem:[%s8357_s26 + $0x1c8] sm:$0xff]  ;;  %v1250_v9 = vld [vmem:[%s8357_s26 + $0x9e0] sm:$0xff] }
 0x220   : > { %5466 = vmatprep.subr.bf16.mxu0 %v7262_v21  ;;  %5507 = vmatprep.subr.bf16.mxu1 %v7264_v35  ;;  %v1055_v21 = vld [vmem:[%s8357_s26 + $0x3c8] sm:$0xff]  ;;  %v7010_v35 = vcombine.high %v990_v17, %v1054_v18  ;;  %v1314_v10 = vld [vmem:[%s8357_s26 + $0xbe0] sm:$0xff] }
 0x222   : > { %v4096_v39 = vpop.f32.mrf.mxu0  ;;  %7333 = vmatmul.mubr.msk.bf16.vlgmr.msra.gmra.mxu0 %vm3238_vm0, %v8829_v63  ;;  %v4137_v44 = vpop.f32.mrf.mxu1  ;;  %7334 = vmatmul.mubr.msk.bf16.vlgmr.msra.gmra.mxu1 %vm3238_vm0, %v8829_v63 }
 0x223   : > { %v6034_v42 = vmul.f32 0.2, %v4096_v39  ;;  %5467 = vmatpush1.bf16.msra.mxu0 %v7261_v32  ;;  %vm5906_vm11 = vcmp.ge.f32.partialorder %v4096_v39, 0.0  ;;  %v6036_v46 = vmul.f32 0.2, %v4137_v44  ;;  %5508 = vmatpush1.bf16.msra.mxu1 %v7263_v33  ;;  %vm5908_vm12 = vcmp.ge.f32.partialorder %v4137_v44, 0.0 }
 0x224   : > { %v4098_v47 = vpop.f32.mrf.mxu0  ;;  %5468 = vmatprep.subr.bf16.mxu0 %v7134_v34  ;;  %v4139_v53 = vpop.f32.mrf.mxu1  ;;  %5509 = vmatprep.subr.bf16.mxu1 %v7136_v36  ;;  %v7012_v32 = vcombine.high %v991_v20, %v1055_v21  ;;  %v7009_v36 = vcombine.low %v990_v17, %v1054_v18  ;;  %v1251_v17 = vld [vmem:[%s8357_s26 + $0x9e8] sm:$0xff] }
 0x225   : > { %vm5907_vm13 = vcmp.ge.f32.partialorder %v4098_v47, 0.0  ;;  %v6035_v52 = vmul.f32 0.2, %v4098_v47  ;;  %5488 = vmatprep.mubr.bf16.mxu0 %v7530_v0  ;;  %vm5909_vm14 = vcmp.ge.f32.partialorder %v4139_v53, 0.0  ;;  %v6037_v55 = vmul.f32 0.2, %v4139_v53  ;;  %5529 = vmatprep.mubr.bf16.mxu1 %v7530_v0 }
 0x226   : > { %v4100_v56 = vpop.f32.mrf.mxu0  ;;  %v6162_v60 = vsel %vm5906_vm11, %v4096_v39, %v6034_v42  ;;  %v4141_v62 = vpop.f32.mrf.mxu1  ;;  %v6164_v43 = vsel %vm5908_vm12, %v4137_v44, %v6036_v46  ;;  %v7011_v42 = vcombine.low %v991_v20, %v1055_v21  ;;  %v7270_v44 = vcombine.high %v1248_v28, %v1312_v29  ;;  %v1315_v18 = vld [vmem:[%s8357_s26 + $0xbe8] sm:$0xff] }
 0x227   : > { %v6163_v61 = vsel %vm5907_vm13, %v4098_v47, %v6035_v52  ;;  %5469 = vmatpush1.bf16.msra.mxu0 %v7133_v45  ;;  %v6165_v4 = vsel %vm5909_vm14, %v4139_v53, %v6037_v55  ;;  %5510 = vmatpush1.bf16.msra.mxu1 %v7135_v48  ;;  %v1120_v52 = vld [vmem:[%s8357_s26 + $0x5d0] sm:$0xff]  ;;  %v1185_v55 = vld [vmem:[%s8357_s26 + $0x7d8] sm:$0xff]  ;;  %v7269_v56 = vcombine.low %v1248_v28, %v1312_v29 }
 0x228   : > { %v7432_v3 = vpack.c.bf16 %v6163_v61, %v6162_v60  ;;  %v4101_v5 = vpop.f32.mrf.mxu0  ;;  %5470 = vmatprep.subr.bf16.mxu0 %v7006_v49  ;;  %v7433_v6 = vpack.c.bf16 %v6165_v4, %v6164_v43  ;;  %v4142_v7 = vpop.f32.mrf.mxu1  ;;  %5511 = vmatprep.subr.bf16.mxu1 %v7008_v54  ;;  %v1184_v53 = vld [vmem:[%s8357_s26 + $0x7d0] sm:$0xff]  ;;  %v1121_v54 = vld [vmem:[%s8357_s26 + $0x5d8] sm:$0xff]  ;;  %v7276_v29 = vcombine.high %v1251_v17, %v1315_v18 }
 0x229   : > { %v7142_v58 = vcombine.high %v1120_v52, %v1184_v53  ;;  %v7144_v59 = vcombine.high %v1121_v54, %v1185_v55  ;;  %v992_v60 = vld [vmem:[%s8357_s26 + $0x1d0] sm:$0xff]  ;;  %v7141_v4 = vcombine.low %v1120_v52, %v1184_v53  ;;  %v7143_v7 = vcombine.low %v1121_v54, %v1185_v55 }
 0x22a   : > { %6782 = vst [vmem:[%s8700_s7 + $0xa0] sm:$0xff] %v7432_v3  ;;  %6783 = vst [vmem:[%s8700_s7 + $0xa8] sm:$0xff] %v7433_v6  ;;  %v1056_v61 = vld [vmem:[%s8357_s26 + $0x3d0] sm:$0xff] }
 0x22b   : > { %5471 = vmatpush1.bf16.msra.mxu0 %v7005_v57  ;;  %5512 = vmatpush1.bf16.msra.mxu1 %v7007_v1  ;;  %v7271_v57 = vcombine.low %v1249_v37, %v1313_v38  ;;  %v993_v1 = vld [vmem:[%s8357_s26 + $0x1d8] sm:$0xff]  ;;  %v1252_v52 = vld [vmem:[%s8357_s26 + $0x9f0] sm:$0xff] }
 0x22c   : > { %5548 = vmatprep.subr.bf16.mxu0 %v7266_v2  ;;  %5589 = vmatprep.subr.bf16.mxu1 %v7268_v8  ;;  %v1057_v2 = vld [vmem:[%s8357_s26 + $0x3d8] sm:$0xff]  ;;  %v7014_v8 = vcombine.high %v992_v60, %v1056_v61  ;;  %v1316_v53 = vld [vmem:[%s8357_s26 + $0xbf0] sm:$0xff] }
 0x22e   : > { %v4178_v19 = vpop.f32.mrf.mxu0  ;;  %7335 = vmatmul.mubr.msk.bf16.vlgmr.msra.gmra.mxu0 %vm3238_vm0, %v8829_v63  ;;  %v4219_v23 = vpop.f32.mrf.mxu1  ;;  %7336 = vmatmul.mubr.msk.bf16.vlgmr.msra.gmra.mxu1 %vm3238_vm0, %v8829_v63 }
 0x22f   : > { %v6038_v22 = vmul.f32 0.2, %v4178_v19  ;;  %5549 = vmatpush1.bf16.msra.mxu0 %v7265_v13  ;;  %vm5910_vm15 = vcmp.ge.f32.partialorder %v4178_v19, 0.0  ;;  %v6040_v25 = vmul.f32 0.2, %v4219_v23  ;;  %5590 = vmatpush1.bf16.msra.mxu1 %v7267_v14  ;;  %vm5912_vm1 = vcmp.ge.f32.partialorder %v4219_v23, 0.0 }
 0x230   : > { %v4180_v26 = vpop.f32.mrf.mxu0  ;;  %5550 = vmatprep.subr.bf16.mxu0 %v7138_v15  ;;  %v4221_v31 = vpop.f32.mrf.mxu1  ;;  %5591 = vmatprep.subr.bf16.mxu1 %v7140_v16  ;;  %v7016_v13 = vcombine.high %v993_v1, %v1057_v2  ;;  %v7013_v16 = vcombine.low %v992_v60, %v1056_v61  ;;  %v1253_v60 = vld [vmem:[%s8357_s26 + $0x9f8] sm:$0xff] }
 0x231   : > { %vm5911_vm2 = vcmp.ge.f32.partialorder %v4180_v26, 0.0  ;;  %v6039_v30 = vmul.f32 0.2, %v4180_v26  ;;  %5570 = vmatprep.mubr.bf16.mxu0 %v7530_v0  ;;  %vm5913_vm3 = vcmp.ge.f32.partialorder %v4221_v31, 0.0  ;;  %v6041_v33 = vmul.f32 0.2, %v4221_v31  ;;  %5611 = vmatprep.mubr.bf16.mxu1 %v7530_v0 }
 0x232   : > { %v4182_v34 = vpop.f32.mrf.mxu0  ;;  %v6166_v39 = vsel %vm5910_vm15, %v4178_v19, %v6038_v22  ;;  %v4223_v41 = vpop.f32.mrf.mxu1  ;;  %v6168_v45 = vsel %vm5912_vm1, %v4219_v23, %v6040_v25  ;;  %v7015_v22 = vcombine.low %v993_v1, %v1057_v2  ;;  %v7274_v23 = vcombine.high %v1250_v9, %v1314_v10  ;;  %v1317_v61 = vld [vmem:[%s8357_s26 + $0xbf8] sm:$0xff] }
 0x233   : > { %v6167_v40 = vsel %vm5911_vm2, %v4180_v26, %v6039_v30  ;;  %5551 = vmatpush1.bf16.msra.mxu0 %v7137_v24  ;;  %v6169_v47 = vsel %vm5913_vm3, %v4221_v31, %v6041_v33  ;;  %5592 = vmatpush1.bf16.msra.mxu1 %v7139_v27  ;;  %v1122_v30 = vld [vmem:[%s8357_s26 + $0x5e0] sm:$0xff]  ;;  %v1187_v33 = vld [vmem:[%s8357_s26 + $0x7e8] sm:$0xff]  ;;  %v7273_v34 = vcombine.low %v1250_v9, %v1314_v10 }
 0x234   : > { %v7434_v46 = vpack.c.bf16 %v6167_v40, %v6166_v39  ;;  %v4183_v48 = vpop.f32.mrf.mxu0  ;;  %5552 = vmatprep.subr.bf16.mxu0 %v7010_v35  ;;  %v7435_v49 = vpack.c.bf16 %v6169_v47, %v6168_v45  ;;  %v4224_v50 = vpop.f32.mrf.mxu1  ;;  %5593 = vmatprep.subr.bf16.mxu1 %v7012_v32  ;;  %v1186_v31 = vld [vmem:[%s8357_s26 + $0x7e0] sm:$0xff]  ;;  %v1123_v32 = vld [vmem:[%s8357_s26 + $0x5e8] sm:$0xff]  ;;  %v7280_v10 = vcombine.high %v1253_v60, %v1317_v61 }
 0x235   : > { %v7146_v37 = vcombine.high %v1122_v30, %v1186_v31  ;;  %v7148_v38 = vcombine.high %v1123_v32, %v1187_v33  ;;  %v994_v39 = vld [vmem:[%s8357_s26 + $0x1e0] sm:$0xff]  ;;  %v7145_v47 = vcombine.low %v1122_v30, %v1186_v31  ;;  %v7147_v50 = vcombine.low %v1123_v32, %v1187_v33 }
 0x236   : > { %6784 = vst [vmem:[%s8700_s7 + $0xb0] sm:$0xff] %v7434_v46  ;;  %6785 = vst [vmem:[%s8700_s7 + $0xb8] sm:$0xff] %v7435_v49  ;;  %v1058_v40 = vld [vmem:[%s8357_s26 + $0x3e0] sm:$0xff] }
 0x237   : > { %5553 = vmatpush1.bf16.msra.mxu0 %v7009_v36  ;;  %5594 = vmatpush1.bf16.msra.mxu1 %v7011_v42  ;;  %v7275_v36 = vcombine.low %v1251_v17, %v1315_v18  ;;  %v995_v42 = vld [vmem:[%s8357_s26 + $0x1e8] sm:$0xff] }
 0x238   : > { %5630 = vmatprep.subr.bf16.mxu0 %v7270_v44  ;;  %5671 = vmatprep.subr.bf16.mxu1 %v7272_v51  ;;  %v1059_v44 = vld [vmem:[%s8357_s26 + $0x3e8] sm:$0xff]  ;;  %v7018_v51 = vcombine.high %v994_v39, %v1058_v40 }
 0x23a   : > { %v4260_v62 = vpop.f32.mrf.mxu0  ;;  %7337 = vmatmul.mubr.msk.bf16.vlgmr.msra.gmra.mxu0 %vm3238_vm0, %v8829_v63  ;;  %v4301_v3 = vpop.f32.mrf.mxu1  ;;  %7338 = vmatmul.mubr.msk.bf16.vlgmr.msra.gmra.mxu1 %vm3238_vm0, %v8829_v63 }
 0x23b   : > { %v6042_v43 = vmul.f32 0.2, %v4260_v62  ;;  %5631 = vmatpush1.bf16.msra.mxu0 %v7269_v56  ;;  %vm5914_vm4 = vcmp.ge.f32.partialorder %v4260_v62, 0.0  ;;  %v6044_v5 = vmul.f32 0.2, %v4301_v3  ;;  %5672 = vmatpush1.bf16.msra.mxu1 %v7271_v57  ;;  %vm5916_vm5 = vcmp.ge.f32.partialorder %v4301_v3, 0.0 }
 0x23c   : > { %v4262_v6 = vpop.f32.mrf.mxu0  ;;  %5632 = vmatprep.subr.bf16.mxu0 %v7142_v58  ;;  %v4303_v12 = vpop.f32.mrf.mxu1  ;;  %5673 = vmatprep.subr.bf16.mxu1 %v7144_v59  ;;  %v7020_v56 = vcombine.high %v995_v42, %v1059_v44  ;;  %v7017_v59 = vcombine.low %v994_v39, %v1058_v40 }
 0x23d   : > { %vm5915_vm6 = vcmp.ge.f32.partialorder %v4262_v6, 0.0  ;;  %v6043_v11 = vmul.f32 0.2, %v4262_v6  ;;  %5652 = vmatprep.mubr.bf16.mxu0 %v7530_v0  ;;  %vm5917_vm7 = vcmp.ge.f32.partialorder %v4303_v12, 0.0  ;;  %v6045_v14 = vmul.f32 0.2, %v4303_v12  ;;  %5693 = vmatprep.mubr.bf16.mxu1 %v7530_v0 }
 0x23e   : > { %v4264_v15 = vpop.f32.mrf.mxu0  ;;  %v6170_v19 = vsel %vm5914_vm4, %v4260_v62, %v6042_v43  ;;  %v4305_v21 = vpop.f32.mrf.mxu1  ;;  %v6172_v24 = vsel %vm5916_vm5, %v4301_v3, %v6044_v5  ;;  %v7019_v43 = vcombine.low %v995_v42, %v1059_v44  ;;  %v7278_v3 = vcombine.high %v1252_v52, %v1316_v53 }
 0x23f   : > { %v6171_v20 = vsel %vm5915_vm6, %v4262_v6, %v6043_v11  ;;  %5633 = vmatpush1.bf16.msra.mxu0 %v7141_v4  ;;  %v6173_v26 = vsel %vm5917_vm7, %v4303_v12, %v6045_v14  ;;  %5674 = vmatpush1.bf16.msra.mxu1 %v7143_v7  ;;  %v1124_v11 = vld [vmem:[%s8357_s26 + $0x5f0] sm:$0xff]  ;;  %v1189_v14 = vld [vmem:[%s8357_s26 + $0x7f8] sm:$0xff]  ;;  %v7277_v15 = vcombine.low %v1252_v52, %v1316_v53 }
 0x240   : > { %v7436_v25 = vpack.c.bf16 %v6171_v20, %v6170_v19  ;;  %v4265_v27 = vpop.f32.mrf.mxu0  ;;  %5634 = vmatprep.subr.bf16.mxu0 %v7014_v8  ;;  %v7437_v35 = vpack.c.bf16 %v6173_v26, %v6172_v24  ;;  %v4306_v28 = vpop.f32.mrf.mxu1  ;;  %5675 = vmatprep.subr.bf16.mxu1 %v7016_v13  ;;  %v1188_v12 = vld [vmem:[%s8357_s26 + $0x7f0] sm:$0xff]  ;;  %v1125_v13 = vld [vmem:[%s8357_s26 + $0x5f8] sm:$0xff]  ;;  %v7505_v26 = vld [vmem:[%s9064_s1] sm:$0xf] }
 0x241   : > { %v7150_v17 = vcombine.high %v1124_v11, %v1188_v12  ;;  %v7152_v18 = vcombine.high %v1125_v13, %v1189_v14  ;;  %v996_v19 = vld [vmem:[%s8357_s26 + $0x1f0] sm:$0xff]  ;;  %v7149_v27 = vcombine.low %v1124_v11, %v1188_v12 }
 0x242   : > { %6786 = vst [vmem:[%s8700_s7 + $0xc0] sm:$0xff] %v7436_v25  ;;  %6787 = vst [vmem:[%s8700_s7 + $0xc8] sm:$0xff] %v7437_v35  ;;  %v1060_v20 = vld [vmem:[%s8357_s26 + $0x3f0] sm:$0xff] }
 0x243   : > { %5635 = vmatpush1.bf16.msra.mxu0 %v7013_v16  ;;  %5676 = vmatpush1.bf16.msra.mxu1 %v7015_v22  ;;  %v7279_v16 = vcombine.low %v1253_v60, %v1317_v61  ;;  %v997_v22 = vld [vmem:[%s8357_s26 + $0x1f8] sm:$0xff]  ;;  %v7022_v30 = vcombine.high %v996_v19, %v1060_v20  ;;  %v7021_v39 = vcombine.low %v996_v19, %v1060_v20 }
 0x244   : > { %5712 = vmatprep.subr.bf16.mxu0 %v7274_v23  ;;  %5753 = vmatprep.subr.bf16.mxu1 %v7276_v29  ;;  %v1061_v23 = vld [vmem:[%s8357_s26 + $0x3f8] sm:$0xff]  ;;  %v7151_v29 = vcombine.low %v1125_v13, %v1189_v14 }
 0x245   : > { %v7024_v32 = vcombine.high %v997_v22, %v1061_v23  ;;  %v7023_v40 = vcombine.low %v997_v22, %v1061_v23 }
 0x246   : > { %v4342_v41 = vpop.f32.mrf.mxu0  ;;  %7339 = vmatmul.mubr.msk.bf16.vlgmr.msra.gmra.mxu0 %vm3238_vm0, %v8829_v63  ;;  %v4383_v46 = vpop.f32.mrf.mxu1  ;;  %7340 = vmatmul.mubr.msk.bf16.vlgmr.msra.gmra.mxu1 %vm3238_vm0, %v8829_v63 }
 0x247   : > { %v6046_v45 = vmul.f32 0.2, %v4342_v41  ;;  %5713 = vmatpush1.bf16.msra.mxu0 %v7273_v34  ;;  %vm5918_vm8 = vcmp.ge.f32.partialorder %v4342_v41, 0.0  ;;  %v6048_v48 = vmul.f32 0.2, %v4383_v46  ;;  %5754 = vmatpush1.bf16.msra.mxu1 %v7275_v36  ;;  %vm5920_vm9 = vcmp.ge.f32.partialorder %v4383_v46, 0.0 }
 0x248   : > { %v4344_v49 = vpop.f32.mrf.mxu0  ;;  %5714 = vmatprep.subr.bf16.mxu0 %v7146_v37  ;;  %v4385_v55 = vpop.f32.mrf.mxu1  ;;  %5755 = vmatprep.subr.bf16.mxu1 %v7148_v38 }
 0x249   : > { %vm5919_vm10 = vcmp.ge.f32.partialorder %v4344_v49, 0.0  ;;  %v6047_v54 = vmul.f32 0.2, %v4344_v49  ;;  %5734 = vmatprep.mubr.bf16.mxu0 %v7530_v0  ;;  %vm5921_vm11 = vcmp.ge.f32.partialorder %v4385_v55, 0.0  ;;  %v6049_v57 = vmul.f32 0.2, %v4385_v55  ;;  %5775 = vmatprep.mubr.bf16.mxu1 %v7530_v0 }
 0x24a   : > { %v4346_v58 = vpop.f32.mrf.mxu0  ;;  %v6174_v62 = vsel %vm5918_vm8, %v4342_v41, %v6046_v45  ;;  %v4387_v2 = vpop.f32.mrf.mxu1  ;;  %v6176_v4 = vsel %vm5920_vm9, %v4383_v46, %v6048_v48 }
 0x24b   : > { %v6175_v1 = vsel %vm5919_vm10, %v4344_v49, %v6047_v54  ;;  %5715 = vmatpush1.bf16.msra.mxu0 %v7145_v47  ;;  %v6177_v6 = vsel %vm5921_vm11, %v4385_v55, %v6049_v57  ;;  %5756 = vmatpush1.bf16.msra.mxu1 %v7147_v50 }
 0x24c   : > { %v7438_v5 = vpack.c.bf16 %v6175_v1, %v6174_v62  ;;  %v4347_v7 = vpop.f32.mrf.mxu0  ;;  %5716 = vmatprep.subr.bf16.mxu0 %v7018_v51  ;;  %v7439_v8 = vpack.c.bf16 %v6177_v6, %v6176_v4  ;;  %v4388_v9 = vpop.f32.mrf.mxu1  ;;  %5757 = vmatprep.subr.bf16.mxu1 %v7020_v56 }
 0x24e   : > { %6788 = vst [vmem:[%s8700_s7 + $0xd0] sm:$0xff] %v7438_v5  ;;  %6789 = vst [vmem:[%s8700_s7 + $0xd8] sm:$0xff] %v7439_v8 }
 0x24f   : > { %5717 = vmatpush1.bf16.msra.mxu0 %v7017_v59  ;;  %5758 = vmatpush1.bf16.msra.mxu1 %v7019_v43 }
 0x250   : > { %5794 = vmatprep.subr.bf16.mxu0 %v7278_v3  ;;  %5835 = vmatprep.subr.bf16.mxu1 %v7280_v10 }
 0x252   : > { %v4424_v21 = vpop.f32.mrf.mxu0  ;;  %7341 = vmatmul.mubr.msk.bf16.vlgmr.msra.gmra.mxu0 %vm3238_vm0, %v8829_v63  ;;  %v4465_v25 = vpop.f32.mrf.mxu1  ;;  %7342 = vmatmul.mubr.msk.bf16.vlgmr.msra.gmra.mxu1 %vm3238_vm0, %v7505_v26 }
 0x253   : > { %v6050_v24 = vmul.f32 0.2, %v4424_v21  ;;  %5795 = vmatpush1.bf16.msra.mxu0 %v7277_v15  ;;  %vm5922_vm12 = vcmp.ge.f32.partialorder %v4424_v21, 0.0  ;;  %v6052_v35 = vmul.f32 0.2, %v4465_v25  ;;  %5836 = vmatpush1.bf16.msra.mxu1 %v7279_v16  ;;  %vm5924_vm13 = vcmp.ge.f32.partialorder %v4465_v25, 0.0 }
 0x254   : > { %v4426_v28 = vpop.f32.mrf.mxu0  ;;  %5796 = vmatprep.subr.bf16.mxu0 %v7150_v17  ;;  %v4467_v31 = vpop.f32.mrf.mxu1  ;;  %5837 = vmatprep.subr.bf16.mxu1 %v7152_v18 }
 0x255   : > { %vm5923_vm14 = vcmp.ge.f32.partialorder %v4426_v28, 0.0  ;;  %v6051_v63 = vmul.f32 0.2, %v4426_v28  ;;  %5816 = vmatprep.mubr.bf16.mxu0 %v7530_v0  ;;  %vm5925_vm15 = vcmp.ge.f32.partialorder %v4467_v31, 0.0  ;;  %v6053_v33 = vmul.f32 0.2, %v4467_v31  ;;  %5857 = vmatprep.mubr.bf16.mxu1 %v7530_v0 }
 0x256   : > { %v4428_v34 = vpop.f32.mrf.mxu0  ;;  %v6178_v36 = vsel %vm5922_vm12, %v4424_v21, %v6050_v24  ;;  %v4469_v38 = vpop.f32.mrf.mxu1  ;;  %v6180_v41 = vsel %vm5924_vm13, %v4465_v25, %v6052_v35 }
 0x257   : > { %v6179_v37 = vsel %vm5923_vm14, %v4426_v28, %v6051_v63  ;;  %5797 = vmatpush1.bf16.msra.mxu0 %v7149_v27  ;;  %v6181_v44 = vsel %vm5925_vm15, %v4467_v31, %v6053_v33  ;;  %5838 = vmatpush1.bf16.msra.mxu1 %v7151_v29 }
 0x258   : > { %v7440_v42 = vpack.c.bf16 %v6179_v37, %v6178_v36  ;;  %v4429_v45 = vpop.f32.mrf.mxu0  ;;  %5798 = vmatprep.subr.bf16.mxu0 %v7022_v30  ;;  %v7441_v46 = vpack.c.bf16 %v6181_v44, %v6180_v41  ;;  %v4470_v47 = vpop.f32.mrf.mxu1  ;;  %5839 = vmatprep.subr.bf16.mxu1 %v7024_v32 }
 0x25a   : > { %6790 = vst [vmem:[%s8700_s7 + $0xe0] sm:$0xff] %v7440_v42  ;;  %6791 = vst [vmem:[%s8700_s7 + $0xe8] sm:$0xff] %v7441_v46 }
 0x25b   : > { %5799 = vmatpush1.bf16.msra.mxu0 %v7021_v39  ;;  %5840 = vmatpush1.bf16.msra.mxu1 %v7023_v40 }
 0x25e   : > { %v4506_v0 = vpop.f32.mrf.mxu0  ;;  %7343 = vmatmul.mubr.msk.bf16.vlgmr.msra.gmra.mxu0 %vm3238_vm0, %v7505_v26  ;;  %v4547_v49 = vpop.f32.mrf.mxu1  ;;  %7344 = vmatmul.mubr.msk.bf16.vlgmr.msra.gmra.mxu1 %vm3238_vm0, %v7505_v26 }
 0x25f   : > { %v6054_v48 = vmul.f32 0.2, %v4506_v0  ;;  %vm5926_vm1 = vcmp.ge.f32.partialorder %v4506_v0, 0.0  ;;  %v6056_v50 = vmul.f32 0.2, %v4547_v49  ;;  %vm5928_vm2 = vcmp.ge.f32.partialorder %v4547_v49, 0.0 }
 0x260   : > { %v4508_v51 = vpop.f32.mrf.mxu0  ;;  %v4549_v53 = vpop.f32.mrf.mxu1 }
 0x261   : > { %vm5927_vm3 = vcmp.ge.f32.partialorder %v4508_v51, 0.0  ;;  %v6055_v52 = vmul.f32 0.2, %v4508_v51  ;;  %vm5929_vm4 = vcmp.ge.f32.partialorder %v4549_v53, 0.0  ;;  %v6057_v54 = vmul.f32 0.2, %v4549_v53 }
 0x262   : > { %v4510_v55 = vpop.f32.mrf.mxu0  ;;  %v6182_v56 = vsel %vm5926_vm1, %v4506_v0, %v6054_v48  ;;  %v4551_v58 = vpop.f32.mrf.mxu1  ;;  %v6184_v59 = vsel %vm5928_vm2, %v4547_v49, %v6056_v50 }
 0x263   : > { %v6183_v57 = vsel %vm5927_vm3, %v4508_v51, %v6055_v52  ;;  %v6185_v61 = vsel %vm5929_vm4, %v4549_v53, %v6057_v54 }
 0x264   : > { %v7442_v60 = vpack.c.bf16 %v6183_v57, %v6182_v56  ;;  %v4511_v62 = vpop.f32.mrf.mxu0  ;;  %v7443_v1 = vpack.c.bf16 %v6185_v61, %v6184_v59  ;;  %v4552_v2 = vpop.f32.mrf.mxu1 }
 0x266   : > { %6792 = vst [vmem:[%s8700_s7 + $0xf0] sm:$0xff] %v7442_v60  ;;  %6793 = vst [vmem:[%s8700_s7 + $0xf8] sm:$0xff] %v7443_v1 }
 0x26a   : > { %v4588_v43 = vpop.f32.mrf.mxu0  ;;  %v4629_v4 = vpop.f32.mrf.mxu1 }
 0x26b   : > { %v6058_v3 = vmul.f32 0.2, %v4588_v43  ;;  %vm5930_vm0 = vcmp.ge.f32.partialorder %v4588_v43, 0.0  ;;  %v6060_v5 = vmul.f32 0.2, %v4629_v4  ;;  %vm5932_vm5 = vcmp.ge.f32.partialorder %v4629_v4, 0.0 }
 0x26c   : > { %v4590_v6 = vpop.f32.mrf.mxu0  ;;  %v4631_v8 = vpop.f32.mrf.mxu1 }
 0x26d   : > { %vm5931_vm6 = vcmp.ge.f32.partialorder %v4590_v6, 0.0  ;;  %v6059_v7 = vmul.f32 0.2, %v4590_v6  ;;  %vm5933_vm7 = vcmp.ge.f32.partialorder %v4631_v8, 0.0  ;;  %v6061_v9 = vmul.f32 0.2, %v4631_v8 }
 0x26e   : > { %v4592_v10 = vpop.f32.mrf.mxu0  ;;  %v6186_v11 = vsel %vm5930_vm0, %v4588_v43, %v6058_v3  ;;  %v4633_v13 = vpop.f32.mrf.mxu1  ;;  %v6188_v14 = vsel %vm5932_vm5, %v4629_v4, %v6060_v5 }
 0x26f   : > { %v6187_v12 = vsel %vm5931_vm6, %v4590_v6, %v6059_v7  ;;  %v6189_v16 = vsel %vm5933_vm7, %v4631_v8, %v6061_v9 }
 0x270   : > { %v7444_v15 = vpack.c.bf16 %v6187_v12, %v6186_v11  ;;  %v4593_v17 = vpop.f32.mrf.mxu0  ;;  %v7445_v18 = vpack.c.bf16 %v6189_v16, %v6188_v14  ;;  %v4634_v19 = vpop.f32.mrf.mxu1 }
 0x272   : > { %6794 = vst [vmem:[%s8700_s7 + $0x100] sm:$0xff] %v7444_v15  ;;  %6795 = vst [vmem:[%s8700_s7 + $0x108] sm:$0xff] %v7445_v18 }
 0x276   : > { %v4670_v20 = vpop.f32.mrf.mxu0  ;;  %v4711_v22 = vpop.f32.mrf.mxu1 }
 0x277   : > { %v6062_v21 = vmul.f32 0.2, %v4670_v20  ;;  %vm5934_vm8 = vcmp.ge.f32.partialorder %v4670_v20, 0.0  ;;  %v6064_v23 = vmul.f32 0.2, %v4711_v22  ;;  %vm5936_vm9 = vcmp.ge.f32.partialorder %v4711_v22, 0.0 }
 0x278   : > { %v4672_v24 = vpop.f32.mrf.mxu0  ;;  %v4713_v26 = vpop.f32.mrf.mxu1 }
 0x279   : > { %vm5935_vm10 = vcmp.ge.f32.partialorder %v4672_v24, 0.0  ;;  %v6063_v25 = vmul.f32 0.2, %v4672_v24  ;;  %vm5937_vm11 = vcmp.ge.f32.partialorder %v4713_v26, 0.0  ;;  %v6065_v27 = vmul.f32 0.2, %v4713_v26 }
 0x27a   : > { %v4674_v35 = vpop.f32.mrf.mxu0  ;;  %v6190_v28 = vsel %vm5934_vm8, %v4670_v20, %v6062_v21  ;;  %v4715_v30 = vpop.f32.mrf.mxu1  ;;  %v6192_v63 = vsel %vm5936_vm9, %v4711_v22, %v6064_v23 }
 0x27b   : > { %v6191_v29 = vsel %vm5935_vm10, %v4672_v24, %v6063_v25  ;;  %v6193_v32 = vsel %vm5937_vm11, %v4713_v26, %v6065_v27 }
 0x27c   : > { %v7446_v31 = vpack.c.bf16 %v6191_v29, %v6190_v28  ;;  %v4675_v33 = vpop.f32.mrf.mxu0  ;;  %v7447_v34 = vpack.c.bf16 %v6193_v32, %v6192_v63  ;;  %v4716_v36 = vpop.f32.mrf.mxu1 }
 0x27e   : > { %6796 = vst [vmem:[%s8700_s7 + $0x110] sm:$0xff] %v7446_v31  ;;  %6797 = vst [vmem:[%s8700_s7 + $0x118] sm:$0xff] %v7447_v34 }
 0x282   : > { %v4752_v37 = vpop.f32.mrf.mxu0  ;;  %v4793_v39 = vpop.f32.mrf.mxu1 }
 0x283   : > { %v6066_v38 = vmul.f32 0.2, %v4752_v37  ;;  %vm5938_vm12 = vcmp.ge.f32.partialorder %v4752_v37, 0.0  ;;  %v6068_v40 = vmul.f32 0.2, %v4793_v39  ;;  %vm5940_vm13 = vcmp.ge.f32.partialorder %v4793_v39, 0.0 }
 0x284   : > { %v4754_v41 = vpop.f32.mrf.mxu0  ;;  %v4795_v44 = vpop.f32.mrf.mxu1 }
 0x285   : > { %vm5939_vm14 = vcmp.ge.f32.partialorder %v4754_v41, 0.0  ;;  %v6067_v42 = vmul.f32 0.2, %v4754_v41  ;;  %vm5941_vm15 = vcmp.ge.f32.partialorder %v4795_v44, 0.0  ;;  %v6069_v45 = vmul.f32 0.2, %v4795_v44 }
 0x286   : > { %v4756_v46 = vpop.f32.mrf.mxu0  ;;  %v6194_v47 = vsel %vm5938_vm12, %v4752_v37, %v6066_v38  ;;  %v4797_v48 = vpop.f32.mrf.mxu1  ;;  %v6196_v49 = vsel %vm5940_vm13, %v4793_v39, %v6068_v40 }
 0x287   : > { %v6195_v0 = vsel %vm5939_vm14, %v4754_v41, %v6067_v42  ;;  %v6197_v51 = vsel %vm5941_vm15, %v4795_v44, %v6069_v45 }
 0x288   : > { %v7448_v50 = vpack.c.bf16 %v6195_v0, %v6194_v47  ;;  %v4757_v52 = vpop.f32.mrf.mxu0  ;;  %v7449_v53 = vpack.c.bf16 %v6197_v51, %v6196_v49  ;;  %v4798_v54 = vpop.f32.mrf.mxu1 }
 0x28a   : > { %6798 = vst [vmem:[%s8700_s7 + $0x120] sm:$0xff] %v7448_v50  ;;  %6799 = vst [vmem:[%s8700_s7 + $0x128] sm:$0xff] %v7449_v53 }
 0x28e   : > { %v4834_v55 = vpop.f32.mrf.mxu0  ;;  %v4875_v57 = vpop.f32.mrf.mxu1 }
 0x28f   : > { %v6070_v56 = vmul.f32 0.2, %v4834_v55  ;;  %vm5942_vm1 = vcmp.ge.f32.partialorder %v4834_v55, 0.0  ;;  %v6072_v58 = vmul.f32 0.2, %v4875_v57  ;;  %vm5944_vm2 = vcmp.ge.f32.partialorder %v4875_v57, 0.0 }
 0x290   : > { %v4836_v59 = vpop.f32.mrf.mxu0  ;;  %v4877_v61 = vpop.f32.mrf.mxu1 }
 0x291   : > { %vm5943_vm3 = vcmp.ge.f32.partialorder %v4836_v59, 0.0  ;;  %v6071_v60 = vmul.f32 0.2, %v4836_v59  ;;  %vm5945_vm4 = vcmp.ge.f32.partialorder %v4877_v61, 0.0  ;;  %v6073_v62 = vmul.f32 0.2, %v4877_v61 }
 0x292   : > { %v4838_v1 = vpop.f32.mrf.mxu0  ;;  %v6198_v2 = vsel %vm5942_vm1, %v4834_v55, %v6070_v56  ;;  %v4879_v3 = vpop.f32.mrf.mxu1  ;;  %v6200_v4 = vsel %vm5944_vm2, %v4875_v57, %v6072_v58 }
 0x293   : > { %v6199_v43 = vsel %vm5943_vm3, %v4836_v59, %v6071_v60  ;;  %v6201_v6 = vsel %vm5945_vm4, %v4877_v61, %v6073_v62 }
 0x294   : > { %v7450_v5 = vpack.c.bf16 %v6199_v43, %v6198_v2  ;;  %v4839_v7 = vpop.f32.mrf.mxu0  ;;  %v7451_v8 = vpack.c.bf16 %v6201_v6, %v6200_v4  ;;  %v4880_v9 = vpop.f32.mrf.mxu1 }
 0x296   : > { %6800 = vst [vmem:[%s8700_s7 + $0x130] sm:$0xff] %v7450_v5  ;;  %6801 = vst [vmem:[%s8700_s7 + $0x138] sm:$0xff] %v7451_v8 }
 0x29a   : > { %v4916_v10 = vpop.f32.mrf.mxu0  ;;  %v4957_v12 = vpop.f32.mrf.mxu1 }
 0x29b   : > { %v6074_v11 = vmul.f32 0.2, %v4916_v10  ;;  %vm5946_vm0 = vcmp.ge.f32.partialorder %v4916_v10, 0.0  ;;  %v6076_v13 = vmul.f32 0.2, %v4957_v12  ;;  %vm5948_vm5 = vcmp.ge.f32.partialorder %v4957_v12, 0.0 }
 0x29c   : > { %v4918_v14 = vpop.f32.mrf.mxu0  ;;  %v4959_v16 = vpop.f32.mrf.mxu1 }
 0x29d   : > { %vm5947_vm6 = vcmp.ge.f32.partialorder %v4918_v14, 0.0  ;;  %v6075_v15 = vmul.f32 0.2, %v4918_v14  ;;  %vm5949_vm7 = vcmp.ge.f32.partialorder %v4959_v16, 0.0  ;;  %v6077_v17 = vmul.f32 0.2, %v4959_v16 }
 0x29e   : > { %v4920_v18 = vpop.f32.mrf.mxu0  ;;  %v6202_v19 = vsel %vm5946_vm0, %v4916_v10, %v6074_v11  ;;  %v4961_v21 = vpop.f32.mrf.mxu1  ;;  %v6204_v22 = vsel %vm5948_vm5, %v4957_v12, %v6076_v13 }
 0x29f   : > { %v6203_v20 = vsel %vm5947_vm6, %v4918_v14, %v6075_v15  ;;  %v6205_v24 = vsel %vm5949_vm7, %v4959_v16, %v6077_v17 }
 0x2a0   : > { %v7452_v23 = vpack.c.bf16 %v6203_v20, %v6202_v19  ;;  %v4921_v25 = vpop.f32.mrf.mxu0  ;;  %v7453_v26 = vpack.c.bf16 %v6205_v24, %v6204_v22  ;;  %v4962_v27 = vpop.f32.mrf.mxu1 }
 0x2a2   : > { %6802 = vst [vmem:[%s8700_s7 + $0x140] sm:$0xff] %v7452_v23  ;;  %6803 = vst [vmem:[%s8700_s7 + $0x148] sm:$0xff] %v7453_v26 }
 0x2a6   : > { %v4998_v35 = vpop.f32.mrf.mxu0  ;;  %v5039_v29 = vpop.f32.mrf.mxu1 }
 0x2a7   : > { %v6078_v28 = vmul.f32 0.2, %v4998_v35  ;;  %vm5950_vm8 = vcmp.ge.f32.partialorder %v4998_v35, 0.0  ;;  %v6080_v30 = vmul.f32 0.2, %v5039_v29  ;;  %vm5952_vm9 = vcmp.ge.f32.partialorder %v5039_v29, 0.0 }
 0x2a8   : > { %v5000_v63 = vpop.f32.mrf.mxu0  ;;  %v5041_v32 = vpop.f32.mrf.mxu1 }
 0x2a9   : > { %vm5951_vm10 = vcmp.ge.f32.partialorder %v5000_v63, 0.0  ;;  %v6079_v31 = vmul.f32 0.2, %v5000_v63  ;;  %vm5953_vm11 = vcmp.ge.f32.partialorder %v5041_v32, 0.0  ;;  %v6081_v33 = vmul.f32 0.2, %v5041_v32 }
 0x2aa   : > { %v5002_v34 = vpop.f32.mrf.mxu0  ;;  %v6206_v36 = vsel %vm5950_vm8, %v4998_v35, %v6078_v28  ;;  %v5043_v38 = vpop.f32.mrf.mxu1  ;;  %v6208_v39 = vsel %vm5952_vm9, %v5039_v29, %v6080_v30 }
 0x2ab   : > { %v6207_v37 = vsel %vm5951_vm10, %v5000_v63, %v6079_v31  ;;  %v6209_v41 = vsel %vm5953_vm11, %v5041_v32, %v6081_v33 }
 0x2ac   : > { %v7454_v40 = vpack.c.bf16 %v6207_v37, %v6206_v36  ;;  %v5003_v42 = vpop.f32.mrf.mxu0  ;;  %v7455_v44 = vpack.c.bf16 %v6209_v41, %v6208_v39  ;;  %v5044_v45 = vpop.f32.mrf.mxu1 }
 0x2ae   : > { %6804 = vst [vmem:[%s8700_s7 + $0x150] sm:$0xff] %v7454_v40  ;;  %6805 = vst [vmem:[%s8700_s7 + $0x158] sm:$0xff] %v7455_v44 }
 0x2b2   : > { %v5080_v46 = vpop.f32.mrf.mxu0  ;;  %v5121_v0 = vpop.f32.mrf.mxu1 }
 0x2b3   : > { %v6082_v47 = vmul.f32 0.2, %v5080_v46  ;;  %vm5954_vm12 = vcmp.ge.f32.partialorder %v5080_v46, 0.0  ;;  %v6084_v48 = vmul.f32 0.2, %v5121_v0  ;;  %vm5956_vm13 = vcmp.ge.f32.partialorder %v5121_v0, 0.0 }
 0x2b4   : > { %v5082_v49 = vpop.f32.mrf.mxu0  ;;  %v5123_v51 = vpop.f32.mrf.mxu1 }
 0x2b5   : > { %vm5955_vm14 = vcmp.ge.f32.partialorder %v5082_v49, 0.0  ;;  %v6083_v50 = vmul.f32 0.2, %v5082_v49  ;;  %vm5957_vm15 = vcmp.ge.f32.partialorder %v5123_v51, 0.0  ;;  %v6085_v52 = vmul.f32 0.2, %v5123_v51 }
 0x2b6   : > { %v5084_v53 = vpop.f32.mrf.mxu0  ;;  %v6210_v54 = vsel %vm5954_vm12, %v5080_v46, %v6082_v47  ;;  %v5125_v56 = vpop.f32.mrf.mxu1  ;;  %v6212_v57 = vsel %vm5956_vm13, %v5121_v0, %v6084_v48 }
 0x2b7   : > { %v6211_v55 = vsel %vm5955_vm14, %v5082_v49, %v6083_v50  ;;  %v6213_v59 = vsel %vm5957_vm15, %v5123_v51, %v6085_v52 }
 0x2b8   : > { %v7456_v58 = vpack.c.bf16 %v6211_v55, %v6210_v54  ;;  %v5085_v60 = vpop.f32.mrf.mxu0  ;;  %v7457_v61 = vpack.c.bf16 %v6213_v59, %v6212_v57  ;;  %v5126_v62 = vpop.f32.mrf.mxu1 }
 0x2ba   : > { %6806 = vst [vmem:[%s8700_s7 + $0x160] sm:$0xff] %v7456_v58  ;;  %6807 = vst [vmem:[%s8700_s7 + $0x168] sm:$0xff] %v7457_v61 }
 0x2be   : > { %v5162_v1 = vpop.f32.mrf.mxu0  ;;  %v5203_v43 = vpop.f32.mrf.mxu1 }
 0x2bf   : > { %v6086_v2 = vmul.f32 0.2, %v5162_v1  ;;  %vm5958_vm1 = vcmp.ge.f32.partialorder %v5162_v1, 0.0  ;;  %v6088_v3 = vmul.f32 0.2, %v5203_v43  ;;  %vm5960_vm2 = vcmp.ge.f32.partialorder %v5203_v43, 0.0 }
 0x2c0   : > { %v5164_v4 = vpop.f32.mrf.mxu0  ;;  %v5205_v6 = vpop.f32.mrf.mxu1 }
 0x2c1   : > { %vm5959_vm3 = vcmp.ge.f32.partialorder %v5164_v4, 0.0  ;;  %v6087_v5 = vmul.f32 0.2, %v5164_v4  ;;  %vm5961_vm4 = vcmp.ge.f32.partialorder %v5205_v6, 0.0  ;;  %v6089_v7 = vmul.f32 0.2, %v5205_v6 }
 0x2c2   : > { %v5166_v8 = vpop.f32.mrf.mxu0  ;;  %v6214_v9 = vsel %vm5958_vm1, %v5162_v1, %v6086_v2  ;;  %v5207_v11 = vpop.f32.mrf.mxu1  ;;  %v6216_v12 = vsel %vm5960_vm2, %v5203_v43, %v6088_v3 }
 0x2c3   : > { %v6215_v10 = vsel %vm5959_vm3, %v5164_v4, %v6087_v5  ;;  %v6217_v14 = vsel %vm5961_vm4, %v5205_v6, %v6089_v7 }
 0x2c4   : > { %v7458_v13 = vpack.c.bf16 %v6215_v10, %v6214_v9  ;;  %v5167_v15 = vpop.f32.mrf.mxu0  ;;  %v7459_v16 = vpack.c.bf16 %v6217_v14, %v6216_v12  ;;  %v5208_v17 = vpop.f32.mrf.mxu1 }
 0x2c6   : > { %6808 = vst [vmem:[%s8700_s7 + $0x170] sm:$0xff] %v7458_v13  ;;  %6809 = vst [vmem:[%s8700_s7 + $0x178] sm:$0xff] %v7459_v16 }
 0x2ca   : > { %v5244_v18 = vpop.f32.mrf.mxu0  ;;  %v5285_v20 = vpop.f32.mrf.mxu1 }
 0x2cb   : > { %v6090_v19 = vmul.f32 0.2, %v5244_v18  ;;  %vm5962_vm0 = vcmp.ge.f32.partialorder %v5244_v18, 0.0  ;;  %v6092_v21 = vmul.f32 0.2, %v5285_v20  ;;  %vm5964_vm5 = vcmp.ge.f32.partialorder %v5285_v20, 0.0 }
 0x2cc   : > { %v5246_v22 = vpop.f32.mrf.mxu0  ;;  %v5287_v24 = vpop.f32.mrf.mxu1 }
 0x2cd   : > { %vm5963_vm6 = vcmp.ge.f32.partialorder %v5246_v22, 0.0  ;;  %v6091_v23 = vmul.f32 0.2, %v5246_v22  ;;  %vm5965_vm7 = vcmp.ge.f32.partialorder %v5287_v24, 0.0  ;;  %v6093_v25 = vmul.f32 0.2, %v5287_v24 }
 0x2ce   : > { %v5248_v26 = vpop.f32.mrf.mxu0  ;;  %v6218_v27 = vsel %vm5962_vm0, %v5244_v18, %v6090_v19  ;;  %v5289_v28 = vpop.f32.mrf.mxu1  ;;  %v6220_v29 = vsel %vm5964_vm5, %v5285_v20, %v6092_v21 }
 0x2cf   : > { %v6219_v35 = vsel %vm5963_vm6, %v5246_v22, %v6091_v23  ;;  %v6221_v63 = vsel %vm5965_vm7, %v5287_v24, %v6093_v25 }
 0x2d0   : > { %v7460_v30 = vpack.c.bf16 %v6219_v35, %v6218_v27  ;;  %v5249_v31 = vpop.f32.mrf.mxu0  ;;  %v7461_v32 = vpack.c.bf16 %v6221_v63, %v6220_v29  ;;  %v5290_v33 = vpop.f32.mrf.mxu1 }
 0x2d2   : > { %6810 = vst [vmem:[%s8700_s7 + $0x180] sm:$0xff] %v7460_v30  ;;  %6811 = vst [vmem:[%s8700_s7 + $0x188] sm:$0xff] %v7461_v32 }
 0x2d6   : > { %v5326_v34 = vpop.f32.mrf.mxu0  ;;  %v5367_v37 = vpop.f32.mrf.mxu1 }
 0x2d7   : > { %v6094_v36 = vmul.f32 0.2, %v5326_v34  ;;  %vm5966_vm8 = vcmp.ge.f32.partialorder %v5326_v34, 0.0  ;;  %v6096_v38 = vmul.f32 0.2, %v5367_v37  ;;  %vm5968_vm9 = vcmp.ge.f32.partialorder %v5367_v37, 0.0 }
 0x2d8   : > { %v5328_v39 = vpop.f32.mrf.mxu0  ;;  %v5369_v41 = vpop.f32.mrf.mxu1 }
 0x2d9   : > { %vm5967_vm10 = vcmp.ge.f32.partialorder %v5328_v39, 0.0  ;;  %v6095_v40 = vmul.f32 0.2, %v5328_v39  ;;  %vm5969_vm11 = vcmp.ge.f32.partialorder %v5369_v41, 0.0  ;;  %v6097_v42 = vmul.f32 0.2, %v5369_v41 }
 0x2da   : > { %v5330_v44 = vpop.f32.mrf.mxu0  ;;  %v6222_v45 = vsel %vm5966_vm8, %v5326_v34, %v6094_v36  ;;  %v5371_v47 = vpop.f32.mrf.mxu1  ;;  %v6224_v0 = vsel %vm5968_vm9, %v5367_v37, %v6096_v38 }
 0x2db   : > { %v6223_v46 = vsel %vm5967_vm10, %v5328_v39, %v6095_v40  ;;  %v6225_v49 = vsel %vm5969_vm11, %v5369_v41, %v6097_v42 }
 0x2dc   : > { %v7462_v48 = vpack.c.bf16 %v6223_v46, %v6222_v45  ;;  %v5331_v50 = vpop.f32.mrf.mxu0  ;;  %v7463_v51 = vpack.c.bf16 %v6225_v49, %v6224_v0  ;;  %v5372_v52 = vpop.f32.mrf.mxu1 }
 0x2de   : > { %6812 = vst [vmem:[%s8700_s7 + $0x190] sm:$0xff] %v7462_v48  ;;  %6813 = vst [vmem:[%s8700_s7 + $0x198] sm:$0xff] %v7463_v51 }
 0x2e2   : > { %v5408_v53 = vpop.f32.mrf.mxu0  ;;  %v5449_v55 = vpop.f32.mrf.mxu1 }
 0x2e3   : > { %v6098_v54 = vmul.f32 0.2, %v5408_v53  ;;  %vm5970_vm12 = vcmp.ge.f32.partialorder %v5408_v53, 0.0  ;;  %v6100_v56 = vmul.f32 0.2, %v5449_v55  ;;  %vm5972_vm13 = vcmp.ge.f32.partialorder %v5449_v55, 0.0 }
 0x2e4   : > { %v5410_v57 = vpop.f32.mrf.mxu0  ;;  %v5451_v59 = vpop.f32.mrf.mxu1 }
 0x2e5   : > { %vm5971_vm14 = vcmp.ge.f32.partialorder %v5410_v57, 0.0  ;;  %v6099_v58 = vmul.f32 0.2, %v5410_v57  ;;  %vm5973_vm15 = vcmp.ge.f32.partialorder %v5451_v59, 0.0  ;;  %v6101_v60 = vmul.f32 0.2, %v5451_v59 }
 0x2e6   : > { %v5412_v61 = vpop.f32.mrf.mxu0  ;;  %v6226_v62 = vsel %vm5970_vm12, %v5408_v53, %v6098_v54  ;;  %v5453_v2 = vpop.f32.mrf.mxu1  ;;  %v6228_v43 = vsel %vm5972_vm13, %v5449_v55, %v6100_v56 }
 0x2e7   : > { %v6227_v1 = vsel %vm5971_vm14, %v5410_v57, %v6099_v58  ;;  %v6229_v4 = vsel %vm5973_vm15, %v5451_v59, %v6101_v60 }
 0x2e8   : > { %v7464_v3 = vpack.c.bf16 %v6227_v1, %v6226_v62  ;;  %v5413_v5 = vpop.f32.mrf.mxu0  ;;  %v7465_v6 = vpack.c.bf16 %v6229_v4, %v6228_v43  ;;  %v5454_v7 = vpop.f32.mrf.mxu1 }
 0x2ea   : > { %6814 = vst [vmem:[%s8700_s7 + $0x1a0] sm:$0xff] %v7464_v3  ;;  %6815 = vst [vmem:[%s8700_s7 + $0x1a8] sm:$0xff] %v7465_v6 }
 0x2ee   : > { %v5490_v8 = vpop.f32.mrf.mxu0  ;;  %v5531_v10 = vpop.f32.mrf.mxu1 }
 0x2ef   : > { %v6102_v9 = vmul.f32 0.2, %v5490_v8  ;;  %vm5974_vm1 = vcmp.ge.f32.partialorder %v5490_v8, 0.0  ;;  %v6104_v11 = vmul.f32 0.2, %v5531_v10  ;;  %vm5976_vm2 = vcmp.ge.f32.partialorder %v5531_v10, 0.0 }
 0x2f0   : > { %v5492_v12 = vpop.f32.mrf.mxu0  ;;  %v5533_v14 = vpop.f32.mrf.mxu1 }
 0x2f1   : > { %vm5975_vm3 = vcmp.ge.f32.partialorder %v5492_v12, 0.0  ;;  %v6103_v13 = vmul.f32 0.2, %v5492_v12  ;;  %vm5977_vm4 = vcmp.ge.f32.partialorder %v5533_v14, 0.0  ;;  %v6105_v15 = vmul.f32 0.2, %v5533_v14 }
 0x2f2   : > { %v5494_v16 = vpop.f32.mrf.mxu0  ;;  %v6230_v17 = vsel %vm5974_vm1, %v5490_v8, %v6102_v9  ;;  %v5535_v19 = vpop.f32.mrf.mxu1  ;;  %v6232_v20 = vsel %vm5976_vm2, %v5531_v10, %v6104_v11 }
 0x2f3   : > { %v6231_v18 = vsel %vm5975_vm3, %v5492_v12, %v6103_v13  ;;  %v6233_v22 = vsel %vm5977_vm4, %v5533_v14, %v6105_v15 }
 0x2f4   : > { %v7466_v21 = vpack.c.bf16 %v6231_v18, %v6230_v17  ;;  %v5495_v23 = vpop.f32.mrf.mxu0  ;;  %v7467_v24 = vpack.c.bf16 %v6233_v22, %v6232_v20  ;;  %v5536_v25 = vpop.f32.mrf.mxu1 }
 0x2f6   : > { %6816 = vst [vmem:[%s8700_s7 + $0x1b0] sm:$0xff] %v7466_v21  ;;  %6817 = vst [vmem:[%s8700_s7 + $0x1b8] sm:$0xff] %v7467_v24 }
 0x2fa   : > { %v5572_v26 = vpop.f32.mrf.mxu0  ;;  %v5613_v35 = vpop.f32.mrf.mxu1 }
 0x2fb   : > { %v6106_v27 = vmul.f32 0.2, %v5572_v26  ;;  %vm5978_vm0 = vcmp.ge.f32.partialorder %v5572_v26, 0.0  ;;  %v6108_v28 = vmul.f32 0.2, %v5613_v35  ;;  %vm5980_vm5 = vcmp.ge.f32.partialorder %v5613_v35, 0.0 }
 0x2fc   : > { %v5574_v29 = vpop.f32.mrf.mxu0  ;;  %v5615_v63 = vpop.f32.mrf.mxu1 }
 0x2fd   : > { %vm5979_vm6 = vcmp.ge.f32.partialorder %v5574_v29, 0.0  ;;  %v6107_v30 = vmul.f32 0.2, %v5574_v29  ;;  %vm5981_vm7 = vcmp.ge.f32.partialorder %v5615_v63, 0.0  ;;  %v6109_v31 = vmul.f32 0.2, %v5615_v63 }
 0x2fe   : > { %v5576_v32 = vpop.f32.mrf.mxu0  ;;  %v6234_v33 = vsel %vm5978_vm0, %v5572_v26, %v6106_v27  ;;  %v5617_v36 = vpop.f32.mrf.mxu1  ;;  %v6236_v37 = vsel %vm5980_vm5, %v5613_v35, %v6108_v28 }
 0x2ff   : > { %v6235_v34 = vsel %vm5979_vm6, %v5574_v29, %v6107_v30  ;;  %v6237_v39 = vsel %vm5981_vm7, %v5615_v63, %v6109_v31 }
 0x300   : > { %v7468_v38 = vpack.c.bf16 %v6235_v34, %v6234_v33  ;;  %v5577_v40 = vpop.f32.mrf.mxu0  ;;  %v7469_v41 = vpack.c.bf16 %v6237_v39, %v6236_v37  ;;  %v5618_v42 = vpop.f32.mrf.mxu1 }
 0x302   : > { %6818 = vst [vmem:[%s8700_s7 + $0x1c0] sm:$0xff] %v7468_v38  ;;  %6819 = vst [vmem:[%s8700_s7 + $0x1c8] sm:$0xff] %v7469_v41 }
 0x306   : > { %v5654_v44 = vpop.f32.mrf.mxu0  ;;  %v5695_v46 = vpop.f32.mrf.mxu1 }
 0x307   : > { %v6110_v45 = vmul.f32 0.2, %v5654_v44  ;;  %vm5982_vm8 = vcmp.ge.f32.partialorder %v5654_v44, 0.0  ;;  %v6112_v47 = vmul.f32 0.2, %v5695_v46  ;;  %vm5984_vm9 = vcmp.ge.f32.partialorder %v5695_v46, 0.0 }
 0x308   : > { %v5656_v0 = vpop.f32.mrf.mxu0  ;;  %v5697_v49 = vpop.f32.mrf.mxu1 }
 0x309   : > { %vm5983_vm10 = vcmp.ge.f32.partialorder %v5656_v0, 0.0  ;;  %v6111_v48 = vmul.f32 0.2, %v5656_v0  ;;  %vm5985_vm11 = vcmp.ge.f32.partialorder %v5697_v49, 0.0  ;;  %v6113_v50 = vmul.f32 0.2, %v5697_v49 }
 0x30a   : > { %v5658_v51 = vpop.f32.mrf.mxu0  ;;  %v6238_v52 = vsel %vm5982_vm8, %v5654_v44, %v6110_v45  ;;  %v5699_v54 = vpop.f32.mrf.mxu1  ;;  %v6240_v55 = vsel %vm5984_vm9, %v5695_v46, %v6112_v47 }
 0x30b   : > { %v6239_v53 = vsel %vm5983_vm10, %v5656_v0, %v6111_v48  ;;  %v6241_v57 = vsel %vm5985_vm11, %v5697_v49, %v6113_v50 }
 0x30c   : > { %v7470_v56 = vpack.c.bf16 %v6239_v53, %v6238_v52  ;;  %v5659_v58 = vpop.f32.mrf.mxu0  ;;  %v7471_v59 = vpack.c.bf16 %v6241_v57, %v6240_v55  ;;  %v5700_v60 = vpop.f32.mrf.mxu1 }
 0x30e   : > { %6820 = vst [vmem:[%s8700_s7 + $0x1d0] sm:$0xff] %v7470_v56  ;;  %6821 = vst [vmem:[%s8700_s7 + $0x1d8] sm:$0xff] %v7471_v59 }
 0x312   : > { %v5736_v61 = vpop.f32.mrf.mxu0  ;;  %v5777_v1 = vpop.f32.mrf.mxu1 }
 0x313   : > { %v6114_v62 = vmul.f32 0.2, %v5736_v61  ;;  %vm5986_vm12 = vcmp.ge.f32.partialorder %v5736_v61, 0.0  ;;  %v6116_v2 = vmul.f32 0.2, %v5777_v1  ;;  %vm5988_vm13 = vcmp.ge.f32.partialorder %v5777_v1, 0.0 }
 0x314   : > { %v5738_v43 = vpop.f32.mrf.mxu0  ;;  %v5779_v4 = vpop.f32.mrf.mxu1 }
 0x315   : > { %vm5987_vm14 = vcmp.ge.f32.partialorder %v5738_v43, 0.0  ;;  %v6115_v3 = vmul.f32 0.2, %v5738_v43  ;;  %vm5989_vm15 = vcmp.ge.f32.partialorder %v5779_v4, 0.0  ;;  %v6117_v5 = vmul.f32 0.2, %v5779_v4 }
 0x316   : > { %v5740_v6 = vpop.f32.mrf.mxu0  ;;  %v6242_v7 = vsel %vm5986_vm12, %v5736_v61, %v6114_v62  ;;  %v5781_v9 = vpop.f32.mrf.mxu1  ;;  %v6244_v10 = vsel %vm5988_vm13, %v5777_v1, %v6116_v2 }
 0x317   : > { %v6243_v8 = vsel %vm5987_vm14, %v5738_v43, %v6115_v3  ;;  %v6245_v12 = vsel %vm5989_vm15, %v5779_v4, %v6117_v5 }
 0x318   : > { %v7472_v11 = vpack.c.bf16 %v6243_v8, %v6242_v7  ;;  %v5741_v13 = vpop.f32.mrf.mxu0  ;;  %v7473_v14 = vpack.c.bf16 %v6245_v12, %v6244_v10  ;;  %v5782_v15 = vpop.f32.mrf.mxu1 }
 0x31a   : > { %6822 = vst [vmem:[%s8700_s7 + $0x1e0] sm:$0xff] %v7472_v11  ;;  %6823 = vst [vmem:[%s8700_s7 + $0x1e8] sm:$0xff] %v7473_v14 }
 0x31e   : > { %v5818_v16 = vpop.f32.mrf.mxu0  ;;  %v5859_v18 = vpop.f32.mrf.mxu1 }
 0x31f   : > { %v6118_v17 = vmul.f32 0.2, %v5818_v16  ;;  %vm5990_vm1 = vcmp.ge.f32.partialorder %v5818_v16, 0.0  ;;  %v6120_v19 = vmul.f32 0.2, %v5859_v18  ;;  %vm5992_vm2 = vcmp.ge.f32.partialorder %v5859_v18, 0.0 }
 0x320   : > { %v5820_v20 = vpop.f32.mrf.mxu0  ;;  %v5861_v22 = vpop.f32.mrf.mxu1 }
 0x321   : > { %vm5991_vm3 = vcmp.ge.f32.partialorder %v5820_v20, 0.0  ;;  %v6119_v21 = vmul.f32 0.2, %v5820_v20  ;;  %vm5993_vm4 = vcmp.ge.f32.partialorder %v5861_v22, 0.0  ;;  %v6121_v23 = vmul.f32 0.2, %v5861_v22 }
 0x322   : > { %v5822_v24 = vpop.f32.mrf.mxu0  ;;  %v6246_v25 = vsel %vm5990_vm1, %v5818_v16, %v6118_v17  ;;  %v5863_v27 = vpop.f32.mrf.mxu1  ;;  %v6248_v35 = vsel %vm5992_vm2, %v5859_v18, %v6120_v19 }
 0x323   : > { %v6247_v26 = vsel %vm5991_vm3, %v5820_v20, %v6119_v21  ;;  %v6249_v29 = vsel %vm5993_vm4, %v5861_v22, %v6121_v23 }
 0x324   : > { %v7474_v28 = vpack.c.bf16 %v6247_v26, %v6246_v25  ;;  %v5823_v30 = vpop.f32.mrf.mxu0  ;;  %v7475_v63 = vpack.c.bf16 %v6249_v29, %v6248_v35  ;;  %v5864_v31 = vpop.f32.mrf.mxu1 }
 0x326   : > { %6824 = vst [vmem:[%s8700_s7 + $0x1f0] sm:$0xff] %v7474_v28  ;;  %6825 = vst [vmem:[%s8700_s7 + $0x1f8] sm:$0xff] %v7475_v63 }
 0x327 PF: > { %p9_p9 = scmp.ge.s32.totalorder %s7563_s13, 4   ;;  %s9066_s9 = smov %s7524_s10 }
 0x328   : > { %s9067_s10 = smov %s7572_s16  ;;  %s9068_s11 = smov %s7563_s13 }
 0x329   :  { %11 = sbr.rel (!%p9_p9) target bundleno = 2 (0x2), region = 86 }

// kernel: discriminator_forward.5
= control target key start
LH: loop header
LB: loop body
LE: loop exit
PB: predicated region body
PF: predicated region fallthrough
CT: control target
= control target key end

     0   :  { %s3960_s12 = smov 0   ;;  %s3962_s13 = smov 0   ;;  %s4972_s0 = inlined_call_operand.vmem [shape: bf16[128,8192], index: 0, kind: input, shape index: {}]   ;;  %s4973_s1 = inlined_call_operand.vmem [shape: bf16[16,128], index: 1, kind: input, shape index: {}]   ;;  %s4974_s2 = inlined_call_operand.vmem [shape: bf16[16,8192], index: 2, kind: output, shape index: {0}]   ;;  %s4975_s3 = inlined_call_operand.vmem [shape: f32[2,16,2], index: 3, kind: output, shape index: {1}]  }
   0x1   :  { %s3964_s14 = smov 0  }
   0x2 LB: > { %s3976_s15 = sadd.s32 4294967295, %s3937_s14   ;;  %s3979_s16 = sadd.s32 1, %s3937_s14   ;;  %s3937_s14 = sphi %s3964_s14, %s4979_s14   ;;  %s3933_s13 = sphi %s3962_s13, %s4978_s13   ;;  %s3929_s12 = sphi %s3960_s12, %s4977_s12  }
   0x3   : > { %s18_s17 = ssub.s32 %s3937_s14, %s3979_s16  ;;  %s21_s18 = sadd.s32 1, %s3933_s13 }
   0x4   : > { %p19_p0 = scmp.eq.s32.totalorder %s18_s17, 0  ;;  %p28_p1 = scmp.ne.s32.totalorder %s3933_s13, %s3929_s12 }
   0x5   : > { %p29_p2 = scmp.eq.s32.totalorder %s3937_s14, 0  ;;  %p79_p3 = scmp.eq.s32.totalorder %s3976_s15, 1 }
   0x6   : > { %s3989_s19 = scalar_select %p19_p0, %s3933_s13, %s21_s18  }
   0x7   : > { %p30_p4 = por %p29_p2, %p28_p1  ;;  %p3991_p5 = por %p79_p3, %p28_p1 }
   0x8   : > { %p3550_p6 = scmp.ge.s32.totalorder %s3937_s14, 2 }
   0xa   : > { %130 = sbr.rel (%p3550_p6) target bundleno = 147 (0x93), region = 20 }
   0xf   : > { %133 = sbr.rel (!%p30_p4) target bundleno = 147 (0x93), region = 24  ;;  %s135_s21 = sand.u32 (%p30_p4), 1, %s3933_s13  }
  0x10   : > { %s3853_s22 = sshll.u32 (%p30_p4), %s3937_s14, 7  ;;  %s3551_s23 = sshll.u32 (%p30_p4), %s135_s21, 11 }
  0x11   : > { %s4001_s26 = scalar_lea.vmem (%p30_p4), %s4972_s0, %s3853_s22  ;;  %s4006_s27 = scalar_lea.vmem (%p30_p4), [#allocation2], %s3551_s23 }
  0x12   : > { %v153_v0 = vld [vmem:[%s4001_s26] sm:$0xff] (%p30_p4)  ;;  %v155_v1 = vld [vmem:[%s4001_s26 + $0x8] sm:$0xff] (%p30_p4)  ;;  %v157_v2 = vld [vmem:[%s4001_s26 + $0x10] sm:$0xff] (%p30_p4) }
  0x13   : > { %154 = vst [vmem:[%s4006_s27] sm:$0xff] (%p30_p4), %v153_v0  ;;  %156 = vst [vmem:[%s4006_s27 + $0x8] sm:$0xff] (%p30_p4), %v155_v1  ;;  %v159_v3 = vld [vmem:[%s4001_s26 + $0x18] sm:$0xff] (%p30_p4)  ;;  %v161_v4 = vld [vmem:[%s4001_s26 + $0x20] sm:$0xff] (%p30_p4) }
  0x14   : > { %158 = vst [vmem:[%s4006_s27 + $0x10] sm:$0xff] %v157_v2  ;;  %v163_v5 = vld [vmem:[%s4001_s26 + $0x28] sm:$0xff]  ;;  %160 = vst [vmem:[%s4006_s27 + $0x18] sm:$0xff] %v159_v3  ;;  %v165_v6 = vld [vmem:[%s4001_s26 + $0x30] sm:$0xff] }
  0x15   : > { %162 = vst [vmem:[%s4006_s27 + $0x20] sm:$0xff] %v161_v4  ;;  %164 = vst [vmem:[%s4006_s27 + $0x28] sm:$0xff] %v163_v5  ;;  %v167_v7 = vld [vmem:[%s4001_s26 + $0x38] sm:$0xff]  ;;  %v169_v8 = vld [vmem:[%s4001_s26 + $0x40] sm:$0xff] }
  0x16   : > { %166 = vst [vmem:[%s4006_s27 + $0x30] sm:$0xff] %v165_v6  ;;  %168 = vst [vmem:[%s4006_s27 + $0x38] sm:$0xff] %v167_v7  ;;  %v171_v9 = vld [vmem:[%s4001_s26 + $0x48] sm:$0xff]  ;;  %v173_v10 = vld [vmem:[%s4001_s26 + $0x50] sm:$0xff] }
  0x17   : > { %170 = vst [vmem:[%s4006_s27 + $0x40] sm:$0xff] %v169_v8  ;;  %v175_v11 = vld [vmem:[%s4001_s26 + $0x58] sm:$0xff]  ;;  %172 = vst [vmem:[%s4006_s27 + $0x48] sm:$0xff] %v171_v9  ;;  %v177_v12 = vld [vmem:[%s4001_s26 + $0x60] sm:$0xff] }
  0x18   : > { %174 = vst [vmem:[%s4006_s27 + $0x50] sm:$0xff] %v173_v10  ;;  %176 = vst [vmem:[%s4006_s27 + $0x58] sm:$0xff] %v175_v11  ;;  %v179_v13 = vld [vmem:[%s4001_s26 + $0x68] sm:$0xff]  ;;  %v181_v14 = vld [vmem:[%s4001_s26 + $0x70] sm:$0xff] }
  0x19   : > { %178 = vst [vmem:[%s4006_s27 + $0x60] sm:$0xff] %v177_v12  ;;  %180 = vst [vmem:[%s4006_s27 + $0x68] sm:$0xff] %v179_v13  ;;  %v183_v15 = vld [vmem:[%s4001_s26 + $0x78] sm:$0xff]  ;;  %v185_v16 = vld [vmem:[%s4001_s26 + $0x100] sm:$0xff] }
  0x1a   : > { %182 = vst [vmem:[%s4006_s27 + $0x70] sm:$0xff] %v181_v14  ;;  %v187_v17 = vld [vmem:[%s4001_s26 + $0x108] sm:$0xff]  ;;  %184 = vst [vmem:[%s4006_s27 + $0x78] sm:$0xff] %v183_v15  ;;  %v189_v18 = vld [vmem:[%s4001_s26 + $0x110] sm:$0xff] }
  0x1b   : > { %186 = vst [vmem:[%s4006_s27 + $0x80] sm:$0xff] %v185_v16  ;;  %188 = vst [vmem:[%s4006_s27 + $0x88] sm:$0xff] %v187_v17  ;;  %v191_v19 = vld [vmem:[%s4001_s26 + $0x118] sm:$0xff]  ;;  %v193_v20 = vld [vmem:[%s4001_s26 + $0x120] sm:$0xff] }
  0x1c   : > { %190 = vst [vmem:[%s4006_s27 + $0x90] sm:$0xff] %v189_v18  ;;  %192 = vst [vmem:[%s4006_s27 + $0x98] sm:$0xff] %v191_v19  ;;  %v195_v21 = vld [vmem:[%s4001_s26 + $0x128] sm:$0xff]  ;;  %v197_v22 = vld [vmem:[%s4001_s26 + $0x130] sm:$0xff] }
  0x1d   : > { %194 = vst [vmem:[%s4006_s27 + $0xa0] sm:$0xff] %v193_v20  ;;  %v199_v23 = vld [vmem:[%s4001_s26 + $0x138] sm:$0xff]  ;;  %196 = vst [vmem:[%s4006_s27 + $0xa8] sm:$0xff] %v195_v21  ;;  %v201_v24 = vld [vmem:[%s4001_s26 + $0x140] sm:$0xff] }
  0x1e   : > { %198 = vst [vmem:[%s4006_s27 + $0xb0] sm:$0xff] %v197_v22  ;;  %200 = vst [vmem:[%s4006_s27 + $0xb8] sm:$0xff] %v199_v23  ;;  %v203_v25 = vld [vmem:[%s4001_s26 + $0x148] sm:$0xff]  ;;  %v205_v26 = vld [vmem:[%s4001_s26 + $0x150] sm:$0xff] }
  0x1f   : > { %202 = vst [vmem:[%s4006_s27 + $0xc0] sm:$0xff] %v201_v24  ;;  %204 = vst [vmem:[%s4006_s27 + $0xc8] sm:$0xff] %v203_v25  ;;  %v207_v27 = vld [vmem:[%s4001_s26 + $0x158] sm:$0xff]  ;;  %v209_v28 = vld [vmem:[%s4001_s26 + $0x160] sm:$0xff] }
  0x20   : > { %206 = vst [vmem:[%s4006_s27 + $0xd0] sm:$0xff] %v205_v26  ;;  %v211_v29 = vld [vmem:[%s4001_s26 + $0x168] sm:$0xff]  ;;  %208 = vst [vmem:[%s4006_s27 + $0xd8] sm:$0xff] %v207_v27  ;;  %v213_v30 = vld [vmem:[%s4001_s26 + $0x170] sm:$0xff] }
  0x21   : > { %210 = vst [vmem:[%s4006_s27 + $0xe0] sm:$0xff] %v209_v28  ;;  %212 = vst [vmem:[%s4006_s27 + $0xe8] sm:$0xff] %v211_v29  ;;  %v215_v31 = vld [vmem:[%s4001_s26 + $0x178] sm:$0xff]  ;;  %v217_v32 = vld [vmem:[%s4001_s26 + $0x200] sm:$0xff] }
  0x22   : > { %214 = vst [vmem:[%s4006_s27 + $0xf0] sm:$0xff] %v213_v30  ;;  %216 = vst [vmem:[%s4006_s27 + $0xf8] sm:$0xff] %v215_v31  ;;  %v219_v33 = vld [vmem:[%s4001_s26 + $0x208] sm:$0xff]  ;;  %v221_v34 = vld [vmem:[%s4001_s26 + $0x210] sm:$0xff] }
  0x23   : > { %218 = vst [vmem:[%s4006_s27 + $0x100] sm:$0xff] %v217_v32  ;;  %v223_v35 = vld [vmem:[%s4001_s26 + $0x218] sm:$0xff]  ;;  %220 = vst [vmem:[%s4006_s27 + $0x108] sm:$0xff] %v219_v33  ;;  %v225_v36 = vld [vmem:[%s4001_s26 + $0x220] sm:$0xff] }
  0x24   : > { %222 = vst [vmem:[%s4006_s27 + $0x110] sm:$0xff] %v221_v34  ;;  %224 = vst [vmem:[%s4006_s27 + $0x118] sm:$0xff] %v223_v35  ;;  %v227_v37 = vld [vmem:[%s4001_s26 + $0x228] sm:$0xff]  ;;  %v229_v38 = vld [vmem:[%s4001_s26 + $0x230] sm:$0xff] }
  0x25   : > { %226 = vst [vmem:[%s4006_s27 + $0x120] sm:$0xff] %v225_v36  ;;  %228 = vst [vmem:[%s4006_s27 + $0x128] sm:$0xff] %v227_v37  ;;  %v231_v39 = vld [vmem:[%s4001_s26 + $0x238] sm:$0xff]  ;;  %v233_v40 = vld [vmem:[%s4001_s26 + $0x240] sm:$0xff] }
  0x26   : > { %230 = vst [vmem:[%s4006_s27 + $0x130] sm:$0xff] %v229_v38  ;;  %v235_v41 = vld [vmem:[%s4001_s26 + $0x248] sm:$0xff]  ;;  %232 = vst [vmem:[%s4006_s27 + $0x138] sm:$0xff] %v231_v39  ;;  %v237_v42 = vld [vmem:[%s4001_s26 + $0x250] sm:$0xff] }
  0x27   : > { %234 = vst [vmem:[%s4006_s27 + $0x140] sm:$0xff] %v233_v40  ;;  %236 = vst [vmem:[%s4006_s27 + $0x148] sm:$0xff] %v235_v41  ;;  %v239_v43 = vld [vmem:[%s4001_s26 + $0x258] sm:$0xff]  ;;  %v241_v44 = vld [vmem:[%s4001_s26 + $0x260] sm:$0xff] }
  0x28   : > { %238 = vst [vmem:[%s4006_s27 + $0x150] sm:$0xff] %v237_v42  ;;  %240 = vst [vmem:[%s4006_s27 + $0x158] sm:$0xff] %v239_v43  ;;  %v243_v45 = vld [vmem:[%s4001_s26 + $0x268] sm:$0xff]  ;;  %v245_v46 = vld [vmem:[%s4001_s26 + $0x270] sm:$0xff] }
  0x29   : > { %242 = vst [vmem:[%s4006_s27 + $0x160] sm:$0xff] %v241_v44  ;;  %v247_v47 = vld [vmem:[%s4001_s26 + $0x278] sm:$0xff]  ;;  %244 = vst [vmem:[%s4006_s27 + $0x168] sm:$0xff] %v243_v45  ;;  %v249_v48 = vld [vmem:[%s4001_s26 + $0x300] sm:$0xff] }
  0x2a   : > { %246 = vst [vmem:[%s4006_s27 + $0x170] sm:$0xff] %v245_v46  ;;  %248 = vst [vmem:[%s4006_s27 + $0x178] sm:$0xff] %v247_v47  ;;  %v251_v49 = vld [vmem:[%s4001_s26 + $0x308] sm:$0xff]  ;;  %v253_v50 = vld [vmem:[%s4001_s26 + $0x310] sm:$0xff] }
  0x2b   : > { %250 = vst [vmem:[%s4006_s27 + $0x180] sm:$0xff] %v249_v48  ;;  %252 = vst [vmem:[%s4006_s27 + $0x188] sm:$0xff] %v251_v49  ;;  %v255_v51 = vld [vmem:[%s4001_s26 + $0x318] sm:$0xff]  ;;  %v257_v52 = vld [vmem:[%s4001_s26 + $0x320] sm:$0xff] }
  0x2c   : > { %254 = vst [vmem:[%s4006_s27 + $0x190] sm:$0xff] %v253_v50  ;;  %v259_v53 = vld [vmem:[%s4001_s26 + $0x328] sm:$0xff]  ;;  %256 = vst [vmem:[%s4006_s27 + $0x198] sm:$0xff] %v255_v51  ;;  %v261_v54 = vld [vmem:[%s4001_s26 + $0x330] sm:$0xff] }
  0x2d   : > { %258 = vst [vmem:[%s4006_s27 + $0x1a0] sm:$0xff] %v257_v52  ;;  %260 = vst [vmem:[%s4006_s27 + $0x1a8] sm:$0xff] %v259_v53  ;;  %v263_v55 = vld [vmem:[%s4001_s26 + $0x338] sm:$0xff]  ;;  %v265_v56 = vld [vmem:[%s4001_s26 + $0x340] sm:$0xff] }
  0x2e   : > { %262 = vst [vmem:[%s4006_s27 + $0x1b0] sm:$0xff] %v261_v54  ;;  %264 = vst [vmem:[%s4006_s27 + $0x1b8] sm:$0xff] %v263_v55  ;;  %v267_v57 = vld [vmem:[%s4001_s26 + $0x348] sm:$0xff]  ;;  %v269_v58 = vld [vmem:[%s4001_s26 + $0x350] sm:$0xff] }
  0x2f   : > { %266 = vst [vmem:[%s4006_s27 + $0x1c0] sm:$0xff] %v265_v56  ;;  %v271_v59 = vld [vmem:[%s4001_s26 + $0x358] sm:$0xff]  ;;  %268 = vst [vmem:[%s4006_s27 + $0x1c8] sm:$0xff] %v267_v57  ;;  %v273_v60 = vld [vmem:[%s4001_s26 + $0x360] sm:$0xff] }
  0x30   : > { %270 = vst [vmem:[%s4006_s27 + $0x1d0] sm:$0xff] %v269_v58  ;;  %272 = vst [vmem:[%s4006_s27 + $0x1d8] sm:$0xff] %v271_v59  ;;  %v275_v61 = vld [vmem:[%s4001_s26 + $0x368] sm:$0xff]  ;;  %v277_v62 = vld [vmem:[%s4001_s26 + $0x370] sm:$0xff] }
  0x31   : > { %274 = vst [vmem:[%s4006_s27 + $0x1e0] sm:$0xff] %v273_v60  ;;  %276 = vst [vmem:[%s4006_s27 + $0x1e8] sm:$0xff] %v275_v61  ;;  %v279_v63 = vld [vmem:[%s4001_s26 + $0x378] sm:$0xff]  ;;  %v281_v0 = vld [vmem:[%s4001_s26 + $0x400] sm:$0xff] }
  0x32   : > { %278 = vst [vmem:[%s4006_s27 + $0x1f0] sm:$0xff] %v277_v62  ;;  %v283_v1 = vld [vmem:[%s4001_s26 + $0x408] sm:$0xff]  ;;  %280 = vst [vmem:[%s4006_s27 + $0x1f8] sm:$0xff] %v279_v63  ;;  %v285_v2 = vld [vmem:[%s4001_s26 + $0x410] sm:$0xff] }
  0x33   : > { %282 = vst [vmem:[%s4006_s27 + $0x200] sm:$0xff] %v281_v0  ;;  %284 = vst [vmem:[%s4006_s27 + $0x208] sm:$0xff] %v283_v1  ;;  %v287_v3 = vld [vmem:[%s4001_s26 + $0x418] sm:$0xff]  ;;  %v289_v4 = vld [vmem:[%s4001_s26 + $0x420] sm:$0xff] }
  0x34   : > { %286 = vst [vmem:[%s4006_s27 + $0x210] sm:$0xff] %v285_v2  ;;  %288 = vst [vmem:[%s4006_s27 + $0x218] sm:$0xff] %v287_v3  ;;  %v291_v5 = vld [vmem:[%s4001_s26 + $0x428] sm:$0xff]  ;;  %v293_v6 = vld [vmem:[%s4001_s26 + $0x430] sm:$0xff] }
  0x35   : > { %290 = vst [vmem:[%s4006_s27 + $0x220] sm:$0xff] %v289_v4  ;;  %v295_v7 = vld [vmem:[%s4001_s26 + $0x438] sm:$0xff]  ;;  %292 = vst [vmem:[%s4006_s27 + $0x228] sm:$0xff] %v291_v5  ;;  %v297_v8 = vld [vmem:[%s4001_s26 + $0x440] sm:$0xff] }
  0x36   : > { %294 = vst [vmem:[%s4006_s27 + $0x230] sm:$0xff] %v293_v6  ;;  %296 = vst [vmem:[%s4006_s27 + $0x238] sm:$0xff] %v295_v7  ;;  %v299_v9 = vld [vmem:[%s4001_s26 + $0x448] sm:$0xff]  ;;  %v301_v10 = vld [vmem:[%s4001_s26 + $0x450] sm:$0xff] }
  0x37   : > { %298 = vst [vmem:[%s4006_s27 + $0x240] sm:$0xff] %v297_v8  ;;  %300 = vst [vmem:[%s4006_s27 + $0x248] sm:$0xff] %v299_v9  ;;  %v303_v11 = vld [vmem:[%s4001_s26 + $0x458] sm:$0xff]  ;;  %v305_v12 = vld [vmem:[%s4001_s26 + $0x460] sm:$0xff] }
  0x38   : > { %302 = vst [vmem:[%s4006_s27 + $0x250] sm:$0xff] %v301_v10  ;;  %v307_v13 = vld [vmem:[%s4001_s26 + $0x468] sm:$0xff]  ;;  %304 = vst [vmem:[%s4006_s27 + $0x258] sm:$0xff] %v303_v11  ;;  %v309_v14 = vld [vmem:[%s4001_s26 + $0x470] sm:$0xff] }
  0x39   : > { %306 = vst [vmem:[%s4006_s27 + $0x260] sm:$0xff] %v305_v12  ;;  %308 = vst [vmem:[%s4006_s27 + $0x268] sm:$0xff] %v307_v13  ;;  %v311_v15 = vld [vmem:[%s4001_s26 + $0x478] sm:$0xff]  ;;  %v313_v16 = vld [vmem:[%s4001_s26 + $0x500] sm:$0xff] }
  0x3a   : > { %310 = vst [vmem:[%s4006_s27 + $0x270] sm:$0xff] %v309_v14  ;;  %312 = vst [vmem:[%s4006_s27 + $0x278] sm:$0xff] %v311_v15  ;;  %v315_v17 = vld [vmem:[%s4001_s26 + $0x508] sm:$0xff]  ;;  %v317_v18 = vld [vmem:[%s4001_s26 + $0x510] sm:$0xff] }
  0x3b   : > { %314 = vst [vmem:[%s4006_s27 + $0x280] sm:$0xff] %v313_v16  ;;  %v319_v19 = vld [vmem:[%s4001_s26 + $0x518] sm:$0xff]  ;;  %316 = vst [vmem:[%s4006_s27 + $0x288] sm:$0xff] %v315_v17  ;;  %v321_v20 = vld [vmem:[%s4001_s26 + $0x520] sm:$0xff] }
  0x3c   : > { %318 = vst [vmem:[%s4006_s27 + $0x290] sm:$0xff] %v317_v18  ;;  %320 = vst [vmem:[%s4006_s27 + $0x298] sm:$0xff] %v319_v19  ;;  %v323_v21 = vld [vmem:[%s4001_s26 + $0x528] sm:$0xff]  ;;  %v325_v22 = vld [vmem:[%s4001_s26 + $0x530] sm:$0xff] }
  0x3d   : > { %322 = vst [vmem:[%s4006_s27 + $0x2a0] sm:$0xff] %v321_v20  ;;  %324 = vst [vmem:[%s4006_s27 + $0x2a8] sm:$0xff] %v323_v21  ;;  %v327_v23 = vld [vmem:[%s4001_s26 + $0x538] sm:$0xff]  ;;  %v329_v24 = vld [vmem:[%s4001_s26 + $0x540] sm:$0xff] }
  0x3e   : > { %326 = vst [vmem:[%s4006_s27 + $0x2b0] sm:$0xff] %v325_v22  ;;  %v331_v25 = vld [vmem:[%s4001_s26 + $0x548] sm:$0xff]  ;;  %328 = vst [vmem:[%s4006_s27 + $0x2b8] sm:$0xff] %v327_v23  ;;  %v333_v26 = vld [vmem:[%s4001_s26 + $0x550] sm:$0xff] }
  0x3f   : > { %330 = vst [vmem:[%s4006_s27 + $0x2c0] sm:$0xff] %v329_v24  ;;  %332 = vst [vmem:[%s4006_s27 + $0x2c8] sm:$0xff] %v331_v25  ;;  %v335_v27 = vld [vmem:[%s4001_s26 + $0x558] sm:$0xff]  ;;  %v337_v28 = vld [vmem:[%s4001_s26 + $0x560] sm:$0xff] }
  0x40   : > { %334 = vst [vmem:[%s4006_s27 + $0x2d0] sm:$0xff] %v333_v26  ;;  %336 = vst [vmem:[%s4006_s27 + $0x2d8] sm:$0xff] %v335_v27  ;;  %v339_v29 = vld [vmem:[%s4001_s26 + $0x568] sm:$0xff]  ;;  %v341_v30 = vld [vmem:[%s4001_s26 + $0x570] sm:$0xff] }
  0x41   : > { %338 = vst [vmem:[%s4006_s27 + $0x2e0] sm:$0xff] %v337_v28  ;;  %v343_v31 = vld [vmem:[%s4001_s26 + $0x578] sm:$0xff]  ;;  %340 = vst [vmem:[%s4006_s27 + $0x2e8] sm:$0xff] %v339_v29  ;;  %v345_v32 = vld [vmem:[%s4001_s26 + $0x600] sm:$0xff] }
  0x42   : > { %342 = vst [vmem:[%s4006_s27 + $0x2f0] sm:$0xff] %v341_v30  ;;  %344 = vst [vmem:[%s4006_s27 + $0x2f8] sm:$0xff] %v343_v31  ;;  %v347_v33 = vld [vmem:[%s4001_s26 + $0x608] sm:$0xff]  ;;  %v349_v34 = vld [vmem:[%s4001_s26 + $0x610] sm:$0xff] }
  0x43   : > { %346 = vst [vmem:[%s4006_s27 + $0x300] sm:$0xff] %v345_v32  ;;  %348 = vst [vmem:[%s4006_s27 + $0x308] sm:$0xff] %v347_v33  ;;  %v351_v35 = vld [vmem:[%s4001_s26 + $0x618] sm:$0xff]  ;;  %v353_v36 = vld [vmem:[%s4001_s26 + $0x620] sm:$0xff] }
  0x44   : > { %350 = vst [vmem:[%s4006_s27 + $0x310] sm:$0xff] %v349_v34  ;;  %v355_v37 = vld [vmem:[%s4001_s26 + $0x628] sm:$0xff]  ;;  %352 = vst [vmem:[%s4006_s27 + $0x318] sm:$0xff] %v351_v35  ;;  %v357_v38 = vld [vmem:[%s4001_s26 + $0x630] sm:$0xff] }
  0x45   : > { %354 = vst [vmem:[%s4006_s27 + $0x320] sm:$0xff] %v353_v36  ;;  %356 = vst [vmem:[%s4006_s27 + $0x328] sm:$0xff] %v355_v37  ;;  %v359_v39 = vld [vmem:[%s4001_s26 + $0x638] sm:$0xff]  ;;  %v361_v40 = vld [vmem:[%s4001_s26 + $0x640] sm:$0xff] }
  0x46   : > { %358 = vst [vmem:[%s4006_s27 + $0x330] sm:$0xff] %v357_v38  ;;  %360 = vst [vmem:[%s4006_s27 + $0x338] sm:$0xff] %v359_v39  ;;  %v363_v41 = vld [vmem:[%s4001_s26 + $0x648] sm:$0xff]  ;;  %v365_v42 = vld [vmem:[%s4001_s26 + $0x650] sm:$0xff] }
  0x47   : > { %362 = vst [vmem:[%s4006_s27 + $0x340] sm:$0xff] %v361_v40  ;;  %v367_v43 = vld [vmem:[%s4001_s26 + $0x658] sm:$0xff]  ;;  %364 = vst [vmem:[%s4006_s27 + $0x348] sm:$0xff] %v363_v41  ;;  %v369_v44 = vld [vmem:[%s4001_s26 + $0x660] sm:$0xff] }
  0x48   : > { %366 = vst [vmem:[%s4006_s27 + $0x350] sm:$0xff] %v365_v42  ;;  %368 = vst [vmem:[%s4006_s27 + $0x358] sm:$0xff] %v367_v43  ;;  %v371_v45 = vld [vmem:[%s4001_s26 + $0x668] sm:$0xff]  ;;  %v373_v46 = vld [vmem:[%s4001_s26 + $0x670] sm:$0xff] }
  0x49   : > { %370 = vst [vmem:[%s4006_s27 + $0x360] sm:$0xff] %v369_v44  ;;  %372 = vst [vmem:[%s4006_s27 + $0x368] sm:$0xff] %v371_v45  ;;  %v375_v47 = vld [vmem:[%s4001_s26 + $0x678] sm:$0xff]  ;;  %v377_v48 = vld [vmem:[%s4001_s26 + $0x700] sm:$0xff] }
  0x4a   : > { %374 = vst [vmem:[%s4006_s27 + $0x370] sm:$0xff] %v373_v46  ;;  %v379_v49 = vld [vmem:[%s4001_s26 + $0x708] sm:$0xff]  ;;  %376 = vst [vmem:[%s4006_s27 + $0x378] sm:$0xff] %v375_v47  ;;  %v381_v50 = vld [vmem:[%s4001_s26 + $0x710] sm:$0xff] }
  0x4b   : > { %378 = vst [vmem:[%s4006_s27 + $0x380] sm:$0xff] %v377_v48  ;;  %380 = vst [vmem:[%s4006_s27 + $0x388] sm:$0xff] %v379_v49  ;;  %v383_v51 = vld [vmem:[%s4001_s26 + $0x718] sm:$0xff]  ;;  %v385_v52 = vld [vmem:[%s4001_s26 + $0x720] sm:$0xff] }
  0x4c   : > { %382 = vst [vmem:[%s4006_s27 + $0x390] sm:$0xff] %v381_v50  ;;  %384 = vst [vmem:[%s4006_s27 + $0x398] sm:$0xff] %v383_v51  ;;  %v387_v53 = vld [vmem:[%s4001_s26 + $0x728] sm:$0xff]  ;;  %v389_v54 = vld [vmem:[%s4001_s26 + $0x730] sm:$0xff] }
  0x4d   : > { %386 = vst [vmem:[%s4006_s27 + $0x3a0] sm:$0xff] %v385_v52  ;;  %v391_v55 = vld [vmem:[%s4001_s26 + $0x738] sm:$0xff]  ;;  %388 = vst [vmem:[%s4006_s27 + $0x3a8] sm:$0xff] %v387_v53  ;;  %v393_v56 = vld [vmem:[%s4001_s26 + $0x740] sm:$0xff] }
  0x4e   : > { %390 = vst [vmem:[%s4006_s27 + $0x3b0] sm:$0xff] %v389_v54  ;;  %392 = vst [vmem:[%s4006_s27 + $0x3b8] sm:$0xff] %v391_v55  ;;  %v395_v57 = vld [vmem:[%s4001_s26 + $0x748] sm:$0xff]  ;;  %v397_v58 = vld [vmem:[%s4001_s26 + $0x750] sm:$0xff] }
  0x4f   : > { %394 = vst [vmem:[%s4006_s27 + $0x3c0] sm:$0xff] %v393_v56  ;;  %396 = vst [vmem:[%s4006_s27 + $0x3c8] sm:$0xff] %v395_v57  ;;  %v399_v59 = vld [vmem:[%s4001_s26 + $0x758] sm:$0xff]  ;;  %v401_v60 = vld [vmem:[%s4001_s26 + $0x760] sm:$0xff] }
  0x50   : > { %398 = vst [vmem:[%s4006_s27 + $0x3d0] sm:$0xff] %v397_v58  ;;  %v403_v61 = vld [vmem:[%s4001_s26 + $0x768] sm:$0xff]  ;;  %400 = vst [vmem:[%s4006_s27 + $0x3d8] sm:$0xff] %v399_v59  ;;  %v405_v62 = vld [vmem:[%s4001_s26 + $0x770] sm:$0xff] }
  0x51   : > { %402 = vst [vmem:[%s4006_s27 + $0x3e0] sm:$0xff] %v401_v60  ;;  %404 = vst [vmem:[%s4006_s27 + $0x3e8] sm:$0xff] %v403_v61  ;;  %v407_v63 = vld [vmem:[%s4001_s26 + $0x778] sm:$0xff]  ;;  %v409_v0 = vld [vmem:[%s4001_s26 + $0x800] sm:$0xff] }
  0x52   : > { %406 = vst [vmem:[%s4006_s27 + $0x3f0] sm:$0xff] %v405_v62  ;;  %408 = vst [vmem:[%s4006_s27 + $0x3f8] sm:$0xff] %v407_v63  ;;  %v411_v1 = vld [vmem:[%s4001_s26 + $0x808] sm:$0xff]  ;;  %v413_v2 = vld [vmem:[%s4001_s26 + $0x810] sm:$0xff] }
  0x53   : > { %410 = vst [vmem:[%s4006_s27 + $0x400] sm:$0xff] %v409_v0  ;;  %v415_v3 = vld [vmem:[%s4001_s26 + $0x818] sm:$0xff]  ;;  %412 = vst [vmem:[%s4006_s27 + $0x408] sm:$0xff] %v411_v1  ;;  %v417_v4 = vld [vmem:[%s4001_s26 + $0x820] sm:$0xff] }
  0x54   : > { %414 = vst [vmem:[%s4006_s27 + $0x410] sm:$0xff] %v413_v2  ;;  %416 = vst [vmem:[%s4006_s27 + $0x418] sm:$0xff] %v415_v3  ;;  %v419_v5 = vld [vmem:[%s4001_s26 + $0x828] sm:$0xff]  ;;  %v421_v6 = vld [vmem:[%s4001_s26 + $0x830] sm:$0xff] }
  0x55   : > { %418 = vst [vmem:[%s4006_s27 + $0x420] sm:$0xff] %v417_v4  ;;  %420 = vst [vmem:[%s4006_s27 + $0x428] sm:$0xff] %v419_v5  ;;  %v423_v7 = vld [vmem:[%s4001_s26 + $0x838] sm:$0xff]  ;;  %v425_v8 = vld [vmem:[%s4001_s26 + $0x840] sm:$0xff] }
  0x56   : > { %422 = vst [vmem:[%s4006_s27 + $0x430] sm:$0xff] %v421_v6  ;;  %v427_v9 = vld [vmem:[%s4001_s26 + $0x848] sm:$0xff]  ;;  %424 = vst [vmem:[%s4006_s27 + $0x438] sm:$0xff] %v423_v7  ;;  %v429_v10 = vld [vmem:[%s4001_s26 + $0x850] sm:$0xff] }
  0x57   : > { %426 = vst [vmem:[%s4006_s27 + $0x440] sm:$0xff] %v425_v8  ;;  %428 = vst [vmem:[%s4006_s27 + $0x448] sm:$0xff] %v427_v9  ;;  %v431_v11 = vld [vmem:[%s4001_s26 + $0x858] sm:$0xff]  ;;  %v433_v12 = vld [vmem:[%s4001_s26 + $0x860] sm:$0xff] }
  0x58   : > { %430 = vst [vmem:[%s4006_s27 + $0x450] sm:$0xff] %v429_v10  ;;  %432 = vst [vmem:[%s4006_s27 + $0x458] sm:$0xff] %v431_v11  ;;  %v435_v13 = vld [vmem:[%s4001_s26 + $0x868] sm:$0xff]  ;;  %v437_v14 = vld [vmem:[%s4001_s26 + $0x870] sm:$0xff] }
  0x59   : > { %434 = vst [vmem:[%s4006_s27 + $0x460] sm:$0xff] %v433_v12  ;;  %v439_v15 = vld [vmem:[%s4001_s26 + $0x878] sm:$0xff]  ;;  %436 = vst [vmem:[%s4006_s27 + $0x468] sm:$0xff] %v435_v13  ;;  %v441_v16 = vld [vmem:[%s4001_s26 + $0x900] sm:$0xff] }
  0x5a   : > { %438 = vst [vmem:[%s4006_s27 + $0x470] sm:$0xff] %v437_v14  ;;  %440 = vst [vmem:[%s4006_s27 + $0x478] sm:$0xff] %v439_v15  ;;  %v443_v17 = vld [vmem:[%s4001_s26 + $0x908] sm:$0xff]  ;;  %v445_v18 = vld [vmem:[%s4001_s26 + $0x910] sm:$0xff] }
  0x5b   : > { %442 = vst [vmem:[%s4006_s27 + $0x480] sm:$0xff] %v441_v16  ;;  %444 = vst [vmem:[%s4006_s27 + $0x488] sm:$0xff] %v443_v17  ;;  %v447_v19 = vld [vmem:[%s4001_s26 + $0x918] sm:$0xff]  ;;  %v449_v20 = vld [vmem:[%s4001_s26 + $0x920] sm:$0xff] }
  0x5c   : > { %446 = vst [vmem:[%s4006_s27 + $0x490] sm:$0xff] %v445_v18  ;;  %v451_v21 = vld [vmem:[%s4001_s26 + $0x928] sm:$0xff]  ;;  %448 = vst [vmem:[%s4006_s27 + $0x498] sm:$0xff] %v447_v19  ;;  %v453_v22 = vld [vmem:[%s4001_s26 + $0x930] sm:$0xff] }
  0x5d   : > { %450 = vst [vmem:[%s4006_s27 + $0x4a0] sm:$0xff] %v449_v20  ;;  %452 = vst [vmem:[%s4006_s27 + $0x4a8] sm:$0xff] %v451_v21  ;;  %v455_v23 = vld [vmem:[%s4001_s26 + $0x938] sm:$0xff]  ;;  %v457_v24 = vld [vmem:[%s4001_s26 + $0x940] sm:$0xff] }
  0x5e   : > { %454 = vst [vmem:[%s4006_s27 + $0x4b0] sm:$0xff] %v453_v22  ;;  %456 = vst [vmem:[%s4006_s27 + $0x4b8] sm:$0xff] %v455_v23  ;;  %v459_v25 = vld [vmem:[%s4001_s26 + $0x948] sm:$0xff]  ;;  %v461_v26 = vld [vmem:[%s4001_s26 + $0x950] sm:$0xff] }
  0x5f   : > { %458 = vst [vmem:[%s4006_s27 + $0x4c0] sm:$0xff] %v457_v24  ;;  %v463_v27 = vld [vmem:[%s4001_s26 + $0x958] sm:$0xff]  ;;  %460 = vst [vmem:[%s4006_s27 + $0x4c8] sm:$0xff] %v459_v25  ;;  %v465_v28 = vld [vmem:[%s4001_s26 + $0x960] sm:$0xff] }
  0x60   : > { %462 = vst [vmem:[%s4006_s27 + $0x4d0] sm:$0xff] %v461_v26  ;;  %464 = vst [vmem:[%s4006_s27 + $0x4d8] sm:$0xff] %v463_v27  ;;  %v467_v29 = vld [vmem:[%s4001_s26 + $0x968] sm:$0xff]  ;;  %v469_v30 = vld [vmem:[%s4001_s26 + $0x970] sm:$0xff] }
  0x61   : > { %466 = vst [vmem:[%s4006_s27 + $0x4e0] sm:$0xff] %v465_v28  ;;  %468 = vst [vmem:[%s4006_s27 + $0x4e8] sm:$0xff] %v467_v29  ;;  %v471_v31 = vld [vmem:[%s4001_s26 + $0x978] sm:$0xff]  ;;  %v473_v32 = vld [vmem:[%s4001_s26 + $0xa00] sm:$0xff] }
  0x62   : > { %470 = vst [vmem:[%s4006_s27 + $0x4f0] sm:$0xff] %v469_v30  ;;  %v475_v33 = vld [vmem:[%s4001_s26 + $0xa08] sm:$0xff]  ;;  %472 = vst [vmem:[%s4006_s27 + $0x4f8] sm:$0xff] %v471_v31  ;;  %v477_v34 = vld [vmem:[%s4001_s26 + $0xa10] sm:$0xff] }
  0x63   : > { %474 = vst [vmem:[%s4006_s27 + $0x500] sm:$0xff] %v473_v32  ;;  %476 = vst [vmem:[%s4006_s27 + $0x508] sm:$0xff] %v475_v33  ;;  %v479_v35 = vld [vmem:[%s4001_s26 + $0xa18] sm:$0xff]  ;;  %v481_v36 = vld [vmem:[%s4001_s26 + $0xa20] sm:$0xff] }
  0x64   : > { %478 = vst [vmem:[%s4006_s27 + $0x510] sm:$0xff] %v477_v34  ;;  %480 = vst [vmem:[%s4006_s27 + $0x518] sm:$0xff] %v479_v35  ;;  %v483_v37 = vld [vmem:[%s4001_s26 + $0xa28] sm:$0xff]  ;;  %v485_v38 = vld [vmem:[%s4001_s26 + $0xa30] sm:$0xff] }
  0x65   : > { %482 = vst [vmem:[%s4006_s27 + $0x520] sm:$0xff] %v481_v36  ;;  %v487_v39 = vld [vmem:[%s4001_s26 + $0xa38] sm:$0xff]  ;;  %484 = vst [vmem:[%s4006_s27 + $0x528] sm:$0xff] %v483_v37  ;;  %v489_v40 = vld [vmem:[%s4001_s26 + $0xa40] sm:$0xff] }
  0x66   : > { %486 = vst [vmem:[%s4006_s27 + $0x530] sm:$0xff] %v485_v38  ;;  %488 = vst [vmem:[%s4006_s27 + $0x538] sm:$0xff] %v487_v39  ;;  %v491_v41 = vld [vmem:[%s4001_s26 + $0xa48] sm:$0xff]  ;;  %v493_v42 = vld [vmem:[%s4001_s26 + $0xa50] sm:$0xff] }
  0x67   : > { %490 = vst [vmem:[%s4006_s27 + $0x540] sm:$0xff] %v489_v40  ;;  %492 = vst [vmem:[%s4006_s27 + $0x548] sm:$0xff] %v491_v41  ;;  %v495_v43 = vld [vmem:[%s4001_s26 + $0xa58] sm:$0xff]  ;;  %v497_v44 = vld [vmem:[%s4001_s26 + $0xa60] sm:$0xff] }
  0x68   : > { %494 = vst [vmem:[%s4006_s27 + $0x550] sm:$0xff] %v493_v42  ;;  %v499_v45 = vld [vmem:[%s4001_s26 + $0xa68] sm:$0xff]  ;;  %496 = vst [vmem:[%s4006_s27 + $0x558] sm:$0xff] %v495_v43  ;;  %v501_v46 = vld [vmem:[%s4001_s26 + $0xa70] sm:$0xff] }
  0x69   : > { %498 = vst [vmem:[%s4006_s27 + $0x560] sm:$0xff] %v497_v44  ;;  %500 = vst [vmem:[%s4006_s27 + $0x568] sm:$0xff] %v499_v45  ;;  %v503_v47 = vld [vmem:[%s4001_s26 + $0xa78] sm:$0xff]  ;;  %v505_v48 = vld [vmem:[%s4001_s26 + $0xb00] sm:$0xff] }
  0x6a   : > { %502 = vst [vmem:[%s4006_s27 + $0x570] sm:$0xff] %v501_v46  ;;  %504 = vst [vmem:[%s4006_s27 + $0x578] sm:$0xff] %v503_v47  ;;  %v507_v49 = vld [vmem:[%s4001_s26 + $0xb08] sm:$0xff]  ;;  %v509_v50 = vld [vmem:[%s4001_s26 + $0xb10] sm:$0xff] }
  0x6b   : > { %506 = vst [vmem:[%s4006_s27 + $0x580] sm:$0xff] %v505_v48  ;;  %v511_v51 = vld [vmem:[%s4001_s26 + $0xb18] sm:$0xff]  ;;  %508 = vst [vmem:[%s4006_s27 + $0x588] sm:$0xff] %v507_v49  ;;  %v513_v52 = vld [vmem:[%s4001_s26 + $0xb20] sm:$0xff] }
  0x6c   : > { %510 = vst [vmem:[%s4006_s27 + $0x590] sm:$0xff] %v509_v50  ;;  %512 = vst [vmem:[%s4006_s27 + $0x598] sm:$0xff] %v511_v51  ;;  %v515_v53 = vld [vmem:[%s4001_s26 + $0xb28] sm:$0xff]  ;;  %v517_v54 = vld [vmem:[%s4001_s26 + $0xb30] sm:$0xff] }
  0x6d   : > { %514 = vst [vmem:[%s4006_s27 + $0x5a0] sm:$0xff] %v513_v52  ;;  %516 = vst [vmem:[%s4006_s27 + $0x5a8] sm:$0xff] %v515_v53  ;;  %v519_v55 = vld [vmem:[%s4001_s26 + $0xb38] sm:$0xff]  ;;  %v521_v56 = vld [vmem:[%s4001_s26 + $0xb40] sm:$0xff] }
  0x6e   : > { %518 = vst [vmem:[%s4006_s27 + $0x5b0] sm:$0xff] %v517_v54  ;;  %v523_v57 = vld [vmem:[%s4001_s26 + $0xb48] sm:$0xff]  ;;  %520 = vst [vmem:[%s4006_s27 + $0x5b8] sm:$0xff] %v519_v55  ;;  %v525_v58 = vld [vmem:[%s4001_s26 + $0xb50] sm:$0xff] }
  0x6f   : > { %522 = vst [vmem:[%s4006_s27 + $0x5c0] sm:$0xff] %v521_v56  ;;  %524 = vst [vmem:[%s4006_s27 + $0x5c8] sm:$0xff] %v523_v57  ;;  %v527_v59 = vld [vmem:[%s4001_s26 + $0xb58] sm:$0xff]  ;;  %v529_v60 = vld [vmem:[%s4001_s26 + $0xb60] sm:$0xff] }
  0x70   : > { %526 = vst [vmem:[%s4006_s27 + $0x5d0] sm:$0xff] %v525_v58  ;;  %528 = vst [vmem:[%s4006_s27 + $0x5d8] sm:$0xff] %v527_v59  ;;  %v531_v61 = vld [vmem:[%s4001_s26 + $0xb68] sm:$0xff]  ;;  %v533_v62 = vld [vmem:[%s4001_s26 + $0xb70] sm:$0xff] }
  0x71   : > { %530 = vst [vmem:[%s4006_s27 + $0x5e0] sm:$0xff] %v529_v60  ;;  %v535_v63 = vld [vmem:[%s4001_s26 + $0xb78] sm:$0xff]  ;;  %532 = vst [vmem:[%s4006_s27 + $0x5e8] sm:$0xff] %v531_v61  ;;  %v537_v0 = vld [vmem:[%s4001_s26 + $0xc00] sm:$0xff] }
  0x72   : > { %534 = vst [vmem:[%s4006_s27 + $0x5f0] sm:$0xff] %v533_v62  ;;  %536 = vst [vmem:[%s4006_s27 + $0x5f8] sm:$0xff] %v535_v63  ;;  %v539_v1 = vld [vmem:[%s4001_s26 + $0xc08] sm:$0xff]  ;;  %v541_v2 = vld [vmem:[%s4001_s26 + $0xc10] sm:$0xff] }
  0x73   : > { %538 = vst [vmem:[%s4006_s27 + $0x600] sm:$0xff] %v537_v0  ;;  %540 = vst [vmem:[%s4006_s27 + $0x608] sm:$0xff] %v539_v1  ;;  %v543_v3 = vld [vmem:[%s4001_s26 + $0xc18] sm:$0xff]  ;;  %v545_v4 = vld [vmem:[%s4001_s26 + $0xc20] sm:$0xff] }
  0x74   : > { %542 = vst [vmem:[%s4006_s27 + $0x610] sm:$0xff] %v541_v2  ;;  %v547_v5 = vld [vmem:[%s4001_s26 + $0xc28] sm:$0xff]  ;;  %544 = vst [vmem:[%s4006_s27 + $0x618] sm:$0xff] %v543_v3  ;;  %v549_v6 = vld [vmem:[%s4001_s26 + $0xc30] sm:$0xff] }
  0x75   : > { %546 = vst [vmem:[%s4006_s27 + $0x620] sm:$0xff] %v545_v4  ;;  %548 = vst [vmem:[%s4006_s27 + $0x628] sm:$0xff] %v547_v5  ;;  %v551_v7 = vld [vmem:[%s4001_s26 + $0xc38] sm:$0xff]  ;;  %v553_v8 = vld [vmem:[%s4001_s26 + $0xc40] sm:$0xff] }
  0x76   : > { %550 = vst [vmem:[%s4006_s27 + $0x630] sm:$0xff] %v549_v6  ;;  %552 = vst [vmem:[%s4006_s27 + $0x638] sm:$0xff] %v551_v7  ;;  %v555_v9 = vld [vmem:[%s4001_s26 + $0xc48] sm:$0xff]  ;;  %v557_v10 = vld [vmem:[%s4001_s26 + $0xc50] sm:$0xff] }
  0x77   : > { %554 = vst [vmem:[%s4006_s27 + $0x640] sm:$0xff] %v553_v8  ;;  %v559_v11 = vld [vmem:[%s4001_s26 + $0xc58] sm:$0xff]  ;;  %556 = vst [vmem:[%s4006_s27 + $0x648] sm:$0xff] %v555_v9  ;;  %v561_v12 = vld [vmem:[%s4001_s26 + $0xc60] sm:$0xff] }
  0x78   : > { %558 = vst [vmem:[%s4006_s27 + $0x650] sm:$0xff] %v557_v10  ;;  %560 = vst [vmem:[%s4006_s27 + $0x658] sm:$0xff] %v559_v11  ;;  %v563_v13 = vld [vmem:[%s4001_s26 + $0xc68] sm:$0xff]  ;;  %v565_v14 = vld [vmem:[%s4001_s26 + $0xc70] sm:$0xff] }
  0x79   : > { %562 = vst [vmem:[%s4006_s27 + $0x660] sm:$0xff] %v561_v12  ;;  %564 = vst [vmem:[%s4006_s27 + $0x668] sm:$0xff] %v563_v13  ;;  %v567_v15 = vld [vmem:[%s4001_s26 + $0xc78] sm:$0xff]  ;;  %v569_v16 = vld [vmem:[%s4001_s26 + $0xd00] sm:$0xff] }
  0x7a   : > { %566 = vst [vmem:[%s4006_s27 + $0x670] sm:$0xff] %v565_v14  ;;  %v571_v17 = vld [vmem:[%s4001_s26 + $0xd08] sm:$0xff]  ;;  %568 = vst [vmem:[%s4006_s27 + $0x678] sm:$0xff] %v567_v15  ;;  %v573_v18 = vld [vmem:[%s4001_s26 + $0xd10] sm:$0xff] }
  0x7b   : > { %570 = vst [vmem:[%s4006_s27 + $0x680] sm:$0xff] %v569_v16  ;;  %572 = vst [vmem:[%s4006_s27 + $0x688] sm:$0xff] %v571_v17  ;;  %v575_v19 = vld [vmem:[%s4001_s26 + $0xd18] sm:$0xff]  ;;  %v577_v20 = vld [vmem:[%s4001_s26 + $0xd20] sm:$0xff] }
  0x7c   : > { %574 = vst [vmem:[%s4006_s27 + $0x690] sm:$0xff] %v573_v18  ;;  %576 = vst [vmem:[%s4006_s27 + $0x698] sm:$0xff] %v575_v19  ;;  %v579_v21 = vld [vmem:[%s4001_s26 + $0xd28] sm:$0xff]  ;;  %v581_v22 = vld [vmem:[%s4001_s26 + $0xd30] sm:$0xff] }
  0x7d   : > { %578 = vst [vmem:[%s4006_s27 + $0x6a0] sm:$0xff] %v577_v20  ;;  %v583_v23 = vld [vmem:[%s4001_s26 + $0xd38] sm:$0xff]  ;;  %580 = vst [vmem:[%s4006_s27 + $0x6a8] sm:$0xff] %v579_v21  ;;  %v585_v24 = vld [vmem:[%s4001_s26 + $0xd40] sm:$0xff] }
  0x7e   : > { %582 = vst [vmem:[%s4006_s27 + $0x6b0] sm:$0xff] %v581_v22  ;;  %584 = vst [vmem:[%s4006_s27 + $0x6b8] sm:$0xff] %v583_v23  ;;  %v587_v25 = vld [vmem:[%s4001_s26 + $0xd48] sm:$0xff]  ;;  %v589_v26 = vld [vmem:[%s4001_s26 + $0xd50] sm:$0xff] }
  0x7f   : > { %586 = vst [vmem:[%s4006_s27 + $0x6c0] sm:$0xff] %v585_v24  ;;  %588 = vst [vmem:[%s4006_s27 + $0x6c8] sm:$0xff] %v587_v25  ;;  %v591_v27 = vld [vmem:[%s4001_s26 + $0xd58] sm:$0xff]  ;;  %v593_v28 = vld [vmem:[%s4001_s26 + $0xd60] sm:$0xff] }
  0x80   : > { %590 = vst [vmem:[%s4006_s27 + $0x6d0] sm:$0xff] %v589_v26  ;;  %v595_v29 = vld [vmem:[%s4001_s26 + $0xd68] sm:$0xff]  ;;  %592 = vst [vmem:[%s4006_s27 + $0x6d8] sm:$0xff] %v591_v27  ;;  %v597_v30 = vld [vmem:[%s4001_s26 + $0xd70] sm:$0xff] }
  0x81   : > { %594 = vst [vmem:[%s4006_s27 + $0x6e0] sm:$0xff] %v593_v28  ;;  %596 = vst [vmem:[%s4006_s27 + $0x6e8] sm:$0xff] %v595_v29  ;;  %v599_v31 = vld [vmem:[%s4001_s26 + $0xd78] sm:$0xff]  ;;  %v601_v32 = vld [vmem:[%s4001_s26 + $0xe00] sm:$0xff] }
  0x82   : > { %598 = vst [vmem:[%s4006_s27 + $0x6f0] sm:$0xff] %v597_v30  ;;  %600 = vst [vmem:[%s4006_s27 + $0x6f8] sm:$0xff] %v599_v31  ;;  %v603_v33 = vld [vmem:[%s4001_s26 + $0xe08] sm:$0xff]  ;;  %v605_v34 = vld [vmem:[%s4001_s26 + $0xe10] sm:$0xff] }
  0x83   : > { %602 = vst [vmem:[%s4006_s27 + $0x700] sm:$0xff] %v601_v32  ;;  %v607_v35 = vld [vmem:[%s4001_s26 + $0xe18] sm:$0xff]  ;;  %604 = vst [vmem:[%s4006_s27 + $0x708] sm:$0xff] %v603_v33  ;;  %v609_v36 = vld [vmem:[%s4001_s26 + $0xe20] sm:$0xff] }
  0x84   : > { %606 = vst [vmem:[%s4006_s27 + $0x710] sm:$0xff] %v605_v34  ;;  %608 = vst [vmem:[%s4006_s27 + $0x718] sm:$0xff] %v607_v35  ;;  %v611_v37 = vld [vmem:[%s4001_s26 + $0xe28] sm:$0xff]  ;;  %v613_v38 = vld [vmem:[%s4001_s26 + $0xe30] sm:$0xff] }
  0x85   : > { %610 = vst [vmem:[%s4006_s27 + $0x720] sm:$0xff] %v609_v36  ;;  %612 = vst [vmem:[%s4006_s27 + $0x728] sm:$0xff] %v611_v37  ;;  %v615_v39 = vld [vmem:[%s4001_s26 + $0xe38] sm:$0xff]  ;;  %v617_v40 = vld [vmem:[%s4001_s26 + $0xe40] sm:$0xff] }
  0x86   : > { %614 = vst [vmem:[%s4006_s27 + $0x730] sm:$0xff] %v613_v38  ;;  %v619_v41 = vld [vmem:[%s4001_s26 + $0xe48] sm:$0xff]  ;;  %616 = vst [vmem:[%s4006_s27 + $0x738] sm:$0xff] %v615_v39  ;;  %v621_v42 = vld [vmem:[%s4001_s26 + $0xe50] sm:$0xff] }
  0x87   : > { %618 = vst [vmem:[%s4006_s27 + $0x740] sm:$0xff] %v617_v40  ;;  %620 = vst [vmem:[%s4006_s27 + $0x748] sm:$0xff] %v619_v41  ;;  %v623_v43 = vld [vmem:[%s4001_s26 + $0xe58] sm:$0xff]  ;;  %v625_v44 = vld [vmem:[%s4001_s26 + $0xe60] sm:$0xff] }
  0x88   : > { %622 = vst [vmem:[%s4006_s27 + $0x750] sm:$0xff] %v621_v42  ;;  %624 = vst [vmem:[%s4006_s27 + $0x758] sm:$0xff] %v623_v43  ;;  %v627_v45 = vld [vmem:[%s4001_s26 + $0xe68] sm:$0xff]  ;;  %v629_v46 = vld [vmem:[%s4001_s26 + $0xe70] sm:$0xff] }
  0x89   : > { %626 = vst [vmem:[%s4006_s27 + $0x760] sm:$0xff] %v625_v44  ;;  %v631_v47 = vld [vmem:[%s4001_s26 + $0xe78] sm:$0xff]  ;;  %628 = vst [vmem:[%s4006_s27 + $0x768] sm:$0xff] %v627_v45  ;;  %v633_v48 = vld [vmem:[%s4001_s26 + $0xf00] sm:$0xff] }
  0x8a   : > { %630 = vst [vmem:[%s4006_s27 + $0x770] sm:$0xff] %v629_v46  ;;  %632 = vst [vmem:[%s4006_s27 + $0x778] sm:$0xff] %v631_v47  ;;  %v635_v49 = vld [vmem:[%s4001_s26 + $0xf08] sm:$0xff]  ;;  %v637_v50 = vld [vmem:[%s4001_s26 + $0xf10] sm:$0xff] }
  0x8b   : > { %634 = vst [vmem:[%s4006_s27 + $0x780] sm:$0xff] %v633_v48  ;;  %636 = vst [vmem:[%s4006_s27 + $0x788] sm:$0xff] %v635_v49  ;;  %v639_v51 = vld [vmem:[%s4001_s26 + $0xf18] sm:$0xff]  ;;  %v641_v52 = vld [vmem:[%s4001_s26 + $0xf20] sm:$0xff] }
  0x8c   : > { %638 = vst [vmem:[%s4006_s27 + $0x790] sm:$0xff] %v637_v50  ;;  %v643_v53 = vld [vmem:[%s4001_s26 + $0xf28] sm:$0xff]  ;;  %640 = vst [vmem:[%s4006_s27 + $0x798] sm:$0xff] %v639_v51  ;;  %v645_v54 = vld [vmem:[%s4001_s26 + $0xf30] sm:$0xff] }
  0x8d   : > { %642 = vst [vmem:[%s4006_s27 + $0x7a0] sm:$0xff] %v641_v52  ;;  %644 = vst [vmem:[%s4006_s27 + $0x7a8] sm:$0xff] %v643_v53  ;;  %v647_v55 = vld [vmem:[%s4001_s26 + $0xf38] sm:$0xff]  ;;  %v649_v56 = vld [vmem:[%s4001_s26 + $0xf40] sm:$0xff] }
  0x8e   : > { %646 = vst [vmem:[%s4006_s27 + $0x7b0] sm:$0xff] %v645_v54  ;;  %648 = vst [vmem:[%s4006_s27 + $0x7b8] sm:$0xff] %v647_v55  ;;  %v651_v57 = vld [vmem:[%s4001_s26 + $0xf48] sm:$0xff]  ;;  %v653_v58 = vld [vmem:[%s4001_s26 + $0xf50] sm:$0xff] }
  0x8f   : > { %650 = vst [vmem:[%s4006_s27 + $0x7c0] sm:$0xff] %v649_v56  ;;  %v655_v59 = vld [vmem:[%s4001_s26 + $0xf58] sm:$0xff]  ;;  %652 = vst [vmem:[%s4006_s27 + $0x7c8] sm:$0xff] %v651_v57  ;;  %v657_v60 = vld [vmem:[%s4001_s26 + $0xf60] sm:$0xff] }
  0x90   : > { %654 = vst [vmem:[%s4006_s27 + $0x7d0] sm:$0xff] %v653_v58  ;;  %656 = vst [vmem:[%s4006_s27 + $0x7d8] sm:$0xff] %v655_v59  ;;  %v659_v61 = vld [vmem:[%s4001_s26 + $0xf68] sm:$0xff]  ;;  %v661_v62 = vld [vmem:[%s4001_s26 + $0xf70] sm:$0xff] }
  0x91   : > { %658 = vst [vmem:[%s4006_s27 + $0x7e0] sm:$0xff] %v657_v60  ;;  %660 = vst [vmem:[%s4006_s27 + $0x7e8] sm:$0xff] %v659_v61  ;;  %v663_v63 = vld [vmem:[%s4001_s26 + $0xf78] sm:$0xff] }
  0x92   : > { %662 = vst [vmem:[%s4006_s27 + $0x7f0] sm:$0xff] %v661_v62  ;;  %664 = vst [vmem:[%s4006_s27 + $0x7f8] sm:$0xff] %v663_v63 }
  0x93 PF: > { %p3554_p7 = scmp.ge.s32.totalorder %s3937_s14, 1  ;;  %p669_p8 = scmp.lt.s32.totalorder %s3937_s14, 3 }
  0x95   : > { %p670_p9 = pnand %p3554_p7, %p669_p8 }
  0x96   : > { %s676_s28 = sand.u32 (!%p670_p9), 1, %s3929_s12   ;;  %p705_p10 = scmp.lt.s32.totalorder (!%p670_p9), %s3976_s15, 1 }
  0x97   : > { %673 = sbr.rel (%p670_p9) target bundleno = 764 (0x2fc), region = 47  ;;  %s3555_s29 = sshll.u32 (!%p670_p9), %s676_s28, 11 }
  0x98   : > { %s4524_s30 = scalar_lea.vmem (!%p670_p9), [#allocation2], %s3555_s29  ;;  %s4797_s8 = sshll.u32 (!%p670_p9), %s676_s28, 8 }
  0x99   : > { %s4818_s9 = scalar_lea.vmem (!%p670_p9), [#allocation3], %s4797_s8 }
  0x9c   : > { %v3939_v0 = vmov 0   ;;  %v937_v1 = vld [vmem:[%s4524_s30 + $0x700] sm:$0xff]  ;;  %v938_v3 = vld [vmem:[%s4524_s30 + $0x708] sm:$0xff]  ;;  %v939_v63 = vld [vmem:[%s4524_s30 + $0x710] sm:$0xff]  ;;  %s706_s10 = scalar_select %p705_p10, %s3976_s15, 1  ;;  %vm3363_vm0 = vcmask 7168  }
  0x9d   : > { %2287 = vmatprep.mubr.bf16.mxu0 %v3939_v0  ;;  %2330 = vmatprep.mubr.bf16.mxu1 %v3939_v0  ;;  %v953_v2 = vld [vmem:[%s4524_s30 + $0x780] sm:$0xff]  ;;  %v954_v5 = vld [vmem:[%s4524_s30 + $0x788] sm:$0xff]  ;;  %vm3366_vm1 = vcmask 15360   ;;  %s3887_s18 = sshll.u32 (%p3991_p5), %s3976_s15, 7 }
  0x9e   : > { %v3785_v4 = vcombine.high %v937_v1, %v953_v2  ;;  %v3784_v6 = vcombine.low %v937_v1, %v953_v2  ;;  %v905_v7 = vld [vmem:[%s4524_s30 + $0x600] sm:$0xff]  ;;  %v3787_v9 = vcombine.high %v938_v3, %v954_v5  ;;  %v3786_v10 = vcombine.low %v938_v3, %v954_v5  ;;  %v906_v12 = vld [vmem:[%s4524_s30 + $0x608] sm:$0xff]  ;;  %v955_v1 = vld [vmem:[%s4524_s30 + $0x790] sm:$0xff]  ;;  %s3854_s11 = sshll.u32 %s706_s10, 4  ;;  %s4899_s23 = scalar_lea.vmem (%p3991_p5), %s4974_s2, %s3887_s18 }
  0x9f   : > { %v921_v8 = vld [vmem:[%s4524_s30 + $0x680] sm:$0xff]  ;;  %v922_v13 = vld [vmem:[%s4524_s30 + $0x688] sm:$0xff]  ;;  %v940_v2 = vld [vmem:[%s4524_s30 + $0x718] sm:$0xff]  ;;  %s709_s17 = scalar_lea.vmem %s4975_s3, %s3854_s11 }
  0xa0   : > { %v3753_v11 = vcombine.high %v905_v7, %v921_v8  ;;  %v873_v14 = vld [vmem:[%s4524_s30 + $0x500] sm:$0xff]  ;;  %2255 = vmatprep.subr.bf16.mxu0 %v3785_v4  ;;  %v3755_v15 = vcombine.high %v906_v12, %v922_v13  ;;  %v874_v17 = vld [vmem:[%s4524_s30 + $0x508] sm:$0xff]  ;;  %2298 = vmatprep.subr.bf16.mxu1 %v3787_v9  ;;  %v3752_v19 = vcombine.low %v905_v7, %v921_v8  ;;  %v956_v3 = vld [vmem:[%s4524_s30 + $0x798] sm:$0xff] }
  0xa1   : > { %v889_v16 = vld [vmem:[%s4524_s30 + $0x580] sm:$0xff]  ;;  %v890_v18 = vld [vmem:[%s4524_s30 + $0x588] sm:$0xff]  ;;  %2256 = vmatpush1.bf16.msra.mxu0 %v3784_v6  ;;  %2299 = vmatpush1.bf16.msra.mxu1 %v3786_v10  ;;  %v3754_v20 = vcombine.low %v906_v12, %v922_v13  ;;  %v3789_v6 = vcombine.high %v939_v63, %v955_v1  ;;  %v3791_v7 = vcombine.high %v940_v2, %v956_v3  ;;  %v907_v8 = vld [vmem:[%s4524_s30 + $0x610] sm:$0xff] }
  0xa2   : > { %2257 = vmatprep.subr.bf16.mxu0 %v3753_v11  ;;  %v3721_v21 = vcombine.high %v873_v14, %v889_v16  ;;  %2300 = vmatprep.subr.bf16.mxu1 %v3755_v15  ;;  %v3723_v22 = vcombine.high %v874_v17, %v890_v18  ;;  %v841_v23 = vld [vmem:[%s4524_s30 + $0x400] sm:$0xff]  ;;  %v842_v25 = vld [vmem:[%s4524_s30 + $0x408] sm:$0xff]  ;;  %v3720_v27 = vcombine.low %v873_v14, %v889_v16  ;;  %v923_v9 = vld [vmem:[%s4524_s30 + $0x690] sm:$0xff] }
  0xa3   : > { %v857_v24 = vld [vmem:[%s4524_s30 + $0x480] sm:$0xff]  ;;  %v858_v26 = vld [vmem:[%s4524_s30 + $0x488] sm:$0xff]  ;;  %v3722_v28 = vcombine.low %v874_v17, %v890_v18  ;;  %v908_v11 = vld [vmem:[%s4524_s30 + $0x618] sm:$0xff]  ;;  %v3788_v13 = vcombine.low %v939_v63, %v955_v1  ;;  %v3790_v14 = vcombine.low %v940_v2, %v956_v3  ;;  %v3757_v15 = vcombine.high %v907_v8, %v923_v9 }
  0xa4   : > { %v3689_v29 = vcombine.high %v841_v23, %v857_v24  ;;  %v3691_v30 = vcombine.high %v842_v25, %v858_v26  ;;  %v809_v31 = vld [vmem:[%s4524_s30 + $0x300] sm:$0xff]  ;;  %v810_v33 = vld [vmem:[%s4524_s30 + $0x308] sm:$0xff]  ;;  %v3688_v35 = vcombine.low %v841_v23, %v857_v24  ;;  %v3690_v36 = vcombine.low %v842_v25, %v858_v26  ;;  %v924_v12 = vld [vmem:[%s4524_s30 + $0x698] sm:$0xff] }
  0xa5   : > { %2258 = vmatpush1.bf16.msra.mxu0 %v3752_v19  ;;  %2301 = vmatpush1.bf16.msra.mxu1 %v3754_v20  ;;  %v825_v32 = vld [vmem:[%s4524_s30 + $0x380] sm:$0xff]  ;;  %v826_v34 = vld [vmem:[%s4524_s30 + $0x388] sm:$0xff]  ;;  %v3759_v16 = vcombine.high %v908_v11, %v924_v12  ;;  %v875_v17 = vld [vmem:[%s4524_s30 + $0x510] sm:$0xff] }
  0xa6   : > { %2259 = vmatprep.subr.bf16.mxu0 %v3721_v21  ;;  %2302 = vmatprep.subr.bf16.mxu1 %v3723_v22  ;;  %v3657_v37 = vcombine.high %v809_v31, %v825_v32  ;;  %v3659_v38 = vcombine.high %v810_v33, %v826_v34  ;;  %v777_v39 = vld [vmem:[%s4524_s30 + $0x200] sm:$0xff]  ;;  %v778_v41 = vld [vmem:[%s4524_s30 + $0x208] sm:$0xff]  ;;  %v3656_v43 = vcombine.low %v809_v31, %v825_v32  ;;  %v891_v18 = vld [vmem:[%s4524_s30 + $0x590] sm:$0xff] }
  0xa7   : > { %v793_v40 = vld [vmem:[%s4524_s30 + $0x280] sm:$0xff]  ;;  %v794_v42 = vld [vmem:[%s4524_s30 + $0x288] sm:$0xff]  ;;  %v3658_v44 = vcombine.low %v810_v33, %v826_v34  ;;  %v876_v19 = vld [vmem:[%s4524_s30 + $0x518] sm:$0xff]  ;;  %v3756_v21 = vcombine.low %v907_v8, %v923_v9  ;;  %v3758_v22 = vcombine.low %v908_v11, %v924_v12  ;;  %v3725_v23 = vcombine.high %v875_v17, %v891_v18 }
  0xa8   : > { %v3625_v45 = vcombine.high %v777_v39, %v793_v40  ;;  %v3627_v46 = vcombine.high %v778_v41, %v794_v42  ;;  %v745_v47 = vld [vmem:[%s4524_s30 + $0x100] sm:$0xff]  ;;  %v746_v49 = vld [vmem:[%s4524_s30 + $0x108] sm:$0xff]  ;;  %v3624_v51 = vcombine.low %v777_v39, %v793_v40  ;;  %v3626_v52 = vcombine.low %v778_v41, %v794_v42  ;;  %v892_v20 = vld [vmem:[%s4524_s30 + $0x598] sm:$0xff] }
  0xa9   : > { %2260 = vmatpush1.bf16.msra.mxu0 %v3720_v27  ;;  %2303 = vmatpush1.bf16.msra.mxu1 %v3722_v28  ;;  %v761_v48 = vld [vmem:[%s4524_s30 + $0x180] sm:$0xff]  ;;  %v762_v50 = vld [vmem:[%s4524_s30 + $0x188] sm:$0xff]  ;;  %v3727_v24 = vcombine.high %v876_v19, %v892_v20  ;;  %v843_v25 = vld [vmem:[%s4524_s30 + $0x410] sm:$0xff] }
  0xaa   : > { %2261 = vmatprep.subr.bf16.mxu0 %v3689_v29  ;;  %2304 = vmatprep.subr.bf16.mxu1 %v3691_v30  ;;  %v3593_v53 = vcombine.high %v745_v47, %v761_v48  ;;  %v3595_v54 = vcombine.high %v746_v49, %v762_v50  ;;  %v713_v55 = vld [vmem:[%s4524_s30] sm:$0xff]  ;;  %v714_v57 = vld [vmem:[%s4524_s30 + $0x8] sm:$0xff]  ;;  %v3592_v59 = vcombine.low %v745_v47, %v761_v48  ;;  %v859_v26 = vld [vmem:[%s4524_s30 + $0x490] sm:$0xff] }
  0xab   : > { %v729_v56 = vld [vmem:[%s4524_s30 + $0x80] sm:$0xff]  ;;  %v730_v58 = vld [vmem:[%s4524_s30 + $0x88] sm:$0xff]  ;;  %v3594_v60 = vcombine.low %v746_v49, %v762_v50  ;;  %v844_v27 = vld [vmem:[%s4524_s30 + $0x418] sm:$0xff]  ;;  %v3724_v29 = vcombine.low %v875_v17, %v891_v18  ;;  %v3726_v30 = vcombine.low %v876_v19, %v892_v20  ;;  %v3693_v31 = vcombine.high %v843_v25, %v859_v26 }
  0xac   : > { %v3561_v61 = vcombine.high %v713_v55, %v729_v56  ;;  %v3563_v62 = vcombine.high %v714_v57, %v730_v58  ;;  %v3560_v4 = vcombine.low %v713_v55, %v729_v56  ;;  %v3562_v5 = vcombine.low %v714_v57, %v730_v58  ;;  %v4567_v10 = vld [vmem:[%s4973_s1] sm:$0xff]   ;;  %v860_v28 = vld [vmem:[%s4524_s30 + $0x498] sm:$0xff]  ;;  %v811_v33 = vld [vmem:[%s4524_s30 + $0x310] sm:$0xff] }
  0xad   : > { %2262 = vmatpush1.bf16.msra.mxu0 %v3688_v35  ;;  %2305 = vmatpush1.bf16.msra.mxu1 %v3690_v36  ;;  %v3695_v32 = vcombine.high %v844_v27, %v860_v28  ;;  %v827_v34 = vld [vmem:[%s4524_s30 + $0x390] sm:$0xff]  ;;  %v812_v35 = vld [vmem:[%s4524_s30 + $0x318] sm:$0xff]  ;;  %v941_v2 = vld [vmem:[%s4524_s30 + $0x720] sm:$0xff] }
  0xae   : > { %2263 = vmatprep.subr.bf16.mxu0 %v3657_v37  ;;  %2306 = vmatprep.subr.bf16.mxu1 %v3659_v38  ;;  %v828_v36 = vld [vmem:[%s4524_s30 + $0x398] sm:$0xff]  ;;  %v3692_v37 = vcombine.low %v843_v25, %v859_v26  ;;  %v3694_v38 = vcombine.low %v844_v27, %v860_v28  ;;  %v3661_v39 = vcombine.high %v811_v33, %v827_v34  ;;  %v779_v41 = vld [vmem:[%s4524_s30 + $0x210] sm:$0xff]  ;;  %v957_v3 = vld [vmem:[%s4524_s30 + $0x7a0] sm:$0xff] }
  0xaf   : > { %v3663_v40 = vcombine.high %v812_v35, %v828_v36  ;;  %v795_v42 = vld [vmem:[%s4524_s30 + $0x290] sm:$0xff]  ;;  %v3793_v8 = vcombine.high %v941_v2, %v957_v3  ;;  %v909_v11 = vld [vmem:[%s4524_s30 + $0x620] sm:$0xff] }
  0xb0   : > { %v3629_v47 = vcombine.high %v779_v41, %v795_v42  ;;  %v747_v49 = vld [vmem:[%s4524_s30 + $0x110] sm:$0xff]  ;;  %v925_v12 = vld [vmem:[%s4524_s30 + $0x6a0] sm:$0xff] }
  0xb1   : > { %2264 = vmatpush1.bf16.msra.mxu0 %v3656_v43  ;;  %2307 = vmatpush1.bf16.msra.mxu1 %v3658_v44  ;;  %v780_v43 = vld [vmem:[%s4524_s30 + $0x218] sm:$0xff]  ;;  %v763_v50 = vld [vmem:[%s4524_s30 + $0x190] sm:$0xff]  ;;  %v3761_v17 = vcombine.high %v909_v11, %v925_v12  ;;  %v877_v19 = vld [vmem:[%s4524_s30 + $0x520] sm:$0xff] }
  0xb2   : > { %2265 = vmatprep.subr.bf16.mxu0 %v3625_v45  ;;  %2308 = vmatprep.subr.bf16.mxu1 %v3627_v46  ;;  %v796_v44 = vld [vmem:[%s4524_s30 + $0x298] sm:$0xff]  ;;  %v3660_v45 = vcombine.low %v811_v33, %v827_v34  ;;  %v3662_v46 = vcombine.low %v812_v35, %v828_v36  ;;  %v3597_v55 = vcombine.high %v747_v49, %v763_v50  ;;  %v715_v57 = vld [vmem:[%s4524_s30 + $0x10] sm:$0xff]  ;;  %v893_v20 = vld [vmem:[%s4524_s30 + $0x5a0] sm:$0xff] }
  0xb3   : > { %v3631_v48 = vcombine.high %v780_v43, %v796_v44  ;;  %v731_v58 = vld [vmem:[%s4524_s30 + $0x90] sm:$0xff]  ;;  %v3729_v25 = vcombine.high %v877_v19, %v893_v20  ;;  %v845_v27 = vld [vmem:[%s4524_s30 + $0x420] sm:$0xff] }
  0xb4   : > { %v3565_v63 = vcombine.high %v715_v57, %v731_v58  ;;  %v861_v28 = vld [vmem:[%s4524_s30 + $0x4a0] sm:$0xff] }
  0xb5   : > { %2266 = vmatpush1.bf16.msra.mxu0 %v3624_v51  ;;  %2309 = vmatpush1.bf16.msra.mxu1 %v3626_v52  ;;  %v748_v51 = vld [vmem:[%s4524_s30 + $0x118] sm:$0xff]  ;;  %v3697_v33 = vcombine.high %v845_v27, %v861_v28  ;;  %v813_v35 = vld [vmem:[%s4524_s30 + $0x320] sm:$0xff] }
  0xb6   : > { %2267 = vmatprep.subr.bf16.mxu0 %v3593_v53  ;;  %2310 = vmatprep.subr.bf16.mxu1 %v3595_v54  ;;  %v764_v52 = vld [vmem:[%s4524_s30 + $0x198] sm:$0xff]  ;;  %v3628_v53 = vcombine.low %v779_v41, %v795_v42  ;;  %v3630_v54 = vcombine.low %v780_v43, %v796_v44  ;;  %v829_v36 = vld [vmem:[%s4524_s30 + $0x3a0] sm:$0xff] }
  0xb7   : > { %v3599_v56 = vcombine.high %v748_v51, %v764_v52  ;;  %v3665_v41 = vcombine.high %v813_v35, %v829_v36  ;;  %v781_v43 = vld [vmem:[%s4524_s30 + $0x220] sm:$0xff] }
  0xb8   : > { %v797_v44 = vld [vmem:[%s4524_s30 + $0x2a0] sm:$0xff] }
  0xb9   : > { %2268 = vmatpush1.bf16.msra.mxu0 %v3592_v59  ;;  %2311 = vmatpush1.bf16.msra.mxu1 %v3594_v60  ;;  %v716_v59 = vld [vmem:[%s4524_s30 + $0x18] sm:$0xff] }
  0xba   : > { %2269 = vmatprep.subr.bf16.mxu0 %v3561_v61  ;;  %2312 = vmatprep.subr.bf16.mxu1 %v3563_v62  ;;  %v732_v60 = vld [vmem:[%s4524_s30 + $0x98] sm:$0xff]  ;;  %v3596_v61 = vcombine.low %v747_v49, %v763_v50  ;;  %v3598_v62 = vcombine.low %v748_v51, %v764_v52  ;;  %v3633_v49 = vcombine.high %v781_v43, %v797_v44  ;;  %v749_v51 = vld [vmem:[%s4524_s30 + $0x120] sm:$0xff] }
  0xbb   : > { %v3567_v1 = vcombine.high %v716_v59, %v732_v60  ;;  %v765_v52 = vld [vmem:[%s4524_s30 + $0x1a0] sm:$0xff] }
  0xbd   : > { %2270 = vmatpush1.bf16.msra.mxu0 %v3560_v4  ;;  %2313 = vmatpush1.bf16.msra.mxu1 %v3562_v5  ;;  %v942_v4 = vld [vmem:[%s4524_s30 + $0x728] sm:$0xff] }
  0xbe   : > { %2341 = vmatprep.subr.bf16.mxu0 %v3789_v6  ;;  %2384 = vmatprep.subr.bf16.mxu1 %v3791_v7  ;;  %v958_v5 = vld [vmem:[%s4524_s30 + $0x7a8] sm:$0xff]  ;;  %v3564_v6 = vcombine.low %v715_v57, %v731_v58  ;;  %v3566_v7 = vcombine.low %v716_v59, %v732_v60  ;;  %v3601_v57 = vcombine.high %v749_v51, %v765_v52  ;;  %v717_v59 = vld [vmem:[%s4524_s30 + $0x20] sm:$0xff] }
  0xbf   : > { %v3795_v9 = vcombine.high %v942_v4, %v958_v5  ;;  %v733_v60 = vld [vmem:[%s4524_s30 + $0xa0] sm:$0xff] }
  0xc0   : > { %2288 = vmatmul.mubr.bf16.vlgmr.msra.gmra.mxu0 %v4567_v10  ;;  %2331 = vmatmul.mubr.bf16.vlgmr.msra.gmra.mxu1 %v4567_v10 }
  0xc1   : > { %2342 = vmatpush1.bf16.msra.mxu0 %v3788_v13  ;;  %2385 = vmatpush1.bf16.msra.mxu1 %v3790_v14  ;;  %v910_v13 = vld [vmem:[%s4524_s30 + $0x628] sm:$0xff] }
  0xc2   : > { %2343 = vmatprep.subr.bf16.mxu0 %v3757_v15  ;;  %2386 = vmatprep.subr.bf16.mxu1 %v3759_v16  ;;  %v926_v14 = vld [vmem:[%s4524_s30 + $0x6a8] sm:$0xff]  ;;  %v3792_v15 = vcombine.low %v941_v2, %v957_v3  ;;  %v3794_v16 = vcombine.low %v942_v4, %v958_v5  ;;  %v3569_v2 = vcombine.high %v717_v59, %v733_v60  ;;  %v943_v4 = vld [vmem:[%s4524_s30 + $0x730] sm:$0xff] }
  0xc3   : > { %2373 = vmatprep.mubr.bf16.mxu0 %v3939_v0  ;;  %2416 = vmatprep.mubr.bf16.mxu1 %v3939_v0  ;;  %v3763_v18 = vcombine.high %v910_v13, %v926_v14  ;;  %v959_v5 = vld [vmem:[%s4524_s30 + $0x7b0] sm:$0xff] }
  0xc5   : > { %2344 = vmatpush1.bf16.msra.mxu0 %v3756_v21  ;;  %2387 = vmatpush1.bf16.msra.mxu1 %v3758_v22  ;;  %v878_v21 = vld [vmem:[%s4524_s30 + $0x528] sm:$0xff] }
  0xc6   : > { %2345 = vmatprep.subr.bf16.mxu0 %v3725_v23  ;;  %2388 = vmatprep.subr.bf16.mxu1 %v3727_v24  ;;  %v894_v22 = vld [vmem:[%s4524_s30 + $0x5a8] sm:$0xff]  ;;  %v3760_v23 = vcombine.low %v909_v11, %v925_v12  ;;  %v3762_v24 = vcombine.low %v910_v13, %v926_v14  ;;  %v3797_v11 = vcombine.high %v943_v4, %v959_v5  ;;  %v911_v13 = vld [vmem:[%s4524_s30 + $0x630] sm:$0xff] }
  0xc7   : > { %v3731_v26 = vcombine.high %v878_v21, %v894_v22  ;;  %v927_v14 = vld [vmem:[%s4524_s30 + $0x6b0] sm:$0xff] }
  0xc9   : > { %2346 = vmatpush1.bf16.msra.mxu0 %v3724_v29  ;;  %2389 = vmatpush1.bf16.msra.mxu1 %v3726_v30  ;;  %v846_v29 = vld [vmem:[%s4524_s30 + $0x428] sm:$0xff] }
  0xca   : > { %2347 = vmatprep.subr.bf16.mxu0 %v3693_v31  ;;  %2390 = vmatprep.subr.bf16.mxu1 %v3695_v32  ;;  %v862_v30 = vld [vmem:[%s4524_s30 + $0x4a8] sm:$0xff]  ;;  %v3728_v31 = vcombine.low %v877_v19, %v893_v20  ;;  %v3730_v32 = vcombine.low %v878_v21, %v894_v22  ;;  %v3765_v19 = vcombine.high %v911_v13, %v927_v14  ;;  %v879_v21 = vld [vmem:[%s4524_s30 + $0x530] sm:$0xff] }
  0xcb   : > { %v3699_v34 = vcombine.high %v846_v29, %v862_v30  ;;  %v895_v22 = vld [vmem:[%s4524_s30 + $0x5b0] sm:$0xff] }
  0xcd   : > { %2348 = vmatpush1.bf16.msra.mxu0 %v3692_v37  ;;  %2391 = vmatpush1.bf16.msra.mxu1 %v3694_v38  ;;  %v814_v37 = vld [vmem:[%s4524_s30 + $0x328] sm:$0xff] }
  0xce   : > { %2349 = vmatprep.subr.bf16.mxu0 %v3661_v39  ;;  %2392 = vmatprep.subr.bf16.mxu1 %v3663_v40  ;;  %v830_v38 = vld [vmem:[%s4524_s30 + $0x3a8] sm:$0xff]  ;;  %v3696_v39 = vcombine.low %v845_v27, %v861_v28  ;;  %v3698_v40 = vcombine.low %v846_v29, %v862_v30  ;;  %v3733_v27 = vcombine.high %v879_v21, %v895_v22  ;;  %v847_v29 = vld [vmem:[%s4524_s30 + $0x430] sm:$0xff] }
  0xcf   : > { %v3667_v42 = vcombine.high %v814_v37, %v830_v38  ;;  %v863_v30 = vld [vmem:[%s4524_s30 + $0x4b0] sm:$0xff] }
  0xd1   : > { %2350 = vmatpush1.bf16.msra.mxu0 %v3660_v45  ;;  %2393 = vmatpush1.bf16.msra.mxu1 %v3662_v46  ;;  %v782_v45 = vld [vmem:[%s4524_s30 + $0x228] sm:$0xff] }
  0xd2   : > { %2351 = vmatprep.subr.bf16.mxu0 %v3629_v47  ;;  %2394 = vmatprep.subr.bf16.mxu1 %v3631_v48  ;;  %v798_v46 = vld [vmem:[%s4524_s30 + $0x2a8] sm:$0xff]  ;;  %v3664_v47 = vcombine.low %v813_v35, %v829_v36  ;;  %v3666_v48 = vcombine.low %v814_v37, %v830_v38  ;;  %v3701_v35 = vcombine.high %v847_v29, %v863_v30  ;;  %v815_v37 = vld [vmem:[%s4524_s30 + $0x330] sm:$0xff] }
  0xd3   : > { %v3635_v50 = vcombine.high %v782_v45, %v798_v46  ;;  %v831_v38 = vld [vmem:[%s4524_s30 + $0x3b0] sm:$0xff] }
  0xd5   : > { %2352 = vmatpush1.bf16.msra.mxu0 %v3628_v53  ;;  %2395 = vmatpush1.bf16.msra.mxu1 %v3630_v54  ;;  %v750_v53 = vld [vmem:[%s4524_s30 + $0x128] sm:$0xff] }
  0xd6   : > { %2353 = vmatprep.subr.bf16.mxu0 %v3597_v55  ;;  %2396 = vmatprep.subr.bf16.mxu1 %v3599_v56  ;;  %v766_v54 = vld [vmem:[%s4524_s30 + $0x1a8] sm:$0xff]  ;;  %v3632_v55 = vcombine.low %v781_v43, %v797_v44  ;;  %v3634_v56 = vcombine.low %v782_v45, %v798_v46  ;;  %v3669_v43 = vcombine.high %v815_v37, %v831_v38  ;;  %v783_v45 = vld [vmem:[%s4524_s30 + $0x230] sm:$0xff] }
  0xd7   : > { %v3603_v58 = vcombine.high %v750_v53, %v766_v54  ;;  %v799_v46 = vld [vmem:[%s4524_s30 + $0x2b0] sm:$0xff] }
  0xd9   : > { %2354 = vmatpush1.bf16.msra.mxu0 %v3596_v61  ;;  %2397 = vmatpush1.bf16.msra.mxu1 %v3598_v62  ;;  %v718_v61 = vld [vmem:[%s4524_s30 + $0x28] sm:$0xff] }
  0xda   : > { %2355 = vmatprep.subr.bf16.mxu0 %v3565_v63  ;;  %2398 = vmatprep.subr.bf16.mxu1 %v3567_v1  ;;  %v734_v62 = vld [vmem:[%s4524_s30 + $0xa8] sm:$0xff]  ;;  %v3600_v63 = vcombine.low %v749_v51, %v765_v52  ;;  %v3602_v1 = vcombine.low %v750_v53, %v766_v54  ;;  %v3637_v51 = vcombine.high %v783_v45, %v799_v46  ;;  %v751_v53 = vld [vmem:[%s4524_s30 + $0x130] sm:$0xff] }
  0xdb   : > { %v3571_v3 = vcombine.high %v718_v61, %v734_v62  ;;  %v767_v54 = vld [vmem:[%s4524_s30 + $0x1b0] sm:$0xff] }
  0xdd   : > { %2356 = vmatpush1.bf16.msra.mxu0 %v3564_v6  ;;  %2399 = vmatpush1.bf16.msra.mxu1 %v3566_v7  ;;  %v944_v6 = vld [vmem:[%s4524_s30 + $0x738] sm:$0xff] }
  0xde   : > { %2427 = vmatprep.subr.bf16.mxu0 %v3793_v8  ;;  %2470 = vmatprep.subr.bf16.mxu1 %v3795_v9  ;;  %v960_v7 = vld [vmem:[%s4524_s30 + $0x7b8] sm:$0xff]  ;;  %v3568_v8 = vcombine.low %v717_v59, %v733_v60  ;;  %v3570_v9 = vcombine.low %v718_v61, %v734_v62  ;;  %v3605_v59 = vcombine.high %v751_v53, %v767_v54  ;;  %v719_v61 = vld [vmem:[%s4524_s30 + $0x30] sm:$0xff] }
  0xdf   : > { %v3799_v12 = vcombine.high %v944_v6, %v960_v7  ;;  %v735_v62 = vld [vmem:[%s4524_s30 + $0xb0] sm:$0xff] }
  0xe0   : > { %2374 = vmatmul.mubr.bf16.vlgmr.msra.gmra.mxu0 %v4567_v10  ;;  %2417 = vmatmul.mubr.bf16.vlgmr.msra.gmra.mxu1 %v4567_v10 }
  0xe1   : > { %2428 = vmatpush1.bf16.msra.mxu0 %v3792_v15  ;;  %2471 = vmatpush1.bf16.msra.mxu1 %v3794_v16  ;;  %v912_v15 = vld [vmem:[%s4524_s30 + $0x638] sm:$0xff] }
  0xe2   : > { %2429 = vmatprep.subr.bf16.mxu0 %v3761_v17  ;;  %2472 = vmatprep.subr.bf16.mxu1 %v3763_v18  ;;  %v928_v16 = vld [vmem:[%s4524_s30 + $0x6b8] sm:$0xff]  ;;  %v3796_v17 = vcombine.low %v943_v4, %v959_v5  ;;  %v3798_v18 = vcombine.low %v944_v6, %v960_v7  ;;  %v3573_v4 = vcombine.high %v719_v61, %v735_v62  ;;  %v945_v6 = vld [vmem:[%s4524_s30 + $0x740] sm:$0xff] }
  0xe3   : > { %2459 = vmatprep.mubr.bf16.mxu0 %v3939_v0  ;;  %2502 = vmatprep.mubr.bf16.mxu1 %v3939_v0  ;;  %v3767_v20 = vcombine.high %v912_v15, %v928_v16  ;;  %v961_v7 = vld [vmem:[%s4524_s30 + $0x7c0] sm:$0xff] }
  0xe5   : > { %2430 = vmatpush1.bf16.msra.mxu0 %v3760_v23  ;;  %2473 = vmatpush1.bf16.msra.mxu1 %v3762_v24  ;;  %v880_v23 = vld [vmem:[%s4524_s30 + $0x538] sm:$0xff] }
  0xe6   : > { %2431 = vmatprep.subr.bf16.mxu0 %v3729_v25  ;;  %2474 = vmatprep.subr.bf16.mxu1 %v3731_v26  ;;  %v896_v24 = vld [vmem:[%s4524_s30 + $0x5b8] sm:$0xff]  ;;  %v3764_v25 = vcombine.low %v911_v13, %v927_v14  ;;  %v3766_v26 = vcombine.low %v912_v15, %v928_v16  ;;  %v3801_v13 = vcombine.high %v945_v6, %v961_v7  ;;  %v913_v15 = vld [vmem:[%s4524_s30 + $0x640] sm:$0xff] }
  0xe7   : > { %v3735_v28 = vcombine.high %v880_v23, %v896_v24  ;;  %v929_v16 = vld [vmem:[%s4524_s30 + $0x6c0] sm:$0xff] }
  0xe9   : > { %2432 = vmatpush1.bf16.msra.mxu0 %v3728_v31  ;;  %2475 = vmatpush1.bf16.msra.mxu1 %v3730_v32  ;;  %v848_v31 = vld [vmem:[%s4524_s30 + $0x438] sm:$0xff] }
  0xea   : > { %2433 = vmatprep.subr.bf16.mxu0 %v3697_v33  ;;  %2476 = vmatprep.subr.bf16.mxu1 %v3699_v34  ;;  %v864_v32 = vld [vmem:[%s4524_s30 + $0x4b8] sm:$0xff]  ;;  %v3732_v33 = vcombine.low %v879_v21, %v895_v22  ;;  %v3734_v34 = vcombine.low %v880_v23, %v896_v24  ;;  %v3769_v21 = vcombine.high %v913_v15, %v929_v16  ;;  %v881_v23 = vld [vmem:[%s4524_s30 + $0x540] sm:$0xff] }
  0xeb   : > { %v3703_v36 = vcombine.high %v848_v31, %v864_v32  ;;  %v897_v24 = vld [vmem:[%s4524_s30 + $0x5c0] sm:$0xff] }
  0xed   : > { %2434 = vmatpush1.bf16.msra.mxu0 %v3696_v39  ;;  %2477 = vmatpush1.bf16.msra.mxu1 %v3698_v40  ;;  %v816_v39 = vld [vmem:[%s4524_s30 + $0x338] sm:$0xff] }
  0xee   : > { %2435 = vmatprep.subr.bf16.mxu0 %v3665_v41  ;;  %2478 = vmatprep.subr.bf16.mxu1 %v3667_v42  ;;  %v832_v40 = vld [vmem:[%s4524_s30 + $0x3b8] sm:$0xff]  ;;  %v3700_v41 = vcombine.low %v847_v29, %v863_v30  ;;  %v3702_v42 = vcombine.low %v848_v31, %v864_v32  ;;  %v3737_v29 = vcombine.high %v881_v23, %v897_v24  ;;  %v849_v31 = vld [vmem:[%s4524_s30 + $0x440] sm:$0xff] }
  0xef   : > { %v3671_v44 = vcombine.high %v816_v39, %v832_v40  ;;  %v865_v32 = vld [vmem:[%s4524_s30 + $0x4c0] sm:$0xff] }
  0xf1   : > { %2436 = vmatpush1.bf16.msra.mxu0 %v3664_v47  ;;  %2479 = vmatpush1.bf16.msra.mxu1 %v3666_v48  ;;  %v784_v47 = vld [vmem:[%s4524_s30 + $0x238] sm:$0xff] }
  0xf2   : > { %2437 = vmatprep.subr.bf16.mxu0 %v3633_v49  ;;  %2480 = vmatprep.subr.bf16.mxu1 %v3635_v50  ;;  %v800_v48 = vld [vmem:[%s4524_s30 + $0x2b8] sm:$0xff]  ;;  %v3668_v49 = vcombine.low %v815_v37, %v831_v38  ;;  %v3670_v50 = vcombine.low %v816_v39, %v832_v40  ;;  %v3705_v37 = vcombine.high %v849_v31, %v865_v32  ;;  %v817_v39 = vld [vmem:[%s4524_s30 + $0x340] sm:$0xff] }
  0xf3   : > { %v3639_v52 = vcombine.high %v784_v47, %v800_v48  ;;  %v833_v40 = vld [vmem:[%s4524_s30 + $0x3c0] sm:$0xff] }
  0xf5   : > { %2438 = vmatpush1.bf16.msra.mxu0 %v3632_v55  ;;  %2481 = vmatpush1.bf16.msra.mxu1 %v3634_v56  ;;  %v752_v55 = vld [vmem:[%s4524_s30 + $0x138] sm:$0xff] }
  0xf6   : > { %2439 = vmatprep.subr.bf16.mxu0 %v3601_v57  ;;  %2482 = vmatprep.subr.bf16.mxu1 %v3603_v58  ;;  %v768_v56 = vld [vmem:[%s4524_s30 + $0x1b8] sm:$0xff]  ;;  %v3636_v57 = vcombine.low %v783_v45, %v799_v46  ;;  %v3638_v58 = vcombine.low %v784_v47, %v800_v48  ;;  %v3673_v45 = vcombine.high %v817_v39, %v833_v40  ;;  %v785_v47 = vld [vmem:[%s4524_s30 + $0x240] sm:$0xff] }
  0xf7   : > { %v3607_v60 = vcombine.high %v752_v55, %v768_v56  ;;  %v801_v48 = vld [vmem:[%s4524_s30 + $0x2c0] sm:$0xff] }
  0xf9   : > { %2440 = vmatpush1.bf16.msra.mxu0 %v3600_v63  ;;  %2483 = vmatpush1.bf16.msra.mxu1 %v3602_v1  ;;  %v720_v63 = vld [vmem:[%s4524_s30 + $0x38] sm:$0xff] }
  0xfa   : > { %2441 = vmatprep.subr.bf16.mxu0 %v3569_v2  ;;  %2484 = vmatprep.subr.bf16.mxu1 %v3571_v3  ;;  %v736_v1 = vld [vmem:[%s4524_s30 + $0xb8] sm:$0xff]  ;;  %v3604_v2 = vcombine.low %v751_v53, %v767_v54  ;;  %v3606_v3 = vcombine.low %v752_v55, %v768_v56  ;;  %v3641_v53 = vcombine.high %v785_v47, %v801_v48  ;;  %v753_v55 = vld [vmem:[%s4524_s30 + $0x140] sm:$0xff] }
  0xfb   : > { %v3575_v5 = vcombine.high %v720_v63, %v736_v1  ;;  %v769_v56 = vld [vmem:[%s4524_s30 + $0x1c0] sm:$0xff] }
  0xfd   : > { %2442 = vmatpush1.bf16.msra.mxu0 %v3568_v8  ;;  %2485 = vmatpush1.bf16.msra.mxu1 %v3570_v9  ;;  %v946_v8 = vld [vmem:[%s4524_s30 + $0x748] sm:$0xff] }
  0xfe   : > { %2513 = vmatprep.subr.bf16.mxu0 %v3797_v11  ;;  %2556 = vmatprep.subr.bf16.mxu1 %v3799_v12  ;;  %v962_v9 = vld [vmem:[%s4524_s30 + $0x7c8] sm:$0xff]  ;;  %v3572_v11 = vcombine.low %v719_v61, %v735_v62  ;;  %v3574_v12 = vcombine.low %v720_v63, %v736_v1  ;;  %v3609_v61 = vcombine.high %v753_v55, %v769_v56  ;;  %v721_v63 = vld [vmem:[%s4524_s30 + $0x40] sm:$0xff] }
  0xff   : > { %v3803_v14 = vcombine.high %v946_v8, %v962_v9  ;;  %v737_v1 = vld [vmem:[%s4524_s30 + $0xc0] sm:$0xff] }
 0x100   : > { %2460 = vmatmul.mubr.bf16.vlgmr.msra.gmra.mxu0 %v4567_v10  ;;  %2503 = vmatmul.mubr.bf16.vlgmr.msra.gmra.mxu1 %v4567_v10 }
 0x101   : > { %2514 = vmatpush1.bf16.msra.mxu0 %v3796_v17  ;;  %2557 = vmatpush1.bf16.msra.mxu1 %v3798_v18  ;;  %v914_v17 = vld [vmem:[%s4524_s30 + $0x648] sm:$0xff] }
 0x102   : > { %2515 = vmatprep.subr.bf16.mxu0 %v3765_v19  ;;  %2558 = vmatprep.subr.bf16.mxu1 %v3767_v20  ;;  %v930_v18 = vld [vmem:[%s4524_s30 + $0x6c8] sm:$0xff]  ;;  %v3800_v19 = vcombine.low %v945_v6, %v961_v7  ;;  %v3802_v20 = vcombine.low %v946_v8, %v962_v9  ;;  %v3577_v6 = vcombine.high %v721_v63, %v737_v1  ;;  %v947_v8 = vld [vmem:[%s4524_s30 + $0x750] sm:$0xff] }
 0x103   : > { %2545 = vmatprep.mubr.bf16.mxu0 %v3939_v0  ;;  %2588 = vmatprep.mubr.bf16.mxu1 %v3939_v0  ;;  %v3771_v22 = vcombine.high %v914_v17, %v930_v18  ;;  %v963_v9 = vld [vmem:[%s4524_s30 + $0x7d0] sm:$0xff] }
 0x105   : > { %2516 = vmatpush1.bf16.msra.mxu0 %v3764_v25  ;;  %2559 = vmatpush1.bf16.msra.mxu1 %v3766_v26  ;;  %v882_v25 = vld [vmem:[%s4524_s30 + $0x548] sm:$0xff] }
 0x106   : > { %2517 = vmatprep.subr.bf16.mxu0 %v3733_v27  ;;  %2560 = vmatprep.subr.bf16.mxu1 %v3735_v28  ;;  %v898_v26 = vld [vmem:[%s4524_s30 + $0x5c8] sm:$0xff]  ;;  %v3768_v27 = vcombine.low %v913_v15, %v929_v16  ;;  %v3770_v28 = vcombine.low %v914_v17, %v930_v18  ;;  %v3805_v15 = vcombine.high %v947_v8, %v963_v9  ;;  %v915_v17 = vld [vmem:[%s4524_s30 + $0x650] sm:$0xff] }
 0x107   : > { %v3739_v30 = vcombine.high %v882_v25, %v898_v26  ;;  %v931_v18 = vld [vmem:[%s4524_s30 + $0x6d0] sm:$0xff] }
 0x109   : > { %2518 = vmatpush1.bf16.msra.mxu0 %v3732_v33  ;;  %2561 = vmatpush1.bf16.msra.mxu1 %v3734_v34  ;;  %v850_v33 = vld [vmem:[%s4524_s30 + $0x448] sm:$0xff] }
 0x10a   : > { %2519 = vmatprep.subr.bf16.mxu0 %v3701_v35  ;;  %2562 = vmatprep.subr.bf16.mxu1 %v3703_v36  ;;  %v866_v34 = vld [vmem:[%s4524_s30 + $0x4c8] sm:$0xff]  ;;  %v3736_v35 = vcombine.low %v881_v23, %v897_v24  ;;  %v3738_v36 = vcombine.low %v882_v25, %v898_v26  ;;  %v3773_v23 = vcombine.high %v915_v17, %v931_v18  ;;  %v883_v25 = vld [vmem:[%s4524_s30 + $0x550] sm:$0xff] }
 0x10b   : > { %v3707_v38 = vcombine.high %v850_v33, %v866_v34  ;;  %v899_v26 = vld [vmem:[%s4524_s30 + $0x5d0] sm:$0xff] }
 0x10d   : > { %2520 = vmatpush1.bf16.msra.mxu0 %v3700_v41  ;;  %2563 = vmatpush1.bf16.msra.mxu1 %v3702_v42  ;;  %v818_v41 = vld [vmem:[%s4524_s30 + $0x348] sm:$0xff] }
 0x10e   : > { %2521 = vmatprep.subr.bf16.mxu0 %v3669_v43  ;;  %2564 = vmatprep.subr.bf16.mxu1 %v3671_v44  ;;  %v834_v42 = vld [vmem:[%s4524_s30 + $0x3c8] sm:$0xff]  ;;  %v3704_v43 = vcombine.low %v849_v31, %v865_v32  ;;  %v3706_v44 = vcombine.low %v850_v33, %v866_v34  ;;  %v3741_v31 = vcombine.high %v883_v25, %v899_v26  ;;  %v851_v33 = vld [vmem:[%s4524_s30 + $0x450] sm:$0xff] }
 0x10f   : > { %v3675_v46 = vcombine.high %v818_v41, %v834_v42  ;;  %v867_v34 = vld [vmem:[%s4524_s30 + $0x4d0] sm:$0xff] }
 0x111   : > { %2522 = vmatpush1.bf16.msra.mxu0 %v3668_v49  ;;  %2565 = vmatpush1.bf16.msra.mxu1 %v3670_v50  ;;  %v786_v49 = vld [vmem:[%s4524_s30 + $0x248] sm:$0xff] }
 0x112   : > { %2523 = vmatprep.subr.bf16.mxu0 %v3637_v51  ;;  %2566 = vmatprep.subr.bf16.mxu1 %v3639_v52  ;;  %v802_v50 = vld [vmem:[%s4524_s30 + $0x2c8] sm:$0xff]  ;;  %v3672_v51 = vcombine.low %v817_v39, %v833_v40  ;;  %v3674_v52 = vcombine.low %v818_v41, %v834_v42  ;;  %v819_v40 = vld [vmem:[%s4524_s30 + $0x350] sm:$0xff]  ;;  %v820_v42 = vld [vmem:[%s4524_s30 + $0x358] sm:$0xff] }
 0x113   : > { %v3643_v54 = vcombine.high %v786_v49, %v802_v50  ;;  %v835_v41 = vld [vmem:[%s4524_s30 + $0x3d0] sm:$0xff] }
 0x115   : > { %2524 = vmatpush1.bf16.msra.mxu0 %v3636_v57  ;;  %2567 = vmatpush1.bf16.msra.mxu1 %v3638_v58  ;;  %v754_v57 = vld [vmem:[%s4524_s30 + $0x148] sm:$0xff] }
 0x116   : > { %2525 = vmatprep.subr.bf16.mxu0 %v3605_v59  ;;  %2568 = vmatprep.subr.bf16.mxu1 %v3607_v60  ;;  %v770_v58 = vld [vmem:[%s4524_s30 + $0x1c8] sm:$0xff]  ;;  %v3640_v59 = vcombine.low %v785_v47, %v801_v48  ;;  %v3642_v60 = vcombine.low %v786_v49, %v802_v50  ;;  %v787_v48 = vld [vmem:[%s4524_s30 + $0x250] sm:$0xff]  ;;  %v788_v50 = vld [vmem:[%s4524_s30 + $0x258] sm:$0xff] }
 0x117   : > { %v3611_v62 = vcombine.high %v754_v57, %v770_v58  ;;  %v803_v49 = vld [vmem:[%s4524_s30 + $0x2d0] sm:$0xff] }
 0x119   : > { %2526 = vmatpush1.bf16.msra.mxu0 %v3604_v2  ;;  %2569 = vmatpush1.bf16.msra.mxu1 %v3606_v3  ;;  %v722_v2 = vld [vmem:[%s4524_s30 + $0x48] sm:$0xff] }
 0x11a   : > { %2527 = vmatprep.subr.bf16.mxu0 %v3573_v4  ;;  %2570 = vmatprep.subr.bf16.mxu1 %v3575_v5  ;;  %v738_v3 = vld [vmem:[%s4524_s30 + $0xc8] sm:$0xff]  ;;  %v3608_v4 = vcombine.low %v753_v55, %v769_v56  ;;  %v3610_v5 = vcombine.low %v754_v57, %v770_v58  ;;  %v755_v56 = vld [vmem:[%s4524_s30 + $0x150] sm:$0xff]  ;;  %v756_v58 = vld [vmem:[%s4524_s30 + $0x158] sm:$0xff] }
 0x11b   : > { %v3579_v7 = vcombine.high %v722_v2, %v738_v3  ;;  %v771_v57 = vld [vmem:[%s4524_s30 + $0x1d0] sm:$0xff] }
 0x11d   : > { %2528 = vmatpush1.bf16.msra.mxu0 %v3572_v11  ;;  %2571 = vmatpush1.bf16.msra.mxu1 %v3574_v12  ;;  %v948_v11 = vld [vmem:[%s4524_s30 + $0x758] sm:$0xff] }
 0x11e   : > { %2599 = vmatprep.subr.bf16.mxu0 %v3801_v13  ;;  %2642 = vmatprep.subr.bf16.mxu1 %v3803_v14  ;;  %v964_v12 = vld [vmem:[%s4524_s30 + $0x7d8] sm:$0xff]  ;;  %v3576_v13 = vcombine.low %v721_v63, %v737_v1  ;;  %v3578_v14 = vcombine.low %v722_v2, %v738_v3  ;;  %v723_v1 = vld [vmem:[%s4524_s30 + $0x50] sm:$0xff] }
 0x11f   : > { %v3807_v16 = vcombine.high %v948_v11, %v964_v12  ;;  %v739_v2 = vld [vmem:[%s4524_s30 + $0xd0] sm:$0xff]  ;;  %v724_v3 = vld [vmem:[%s4524_s30 + $0x58] sm:$0xff] }
 0x120   : > { %2546 = vmatmul.mubr.bf16.vlgmr.msra.gmra.mxu0 %v4567_v10  ;;  %2589 = vmatmul.mubr.bf16.vlgmr.msra.gmra.mxu1 %v4567_v10 }
 0x121   : > { %2600 = vmatpush1.bf16.msra.mxu0 %v3800_v19  ;;  %2643 = vmatpush1.bf16.msra.mxu1 %v3802_v20  ;;  %v916_v19 = vld [vmem:[%s4524_s30 + $0x658] sm:$0xff] }
 0x122   : > { %2601 = vmatprep.subr.bf16.mxu0 %v3769_v21  ;;  %2644 = vmatprep.subr.bf16.mxu1 %v3771_v22  ;;  %v932_v20 = vld [vmem:[%s4524_s30 + $0x6d8] sm:$0xff]  ;;  %v3804_v21 = vcombine.low %v947_v8, %v963_v9  ;;  %v3806_v22 = vcombine.low %v948_v11, %v964_v12  ;;  %v949_v9 = vld [vmem:[%s4524_s30 + $0x760] sm:$0xff]  ;;  %v950_v12 = vld [vmem:[%s4524_s30 + $0x768] sm:$0xff] }
 0x123   : > { %2631 = vmatprep.mubr.bf16.mxu0 %v3939_v0  ;;  %2674 = vmatprep.mubr.bf16.mxu1 %v3939_v0  ;;  %v3775_v24 = vcombine.high %v916_v19, %v932_v20  ;;  %v965_v11 = vld [vmem:[%s4524_s30 + $0x7e0] sm:$0xff] }
 0x125   : > { %2602 = vmatpush1.bf16.msra.mxu0 %v3768_v27  ;;  %2645 = vmatpush1.bf16.msra.mxu1 %v3770_v28  ;;  %v884_v27 = vld [vmem:[%s4524_s30 + $0x558] sm:$0xff] }
 0x126   : > { %2603 = vmatprep.subr.bf16.mxu0 %v3737_v29  ;;  %2646 = vmatprep.subr.bf16.mxu1 %v3739_v30  ;;  %v900_v28 = vld [vmem:[%s4524_s30 + $0x5d8] sm:$0xff]  ;;  %v3772_v29 = vcombine.low %v915_v17, %v931_v18  ;;  %v3774_v30 = vcombine.low %v916_v19, %v932_v20  ;;  %v917_v18 = vld [vmem:[%s4524_s30 + $0x660] sm:$0xff]  ;;  %v918_v20 = vld [vmem:[%s4524_s30 + $0x668] sm:$0xff] }
 0x127   : > { %v3743_v32 = vcombine.high %v884_v27, %v900_v28  ;;  %v933_v19 = vld [vmem:[%s4524_s30 + $0x6e0] sm:$0xff] }
 0x129   : > { %2604 = vmatpush1.bf16.msra.mxu0 %v3736_v35  ;;  %2647 = vmatpush1.bf16.msra.mxu1 %v3738_v36  ;;  %v852_v35 = vld [vmem:[%s4524_s30 + $0x458] sm:$0xff] }
 0x12a   : > { %2605 = vmatprep.subr.bf16.mxu0 %v3705_v37  ;;  %2648 = vmatprep.subr.bf16.mxu1 %v3707_v38  ;;  %v868_v36 = vld [vmem:[%s4524_s30 + $0x4d8] sm:$0xff]  ;;  %v3742_v37 = vcombine.low %v884_v27, %v900_v28  ;;  %v3709_v38 = vcombine.high %v851_v33, %v867_v34  ;;  %v901_v27 = vld [vmem:[%s4524_s30 + $0x5e0] sm:$0xff] }
 0x12b   : > { %v3711_v39 = vcombine.high %v852_v35, %v868_v36  ;;  %v4756_v28 = vld [vmem:[%s4973_s1] sm:$0xff]  }
 0x12d   : > { %2606 = vmatpush1.bf16.msra.mxu0 %v3704_v43  ;;  %2649 = vmatpush1.bf16.msra.mxu1 %v3706_v44  ;;  %v836_v43 = vld [vmem:[%s4524_s30 + $0x3d8] sm:$0xff]  ;;  %v3708_v44 = vcombine.low %v851_v33, %v867_v34 }
 0x12e   : > { %2607 = vmatprep.subr.bf16.mxu0 %v3673_v45  ;;  %2650 = vmatprep.subr.bf16.mxu1 %v3675_v46  ;;  %v3710_v45 = vcombine.low %v852_v35, %v868_v36  ;;  %v3677_v46 = vcombine.high %v819_v40, %v835_v41  ;;  %v3679_v47 = vcombine.high %v820_v42, %v836_v43  ;;  %v853_v35 = vld [vmem:[%s4524_s30 + $0x460] sm:$0xff] }
 0x12f   : > { %v869_v36 = vld [vmem:[%s4524_s30 + $0x4e0] sm:$0xff] }
 0x131   : > { %2608 = vmatpush1.bf16.msra.mxu0 %v3672_v51  ;;  %2651 = vmatpush1.bf16.msra.mxu1 %v3674_v52  ;;  %v804_v51 = vld [vmem:[%s4524_s30 + $0x2d8] sm:$0xff]  ;;  %v3676_v52 = vcombine.low %v819_v40, %v835_v41  ;;  %v3713_v40 = vcombine.high %v853_v35, %v869_v36 }
 0x132   : > { %2609 = vmatprep.subr.bf16.mxu0 %v3641_v53  ;;  %2652 = vmatprep.subr.bf16.mxu1 %v3643_v54  ;;  %v3678_v53 = vcombine.low %v820_v42, %v836_v43  ;;  %v3645_v54 = vcombine.high %v787_v48, %v803_v49  ;;  %v3647_v55 = vcombine.high %v788_v50, %v804_v51  ;;  %v821_v42 = vld [vmem:[%s4524_s30 + $0x360] sm:$0xff] }
 0x133   : > { %v837_v43 = vld [vmem:[%s4524_s30 + $0x3e0] sm:$0xff] }
 0x135   : > { %2610 = vmatpush1.bf16.msra.mxu0 %v3640_v59  ;;  %2653 = vmatpush1.bf16.msra.mxu1 %v3642_v60  ;;  %v772_v59 = vld [vmem:[%s4524_s30 + $0x1d8] sm:$0xff]  ;;  %v3644_v60 = vcombine.low %v787_v48, %v803_v49  ;;  %v3681_v48 = vcombine.high %v821_v42, %v837_v43 }
 0x136   : > { %2611 = vmatprep.subr.bf16.mxu0 %v3609_v61  ;;  %2654 = vmatprep.subr.bf16.mxu1 %v3611_v62  ;;  %v3646_v61 = vcombine.low %v788_v50, %v804_v51  ;;  %v3613_v62 = vcombine.high %v755_v56, %v771_v57  ;;  %v3615_v63 = vcombine.high %v756_v58, %v772_v59  ;;  %v789_v50 = vld [vmem:[%s4524_s30 + $0x260] sm:$0xff] }
 0x137   : > { %v805_v51 = vld [vmem:[%s4524_s30 + $0x2e0] sm:$0xff] }
 0x139   : > { %2612 = vmatpush1.bf16.msra.mxu0 %v3608_v4  ;;  %2655 = vmatpush1.bf16.msra.mxu1 %v3610_v5  ;;  %v740_v4 = vld [vmem:[%s4524_s30 + $0xd8] sm:$0xff]  ;;  %v3612_v5 = vcombine.low %v755_v56, %v771_v57  ;;  %v3649_v56 = vcombine.high %v789_v50, %v805_v51 }
 0x13a   : > { %2613 = vmatprep.subr.bf16.mxu0 %v3577_v6  ;;  %2656 = vmatprep.subr.bf16.mxu1 %v3579_v7  ;;  %v3614_v6 = vcombine.low %v756_v58, %v772_v59  ;;  %v3581_v7 = vcombine.high %v723_v1, %v739_v2  ;;  %v3583_v8 = vcombine.high %v724_v3, %v740_v4  ;;  %v757_v58 = vld [vmem:[%s4524_s30 + $0x160] sm:$0xff] }
 0x13b   : > { %v773_v59 = vld [vmem:[%s4524_s30 + $0x1e0] sm:$0xff] }
 0x13d   : > { %2614 = vmatpush1.bf16.msra.mxu0 %v3576_v13  ;;  %2657 = vmatpush1.bf16.msra.mxu1 %v3578_v14  ;;  %v966_v13 = vld [vmem:[%s4524_s30 + $0x7e8] sm:$0xff]  ;;  %v3580_v14 = vcombine.low %v723_v1, %v739_v2  ;;  %v3617_v1 = vcombine.high %v757_v58, %v773_v59 }
 0x13e   : > { %2685 = vmatprep.subr.bf16.mxu0 %v3805_v15  ;;  %2728 = vmatprep.subr.bf16.mxu1 %v3807_v16  ;;  %v3582_v15 = vcombine.low %v724_v3, %v740_v4  ;;  %v3809_v16 = vcombine.high %v949_v9, %v965_v11  ;;  %v3811_v17 = vcombine.high %v950_v12, %v966_v13  ;;  %v725_v3 = vld [vmem:[%s4524_s30 + $0x60] sm:$0xff] }
 0x13f   : > { %v741_v4 = vld [vmem:[%s4524_s30 + $0xe0] sm:$0xff] }
 0x140   : > { %2632 = vmatmul.mubr.bf16.vlgmr.msra.gmra.mxu0 %v4567_v10  ;;  %2675 = vmatmul.mubr.bf16.vlgmr.msra.gmra.mxu1 %v4567_v10  ;;  %v3740_v10 = vcombine.low %v883_v25, %v899_v26  ;;  %v885_v26 = vld [vmem:[%s4524_s30 + $0x560] sm:$0xff] }
 0x141   : > { %2686 = vmatpush1.bf16.msra.mxu0 %v3804_v21  ;;  %2729 = vmatpush1.bf16.msra.mxu1 %v3806_v22  ;;  %v934_v21 = vld [vmem:[%s4524_s30 + $0x6e8] sm:$0xff]  ;;  %v3808_v22 = vcombine.low %v949_v9, %v965_v11  ;;  %v3745_v33 = vcombine.high %v885_v26, %v901_v27  ;;  %v3585_v9 = vcombine.high %v725_v3, %v741_v4 }
 0x142   : > { %2687 = vmatprep.subr.bf16.mxu0 %v3773_v23  ;;  %2730 = vmatprep.subr.bf16.mxu1 %v3775_v24  ;;  %v3810_v23 = vcombine.low %v950_v12, %v966_v13  ;;  %v3777_v24 = vcombine.high %v917_v18, %v933_v19  ;;  %v3779_v25 = vcombine.high %v918_v20, %v934_v21  ;;  %v951_v12 = vld [vmem:[%s4524_s30 + $0x770] sm:$0xff] }
 0x143   : > { %2717 = vmatprep.mubr.bf16.mxu0 %v3939_v0  ;;  %2760 = vmatprep.mubr.bf16.mxu1 %v3939_v0  ;;  %v967_v13 = vld [vmem:[%s4524_s30 + $0x7f0] sm:$0xff] }
 0x145   : > { %2688 = vmatpush1.bf16.msra.mxu0 %v3772_v29  ;;  %2731 = vmatpush1.bf16.msra.mxu1 %v3774_v30  ;;  %v886_v29 = vld [vmem:[%s4524_s30 + $0x568] sm:$0xff] }
 0x146   : > { %2689 = vmatprep.subr.bf16.mxu0 %v3741_v31  ;;  %2732 = vmatprep.subr.bf16.mxu1 %v3743_v32  ;;  %v902_v30 = vld [vmem:[%s4524_s30 + $0x5e8] sm:$0xff]  ;;  %v3776_v31 = vcombine.low %v917_v18, %v933_v19  ;;  %v3778_v32 = vcombine.low %v918_v20, %v934_v21  ;;  %v3813_v18 = vcombine.high %v951_v12, %v967_v13  ;;  %v919_v20 = vld [vmem:[%s4524_s30 + $0x670] sm:$0xff] }
 0x147   : > { %v3747_v34 = vcombine.high %v886_v29, %v902_v30  ;;  %v935_v21 = vld [vmem:[%s4524_s30 + $0x6f0] sm:$0xff] }
 0x149   : > { %2690 = vmatpush1.bf16.msra.mxu0 %v3740_v10  ;;  %2733 = vmatpush1.bf16.msra.mxu1 %v3742_v37  ;;  %v854_v10 = vld [vmem:[%s4524_s30 + $0x468] sm:$0xff] }
 0x14a   : > { %2691 = vmatprep.subr.bf16.mxu0 %v3709_v38  ;;  %2734 = vmatprep.subr.bf16.mxu1 %v3711_v39  ;;  %v870_v37 = vld [vmem:[%s4524_s30 + $0x4e8] sm:$0xff]  ;;  %v3744_v38 = vcombine.low %v885_v26, %v901_v27  ;;  %v3746_v39 = vcombine.low %v886_v29, %v902_v30  ;;  %v3781_v26 = vcombine.high %v919_v20, %v935_v21  ;;  %v4793_v27 = vld [vmem:[%s4524_s30 + $0x570] sm:$0xff] }
 0x14b   : > { %v3715_v41 = vcombine.high %v854_v10, %v870_v37  ;;  %v903_v30 = vld [vmem:[%s4524_s30 + $0x5f0] sm:$0xff] }
 0x14d   : > { %2692 = vmatpush1.bf16.msra.mxu0 %v3708_v44  ;;  %2735 = vmatpush1.bf16.msra.mxu1 %v3710_v45  ;;  %v822_v44 = vld [vmem:[%s4524_s30 + $0x368] sm:$0xff] }
 0x14e   : > { %2693 = vmatprep.subr.bf16.mxu0 %v3677_v46  ;;  %2736 = vmatprep.subr.bf16.mxu1 %v3679_v47  ;;  %v838_v45 = vld [vmem:[%s4524_s30 + $0x3e8] sm:$0xff]  ;;  %v3712_v46 = vcombine.low %v853_v35, %v869_v36  ;;  %v3714_v47 = vcombine.low %v854_v10, %v870_v37  ;;  %v3780_v36 = vcombine.low %v919_v20, %v935_v21 }
 0x14f   : > { %v3683_v49 = vcombine.high %v822_v44, %v838_v45 }
 0x151   : > { %2694 = vmatpush1.bf16.msra.mxu0 %v3676_v52  ;;  %2737 = vmatpush1.bf16.msra.mxu1 %v3678_v53  ;;  %v790_v52 = vld [vmem:[%s4524_s30 + $0x268] sm:$0xff] }
 0x152   : > { %2695 = vmatprep.subr.bf16.mxu0 %v3645_v54  ;;  %2738 = vmatprep.subr.bf16.mxu1 %v3647_v55  ;;  %v806_v53 = vld [vmem:[%s4524_s30 + $0x2e8] sm:$0xff]  ;;  %v3680_v54 = vcombine.low %v821_v42, %v837_v43  ;;  %v3682_v55 = vcombine.low %v822_v44, %v838_v45 }
 0x153   : > { %v3651_v57 = vcombine.high %v790_v52, %v806_v53 }
 0x155   : > { %2696 = vmatpush1.bf16.msra.mxu0 %v3644_v60  ;;  %2739 = vmatpush1.bf16.msra.mxu1 %v3646_v61  ;;  %v758_v60 = vld [vmem:[%s4524_s30 + $0x168] sm:$0xff] }
 0x156   : > { %2697 = vmatprep.subr.bf16.mxu0 %v3613_v62  ;;  %2740 = vmatprep.subr.bf16.mxu1 %v3615_v63  ;;  %v774_v61 = vld [vmem:[%s4524_s30 + $0x1e8] sm:$0xff]  ;;  %v3648_v62 = vcombine.low %v789_v50, %v805_v51  ;;  %v3650_v63 = vcombine.low %v790_v52, %v806_v53 }
 0x157   : > { %v3619_v2 = vcombine.high %v758_v60, %v774_v61 }
 0x159   : > { %2698 = vmatpush1.bf16.msra.mxu0 %v3612_v5  ;;  %2741 = vmatpush1.bf16.msra.mxu1 %v3614_v6  ;;  %v726_v5 = vld [vmem:[%s4524_s30 + $0x68] sm:$0xff] }
 0x15a   : > { %2699 = vmatprep.subr.bf16.mxu0 %v3581_v7  ;;  %2742 = vmatprep.subr.bf16.mxu1 %v3583_v8  ;;  %v742_v6 = vld [vmem:[%s4524_s30 + $0xe8] sm:$0xff]  ;;  %v3616_v7 = vcombine.low %v757_v58, %v773_v59  ;;  %v3618_v8 = vcombine.low %v758_v60, %v774_v61 }
 0x15b   : > { %v3587_v11 = vcombine.high %v726_v5, %v742_v6 }
 0x15d   : > { %2700 = vmatpush1.bf16.msra.mxu0 %v3580_v14  ;;  %2743 = vmatpush1.bf16.msra.mxu1 %v3582_v15  ;;  %v952_v14 = vld [vmem:[%s4524_s30 + $0x778] sm:$0xff] }
 0x15e   : > { %2771 = vmatprep.subr.bf16.mxu0 %v3809_v16  ;;  %2814 = vmatprep.subr.bf16.mxu1 %v3811_v17  ;;  %v968_v15 = vld [vmem:[%s4524_s30 + $0x7f8] sm:$0xff]  ;;  %v3584_v16 = vcombine.low %v725_v3, %v741_v4  ;;  %v3586_v17 = vcombine.low %v726_v5, %v742_v6 }
 0x15f   : > { %v3815_v19 = vcombine.high %v952_v14, %v968_v15  ;;  %v824_v6 = vld [vmem:[%s4524_s30 + $0x378] sm:$0xff] }
 0x160   : > { %2718 = vmatmul.mubr.bf16.vlgmr.msra.gmra.mxu0 %v4756_v28  ;;  %2761 = vmatmul.mubr.bf16.vlgmr.msra.gmra.mxu1 %v4756_v28 }
 0x161   : > { %2772 = vmatpush1.bf16.msra.mxu0 %v3808_v22  ;;  %2815 = vmatpush1.bf16.msra.mxu1 %v3810_v23  ;;  %v920_v22 = vld [vmem:[%s4524_s30 + $0x678] sm:$0xff] }
 0x162   : > { %2773 = vmatprep.subr.bf16.mxu0 %v3777_v24  ;;  %2816 = vmatprep.subr.bf16.mxu1 %v3779_v25  ;;  %v936_v23 = vld [vmem:[%s4524_s30 + $0x6f8] sm:$0xff]  ;;  %v3812_v24 = vcombine.low %v951_v12, %v967_v13  ;;  %v3814_v25 = vcombine.low %v952_v14, %v968_v15 }
 0x163   : > { %2803 = vmatprep.mubr.bf16.mxu0 %v3939_v0  ;;  %2846 = vmatprep.mubr.bf16.mxu1 %v3939_v0  ;;  %v3783_v29 = vcombine.high %v920_v22, %v936_v23  ;;  %v3782_v10 = vcombine.low %v920_v22, %v936_v23  ;;  %v792_v22 = vld [vmem:[%s4524_s30 + $0x278] sm:$0xff] }
 0x164   : > { %v808_v23 = vld [vmem:[%s4524_s30 + $0x2f8] sm:$0xff] }
 0x165   : > { %2774 = vmatpush1.bf16.msra.mxu0 %v3776_v31  ;;  %2817 = vmatpush1.bf16.msra.mxu1 %v3778_v32  ;;  %v4801_v31 = vld [vmem:[%s4524_s30 + $0x578] sm:$0xff] }
 0x166   : > { %2775 = vmatprep.subr.bf16.mxu0 %v3745_v33  ;;  %2818 = vmatprep.subr.bf16.mxu1 %v3747_v34  ;;  %v4804_v32 = vld [vmem:[%s4524_s30 + $0x5f8] sm:$0xff] }
 0x169   : > { %2776 = vmatpush1.bf16.msra.mxu0 %v3744_v38  ;;  %2819 = vmatpush1.bf16.msra.mxu1 %v3746_v39  ;;  %v3749_v39 = vcombine.high %v4793_v27, %v903_v30 }
 0x16a   : > { %2777 = vmatprep.subr.bf16.mxu0 %v3713_v40  ;;  %2820 = vmatprep.subr.bf16.mxu1 %v3715_v41  ;;  %v3751_v40 = vcombine.high %v4801_v31, %v4804_v32  ;;  %v855_v41 = vld [vmem:[%s4524_s30 + $0x470] sm:$0xff] }
 0x16d   : > { %2778 = vmatpush1.bf16.msra.mxu0 %v3712_v46  ;;  %2821 = vmatpush1.bf16.msra.mxu1 %v3714_v47  ;;  %v871_v46 = vld [vmem:[%s4524_s30 + $0x4f0] sm:$0xff]  ;;  %v856_v47 = vld [vmem:[%s4524_s30 + $0x478] sm:$0xff] }
 0x16e   : > { %2779 = vmatprep.subr.bf16.mxu0 %v3681_v48  ;;  %2822 = vmatprep.subr.bf16.mxu1 %v3683_v49  ;;  %v872_v48 = vld [vmem:[%s4524_s30 + $0x4f8] sm:$0xff] }
 0x16f   : > { %v3719_v58 = vcombine.high %v856_v47, %v872_v48  ;;  %v3718_v12 = vcombine.low %v856_v47, %v872_v48 }
 0x171   : > { %2780 = vmatpush1.bf16.msra.mxu0 %v3680_v54  ;;  %2823 = vmatpush1.bf16.msra.mxu1 %v3682_v55  ;;  %v3748_v55 = vcombine.low %v4793_v27, %v903_v30  ;;  %v759_v30 = vld [vmem:[%s4524_s30 + $0x170] sm:$0xff] }
 0x172   : > { %2781 = vmatprep.subr.bf16.mxu0 %v3649_v56  ;;  %2824 = vmatprep.subr.bf16.mxu1 %v3651_v57  ;;  %v3717_v57 = vcombine.high %v855_v41, %v871_v46 }
 0x175   : > { %2782 = vmatpush1.bf16.msra.mxu0 %v3648_v62  ;;  %2825 = vmatpush1.bf16.msra.mxu1 %v3650_v63 }
 0x176   : > { %2783 = vmatprep.subr.bf16.mxu0 %v3617_v1  ;;  %2826 = vmatprep.subr.bf16.mxu1 %v3619_v2  ;;  %v823_v1 = vld [vmem:[%s4524_s30 + $0x370] sm:$0xff] }
 0x177   : > { %v839_v2 = vld [vmem:[%s4524_s30 + $0x3f0] sm:$0xff] }
 0x178   : > { %v3685_v15 = vcombine.high %v823_v1, %v839_v2 }
 0x179   : > { %2784 = vmatpush1.bf16.msra.mxu0 %v3616_v7  ;;  %2827 = vmatpush1.bf16.msra.mxu1 %v3618_v8  ;;  %v840_v7 = vld [vmem:[%s4524_s30 + $0x3f8] sm:$0xff] }
 0x17a   : > { %2785 = vmatprep.subr.bf16.mxu0 %v3585_v9  ;;  %2828 = vmatprep.subr.bf16.mxu1 %v3587_v11  ;;  %v3716_v11 = vcombine.low %v855_v41, %v871_v46 }
 0x17d   : > { %2786 = vmatpush1.bf16.msra.mxu0 %v3584_v16  ;;  %2829 = vmatpush1.bf16.msra.mxu1 %v3586_v17  ;;  %v3687_v17 = vcombine.high %v824_v6, %v840_v7 }
 0x17e   : > { %2857 = vmatprep.subr.bf16.mxu0 %v3813_v18  ;;  %2900 = vmatprep.subr.bf16.mxu1 %v3815_v19  ;;  %v791_v18 = vld [vmem:[%s4524_s30 + $0x270] sm:$0xff] }
 0x17f   : > { %v807_v19 = vld [vmem:[%s4524_s30 + $0x2f0] sm:$0xff] }
 0x180   : > { %v2289_v33 = vpop.f32.mrf.mxu0  ;;  %2804 = vmatmul.mubr.bf16.vlgmr.msra.gmra.mxu0 %v4756_v28  ;;  %v2332_v35 = vpop.f32.mrf.mxu1  ;;  %2847 = vmatmul.mubr.bf16.vlgmr.msra.gmra.mxu1 %v4756_v28  ;;  %v3653_v27 = vcombine.high %v791_v18, %v807_v19 }
 0x181   : > { %v3233_v34 = vmul.f32 %v2289_v33, %v2289_v33  ;;  %2858 = vmatpush1.bf16.msra.mxu0 %v3812_v24  ;;  %v3235_v37 = vmul.f32 %v2332_v35, %v2332_v35  ;;  %2901 = vmatpush1.bf16.msra.mxu1 %v3814_v25  ;;  %v3684_v24 = vcombine.low %v823_v1, %v839_v2 }
 0x182   : > { %v2291_v38 = vpop.f32.mrf.mxu0  ;;  %2859 = vmatprep.subr.bf16.mxu0 %v3781_v26  ;;  %v2334_v45 = vpop.f32.mrf.mxu1  ;;  %2902 = vmatprep.subr.bf16.mxu1 %v3783_v29  ;;  %v3686_v26 = vcombine.low %v824_v6, %v840_v7  ;;  %v3655_v29 = vcombine.high %v792_v22, %v808_v23 }
 0x183   : > { %v3855_v42 = vpack.c.bf16 %v2291_v38, %v2289_v33  ;;  %v3167_v43 = vadd.f32 %v2291_v38, %v2289_v33  ;;  %v3234_v44 = vmul.f32 %v2291_v38, %v2291_v38  ;;  %2889 = vmatprep.mubr.bf16.mxu0 %v3939_v0  ;;  %v3856_v49 = vpack.c.bf16 %v2334_v45, %v2332_v35  ;;  %v776_v33 = vld [vmem:[%s4524_s30 + $0x1f8] sm:$0xff]  ;;  %v743_v38 = vld [vmem:[%s4524_s30 + $0xf0] sm:$0xff] }
 0x184   : > { %v2293_v50 = vpop.f32.mrf.mxu0  ;;  %2932 = vmatprep.mubr.bf16.mxu1 %v3939_v0  ;;  %v3236_v53 = vmul.f32 %v2334_v45, %v2334_v45  ;;  %v2336_v54 = vpop.f32.mrf.mxu1  ;;  %v3750_v0 = vcombine.low %v4801_v31, %v4804_v32  ;;  %v775_v31 = vld [vmem:[%s4524_s30 + $0x1f0] sm:$0xff]  ;;  %v760_v32 = vld [vmem:[%s4524_s30 + $0x178] sm:$0xff] }
 0x185   : > { %3135 = vst [vmem:[%s4818_s9] sm:$0xff] %v3855_v42  ;;  %v3297_v51 = vadd.f32 %v3234_v44, %v3233_v34  ;;  %v3168_v52 = vadd.f32 %v3167_v43, %v2332_v35  ;;  %2860 = vmatpush1.bf16.msra.mxu0 %v3780_v36  ;;  %3136 = vst [vmem:[%s4818_s9 + $0x8] sm:$0xff] %v3856_v49  ;;  %2903 = vmatpush1.bf16.msra.mxu1 %v3782_v10 }
 0x186   : > { %v2295_v56 = vpop.f32.mrf.mxu0  ;;  %2861 = vmatprep.subr.bf16.mxu0 %v3749_v39  ;;  %v2338_v63 = vpop.f32.mrf.mxu1  ;;  %2904 = vmatprep.subr.bf16.mxu1 %v3751_v40  ;;  %v3265_v3 = vmul.f32 %v2293_v50, %v2293_v50  ;;  %v3267_v13 = vmul.f32 %v2336_v54, %v2336_v54  ;;  %v3652_v34 = vcombine.low %v791_v18, %v807_v19  ;;  %v728_v39 = vld [vmem:[%s4524_s30 + $0x78] sm:$0xff] }
 0x187   : > { %v4825_v59 = vadd.f32 %v3168_v52, %v2334_v45  ;;  %v3298_v60 = vadd.f32 %v3297_v51, %v3235_v37  ;;  %v3871_v61 = vpack.c.bf16 %v2295_v56, %v2293_v50  ;;  %v3200_v62 = vadd.f32 %v2295_v56, %v2293_v50  ;;  %v727_v37 = vld [vmem:[%s4524_s30 + $0x70] sm:$0xff]  ;;  %v744_v40 = vld [vmem:[%s4524_s30 + $0xf8] sm:$0xff] }
 0x188   : > { %v3266_v4 = vmul.f32 %v2295_v56, %v2295_v56  ;;  %v3872_v5 = vpack.c.bf16 %v2338_v63, %v2336_v54  ;;  %v3268_v20 = vmul.f32 %v2338_v63, %v2338_v63  ;;  %v3654_v35 = vcombine.low %v792_v22, %v808_v23 }
 0x189   : > { %v4831_v8 = vadd.f32 %v3298_v60, %v3236_v53  ;;  %3151 = vst [vmem:[%s4818_s9 + $0x80] sm:$0xff] %v3871_v61  ;;  %v3201_v9 = vadd.f32 %v3200_v62, %v2336_v54  ;;  %2862 = vmatpush1.bf16.msra.mxu0 %v3748_v55  ;;  %2905 = vmatpush1.bf16.msra.mxu1 %v3750_v0 }
 0x18a   : > { %v3330_v14 = vadd.f32 %v3266_v4, %v3265_v3  ;;  %3152 = vst [vmem:[%s4818_s9 + $0x88] sm:$0xff] %v3872_v5  ;;  %2863 = vmatprep.subr.bf16.mxu0 %v3717_v57  ;;  %2906 = vmatprep.subr.bf16.mxu1 %v3719_v58  ;;  %v3621_v36 = vcombine.high %v759_v30, %v775_v31 }
 0x18b   : > { %v4835_v16 = vadd.f32 %v3201_v9, %v2338_v63  ;;  %v3623_v10 = vcombine.high %v760_v32, %v776_v33  ;;  %v3620_v41 = vcombine.low %v759_v30, %v775_v31  ;;  %v3622_v42 = vcombine.low %v760_v32, %v776_v33 }
 0x18c   : > { %v3331_v21 = vadd.f32 %v3330_v14, %v3267_v13  ;;  %v3589_v43 = vcombine.high %v727_v37, %v743_v38  ;;  %v3591_v44 = vcombine.high %v728_v39, %v744_v40  ;;  %v3588_v45 = vcombine.low %v727_v37, %v743_v38 }
 0x18d   : > { %2864 = vmatpush1.bf16.msra.mxu0 %v3716_v11  ;;  %2907 = vmatpush1.bf16.msra.mxu1 %v3718_v12  ;;  %v3590_v46 = vcombine.low %v728_v39, %v744_v40 }
 0x18e   : > { %v4841_v25 = vadd.f32 %v3331_v21, %v3268_v20  ;;  %2865 = vmatprep.subr.bf16.mxu0 %v3685_v15  ;;  %2908 = vmatprep.subr.bf16.mxu1 %v3687_v17 }
 0x191   : > { %2866 = vmatpush1.bf16.msra.mxu0 %v3684_v24  ;;  %2909 = vmatpush1.bf16.msra.mxu1 %v3686_v26 }
 0x192   : > { %2867 = vmatprep.subr.bf16.mxu0 %v3653_v27  ;;  %2910 = vmatprep.subr.bf16.mxu1 %v3655_v29 }
 0x195   : > { %2868 = vmatpush1.bf16.msra.mxu0 %v3652_v34  ;;  %2911 = vmatpush1.bf16.msra.mxu1 %v3654_v35 }
 0x196   : > { %2869 = vmatprep.subr.bf16.mxu0 %v3621_v36  ;;  %2912 = vmatprep.subr.bf16.mxu1 %v3623_v10 }
 0x199   : > { %2870 = vmatpush1.bf16.msra.mxu0 %v3620_v41  ;;  %2913 = vmatpush1.bf16.msra.mxu1 %v3622_v42 }
 0x19a   : > { %2871 = vmatprep.subr.bf16.mxu0 %v3589_v43  ;;  %2914 = vmatprep.subr.bf16.mxu1 %v3591_v44 }
 0x19d   : > { %2872 = vmatpush1.bf16.msra.mxu0 %v3588_v45  ;;  %2915 = vmatpush1.bf16.msra.mxu1 %v3590_v46 }
 0x1a0   : > { %v2375_v47 = vpop.f32.mrf.mxu0  ;;  %2890 = vmatmul.mubr.bf16.vlgmr.msra.gmra.mxu0 %v4756_v28  ;;  %v2418_v50 = vpop.f32.mrf.mxu1  ;;  %2933 = vmatmul.mubr.bf16.vlgmr.msra.gmra.mxu1 %v4756_v28 }
 0x1a1   : > { %v3170_v48 = vadd.f32 %v4825_v59, %v2375_v47  ;;  %v3237_v49 = vmul.f32 %v2375_v47, %v2375_v47  ;;  %v3239_v51 = vmul.f32 %v2418_v50, %v2418_v50 }
 0x1a2   : > { %v2377_v52 = vpop.f32.mrf.mxu0  ;;  %v2420_v0 = vpop.f32.mrf.mxu1 }
 0x1a3   : > { %v3300_v53 = vadd.f32 %v4831_v8, %v3237_v49  ;;  %v3857_v54 = vpack.c.bf16 %v2377_v52, %v2375_v47  ;;  %v3171_v55 = vadd.f32 %v3170_v48, %v2377_v52  ;;  %v3238_v56 = vmul.f32 %v2377_v52, %v2377_v52 }
 0x1a4   : > { %v3858_v57 = vpack.c.bf16 %v2420_v0, %v2418_v50  ;;  %v3240_v58 = vmul.f32 %v2420_v0, %v2420_v0  ;;  %v2379_v60 = vpop.f32.mrf.mxu0  ;;  %v2422_v28 = vpop.f32.mrf.mxu1 }
 0x1a5   : > { %3137 = vst [vmem:[%s4818_s9 + $0x10] sm:$0xff] %v3857_v54  ;;  %v3301_v61 = vadd.f32 %v3300_v53, %v3238_v56  ;;  %v3172_v59 = vadd.f32 %v3171_v55, %v2418_v50  ;;  %v3203_v62 = vadd.f32 %v4835_v16, %v2379_v60  ;;  %v3269_v63 = vmul.f32 %v2379_v60, %v2379_v60 }
 0x1a6   : > { %3138 = vst [vmem:[%s4818_s9 + $0x18] sm:$0xff] %v3858_v57  ;;  %v2381_v1 = vpop.f32.mrf.mxu0  ;;  %v2424_v6 = vpop.f32.mrf.mxu1  ;;  %v3271_v12 = vmul.f32 %v2422_v28, %v2422_v28 }
 0x1a7   : > { %v3173_v2 = vadd.f32 %v3172_v59, %v2420_v0  ;;  %v3302_v3 = vadd.f32 %v3301_v61, %v3239_v51  ;;  %v3333_v4 = vadd.f32 %v4841_v25, %v3269_v63  ;;  %v3873_v5 = vpack.c.bf16 %v2381_v1, %v2379_v60 }
 0x1a8   : > { %v3204_v7 = vadd.f32 %v3203_v62, %v2381_v1  ;;  %v3270_v8 = vmul.f32 %v2381_v1, %v2381_v1  ;;  %v3874_v9 = vpack.c.bf16 %v2424_v6, %v2422_v28  ;;  %v3272_v16 = vmul.f32 %v2424_v6, %v2424_v6 }
 0x1a9   : > { %v3303_v11 = vadd.f32 %v3302_v3, %v3240_v58  ;;  %3153 = vst [vmem:[%s4818_s9 + $0x90] sm:$0xff] %v3873_v5 }
 0x1aa   : > { %v3334_v13 = vadd.f32 %v3333_v4, %v3270_v8  ;;  %3154 = vst [vmem:[%s4818_s9 + $0x98] sm:$0xff] %v3874_v9  ;;  %v3205_v14 = vadd.f32 %v3204_v7, %v2422_v28 }
 0x1ac   : > { %v3206_v15 = vadd.f32 %v3205_v14, %v2424_v6  ;;  %v3335_v17 = vadd.f32 %v3334_v13, %v3271_v12 }
 0x1ae   : > { %v3336_v18 = vadd.f32 %v3335_v17, %v3272_v16 }
 0x1c0   : > { %v2461_v19 = vpop.f32.mrf.mxu0  ;;  %v2504_v22 = vpop.f32.mrf.mxu1 }
 0x1c1   : > { %v3174_v20 = vadd.f32 %v3173_v2, %v2461_v19  ;;  %v3241_v21 = vmul.f32 %v2461_v19, %v2461_v19  ;;  %v3243_v23 = vmul.f32 %v2504_v22, %v2504_v22 }
 0x1c2   : > { %v2463_v24 = vpop.f32.mrf.mxu0  ;;  %v2506_v30 = vpop.f32.mrf.mxu1 }
 0x1c3   : > { %v3304_v25 = vadd.f32 %v3303_v11, %v3241_v21  ;;  %v3859_v26 = vpack.c.bf16 %v2463_v24, %v2461_v19  ;;  %v3175_v27 = vadd.f32 %v3174_v20, %v2463_v24  ;;  %v3242_v29 = vmul.f32 %v2463_v24, %v2463_v24 }
 0x1c4   : > { %v3860_v31 = vpack.c.bf16 %v2506_v30, %v2504_v22  ;;  %v3244_v32 = vmul.f32 %v2506_v30, %v2506_v30  ;;  %v2465_v33 = vpop.f32.mrf.mxu0  ;;  %v2508_v37 = vpop.f32.mrf.mxu1 }
 0x1c5   : > { %3139 = vst [vmem:[%s4818_s9 + $0x20] sm:$0xff] %v3859_v26  ;;  %v3305_v34 = vadd.f32 %v3304_v25, %v3242_v29  ;;  %v3176_v35 = vadd.f32 %v3175_v27, %v2504_v22  ;;  %v3207_v36 = vadd.f32 %v3206_v15, %v2465_v33  ;;  %v3273_v10 = vmul.f32 %v2465_v33, %v2465_v33 }
 0x1c6   : > { %3140 = vst [vmem:[%s4818_s9 + $0x28] sm:$0xff] %v3860_v31  ;;  %v2467_v38 = vpop.f32.mrf.mxu0  ;;  %v2510_v43 = vpop.f32.mrf.mxu1  ;;  %v3275_v48 = vmul.f32 %v2508_v37, %v2508_v37 }
 0x1c7   : > { %v3177_v39 = vadd.f32 %v3176_v35, %v2506_v30  ;;  %v3306_v40 = vadd.f32 %v3305_v34, %v3243_v23  ;;  %v3337_v41 = vadd.f32 %v3336_v18, %v3273_v10  ;;  %v3875_v42 = vpack.c.bf16 %v2467_v38, %v2465_v33 }
 0x1c8   : > { %v3208_v44 = vadd.f32 %v3207_v36, %v2467_v38  ;;  %v3274_v45 = vmul.f32 %v2467_v38, %v2467_v38  ;;  %v3876_v46 = vpack.c.bf16 %v2510_v43, %v2508_v37  ;;  %v3276_v52 = vmul.f32 %v2510_v43, %v2510_v43 }
 0x1c9   : > { %v3307_v47 = vadd.f32 %v3306_v40, %v3244_v32  ;;  %3155 = vst [vmem:[%s4818_s9 + $0xa0] sm:$0xff] %v3875_v42 }
 0x1ca   : > { %v3338_v49 = vadd.f32 %v3337_v41, %v3274_v45  ;;  %3156 = vst [vmem:[%s4818_s9 + $0xa8] sm:$0xff] %v3876_v46  ;;  %v3209_v50 = vadd.f32 %v3208_v44, %v2508_v37 }
 0x1cc   : > { %v3210_v51 = vadd.f32 %v3209_v50, %v2510_v43  ;;  %v3339_v53 = vadd.f32 %v3338_v49, %v3275_v48 }
 0x1ce   : > { %v3340_v54 = vadd.f32 %v3339_v53, %v3276_v52 }
 0x1e0   : > { %v2547_v55 = vpop.f32.mrf.mxu0  ;;  %v2590_v57 = vpop.f32.mrf.mxu1 }
 0x1e1   : > { %v3178_v56 = vadd.f32 %v3177_v39, %v2547_v55  ;;  %v3245_v0 = vmul.f32 %v2547_v55, %v2547_v55  ;;  %v3247_v58 = vmul.f32 %v2590_v57, %v2590_v57 }
 0x1e2   : > { %v2549_v60 = vpop.f32.mrf.mxu0  ;;  %v2592_v28 = vpop.f32.mrf.mxu1 }
 0x1e3   : > { %v3308_v61 = vadd.f32 %v3307_v47, %v3245_v0  ;;  %v3861_v59 = vpack.c.bf16 %v2549_v60, %v2547_v55  ;;  %v3179_v62 = vadd.f32 %v3178_v56, %v2549_v60  ;;  %v3246_v63 = vmul.f32 %v2549_v60, %v2549_v60 }
 0x1e4   : > { %v3862_v1 = vpack.c.bf16 %v2592_v28, %v2590_v57  ;;  %v3248_v2 = vmul.f32 %v2592_v28, %v2592_v28  ;;  %v2551_v3 = vpop.f32.mrf.mxu0  ;;  %v2594_v8 = vpop.f32.mrf.mxu1 }
 0x1e5   : > { %3141 = vst [vmem:[%s4818_s9 + $0x30] sm:$0xff] %v3861_v59  ;;  %v3309_v4 = vadd.f32 %v3308_v61, %v3246_v63  ;;  %v3180_v5 = vadd.f32 %v3179_v62, %v2590_v57  ;;  %v3211_v6 = vadd.f32 %v3210_v51, %v2551_v3  ;;  %v3277_v7 = vmul.f32 %v2551_v3, %v2551_v3 }
 0x1e6   : > { %3142 = vst [vmem:[%s4818_s9 + $0x38] sm:$0xff] %v3862_v1  ;;  %v2553_v9 = vpop.f32.mrf.mxu0  ;;  %v2596_v15 = vpop.f32.mrf.mxu1  ;;  %v3279_v20 = vmul.f32 %v2594_v8, %v2594_v8 }
 0x1e7   : > { %v3181_v11 = vadd.f32 %v3180_v5, %v2592_v28  ;;  %v3310_v12 = vadd.f32 %v3309_v4, %v3247_v58  ;;  %v3341_v13 = vadd.f32 %v3340_v54, %v3277_v7  ;;  %v3877_v14 = vpack.c.bf16 %v2553_v9, %v2551_v3 }
 0x1e8   : > { %v3212_v16 = vadd.f32 %v3211_v6, %v2553_v9  ;;  %v3278_v17 = vmul.f32 %v2553_v9, %v2553_v9  ;;  %v3878_v18 = vpack.c.bf16 %v2596_v15, %v2594_v8  ;;  %v3280_v24 = vmul.f32 %v2596_v15, %v2596_v15 }
 0x1e9   : > { %v3311_v19 = vadd.f32 %v3310_v12, %v3248_v2  ;;  %3157 = vst [vmem:[%s4818_s9 + $0xb0] sm:$0xff] %v3877_v14 }
 0x1ea   : > { %v3342_v21 = vadd.f32 %v3341_v13, %v3278_v17  ;;  %3158 = vst [vmem:[%s4818_s9 + $0xb8] sm:$0xff] %v3878_v18  ;;  %v3213_v22 = vadd.f32 %v3212_v16, %v2594_v8 }
 0x1ec   : > { %v3214_v23 = vadd.f32 %v3213_v22, %v2596_v15  ;;  %v3343_v25 = vadd.f32 %v3342_v21, %v3279_v20 }
 0x1ee   : > { %v3344_v26 = vadd.f32 %v3343_v25, %v3280_v24 }
 0x200   : > { %v2633_v27 = vpop.f32.mrf.mxu0  ;;  %v2676_v31 = vpop.f32.mrf.mxu1 }
 0x201   : > { %v3182_v29 = vadd.f32 %v3181_v11, %v2633_v27  ;;  %v3249_v30 = vmul.f32 %v2633_v27, %v2633_v27  ;;  %v3251_v32 = vmul.f32 %v2676_v31, %v2676_v31 }
 0x202   : > { %v2635_v33 = vpop.f32.mrf.mxu0  ;;  %v2678_v37 = vpop.f32.mrf.mxu1 }
 0x203   : > { %v3312_v34 = vadd.f32 %v3311_v19, %v3249_v30  ;;  %v3863_v35 = vpack.c.bf16 %v2635_v33, %v2633_v27  ;;  %v3183_v36 = vadd.f32 %v3182_v29, %v2635_v33  ;;  %v3250_v10 = vmul.f32 %v2635_v33, %v2635_v33 }
 0x204   : > { %v3864_v38 = vpack.c.bf16 %v2678_v37, %v2676_v31  ;;  %v3252_v39 = vmul.f32 %v2678_v37, %v2678_v37  ;;  %v2637_v40 = vpop.f32.mrf.mxu0  ;;  %v2680_v45 = vpop.f32.mrf.mxu1 }
 0x205   : > { %3143 = vst [vmem:[%s4818_s9 + $0x40] sm:$0xff] %v3863_v35  ;;  %v3313_v41 = vadd.f32 %v3312_v34, %v3250_v10  ;;  %v3184_v42 = vadd.f32 %v3183_v36, %v2676_v31  ;;  %v3215_v43 = vadd.f32 %v3214_v23, %v2637_v40  ;;  %v3281_v44 = vmul.f32 %v2637_v40, %v2637_v40 }
 0x206   : > { %3144 = vst [vmem:[%s4818_s9 + $0x48] sm:$0xff] %v3864_v38  ;;  %v2639_v46 = vpop.f32.mrf.mxu0  ;;  %v2682_v51 = vpop.f32.mrf.mxu1  ;;  %v3283_v56 = vmul.f32 %v2680_v45, %v2680_v45 }
 0x207   : > { %v3185_v47 = vadd.f32 %v3184_v42, %v2678_v37  ;;  %v3314_v48 = vadd.f32 %v3313_v41, %v3251_v32  ;;  %v3345_v49 = vadd.f32 %v3344_v26, %v3281_v44  ;;  %v3879_v50 = vpack.c.bf16 %v2639_v46, %v2637_v40 }
 0x208   : > { %v3216_v52 = vadd.f32 %v3215_v43, %v2639_v46  ;;  %v3282_v53 = vmul.f32 %v2639_v46, %v2639_v46  ;;  %v3880_v54 = vpack.c.bf16 %v2682_v51, %v2680_v45  ;;  %v3284_v60 = vmul.f32 %v2682_v51, %v2682_v51 }
 0x209   : > { %v3315_v55 = vadd.f32 %v3314_v48, %v3252_v39  ;;  %3159 = vst [vmem:[%s4818_s9 + $0xc0] sm:$0xff] %v3879_v50 }
 0x20a   : > { %v3346_v0 = vadd.f32 %v3345_v49, %v3282_v53  ;;  %3160 = vst [vmem:[%s4818_s9 + $0xc8] sm:$0xff] %v3880_v54  ;;  %v3217_v57 = vadd.f32 %v3216_v52, %v2680_v45 }
 0x20c   : > { %v3218_v58 = vadd.f32 %v3217_v57, %v2682_v51  ;;  %v3347_v61 = vadd.f32 %v3346_v0, %v3283_v56 }
 0x20e   : > { %v3348_v59 = vadd.f32 %v3347_v61, %v3284_v60 }
 0x220   : > { %v2719_v62 = vpop.f32.mrf.mxu0  ;;  %v2762_v63 = vpop.f32.mrf.mxu1 }
 0x221   : > { %v3253_v14 = vmul.f32 %v2719_v62, %v2719_v62  ;;  %v3186_v19 = vadd.f32 %v3185_v47, %v2719_v62  ;;  %v3255_v33 = vmul.f32 %v2762_v63, %v2762_v63 }
 0x222   : > { %v2721_v28 = vpop.f32.mrf.mxu0  ;;  %v2764_v2 = vpop.f32.mrf.mxu1 }
 0x223   : > { %v3865_v1 = vpack.c.bf16 %v2721_v28, %v2719_v62  ;;  %v3866_v3 = vpack.c.bf16 %v2764_v2, %v2762_v63  ;;  %v3316_v23 = vadd.f32 %v3315_v55, %v3253_v14  ;;  %v3254_v24 = vmul.f32 %v2721_v28, %v2721_v28 }
 0x224   : > { %v2723_v4 = vpop.f32.mrf.mxu0  ;;  %v2766_v5 = vpop.f32.mrf.mxu1  ;;  %v3187_v30 = vadd.f32 %v3186_v19, %v2721_v28  ;;  %v3256_v37 = vmul.f32 %v2764_v2, %v2764_v2 }
 0x225   : > { %3145 = vst [vmem:[%s4818_s9 + $0x50] sm:$0xff] %v3865_v1  ;;  %3146 = vst [vmem:[%s4818_s9 + $0x58] sm:$0xff] %v3866_v3  ;;  %v3285_v21 = vmul.f32 %v2723_v4, %v2723_v4  ;;  %v3219_v27 = vadd.f32 %v3218_v58, %v2723_v4  ;;  %v3317_v34 = vadd.f32 %v3316_v23, %v3254_v24 }
 0x226   : > { %v2725_v6 = vpop.f32.mrf.mxu0  ;;  %v2768_v8 = vpop.f32.mrf.mxu1  ;;  %v3188_v36 = vadd.f32 %v3187_v30, %v2762_v63  ;;  %v3287_v39 = vmul.f32 %v2766_v5, %v2766_v5 }
 0x227   : > { %v3881_v7 = vpack.c.bf16 %v2725_v6, %v2723_v4  ;;  %v3882_v9 = vpack.c.bf16 %v2768_v8, %v2766_v5  ;;  %v3349_v31 = vadd.f32 %v3348_v59, %v3285_v21  ;;  %v3286_v32 = vmul.f32 %v2725_v6, %v2725_v6 }
 0x228   : > { %v3220_v35 = vadd.f32 %v3219_v27, %v2725_v6  ;;  %v3318_v38 = vadd.f32 %v3317_v34, %v3255_v33  ;;  %v3189_v41 = vadd.f32 %v3188_v36, %v2764_v2  ;;  %v3288_v47 = vmul.f32 %v2768_v8, %v2768_v8 }
 0x229   : > { %3161 = vst [vmem:[%s4818_s9 + $0xd0] sm:$0xff] %v3881_v7  ;;  %3162 = vst [vmem:[%s4818_s9 + $0xd8] sm:$0xff] %v3882_v9  ;;  %v3350_v10 = vadd.f32 %v3349_v31, %v3286_v32 }
 0x22a   : > { %v3221_v40 = vadd.f32 %v3220_v35, %v2766_v5  ;;  %v3319_v44 = vadd.f32 %v3318_v38, %v3256_v37 }
 0x22b   : > { %v3351_v43 = vadd.f32 %v3350_v10, %v3287_v39 }
 0x22c   : > { %v3222_v46 = vadd.f32 %v3221_v40, %v2768_v8 }
 0x22d   : > { %v3352_v51 = vadd.f32 %v3351_v43, %v3288_v47 }
 0x240   : > { %v2805_v11 = vpop.f32.mrf.mxu0  ;;  %v2848_v12 = vpop.f32.mrf.mxu1 }
 0x241   : > { %v3257_v42 = vmul.f32 %v2805_v11, %v2805_v11  ;;  %v3190_v45 = vadd.f32 %v3189_v41, %v2805_v11  ;;  %v3259_v56 = vmul.f32 %v2848_v12, %v2848_v12 }
 0x242   : > { %v2807_v13 = vpop.f32.mrf.mxu0  ;;  %v2850_v16 = vpop.f32.mrf.mxu1 }
 0x243   : > { %v3867_v15 = vpack.c.bf16 %v2807_v13, %v2805_v11  ;;  %v3868_v17 = vpack.c.bf16 %v2850_v16, %v2848_v12  ;;  %v3320_v49 = vadd.f32 %v3319_v44, %v3257_v42  ;;  %v3258_v50 = vmul.f32 %v2807_v13, %v2807_v13 }
 0x244   : > { %v2809_v18 = vpop.f32.mrf.mxu0  ;;  %v2852_v20 = vpop.f32.mrf.mxu1  ;;  %v3191_v53 = vadd.f32 %v3190_v45, %v2807_v13  ;;  %v3260_v61 = vmul.f32 %v2850_v16, %v2850_v16 }
 0x245   : > { %3147 = vst [vmem:[%s4818_s9 + $0x60] sm:$0xff] %v3867_v15  ;;  %3148 = vst [vmem:[%s4818_s9 + $0x68] sm:$0xff] %v3868_v17  ;;  %v3289_v48 = vmul.f32 %v2809_v18, %v2809_v18  ;;  %v3223_v52 = vadd.f32 %v3222_v46, %v2809_v18  ;;  %v3321_v0 = vadd.f32 %v3320_v49, %v3258_v50  ;;  %v3396_v49 = vld [vmem:[%s4818_s9] sm:$0xff] (%p3991_p5)  ;;  %v3398_v50 = vld [vmem:[%s4818_s9 + $0x8] sm:$0xff] (%p3991_p5) }
 0x246   : > { %v2811_v22 = vpop.f32.mrf.mxu0  ;;  %v2854_v26 = vpop.f32.mrf.mxu1  ;;  %v3192_v58 = vadd.f32 %v3191_v53, %v2848_v12  ;;  %v3291_v62 = vmul.f32 %v2852_v20, %v2852_v20  ;;  %v3404_v53 = vld [vmem:[%s4818_s9 + $0x20] sm:$0xff] (%p3991_p5)  ;;  %3397 = vst [vmem:[%s4899_s23] sm:$0xff] (%p3991_p5), %v3396_v49  ;;  %3399 = vst [vmem:[%s4899_s23 + $0x8] sm:$0xff] (%p3991_p5), %v3398_v50 }
 0x247   : > { %v3883_v25 = vpack.c.bf16 %v2811_v22, %v2809_v18  ;;  %v3884_v29 = vpack.c.bf16 %v2854_v26, %v2852_v20  ;;  %v3353_v54 = vadd.f32 %v3352_v51, %v3289_v48  ;;  %v3290_v55 = vmul.f32 %v2811_v22, %v2811_v22  ;;  %v3400_v51 = vld [vmem:[%s4818_s9 + $0x10] sm:$0xff] (%p3991_p5)  ;;  %3405 = vst [vmem:[%s4899_s23 + $0x20] sm:$0xff] (%p3991_p5), %v3404_v53 }
 0x248   : > { %v3224_v57 = vadd.f32 %v3223_v52, %v2811_v22  ;;  %v3322_v59 = vadd.f32 %v3321_v0, %v3259_v56  ;;  %v3193_v28 = vadd.f32 %v3192_v58, %v2850_v16  ;;  %v3292_v8 = vmul.f32 %v2854_v26, %v2854_v26  ;;  %v3402_v52 = vld [vmem:[%s4818_s9 + $0x18] sm:$0xff] (%p3991_p5)  ;;  %3401 = vst [vmem:[%s4899_s23 + $0x10] sm:$0xff] (%p3991_p5), %v3400_v51  ;;  %v3412_v0 = vld [vmem:[%s4818_s9 + $0x40] sm:$0xff] (%p3991_p5)  ;;  %v3416_v58 = vld [vmem:[%s4818_s9 + $0x50] sm:$0xff] (%p3991_p5) }
 0x249   : > { %3163 = vst [vmem:[%s4818_s9 + $0xe0] sm:$0xff] %v3883_v25  ;;  %3164 = vst [vmem:[%s4818_s9 + $0xe8] sm:$0xff] %v3884_v29  ;;  %v3354_v60 = vadd.f32 %v3353_v54, %v3290_v55  ;;  %v3406_v54 = vld [vmem:[%s4818_s9 + $0x28] sm:$0xff] (%p3991_p5)  ;;  %v3408_v55 = vld [vmem:[%s4818_s9 + $0x30] sm:$0xff] (%p3991_p5) }
 0x24a   : > { %v3225_v63 = vadd.f32 %v3224_v57, %v2852_v20  ;;  %v3323_v3 = vadd.f32 %v3322_v59, %v3260_v61  ;;  %3403 = vst [vmem:[%s4899_s23 + $0x18] sm:$0xff] (%p3991_p5), %v3402_v52  ;;  %3407 = vst [vmem:[%s4899_s23 + $0x28] sm:$0xff] (%p3991_p5), %v3406_v54  ;;  %v3410_v56 = vld [vmem:[%s4818_s9 + $0x38] sm:$0xff] (%p3991_p5)  ;;  %v3414_v57 = vld [vmem:[%s4818_s9 + $0x48] sm:$0xff] (%p3991_p5) }
 0x24b   : > { %v3355_v1 = vadd.f32 %v3354_v60, %v3291_v62  ;;  %3409 = vst [vmem:[%s4899_s23 + $0x30] sm:$0xff] (%p3991_p5), %v3408_v55  ;;  %3411 = vst [vmem:[%s4899_s23 + $0x38] sm:$0xff] (%p3991_p5), %v3410_v56  ;;  %v3418_v60 = vld [vmem:[%s4818_s9 + $0x58] sm:$0xff] (%p3991_p5) }
 0x24c   : > { %v3226_v7 = vadd.f32 %v3225_v63, %v2854_v26  ;;  %3413 = vst [vmem:[%s4899_s23 + $0x40] sm:$0xff] (%p3991_p5), %v3412_v0  ;;  %3415 = vst [vmem:[%s4899_s23 + $0x48] sm:$0xff] (%p3991_p5), %v3414_v57  ;;  %v3420_v61 = vld [vmem:[%s4818_s9 + $0x60] sm:$0xff] (%p3991_p5)  ;;  %v3422_v59 = vld [vmem:[%s4818_s9 + $0x68] sm:$0xff] (%p3991_p5) }
 0x24d   : > { %v3356_v17 = vadd.f32 %v3355_v1, %v3292_v8  ;;  %3417 = vst [vmem:[%s4899_s23 + $0x50] sm:$0xff] (%p3991_p5), %v3416_v58  ;;  %3419 = vst [vmem:[%s4899_s23 + $0x58] sm:$0xff] (%p3991_p5), %v3418_v60  ;;  %v3430_v1 = vld [vmem:[%s4818_s9 + $0x88] sm:$0xff] (%p3991_p5)  ;;  %v3444_v8 = vld [vmem:[%s4818_s9 + $0xc0] sm:$0xff] (%p3991_p5) }
 0x24e   : > { %3421 = vst [vmem:[%s4899_s23 + $0x60] sm:$0xff] (%p3991_p5), %v3420_v61  ;;  %3423 = vst [vmem:[%s4899_s23 + $0x68] sm:$0xff] (%p3991_p5), %v3422_v59 }
 0x24f   : > { %3431 = vst [vmem:[%s4899_s23 + $0x108] sm:$0xff] (%p3991_p5), %v3430_v1  ;;  %3445 = vst [vmem:[%s4899_s23 + $0x140] sm:$0xff] (%p3991_p5), %v3444_v8 }
 0x260   : > { %v2891_v2 = vpop.f32.mrf.mxu0  ;;  %v2934_v6 = vpop.f32.mrf.mxu1 }
 0x261   : > { %v3194_v4 = vadd.f32 %v3193_v28, %v2891_v2  ;;  %v3261_v5 = vmul.f32 %v2891_v2, %v2891_v2  ;;  %v3263_v18 = vmul.f32 %v2934_v6, %v2934_v6  ;;  %v3428_v28 = vld [vmem:[%s4818_s9 + $0x80] sm:$0xff] (%p3991_p5) }
 0x262   : > { %v2893_v9 = vpop.f32.mrf.mxu0  ;;  %v2936_v15 = vpop.f32.mrf.mxu1  ;;  %3429 = vst [vmem:[%s4899_s23 + $0x100] sm:$0xff] (%p3991_p5), %v3428_v28 }
 0x263   : > { %v3324_v11 = vadd.f32 %v3323_v3, %v3261_v5  ;;  %v3869_v13 = vpack.c.bf16 %v2893_v9, %v2891_v2  ;;  %v3195_v12 = vadd.f32 %v3194_v4, %v2893_v9  ;;  %v3262_v14 = vmul.f32 %v2893_v9, %v2893_v9  ;;  %v3432_v2 = vld [vmem:[%s4818_s9 + $0x90] sm:$0xff] (%p3991_p5)  ;;  %v3434_v3 = vld [vmem:[%s4818_s9 + $0x98] sm:$0xff] (%p3991_p5)  ;;  %v3436_v4 = vld [vmem:[%s4818_s9 + $0xa0] sm:$0xff] (%p3991_p5) }
 0x264   : > { %v3870_v19 = vpack.c.bf16 %v2936_v15, %v2934_v6  ;;  %v2895_v16 = vpop.f32.mrf.mxu0  ;;  %v2938_v22 = vpop.f32.mrf.mxu1  ;;  %v3264_v34 = vmul.f32 %v2936_v15, %v2936_v15  ;;  %3433 = vst [vmem:[%s4899_s23 + $0x110] sm:$0xff] (%p3991_p5), %v3432_v2  ;;  %3435 = vst [vmem:[%s4899_s23 + $0x118] sm:$0xff] (%p3991_p5), %v3434_v3  ;;  %v3438_v5 = vld [vmem:[%s4818_s9 + $0xa8] sm:$0xff] (%p3991_p5) }
 0x265   : > { %3149 = vst [vmem:[%s4818_s9 + $0x70] sm:$0xff] %v3869_v13  ;;  %v3227_v20 = vadd.f32 %v3226_v7, %v2895_v16  ;;  %v3293_v21 = vmul.f32 %v2895_v16, %v2895_v16  ;;  %v3196_v23 = vadd.f32 %v3195_v12, %v2934_v6  ;;  %v3325_v24 = vadd.f32 %v3324_v11, %v3262_v14  ;;  %v3440_v6 = vld [vmem:[%s4818_s9 + $0xb0] sm:$0xff] (%p3991_p5)  ;;  %v3442_v7 = vld [vmem:[%s4818_s9 + $0xb8] sm:$0xff] (%p3991_p5)  ;;  %v3446_v9 = vld [vmem:[%s4818_s9 + $0xc8] sm:$0xff] (%p3991_p5) }
 0x266   : > { %3150 = vst [vmem:[%s4818_s9 + $0x78] sm:$0xff] %v3870_v19  ;;  %v2897_v25 = vpop.f32.mrf.mxu0  ;;  %v2940_v31 = vpop.f32.mrf.mxu1  ;;  %v3295_v36 = vmul.f32 %v2938_v22, %v2938_v22  ;;  %3437 = vst [vmem:[%s4899_s23 + $0x120] sm:$0xff] (%p3991_p5), %v3436_v4  ;;  %v3448_v11 = vld [vmem:[%s4818_s9 + $0xd0] sm:$0xff] (%p3991_p5)  ;;  %v3450_v13 = vld [vmem:[%s4818_s9 + $0xd8] sm:$0xff] (%p3991_p5) }
 0x267   : > { %v3357_v26 = vadd.f32 %v3356_v17, %v3293_v21  ;;  %v3885_v27 = vpack.c.bf16 %v2897_v25, %v2895_v16  ;;  %v3228_v29 = vadd.f32 %v3227_v20, %v2897_v25  ;;  %v3294_v30 = vmul.f32 %v2897_v25, %v2897_v25  ;;  %3439 = vst [vmem:[%s4899_s23 + $0x128] sm:$0xff] (%p3991_p5), %v3438_v5  ;;  %v3452_v12 = vld [vmem:[%s4818_s9 + $0xe0] sm:$0xff] (%p3991_p5)  ;;  %v3454_v14 = vld [vmem:[%s4818_s9 + $0xe8] sm:$0xff] (%p3991_p5) }
 0x268   : > { %v3886_v32 = vpack.c.bf16 %v2940_v31, %v2938_v22  ;;  %v3197_v33 = vadd.f32 %v3196_v23, %v2936_v15  ;;  %v3326_v35 = vadd.f32 %v3325_v24, %v3263_v18  ;;  %v3296_v39 = vmul.f32 %v2940_v31, %v2940_v31  ;;  %3441 = vst [vmem:[%s4899_s23 + $0x130] sm:$0xff] (%p3991_p5), %v3440_v6 }
 0x269   : > { %3165 = vst [vmem:[%s4818_s9 + $0xf0] sm:$0xff] %v3885_v27  ;;  %v3358_v10 = vadd.f32 %v3357_v26, %v3294_v30  ;;  %v3229_v37 = vadd.f32 %v3228_v29, %v2938_v22  ;;  %3443 = vst [vmem:[%s4899_s23 + $0x138] sm:$0xff] (%p3991_p5), %v3442_v7 }
 0x26a   : > { %3166 = vst [vmem:[%s4818_s9 + $0xf8] sm:$0xff] %v3886_v32  ;;  %3198 = vadd.xlane.f32.xlu0 %v3197_v33  ;;  %v3327_v38 = vadd.f32 %v3326_v35, %v3264_v34  ;;  %3447 = vst [vmem:[%s4899_s23 + $0x148] sm:$0xff] (%p3991_p5), %v3446_v9 }
 0x26b   : > { %v3230_v40 = vadd.f32 %v3229_v37, %v2940_v31  ;;  %v3359_v41 = vadd.f32 %v3358_v10, %v3295_v36  ;;  %3449 = vst [vmem:[%s4899_s23 + $0x150] sm:$0xff] (%p3991_p5), %v3448_v11  ;;  %3451 = vst [vmem:[%s4899_s23 + $0x158] sm:$0xff] (%p3991_p5), %v3450_v13 }
 0x26c   : > { %3328 = vadd.xlane.f32.xlu1 %v3327_v38  ;;  %v3424_v62 = vld [vmem:[%s4818_s9 + $0x70] sm:$0xff] (%p3991_p5)  ;;  %3453 = vst [vmem:[%s4899_s23 + $0x160] sm:$0xff] (%p3991_p5), %v3452_v12  ;;  %3455 = vst [vmem:[%s4899_s23 + $0x168] sm:$0xff] (%p3991_p5), %v3454_v14 }
 0x26d   : > { %v3360_v42 = vadd.f32 %v3359_v41, %v3296_v39  ;;  %3425 = vst [vmem:[%s4899_s23 + $0x70] sm:$0xff] (%p3991_p5), %v3424_v62  ;;  %v3426_v63 = vld [vmem:[%s4818_s9 + $0x78] sm:$0xff] (%p3991_p5) }
 0x26e   : > { %3231 = vadd.xlane.f32.xlu0 %v3230_v40  ;;  %3427 = vst [vmem:[%s4899_s23 + $0x78] sm:$0xff] (%p3991_p5), %v3426_v63 }
 0x270   : > { %3361 = vadd.xlane.f32.xlu1 %v3360_v42  ;;  %v3456_v15 = vld [vmem:[%s4818_s9 + $0xf0] sm:$0xff] (%p3991_p5) }
 0x271   : > { %v3458_v17 = vld [vmem:[%s4818_s9 + $0xf8] sm:$0xff] (%p3991_p5)  ;;  %3457 = vst [vmem:[%s4899_s23 + $0x170] sm:$0xff] (%p3991_p5), %v3456_v15 }
 0x272   : > { %3459 = vst [vmem:[%s4899_s23 + $0x178] sm:$0xff] (%p3991_p5), %v3458_v17 }
 0x2f3   : > { %v3199_v43 = vpop.xlane.xlu0 %3198 }
 0x2f5   : > { %v3329_v44 = vpop.xlane.xlu1 %3328 }
 0x2f6   : > { %v3364_v45 = vsel %vm3363_vm0, %v3199_v43, %v3329_v44 }
 0x2f7   : > { %3367 = vst.msk [vmem:[%s709_s17] sm:$0xff] %vm3366_vm1, %v3364_v45  ;;  %v3232_v46 = vpop.xlane.xlu0 %3231  ;;  %3380 = sbr.rel (!%p3991_p5) target bundleno = 764 (0x2fc), region = 55 }
 0x2f9   : > { %v3362_v47 = vpop.xlane.xlu1 %3361 }
 0x2fa   : > { %v3365_v48 = vsel %vm3363_vm0, %v3232_v46, %v3362_v47 }
 0x2fb   : > { %3368 = vst.msk [vmem:[%s709_s17 + $0x8] sm:$0xff] %vm3366_vm1, %v3365_v48 }
 0x2fc PF: > { %p11_p11 = scmp.ge.s32.totalorder %s3979_s16, 4   ;;  %s4977_s12 = smov %s3933_s13 }
 0x2fd   : > { %s4978_s13 = smov %s3989_s19  ;;  %s4979_s14 = smov %s3979_s16 }
 0x2fe   :  { %13 = sbr.rel (!%p11_p11) target bundleno = 2 (0x2), region = 121 }

// kernel: discriminator_forward.6
= control target key start
LH: loop header
LB: loop body
LE: loop exit
PB: predicated region body
PF: predicated region fallthrough
CT: control target
= control target key end

     0   :  { %s2088_s12 = smov 0   ;;  %s2090_s13 = smov 0   ;;  %s2636_s0 = inlined_call_operand.vmem [shape: bf16[256,2048], index: 0, kind: input, shape index: {}]   ;;  %s2637_s1 = inlined_call_operand.vmem [shape: bf16[32,256], index: 1, kind: input, shape index: {}]   ;;  %s2638_s2 = inlined_call_operand.vmem [shape: bf16[32,2048], index: 2, kind: output, shape index: {0}]   ;;  %s2639_s3 = inlined_call_operand.vmem [shape: f32[2,32,2], index: 3, kind: output, shape index: {1}]  }
   0x1   :  { %s2092_s14 = smov 0  }
   0x2 LB: > { %s2104_s15 = sadd.s32 4294967295, %s2066_s14   ;;  %s2107_s16 = sadd.s32 1, %s2066_s14   ;;  %s2066_s14 = sphi %s2092_s14, %s2643_s14   ;;  %s2062_s13 = sphi %s2090_s13, %s2642_s13   ;;  %s2058_s12 = sphi %s2088_s12, %s2641_s12  }
   0x3   : > { %s18_s17 = ssub.s32 %s2066_s14, %s2107_s16  ;;  %s21_s18 = sadd.s32 1, %s2062_s13 }
   0x4   : > { %p19_p0 = scmp.eq.s32.totalorder %s18_s17, 0  ;;  %p28_p1 = scmp.ne.s32.totalorder %s2062_s13, %s2058_s12 }
   0x5   : > { %p29_p2 = scmp.eq.s32.totalorder %s2066_s14, 0  ;;  %p79_p3 = scmp.eq.s32.totalorder %s2104_s15, 1 }
   0x6   : > { %s2117_s19 = scalar_select %p19_p0, %s2062_s13, %s21_s18  }
   0x7   : > { %p30_p4 = por %p29_p2, %p28_p1  ;;  %p2119_p5 = por %p79_p3, %p28_p1 }
   0x8   : > { %p1833_p6 = scmp.ge.s32.totalorder %s2066_s14, 2 }
   0xa   : > { %130 = sbr.rel (%p1833_p6) target bundleno = 83 (0x53), region = 20 }
   0xf   : > { %133 = sbr.rel (!%p30_p4) target bundleno = 83 (0x53), region = 24  ;;  %s135_s21 = sand.u32 (%p30_p4), 1, %s2062_s13  }
  0x10   : > { %s1995_s22 = sshll.u32 (%p30_p4), %s2066_s14, 5  ;;  %s1834_s23 = sshll.u32 (%p30_p4), %s135_s21, 10 }
  0x11   : > { %s2129_s26 = scalar_lea.vmem (%p30_p4), %s2636_s0, %s1995_s22  ;;  %s2134_s27 = scalar_lea.vmem (%p30_p4), [#allocation2], %s1834_s23 }
  0x12   : > { %v153_v0 = vld [vmem:[%s2129_s26] sm:$0xff] (%p30_p4)  ;;  %v155_v1 = vld [vmem:[%s2129_s26 + $0x8] sm:$0xff] (%p30_p4)  ;;  %v157_v2 = vld [vmem:[%s2129_s26 + $0x10] sm:$0xff] (%p30_p4) }
  0x13   : > { %154 = vst [vmem:[%s2134_s27] sm:$0xff] (%p30_p4), %v153_v0  ;;  %156 = vst [vmem:[%s2134_s27 + $0x8] sm:$0xff] (%p30_p4), %v155_v1  ;;  %v159_v3 = vld [vmem:[%s2129_s26 + $0x18] sm:$0xff] (%p30_p4)  ;;  %v161_v4 = vld [vmem:[%s2129_s26 + $0x40] sm:$0xff] (%p30_p4) }
  0x14   : > { %158 = vst [vmem:[%s2134_s27 + $0x10] sm:$0xff] %v157_v2  ;;  %v163_v5 = vld [vmem:[%s2129_s26 + $0x48] sm:$0xff]  ;;  %160 = vst [vmem:[%s2134_s27 + $0x18] sm:$0xff] %v159_v3  ;;  %v165_v6 = vld [vmem:[%s2129_s26 + $0x50] sm:$0xff] }
  0x15   : > { %162 = vst [vmem:[%s2134_s27 + $0x20] sm:$0xff] %v161_v4  ;;  %164 = vst [vmem:[%s2134_s27 + $0x28] sm:$0xff] %v163_v5  ;;  %v167_v7 = vld [vmem:[%s2129_s26 + $0x58] sm:$0xff]  ;;  %v169_v8 = vld [vmem:[%s2129_s26 + $0x80] sm:$0xff] }
  0x16   : > { %166 = vst [vmem:[%s2134_s27 + $0x30] sm:$0xff] %v165_v6  ;;  %168 = vst [vmem:[%s2134_s27 + $0x38] sm:$0xff] %v167_v7  ;;  %v171_v9 = vld [vmem:[%s2129_s26 + $0x88] sm:$0xff]  ;;  %v173_v10 = vld [vmem:[%s2129_s26 + $0x90] sm:$0xff] }
  0x17   : > { %170 = vst [vmem:[%s2134_s27 + $0x40] sm:$0xff] %v169_v8  ;;  %v175_v11 = vld [vmem:[%s2129_s26 + $0x98] sm:$0xff]  ;;  %172 = vst [vmem:[%s2134_s27 + $0x48] sm:$0xff] %v171_v9  ;;  %v177_v12 = vld [vmem:[%s2129_s26 + $0xc0] sm:$0xff] }
  0x18   : > { %174 = vst [vmem:[%s2134_s27 + $0x50] sm:$0xff] %v173_v10  ;;  %176 = vst [vmem:[%s2134_s27 + $0x58] sm:$0xff] %v175_v11  ;;  %v179_v13 = vld [vmem:[%s2129_s26 + $0xc8] sm:$0xff]  ;;  %v181_v14 = vld [vmem:[%s2129_s26 + $0xd0] sm:$0xff] }
  0x19   : > { %178 = vst [vmem:[%s2134_s27 + $0x60] sm:$0xff] %v177_v12  ;;  %180 = vst [vmem:[%s2134_s27 + $0x68] sm:$0xff] %v179_v13  ;;  %v183_v15 = vld [vmem:[%s2129_s26 + $0xd8] sm:$0xff]  ;;  %v185_v16 = vld [vmem:[%s2129_s26 + $0x100] sm:$0xff] }
  0x1a   : > { %182 = vst [vmem:[%s2134_s27 + $0x70] sm:$0xff] %v181_v14  ;;  %v187_v17 = vld [vmem:[%s2129_s26 + $0x108] sm:$0xff]  ;;  %184 = vst [vmem:[%s2134_s27 + $0x78] sm:$0xff] %v183_v15  ;;  %v189_v18 = vld [vmem:[%s2129_s26 + $0x110] sm:$0xff] }
  0x1b   : > { %186 = vst [vmem:[%s2134_s27 + $0x80] sm:$0xff] %v185_v16  ;;  %188 = vst [vmem:[%s2134_s27 + $0x88] sm:$0xff] %v187_v17  ;;  %v191_v19 = vld [vmem:[%s2129_s26 + $0x118] sm:$0xff]  ;;  %v193_v20 = vld [vmem:[%s2129_s26 + $0x140] sm:$0xff] }
  0x1c   : > { %190 = vst [vmem:[%s2134_s27 + $0x90] sm:$0xff] %v189_v18  ;;  %192 = vst [vmem:[%s2134_s27 + $0x98] sm:$0xff] %v191_v19  ;;  %v195_v21 = vld [vmem:[%s2129_s26 + $0x148] sm:$0xff]  ;;  %v197_v22 = vld [vmem:[%s2129_s26 + $0x150] sm:$0xff] }
  0x1d   : > { %194 = vst [vmem:[%s2134_s27 + $0xa0] sm:$0xff] %v193_v20  ;;  %v199_v23 = vld [vmem:[%s2129_s26 + $0x158] sm:$0xff]  ;;  %196 = vst [vmem:[%s2134_s27 + $0xa8] sm:$0xff] %v195_v21  ;;  %v201_v24 = vld [vmem:[%s2129_s26 + $0x180] sm:$0xff] }
  0x1e   : > { %198 = vst [vmem:[%s2134_s27 + $0xb0] sm:$0xff] %v197_v22  ;;  %200 = vst [vmem:[%s2134_s27 + $0xb8] sm:$0xff] %v199_v23  ;;  %v203_v25 = vld [vmem:[%s2129_s26 + $0x188] sm:$0xff]  ;;  %v205_v26 = vld [vmem:[%s2129_s26 + $0x190] sm:$0xff] }
  0x1f   : > { %202 = vst [vmem:[%s2134_s27 + $0xc0] sm:$0xff] %v201_v24  ;;  %204 = vst [vmem:[%s2134_s27 + $0xc8] sm:$0xff] %v203_v25  ;;  %v207_v27 = vld [vmem:[%s2129_s26 + $0x198] sm:$0xff]  ;;  %v209_v28 = vld [vmem:[%s2129_s26 + $0x1c0] sm:$0xff] }
  0x20   : > { %206 = vst [vmem:[%s2134_s27 + $0xd0] sm:$0xff] %v205_v26  ;;  %v211_v29 = vld [vmem:[%s2129_s26 + $0x1c8] sm:$0xff]  ;;  %208 = vst [vmem:[%s2134_s27 + $0xd8] sm:$0xff] %v207_v27  ;;  %v213_v30 = vld [vmem:[%s2129_s26 + $0x1d0] sm:$0xff] }
  0x21   : > { %210 = vst [vmem:[%s2134_s27 + $0xe0] sm:$0xff] %v209_v28  ;;  %212 = vst [vmem:[%s2134_s27 + $0xe8] sm:$0xff] %v211_v29  ;;  %v215_v31 = vld [vmem:[%s2129_s26 + $0x1d8] sm:$0xff]  ;;  %v217_v32 = vld [vmem:[%s2129_s26 + $0x200] sm:$0xff] }
  0x22   : > { %214 = vst [vmem:[%s2134_s27 + $0xf0] sm:$0xff] %v213_v30  ;;  %216 = vst [vmem:[%s2134_s27 + $0xf8] sm:$0xff] %v215_v31  ;;  %v219_v33 = vld [vmem:[%s2129_s26 + $0x208] sm:$0xff]  ;;  %v221_v34 = vld [vmem:[%s2129_s26 + $0x210] sm:$0xff] }
  0x23   : > { %218 = vst [vmem:[%s2134_s27 + $0x100] sm:$0xff] %v217_v32  ;;  %v223_v35 = vld [vmem:[%s2129_s26 + $0x218] sm:$0xff]  ;;  %220 = vst [vmem:[%s2134_s27 + $0x108] sm:$0xff] %v219_v33  ;;  %v225_v36 = vld [vmem:[%s2129_s26 + $0x240] sm:$0xff] }
  0x24   : > { %222 = vst [vmem:[%s2134_s27 + $0x110] sm:$0xff] %v221_v34  ;;  %224 = vst [vmem:[%s2134_s27 + $0x118] sm:$0xff] %v223_v35  ;;  %v227_v37 = vld [vmem:[%s2129_s26 + $0x248] sm:$0xff]  ;;  %v229_v38 = vld [vmem:[%s2129_s26 + $0x250] sm:$0xff] }
  0x25   : > { %226 = vst [vmem:[%s2134_s27 + $0x120] sm:$0xff] %v225_v36  ;;  %228 = vst [vmem:[%s2134_s27 + $0x128] sm:$0xff] %v227_v37  ;;  %v231_v39 = vld [vmem:[%s2129_s26 + $0x258] sm:$0xff]  ;;  %v233_v40 = vld [vmem:[%s2129_s26 + $0x280] sm:$0xff] }
  0x26   : > { %230 = vst [vmem:[%s2134_s27 + $0x130] sm:$0xff] %v229_v38  ;;  %v235_v41 = vld [vmem:[%s2129_s26 + $0x288] sm:$0xff]  ;;  %232 = vst [vmem:[%s2134_s27 + $0x138] sm:$0xff] %v231_v39  ;;  %v237_v42 = vld [vmem:[%s2129_s26 + $0x290] sm:$0xff] }
  0x27   : > { %234 = vst [vmem:[%s2134_s27 + $0x140] sm:$0xff] %v233_v40  ;;  %236 = vst [vmem:[%s2134_s27 + $0x148] sm:$0xff] %v235_v41  ;;  %v239_v43 = vld [vmem:[%s2129_s26 + $0x298] sm:$0xff]  ;;  %v241_v44 = vld [vmem:[%s2129_s26 + $0x2c0] sm:$0xff] }
  0x28   : > { %238 = vst [vmem:[%s2134_s27 + $0x150] sm:$0xff] %v237_v42  ;;  %240 = vst [vmem:[%s2134_s27 + $0x158] sm:$0xff] %v239_v43  ;;  %v243_v45 = vld [vmem:[%s2129_s26 + $0x2c8] sm:$0xff]  ;;  %v245_v46 = vld [vmem:[%s2129_s26 + $0x2d0] sm:$0xff] }
  0x29   : > { %242 = vst [vmem:[%s2134_s27 + $0x160] sm:$0xff] %v241_v44  ;;  %v247_v47 = vld [vmem:[%s2129_s26 + $0x2d8] sm:$0xff]  ;;  %244 = vst [vmem:[%s2134_s27 + $0x168] sm:$0xff] %v243_v45  ;;  %v249_v48 = vld [vmem:[%s2129_s26 + $0x300] sm:$0xff] }
  0x2a   : > { %246 = vst [vmem:[%s2134_s27 + $0x170] sm:$0xff] %v245_v46  ;;  %248 = vst [vmem:[%s2134_s27 + $0x178] sm:$0xff] %v247_v47  ;;  %v251_v49 = vld [vmem:[%s2129_s26 + $0x308] sm:$0xff]  ;;  %v253_v50 = vld [vmem:[%s2129_s26 + $0x310] sm:$0xff] }
  0x2b   : > { %250 = vst [vmem:[%s2134_s27 + $0x180] sm:$0xff] %v249_v48  ;;  %252 = vst [vmem:[%s2134_s27 + $0x188] sm:$0xff] %v251_v49  ;;  %v255_v51 = vld [vmem:[%s2129_s26 + $0x318] sm:$0xff]  ;;  %v257_v52 = vld [vmem:[%s2129_s26 + $0x340] sm:$0xff] }
  0x2c   : > { %254 = vst [vmem:[%s2134_s27 + $0x190] sm:$0xff] %v253_v50  ;;  %v259_v53 = vld [vmem:[%s2129_s26 + $0x348] sm:$0xff]  ;;  %256 = vst [vmem:[%s2134_s27 + $0x198] sm:$0xff] %v255_v51  ;;  %v261_v54 = vld [vmem:[%s2129_s26 + $0x350] sm:$0xff] }
  0x2d   : > { %258 = vst [vmem:[%s2134_s27 + $0x1a0] sm:$0xff] %v257_v52  ;;  %260 = vst [vmem:[%s2134_s27 + $0x1a8] sm:$0xff] %v259_v53  ;;  %v263_v55 = vld [vmem:[%s2129_s26 + $0x358] sm:$0xff]  ;;  %v265_v56 = vld [vmem:[%s2129_s26 + $0x380] sm:$0xff] }
  0x2e   : > { %262 = vst [vmem:[%s2134_s27 + $0x1b0] sm:$0xff] %v261_v54  ;;  %264 = vst [vmem:[%s2134_s27 + $0x1b8] sm:$0xff] %v263_v55  ;;  %v267_v57 = vld [vmem:[%s2129_s26 + $0x388] sm:$0xff]  ;;  %v269_v58 = vld [vmem:[%s2129_s26 + $0x390] sm:$0xff] }
  0x2f   : > { %266 = vst [vmem:[%s2134_s27 + $0x1c0] sm:$0xff] %v265_v56  ;;  %v271_v59 = vld [vmem:[%s2129_s26 + $0x398] sm:$0xff]  ;;  %268 = vst [vmem:[%s2134_s27 + $0x1c8] sm:$0xff] %v267_v57  ;;  %v273_v60 = vld [vmem:[%s2129_s26 + $0x3c0] sm:$0xff] }
  0x30   : > { %270 = vst [vmem:[%s2134_s27 + $0x1d0] sm:$0xff] %v269_v58  ;;  %272 = vst [vmem:[%s2134_s27 + $0x1d8] sm:$0xff] %v271_v59  ;;  %v275_v61 = vld [vmem:[%s2129_s26 + $0x3c8] sm:$0xff]  ;;  %v277_v62 = vld [vmem:[%s2129_s26 + $0x3d0] sm:$0xff] }
  0x31   : > { %274 = vst [vmem:[%s2134_s27 + $0x1e0] sm:$0xff] %v273_v60  ;;  %276 = vst [vmem:[%s2134_s27 + $0x1e8] sm:$0xff] %v275_v61  ;;  %v279_v63 = vld [vmem:[%s2129_s26 + $0x3d8] sm:$0xff]  ;;  %v281_v0 = vld [vmem:[%s2129_s26 + $0x400] sm:$0xff] }
  0x32   : > { %278 = vst [vmem:[%s2134_s27 + $0x1f0] sm:$0xff] %v277_v62  ;;  %v283_v1 = vld [vmem:[%s2129_s26 + $0x408] sm:$0xff]  ;;  %280 = vst [vmem:[%s2134_s27 + $0x1f8] sm:$0xff] %v279_v63  ;;  %v285_v2 = vld [vmem:[%s2129_s26 + $0x410] sm:$0xff] }
  0x33   : > { %282 = vst [vmem:[%s2134_s27 + $0x200] sm:$0xff] %v281_v0  ;;  %284 = vst [vmem:[%s2134_s27 + $0x208] sm:$0xff] %v283_v1  ;;  %v287_v3 = vld [vmem:[%s2129_s26 + $0x418] sm:$0xff]  ;;  %v289_v4 = vld [vmem:[%s2129_s26 + $0x440] sm:$0xff] }
  0x34   : > { %286 = vst [vmem:[%s2134_s27 + $0x210] sm:$0xff] %v285_v2  ;;  %288 = vst [vmem:[%s2134_s27 + $0x218] sm:$0xff] %v287_v3  ;;  %v291_v5 = vld [vmem:[%s2129_s26 + $0x448] sm:$0xff]  ;;  %v293_v6 = vld [vmem:[%s2129_s26 + $0x450] sm:$0xff] }
  0x35   : > { %290 = vst [vmem:[%s2134_s27 + $0x220] sm:$0xff] %v289_v4  ;;  %v295_v7 = vld [vmem:[%s2129_s26 + $0x458] sm:$0xff]  ;;  %292 = vst [vmem:[%s2134_s27 + $0x228] sm:$0xff] %v291_v5  ;;  %v297_v8 = vld [vmem:[%s2129_s26 + $0x480] sm:$0xff] }
  0x36   : > { %294 = vst [vmem:[%s2134_s27 + $0x230] sm:$0xff] %v293_v6  ;;  %296 = vst [vmem:[%s2134_s27 + $0x238] sm:$0xff] %v295_v7  ;;  %v299_v9 = vld [vmem:[%s2129_s26 + $0x488] sm:$0xff]  ;;  %v301_v10 = vld [vmem:[%s2129_s26 + $0x490] sm:$0xff] }
  0x37   : > { %298 = vst [vmem:[%s2134_s27 + $0x240] sm:$0xff] %v297_v8  ;;  %300 = vst [vmem:[%s2134_s27 + $0x248] sm:$0xff] %v299_v9  ;;  %v303_v11 = vld [vmem:[%s2129_s26 + $0x498] sm:$0xff]  ;;  %v305_v12 = vld [vmem:[%s2129_s26 + $0x4c0] sm:$0xff] }
  0x38   : > { %302 = vst [vmem:[%s2134_s27 + $0x250] sm:$0xff] %v301_v10  ;;  %v307_v13 = vld [vmem:[%s2129_s26 + $0x4c8] sm:$0xff]  ;;  %304 = vst [vmem:[%s2134_s27 + $0x258] sm:$0xff] %v303_v11  ;;  %v309_v14 = vld [vmem:[%s2129_s26 + $0x4d0] sm:$0xff] }
  0x39   : > { %306 = vst [vmem:[%s2134_s27 + $0x260] sm:$0xff] %v305_v12  ;;  %308 = vst [vmem:[%s2134_s27 + $0x268] sm:$0xff] %v307_v13  ;;  %v311_v15 = vld [vmem:[%s2129_s26 + $0x4d8] sm:$0xff]  ;;  %v313_v16 = vld [vmem:[%s2129_s26 + $0x500] sm:$0xff] }
  0x3a   : > { %310 = vst [vmem:[%s2134_s27 + $0x270] sm:$0xff] %v309_v14  ;;  %312 = vst [vmem:[%s2134_s27 + $0x278] sm:$0xff] %v311_v15  ;;  %v315_v17 = vld [vmem:[%s2129_s26 + $0x508] sm:$0xff]  ;;  %v317_v18 = vld [vmem:[%s2129_s26 + $0x510] sm:$0xff] }
  0x3b   : > { %314 = vst [vmem:[%s2134_s27 + $0x280] sm:$0xff] %v313_v16  ;;  %v319_v19 = vld [vmem:[%s2129_s26 + $0x518] sm:$0xff]  ;;  %316 = vst [vmem:[%s2134_s27 + $0x288] sm:$0xff] %v315_v17  ;;  %v321_v20 = vld [vmem:[%s2129_s26 + $0x540] sm:$0xff] }
  0x3c   : > { %318 = vst [vmem:[%s2134_s27 + $0x290] sm:$0xff] %v317_v18  ;;  %320 = vst [vmem:[%s2134_s27 + $0x298] sm:$0xff] %v319_v19  ;;  %v323_v21 = vld [vmem:[%s2129_s26 + $0x548] sm:$0xff]  ;;  %v325_v22 = vld [vmem:[%s2129_s26 + $0x550] sm:$0xff] }
  0x3d   : > { %322 = vst [vmem:[%s2134_s27 + $0x2a0] sm:$0xff] %v321_v20  ;;  %324 = vst [vmem:[%s2134_s27 + $0x2a8] sm:$0xff] %v323_v21  ;;  %v327_v23 = vld [vmem:[%s2129_s26 + $0x558] sm:$0xff]  ;;  %v329_v24 = vld [vmem:[%s2129_s26 + $0x580] sm:$0xff] }
  0x3e   : > { %326 = vst [vmem:[%s2134_s27 + $0x2b0] sm:$0xff] %v325_v22  ;;  %v331_v25 = vld [vmem:[%s2129_s26 + $0x588] sm:$0xff]  ;;  %328 = vst [vmem:[%s2134_s27 + $0x2b8] sm:$0xff] %v327_v23  ;;  %v333_v26 = vld [vmem:[%s2129_s26 + $0x590] sm:$0xff] }
  0x3f   : > { %330 = vst [vmem:[%s2134_s27 + $0x2c0] sm:$0xff] %v329_v24  ;;  %332 = vst [vmem:[%s2134_s27 + $0x2c8] sm:$0xff] %v331_v25  ;;  %v335_v27 = vld [vmem:[%s2129_s26 + $0x598] sm:$0xff]  ;;  %v337_v28 = vld [vmem:[%s2129_s26 + $0x5c0] sm:$0xff] }
  0x40   : > { %334 = vst [vmem:[%s2134_s27 + $0x2d0] sm:$0xff] %v333_v26  ;;  %336 = vst [vmem:[%s2134_s27 + $0x2d8] sm:$0xff] %v335_v27  ;;  %v339_v29 = vld [vmem:[%s2129_s26 + $0x5c8] sm:$0xff]  ;;  %v341_v30 = vld [vmem:[%s2129_s26 + $0x5d0] sm:$0xff] }
  0x41   : > { %338 = vst [vmem:[%s2134_s27 + $0x2e0] sm:$0xff] %v337_v28  ;;  %v343_v31 = vld [vmem:[%s2129_s26 + $0x5d8] sm:$0xff]  ;;  %340 = vst [vmem:[%s2134_s27 + $0x2e8] sm:$0xff] %v339_v29  ;;  %v345_v32 = vld [vmem:[%s2129_s26 + $0x600] sm:$0xff] }
  0x42   : > { %342 = vst [vmem:[%s2134_s27 + $0x2f0] sm:$0xff] %v341_v30  ;;  %344 = vst [vmem:[%s2134_s27 + $0x2f8] sm:$0xff] %v343_v31  ;;  %v347_v33 = vld [vmem:[%s2129_s26 + $0x608] sm:$0xff]  ;;  %v349_v34 = vld [vmem:[%s2129_s26 + $0x610] sm:$0xff] }
  0x43   : > { %346 = vst [vmem:[%s2134_s27 + $0x300] sm:$0xff] %v345_v32  ;;  %348 = vst [vmem:[%s2134_s27 + $0x308] sm:$0xff] %v347_v33  ;;  %v351_v35 = vld [vmem:[%s2129_s26 + $0x618] sm:$0xff]  ;;  %v353_v36 = vld [vmem:[%s2129_s26 + $0x640] sm:$0xff] }
  0x44   : > { %350 = vst [vmem:[%s2134_s27 + $0x310] sm:$0xff] %v349_v34  ;;  %v355_v37 = vld [vmem:[%s2129_s26 + $0x648] sm:$0xff]  ;;  %352 = vst [vmem:[%s2134_s27 + $0x318] sm:$0xff] %v351_v35  ;;  %v357_v38 = vld [vmem:[%s2129_s26 + $0x650] sm:$0xff] }
  0x45   : > { %354 = vst [vmem:[%s2134_s27 + $0x320] sm:$0xff] %v353_v36  ;;  %356 = vst [vmem:[%s2134_s27 + $0x328] sm:$0xff] %v355_v37  ;;  %v359_v39 = vld [vmem:[%s2129_s26 + $0x658] sm:$0xff]  ;;  %v361_v40 = vld [vmem:[%s2129_s26 + $0x680] sm:$0xff] }
  0x46   : > { %358 = vst [vmem:[%s2134_s27 + $0x330] sm:$0xff] %v357_v38  ;;  %360 = vst [vmem:[%s2134_s27 + $0x338] sm:$0xff] %v359_v39  ;;  %v363_v41 = vld [vmem:[%s2129_s26 + $0x688] sm:$0xff]  ;;  %v365_v42 = vld [vmem:[%s2129_s26 + $0x690] sm:$0xff] }
  0x47   : > { %362 = vst [vmem:[%s2134_s27 + $0x340] sm:$0xff] %v361_v40  ;;  %v367_v43 = vld [vmem:[%s2129_s26 + $0x698] sm:$0xff]  ;;  %364 = vst [vmem:[%s2134_s27 + $0x348] sm:$0xff] %v363_v41  ;;  %v369_v44 = vld [vmem:[%s2129_s26 + $0x6c0] sm:$0xff] }
  0x48   : > { %366 = vst [vmem:[%s2134_s27 + $0x350] sm:$0xff] %v365_v42  ;;  %368 = vst [vmem:[%s2134_s27 + $0x358] sm:$0xff] %v367_v43  ;;  %v371_v45 = vld [vmem:[%s2129_s26 + $0x6c8] sm:$0xff]  ;;  %v373_v46 = vld [vmem:[%s2129_s26 + $0x6d0] sm:$0xff] }
  0x49   : > { %370 = vst [vmem:[%s2134_s27 + $0x360] sm:$0xff] %v369_v44  ;;  %372 = vst [vmem:[%s2134_s27 + $0x368] sm:$0xff] %v371_v45  ;;  %v375_v47 = vld [vmem:[%s2129_s26 + $0x6d8] sm:$0xff]  ;;  %v377_v48 = vld [vmem:[%s2129_s26 + $0x700] sm:$0xff] }
  0x4a   : > { %374 = vst [vmem:[%s2134_s27 + $0x370] sm:$0xff] %v373_v46  ;;  %v379_v49 = vld [vmem:[%s2129_s26 + $0x708] sm:$0xff]  ;;  %376 = vst [vmem:[%s2134_s27 + $0x378] sm:$0xff] %v375_v47  ;;  %v381_v50 = vld [vmem:[%s2129_s26 + $0x710] sm:$0xff] }
  0x4b   : > { %378 = vst [vmem:[%s2134_s27 + $0x380] sm:$0xff] %v377_v48  ;;  %380 = vst [vmem:[%s2134_s27 + $0x388] sm:$0xff] %v379_v49  ;;  %v383_v51 = vld [vmem:[%s2129_s26 + $0x718] sm:$0xff]  ;;  %v385_v52 = vld [vmem:[%s2129_s26 + $0x740] sm:$0xff] }
  0x4c   : > { %382 = vst [vmem:[%s2134_s27 + $0x390] sm:$0xff] %v381_v50  ;;  %384 = vst [vmem:[%s2134_s27 + $0x398] sm:$0xff] %v383_v51  ;;  %v387_v53 = vld [vmem:[%s2129_s26 + $0x748] sm:$0xff]  ;;  %v389_v54 = vld [vmem:[%s2129_s26 + $0x750] sm:$0xff] }
  0x4d   : > { %386 = vst [vmem:[%s2134_s27 + $0x3a0] sm:$0xff] %v385_v52  ;;  %v391_v55 = vld [vmem:[%s2129_s26 + $0x758] sm:$0xff]  ;;  %388 = vst [vmem:[%s2134_s27 + $0x3a8] sm:$0xff] %v387_v53  ;;  %v393_v56 = vld [vmem:[%s2129_s26 + $0x780] sm:$0xff] }
  0x4e   : > { %390 = vst [vmem:[%s2134_s27 + $0x3b0] sm:$0xff] %v389_v54  ;;  %392 = vst [vmem:[%s2134_s27 + $0x3b8] sm:$0xff] %v391_v55  ;;  %v395_v57 = vld [vmem:[%s2129_s26 + $0x788] sm:$0xff]  ;;  %v397_v58 = vld [vmem:[%s2129_s26 + $0x790] sm:$0xff] }
  0x4f   : > { %394 = vst [vmem:[%s2134_s27 + $0x3c0] sm:$0xff] %v393_v56  ;;  %396 = vst [vmem:[%s2134_s27 + $0x3c8] sm:$0xff] %v395_v57  ;;  %v399_v59 = vld [vmem:[%s2129_s26 + $0x798] sm:$0xff]  ;;  %v401_v60 = vld [vmem:[%s2129_s26 + $0x7c0] sm:$0xff] }
  0x50   : > { %398 = vst [vmem:[%s2134_s27 + $0x3d0] sm:$0xff] %v397_v58  ;;  %v403_v61 = vld [vmem:[%s2129_s26 + $0x7c8] sm:$0xff]  ;;  %400 = vst [vmem:[%s2134_s27 + $0x3d8] sm:$0xff] %v399_v59  ;;  %v405_v62 = vld [vmem:[%s2129_s26 + $0x7d0] sm:$0xff] }
  0x51   : > { %402 = vst [vmem:[%s2134_s27 + $0x3e0] sm:$0xff] %v401_v60  ;;  %404 = vst [vmem:[%s2134_s27 + $0x3e8] sm:$0xff] %v403_v61  ;;  %v407_v63 = vld [vmem:[%s2129_s26 + $0x7d8] sm:$0xff] }
  0x52   : > { %406 = vst [vmem:[%s2134_s27 + $0x3f0] sm:$0xff] %v405_v62  ;;  %408 = vst [vmem:[%s2134_s27 + $0x3f8] sm:$0xff] %v407_v63 }
  0x53 PF: > { %p1837_p7 = scmp.ge.s32.totalorder %s2066_s14, 1  ;;  %p413_p8 = scmp.lt.s32.totalorder %s2066_s14, 3 }
  0x55   : > { %p414_p9 = pnand %p1837_p7, %p413_p8 }
  0x56   : > { %s420_s28 = sand.u32 (!%p414_p9), 1, %s2058_s12   ;;  %p449_p10 = scmp.lt.s32.totalorder (!%p414_p9), %s2104_s15, 1 }
  0x57   : > { %417 = sbr.rel (%p414_p9) target bundleno = 585 (0x249), region = 47  ;;  %s1838_s4 = sshll.u32 (!%p414_p9), %s420_s28, 10 }
  0x58   : > { %s2401_s5 = scalar_lea.vmem (!%p414_p9), [#allocation2], %s1838_s4  ;;  %s1839_s14 = sshll.u32 (!%p414_p9), %s420_s28, 7 }
  0x59   : > { %s2562_s17 = scalar_lea.vmem (!%p414_p9), [#allocation3], %s1839_s14 }
  0x5c   : > { %v2395_v0 = vld [vmem:[%s2637_s1 + $0x4] ss:$8 sps:$4 sm:$0xff]   ;;  %s450_s12 = scalar_select %p449_p10, %s2104_s15, 1  ;;  %vm1674_vm0 = vcmask 7168   ;;  %vm1679_vm1 = vcmask 15360  }
  0x5d   : > { %1278 = vmatprep.mubr.bf16.mxu0 %v2395_v0  ;;  %1331 = vmatprep.mubr.bf16.mxu1 %v2395_v0  ;;  %v514_v1 = vld [vmem:[%s2401_s5 + $0x1c0] sm:$0xff]  ;;  %v515_v3 = vld [vmem:[%s2401_s5 + $0x1c8] sm:$0xff]  ;;  %s2013_s24 = sshll.u32 (%p2119_p5), %s2104_s15, 5 }
  0x5e   : > { %v518_v2 = vld [vmem:[%s2401_s5 + $0x1e0] sm:$0xff]  ;;  %v519_v5 = vld [vmem:[%s2401_s5 + $0x1e8] sm:$0xff]  ;;  %s1996_s18 = sshll.u32 %s450_s12, 5  ;;  %s1698_s27 = scalar_lea.vmem (%p2119_p5), %s2638_s2, %s2013_s24 }
  0x5f   : > { %v1903_v4 = vcombine.high %v514_v1, %v518_v2  ;;  %v1902_v6 = vcombine.low %v514_v1, %v518_v2  ;;  %v506_v7 = vld [vmem:[%s2401_s5 + $0x180] sm:$0xff]  ;;  %v1905_v9 = vcombine.high %v515_v3, %v519_v5  ;;  %v1904_v10 = vcombine.low %v515_v3, %v519_v5  ;;  %v507_v12 = vld [vmem:[%s2401_s5 + $0x188] sm:$0xff]  ;;  %s453_s23 = scalar_lea.vmem %s2639_s3, %s1996_s18 }
  0x60   : > { %v510_v8 = vld [vmem:[%s2401_s5 + $0x1a0] sm:$0xff]  ;;  %v511_v13 = vld [vmem:[%s2401_s5 + $0x1a8] sm:$0xff] }
  0x61   : > { %v1895_v11 = vcombine.high %v506_v7, %v510_v8  ;;  %v498_v14 = vld [vmem:[%s2401_s5 + $0x140] sm:$0xff]  ;;  %1246 = vmatprep.subr.bf16.mxu0 %v1903_v4  ;;  %v1897_v15 = vcombine.high %v507_v12, %v511_v13  ;;  %v499_v17 = vld [vmem:[%s2401_s5 + $0x148] sm:$0xff]  ;;  %1299 = vmatprep.subr.bf16.mxu1 %v1905_v9  ;;  %v1894_v19 = vcombine.low %v506_v7, %v510_v8 }
  0x62   : > { %v502_v16 = vld [vmem:[%s2401_s5 + $0x160] sm:$0xff]  ;;  %v503_v18 = vld [vmem:[%s2401_s5 + $0x168] sm:$0xff]  ;;  %1247 = vmatpush1.bf16.msra.mxu0 %v1902_v6  ;;  %1300 = vmatpush1.bf16.msra.mxu1 %v1904_v10  ;;  %v1896_v20 = vcombine.low %v507_v12, %v511_v13 }
  0x63   : > { %1248 = vmatprep.subr.bf16.mxu0 %v1895_v11  ;;  %v1887_v21 = vcombine.high %v498_v14, %v502_v16  ;;  %1301 = vmatprep.subr.bf16.mxu1 %v1897_v15  ;;  %v1889_v22 = vcombine.high %v499_v17, %v503_v18  ;;  %v490_v23 = vld [vmem:[%s2401_s5 + $0x100] sm:$0xff]  ;;  %v491_v25 = vld [vmem:[%s2401_s5 + $0x108] sm:$0xff]  ;;  %v1886_v27 = vcombine.low %v498_v14, %v502_v16 }
  0x64   : > { %v494_v24 = vld [vmem:[%s2401_s5 + $0x120] sm:$0xff]  ;;  %v495_v26 = vld [vmem:[%s2401_s5 + $0x128] sm:$0xff]  ;;  %v1888_v28 = vcombine.low %v499_v17, %v503_v18 }
  0x65   : > { %v1879_v29 = vcombine.high %v490_v23, %v494_v24  ;;  %v1881_v30 = vcombine.high %v491_v25, %v495_v26  ;;  %v482_v31 = vld [vmem:[%s2401_s5 + $0xc0] sm:$0xff]  ;;  %v483_v33 = vld [vmem:[%s2401_s5 + $0xc8] sm:$0xff]  ;;  %v1878_v35 = vcombine.low %v490_v23, %v494_v24  ;;  %v1880_v36 = vcombine.low %v491_v25, %v495_v26 }
  0x66   : > { %1249 = vmatpush1.bf16.msra.mxu0 %v1894_v19  ;;  %1302 = vmatpush1.bf16.msra.mxu1 %v1896_v20  ;;  %v486_v32 = vld [vmem:[%s2401_s5 + $0xe0] sm:$0xff]  ;;  %v487_v34 = vld [vmem:[%s2401_s5 + $0xe8] sm:$0xff] }
  0x67   : > { %1250 = vmatprep.subr.bf16.mxu0 %v1887_v21  ;;  %1303 = vmatprep.subr.bf16.mxu1 %v1889_v22  ;;  %v1871_v37 = vcombine.high %v482_v31, %v486_v32  ;;  %v1873_v38 = vcombine.high %v483_v33, %v487_v34  ;;  %v474_v39 = vld [vmem:[%s2401_s5 + $0x80] sm:$0xff]  ;;  %v475_v41 = vld [vmem:[%s2401_s5 + $0x88] sm:$0xff]  ;;  %v1870_v43 = vcombine.low %v482_v31, %v486_v32 }
  0x68   : > { %v478_v40 = vld [vmem:[%s2401_s5 + $0xa0] sm:$0xff]  ;;  %v479_v42 = vld [vmem:[%s2401_s5 + $0xa8] sm:$0xff]  ;;  %v1872_v44 = vcombine.low %v483_v33, %v487_v34 }
  0x69   : > { %v1863_v45 = vcombine.high %v474_v39, %v478_v40  ;;  %v1865_v46 = vcombine.high %v475_v41, %v479_v42  ;;  %v466_v47 = vld [vmem:[%s2401_s5 + $0x40] sm:$0xff]  ;;  %v467_v49 = vld [vmem:[%s2401_s5 + $0x48] sm:$0xff]  ;;  %v1862_v51 = vcombine.low %v474_v39, %v478_v40  ;;  %v1864_v52 = vcombine.low %v475_v41, %v479_v42 }
  0x6a   : > { %1251 = vmatpush1.bf16.msra.mxu0 %v1886_v27  ;;  %1304 = vmatpush1.bf16.msra.mxu1 %v1888_v28  ;;  %v470_v48 = vld [vmem:[%s2401_s5 + $0x60] sm:$0xff]  ;;  %v471_v50 = vld [vmem:[%s2401_s5 + $0x68] sm:$0xff] }
  0x6b   : > { %1252 = vmatprep.subr.bf16.mxu0 %v1879_v29  ;;  %1305 = vmatprep.subr.bf16.mxu1 %v1881_v30  ;;  %v1855_v53 = vcombine.high %v466_v47, %v470_v48  ;;  %v1857_v54 = vcombine.high %v467_v49, %v471_v50  ;;  %v458_v55 = vld [vmem:[%s2401_s5] sm:$0xff]  ;;  %v459_v57 = vld [vmem:[%s2401_s5 + $0x8] sm:$0xff]  ;;  %v1854_v59 = vcombine.low %v466_v47, %v470_v48 }
  0x6c   : > { %v462_v56 = vld [vmem:[%s2401_s5 + $0x20] sm:$0xff]  ;;  %v463_v58 = vld [vmem:[%s2401_s5 + $0x28] sm:$0xff]  ;;  %v1856_v60 = vcombine.low %v467_v49, %v471_v50 }
  0x6d   : > { %v1847_v61 = vcombine.high %v458_v55, %v462_v56  ;;  %v1849_v62 = vcombine.high %v459_v57, %v463_v58  ;;  %v578_v63 = vld [vmem:[%s2401_s5 + $0x3c0] sm:$0xff]  ;;  %v579_v2 = vld [vmem:[%s2401_s5 + $0x3c8] sm:$0xff]  ;;  %v1846_v4 = vcombine.low %v458_v55, %v462_v56  ;;  %v1848_v5 = vcombine.low %v459_v57, %v463_v58 }
  0x6e   : > { %1253 = vmatpush1.bf16.msra.mxu0 %v1878_v35  ;;  %1306 = vmatpush1.bf16.msra.mxu1 %v1880_v36  ;;  %v582_v1 = vld [vmem:[%s2401_s5 + $0x3e0] sm:$0xff]  ;;  %v583_v3 = vld [vmem:[%s2401_s5 + $0x3e8] sm:$0xff] }
  0x6f   : > { %1254 = vmatprep.subr.bf16.mxu0 %v1871_v37  ;;  %1307 = vmatprep.subr.bf16.mxu1 %v1873_v38  ;;  %v1967_v6 = vcombine.high %v578_v63, %v582_v1  ;;  %v1969_v7 = vcombine.high %v579_v2, %v583_v3  ;;  %v570_v8 = vld [vmem:[%s2401_s5 + $0x380] sm:$0xff]  ;;  %v571_v10 = vld [vmem:[%s2401_s5 + $0x388] sm:$0xff]  ;;  %v1966_v12 = vcombine.low %v578_v63, %v582_v1  ;;  %v516_v1 = vld [vmem:[%s2401_s5 + $0x1d0] sm:$0xff] }
  0x70   : > { %v574_v9 = vld [vmem:[%s2401_s5 + $0x3a0] sm:$0xff]  ;;  %v575_v11 = vld [vmem:[%s2401_s5 + $0x3a8] sm:$0xff]  ;;  %v1968_v13 = vcombine.low %v579_v2, %v583_v3  ;;  %v520_v2 = vld [vmem:[%s2401_s5 + $0x1f0] sm:$0xff] }
  0x71   : > { %v1959_v14 = vcombine.high %v570_v8, %v574_v9  ;;  %v1961_v15 = vcombine.high %v571_v10, %v575_v11  ;;  %v562_v16 = vld [vmem:[%s2401_s5 + $0x340] sm:$0xff]  ;;  %v563_v18 = vld [vmem:[%s2401_s5 + $0x348] sm:$0xff]  ;;  %v1958_v20 = vcombine.low %v570_v8, %v574_v9  ;;  %v1960_v21 = vcombine.low %v571_v10, %v575_v11  ;;  %v517_v3 = vld [vmem:[%s2401_s5 + $0x1d8] sm:$0xff] }
  0x72   : > { %1255 = vmatpush1.bf16.msra.mxu0 %v1870_v43  ;;  %1308 = vmatpush1.bf16.msra.mxu1 %v1872_v44  ;;  %v566_v17 = vld [vmem:[%s2401_s5 + $0x360] sm:$0xff]  ;;  %v567_v19 = vld [vmem:[%s2401_s5 + $0x368] sm:$0xff]  ;;  %v508_v9 = vld [vmem:[%s2401_s5 + $0x190] sm:$0xff] }
  0x73   : > { %1256 = vmatprep.subr.bf16.mxu0 %v1863_v45  ;;  %1309 = vmatprep.subr.bf16.mxu1 %v1865_v46  ;;  %v1951_v22 = vcombine.high %v562_v16, %v566_v17  ;;  %v1953_v23 = vcombine.high %v563_v18, %v567_v19  ;;  %v554_v24 = vld [vmem:[%s2401_s5 + $0x300] sm:$0xff]  ;;  %v555_v26 = vld [vmem:[%s2401_s5 + $0x308] sm:$0xff]  ;;  %v1950_v28 = vcombine.low %v562_v16, %v566_v17  ;;  %v512_v10 = vld [vmem:[%s2401_s5 + $0x1b0] sm:$0xff] }
  0x74   : > { %v558_v25 = vld [vmem:[%s2401_s5 + $0x320] sm:$0xff]  ;;  %v559_v27 = vld [vmem:[%s2401_s5 + $0x328] sm:$0xff]  ;;  %v1952_v29 = vcombine.low %v563_v18, %v567_v19  ;;  %v1899_v16 = vcombine.high %v508_v9, %v512_v10  ;;  %v500_v18 = vld [vmem:[%s2401_s5 + $0x150] sm:$0xff] }
  0x75   : > { %v1943_v30 = vcombine.high %v554_v24, %v558_v25  ;;  %v1945_v31 = vcombine.high %v555_v26, %v559_v27  ;;  %v546_v32 = vld [vmem:[%s2401_s5 + $0x2c0] sm:$0xff]  ;;  %v547_v34 = vld [vmem:[%s2401_s5 + $0x2c8] sm:$0xff]  ;;  %v1942_v36 = vcombine.low %v554_v24, %v558_v25  ;;  %v1944_v37 = vcombine.low %v555_v26, %v559_v27  ;;  %v504_v19 = vld [vmem:[%s2401_s5 + $0x170] sm:$0xff] }
  0x76   : > { %1257 = vmatpush1.bf16.msra.mxu0 %v1862_v51  ;;  %1310 = vmatpush1.bf16.msra.mxu1 %v1864_v52  ;;  %v550_v33 = vld [vmem:[%s2401_s5 + $0x2e0] sm:$0xff]  ;;  %v551_v35 = vld [vmem:[%s2401_s5 + $0x2e8] sm:$0xff]  ;;  %v1891_v25 = vcombine.high %v500_v18, %v504_v19  ;;  %v492_v27 = vld [vmem:[%s2401_s5 + $0x110] sm:$0xff] }
  0x77   : > { %1258 = vmatprep.subr.bf16.mxu0 %v1855_v53  ;;  %1311 = vmatprep.subr.bf16.mxu1 %v1857_v54  ;;  %v1935_v38 = vcombine.high %v546_v32, %v550_v33  ;;  %v1937_v39 = vcombine.high %v547_v34, %v551_v35  ;;  %v538_v40 = vld [vmem:[%s2401_s5 + $0x280] sm:$0xff]  ;;  %v539_v42 = vld [vmem:[%s2401_s5 + $0x288] sm:$0xff]  ;;  %v1934_v44 = vcombine.low %v546_v32, %v550_v33 }
  0x78   : > { %v542_v41 = vld [vmem:[%s2401_s5 + $0x2a0] sm:$0xff]  ;;  %v543_v43 = vld [vmem:[%s2401_s5 + $0x2a8] sm:$0xff]  ;;  %v1936_v45 = vcombine.low %v547_v34, %v551_v35  ;;  %v1890_v32 = vcombine.low %v500_v18, %v504_v19 }
  0x79   : > { %v1927_v46 = vcombine.high %v538_v40, %v542_v41  ;;  %v1929_v47 = vcombine.high %v539_v42, %v543_v43  ;;  %v530_v48 = vld [vmem:[%s2401_s5 + $0x240] sm:$0xff]  ;;  %v531_v50 = vld [vmem:[%s2401_s5 + $0x248] sm:$0xff]  ;;  %v1926_v52 = vcombine.low %v538_v40, %v542_v41  ;;  %v1928_v53 = vcombine.low %v539_v42, %v543_v43 }
  0x7a   : > { %1259 = vmatpush1.bf16.msra.mxu0 %v1854_v59  ;;  %1312 = vmatpush1.bf16.msra.mxu1 %v1856_v60  ;;  %v534_v49 = vld [vmem:[%s2401_s5 + $0x260] sm:$0xff]  ;;  %v535_v51 = vld [vmem:[%s2401_s5 + $0x268] sm:$0xff] }
  0x7b   : > { %1260 = vmatprep.subr.bf16.mxu0 %v1847_v61  ;;  %1313 = vmatprep.subr.bf16.mxu1 %v1849_v62  ;;  %v1919_v54 = vcombine.high %v530_v48, %v534_v49  ;;  %v1921_v55 = vcombine.high %v531_v50, %v535_v51  ;;  %v522_v56 = vld [vmem:[%s2401_s5 + $0x200] sm:$0xff]  ;;  %v523_v58 = vld [vmem:[%s2401_s5 + $0x208] sm:$0xff]  ;;  %v1918_v60 = vcombine.low %v530_v48, %v534_v49 }
  0x7c   : > { %v526_v57 = vld [vmem:[%s2401_s5 + $0x220] sm:$0xff]  ;;  %v527_v59 = vld [vmem:[%s2401_s5 + $0x228] sm:$0xff]  ;;  %v1920_v61 = vcombine.low %v531_v50, %v535_v51 }
  0x7d   : > { %v1911_v62 = vcombine.high %v522_v56, %v526_v57  ;;  %v1913_v63 = vcombine.high %v523_v58, %v527_v59  ;;  %v2476_v11 = vld [vmem:[%s2637_s1] ss:$8 sps:$4 sm:$0xff]  }
  0x7e   : > { %1261 = vmatpush1.bf16.msra.mxu0 %v1846_v4  ;;  %1314 = vmatpush1.bf16.msra.mxu1 %v1848_v5  ;;  %v521_v4 = vld [vmem:[%s2401_s5 + $0x1f8] sm:$0xff]  ;;  %v1910_v5 = vcombine.low %v522_v56, %v526_v57 }
  0x7f   : > { %1262 = vmatprep.subr.bf16.mxu0 %v1967_v6  ;;  %1315 = vmatprep.subr.bf16.mxu1 %v1969_v7  ;;  %v1912_v6 = vcombine.low %v523_v58, %v527_v59  ;;  %v1907_v7 = vcombine.high %v516_v1, %v520_v2  ;;  %v1909_v8 = vcombine.high %v517_v3, %v521_v4  ;;  %v460_v59 = vld [vmem:[%s2401_s5 + $0x10] sm:$0xff] }
  0x82   : > { %1263 = vmatpush2.bf16.msra.mxu0 %v1966_v12  ;;  %1316 = vmatpush2.bf16.msra.mxu1 %v1968_v13  ;;  %v509_v12 = vld [vmem:[%s2401_s5 + $0x198] sm:$0xff] }
  0x83   : > { %1264 = vmatprep.subr.bf16.mxu0 %v1959_v14  ;;  %1317 = vmatprep.subr.bf16.mxu1 %v1961_v15  ;;  %v513_v13 = vld [vmem:[%s2401_s5 + $0x1b8] sm:$0xff]  ;;  %v1906_v14 = vcombine.low %v516_v1, %v520_v2  ;;  %v1908_v15 = vcombine.low %v517_v3, %v521_v4  ;;  %v580_v4 = vld [vmem:[%s2401_s5 + $0x3d0] sm:$0xff] }
  0x84   : > { %v1901_v17 = vcombine.high %v509_v12, %v513_v13  ;;  %v1900_v24 = vcombine.low %v509_v12, %v513_v13  ;;  %v572_v13 = vld [vmem:[%s2401_s5 + $0x390] sm:$0xff] }
  0x86   : > { %1265 = vmatpush2.bf16.msra.mxu0 %v1958_v20  ;;  %1318 = vmatpush2.bf16.msra.mxu1 %v1960_v21  ;;  %v2485_v20 = vld [vmem:[%s2637_s1 + $0x14] ss:$8 sps:$4 sm:$0xff]  }
  0x87   : > { %1266 = vmatprep.subr.bf16.mxu0 %v1951_v22  ;;  %1319 = vmatprep.subr.bf16.mxu1 %v1953_v23  ;;  %v501_v21 = vld [vmem:[%s2401_s5 + $0x158] sm:$0xff]  ;;  %v1898_v23 = vcombine.low %v508_v9, %v512_v10 }
  0x88   : > { %v505_v22 = vld [vmem:[%s2401_s5 + $0x178] sm:$0xff] }
  0x89   : > { %v1893_v26 = vcombine.high %v501_v21, %v505_v22  ;;  %v1892_v33 = vcombine.low %v501_v21, %v505_v22  ;;  %v564_v22 = vld [vmem:[%s2401_s5 + $0x350] sm:$0xff] }
  0x8a   : > { %1267 = vmatpush2.bf16.msra.mxu0 %v1950_v28  ;;  %1320 = vmatpush2.bf16.msra.mxu1 %v1952_v29  ;;  %v496_v28 = vld [vmem:[%s2401_s5 + $0x130] sm:$0xff]  ;;  %v493_v29 = vld [vmem:[%s2401_s5 + $0x118] sm:$0xff] }
  0x8b   : > { %1268 = vmatprep.subr.bf16.mxu0 %v1943_v30  ;;  %1321 = vmatprep.subr.bf16.mxu1 %v1945_v31  ;;  %v497_v30 = vld [vmem:[%s2401_s5 + $0x138] sm:$0xff]  ;;  %v1883_v34 = vcombine.high %v492_v27, %v496_v28  ;;  %v1882_v40 = vcombine.low %v492_v27, %v496_v28 }
  0x8c   : > { %v2499_v31 = vld [vmem:[%s2637_s1 + $0x10] ss:$8 sps:$4 sm:$0xff]   ;;  %v1885_v35 = vcombine.high %v493_v29, %v497_v30  ;;  %v1884_v41 = vcombine.low %v493_v29, %v497_v30 }
  0x8d   : > { %v556_v30 = vld [vmem:[%s2401_s5 + $0x310] sm:$0xff] }
  0x8e   : > { %1269 = vmatpush2.bf16.msra.mxu0 %v1942_v36  ;;  %1322 = vmatpush2.bf16.msra.mxu1 %v1944_v37  ;;  %v484_v36 = vld [vmem:[%s2401_s5 + $0xd0] sm:$0xff] }
  0x8f   : > { %1270 = vmatprep.subr.bf16.mxu0 %v1935_v38  ;;  %1323 = vmatprep.subr.bf16.mxu1 %v1937_v39  ;;  %v488_v37 = vld [vmem:[%s2401_s5 + $0xf0] sm:$0xff]  ;;  %v485_v38 = vld [vmem:[%s2401_s5 + $0xd8] sm:$0xff] }
  0x90   : > { %v489_v39 = vld [vmem:[%s2401_s5 + $0xf8] sm:$0xff]  ;;  %v1875_v42 = vcombine.high %v484_v36, %v488_v37  ;;  %v1874_v48 = vcombine.low %v484_v36, %v488_v37 }
  0x91   : > { %v1877_v43 = vcombine.high %v485_v38, %v489_v39  ;;  %v1876_v49 = vcombine.low %v485_v38, %v489_v39  ;;  %v548_v39 = vld [vmem:[%s2401_s5 + $0x2d0] sm:$0xff] }
  0x92   : > { %1271 = vmatpush2.bf16.msra.mxu0 %v1934_v44  ;;  %1324 = vmatpush2.bf16.msra.mxu1 %v1936_v45  ;;  %v476_v44 = vld [vmem:[%s2401_s5 + $0x90] sm:$0xff] }
  0x93   : > { %1272 = vmatprep.subr.bf16.mxu0 %v1927_v46  ;;  %1325 = vmatprep.subr.bf16.mxu1 %v1929_v47  ;;  %v480_v45 = vld [vmem:[%s2401_s5 + $0xb0] sm:$0xff]  ;;  %v477_v46 = vld [vmem:[%s2401_s5 + $0x98] sm:$0xff] }
  0x94   : > { %v481_v47 = vld [vmem:[%s2401_s5 + $0xb8] sm:$0xff]  ;;  %v1867_v50 = vcombine.high %v476_v44, %v480_v45  ;;  %v1866_v56 = vcombine.low %v476_v44, %v480_v45 }
  0x95   : > { %v1869_v51 = vcombine.high %v477_v46, %v481_v47 }
  0x96   : > { %1273 = vmatpush2.bf16.msra.mxu0 %v1926_v52  ;;  %1326 = vmatpush2.bf16.msra.mxu1 %v1928_v53  ;;  %v468_v52 = vld [vmem:[%s2401_s5 + $0x50] sm:$0xff] }
  0x97   : > { %1274 = vmatprep.subr.bf16.mxu0 %v1919_v54  ;;  %1327 = vmatprep.subr.bf16.mxu1 %v1921_v55  ;;  %v472_v53 = vld [vmem:[%s2401_s5 + $0x70] sm:$0xff]  ;;  %v469_v54 = vld [vmem:[%s2401_s5 + $0x58] sm:$0xff] }
  0x98   : > { %v473_v55 = vld [vmem:[%s2401_s5 + $0x78] sm:$0xff]  ;;  %v1859_v57 = vcombine.high %v468_v52, %v472_v53 }
  0x99   : > { %v1861_v58 = vcombine.high %v469_v54, %v473_v55  ;;  %v1860_v1 = vcombine.low %v469_v54, %v473_v55  ;;  %v532_v55 = vld [vmem:[%s2401_s5 + $0x250] sm:$0xff] }
  0x9a   : > { %1275 = vmatpush2.bf16.msra.mxu0 %v1918_v60  ;;  %1328 = vmatpush2.bf16.msra.mxu1 %v1920_v61  ;;  %v464_v60 = vld [vmem:[%s2401_s5 + $0x30] sm:$0xff]  ;;  %v461_v61 = vld [vmem:[%s2401_s5 + $0x18] sm:$0xff] }
  0x9b   : > { %1276 = vmatprep.subr.bf16.mxu0 %v1911_v62  ;;  %1329 = vmatprep.subr.bf16.mxu1 %v1913_v63  ;;  %v465_v62 = vld [vmem:[%s2401_s5 + $0x38] sm:$0xff]  ;;  %v1858_v63 = vcombine.low %v468_v52, %v472_v53  ;;  %v1851_v2 = vcombine.high %v460_v59, %v464_v60 }
  0x9c   : > { %v1853_v3 = vcombine.high %v461_v61, %v465_v62  ;;  %v1852_v9 = vcombine.low %v461_v61, %v465_v62  ;;  %v524_v62 = vld [vmem:[%s2401_s5 + $0x210] sm:$0xff] }
  0x9e   : > { %1277 = vmatpush2.bf16.msra.mxu0 %v1910_v5  ;;  %1330 = vmatpush2.bf16.msra.mxu1 %v1912_v6  ;;  %v584_v5 = vld [vmem:[%s2401_s5 + $0x3f0] sm:$0xff]  ;;  %v581_v6 = vld [vmem:[%s2401_s5 + $0x3d8] sm:$0xff] }
  0x9f   : > { %1352 = vmatprep.subr.bf16.mxu0 %v1907_v7  ;;  %1405 = vmatprep.subr.bf16.mxu1 %v1909_v8  ;;  %v585_v7 = vld [vmem:[%s2401_s5 + $0x3f8] sm:$0xff]  ;;  %v1850_v8 = vcombine.low %v460_v59, %v464_v60  ;;  %v1971_v10 = vcombine.high %v580_v4, %v584_v5 }
  0xa0   : > { %v1973_v12 = vcombine.high %v581_v6, %v585_v7  ;;  %v1972_v18 = vcombine.low %v581_v6, %v585_v7 }
  0xa1   : > { %1279 = vmatmul.mubr.bf16.vlgmr.msra.gmra.mxu0 %v2476_v11  ;;  %1332 = vmatmul.mubr.bf16.vlgmr.msra.gmra.mxu1 %v2476_v11 }
  0xa2   : > { %1353 = vmatpush1.bf16.msra.mxu0 %v1906_v14  ;;  %1406 = vmatpush1.bf16.msra.mxu1 %v1908_v15  ;;  %v576_v14 = vld [vmem:[%s2401_s5 + $0x3b0] sm:$0xff]  ;;  %v573_v15 = vld [vmem:[%s2401_s5 + $0x398] sm:$0xff] }
  0xa3   : > { %1354 = vmatprep.subr.bf16.mxu0 %v1899_v16  ;;  %1407 = vmatprep.subr.bf16.mxu1 %v1901_v17  ;;  %v577_v16 = vld [vmem:[%s2401_s5 + $0x3b8] sm:$0xff]  ;;  %v1970_v17 = vcombine.low %v580_v4, %v584_v5  ;;  %v1963_v19 = vcombine.high %v572_v13, %v576_v14 }
  0xa4   : > { %1288 = vmatprep.mubr.bf16.mxu0 %v2485_v20  ;;  %1341 = vmatprep.mubr.bf16.mxu1 %v2485_v20  ;;  %v1965_v21 = vcombine.high %v573_v15, %v577_v16  ;;  %v1964_v27 = vcombine.low %v573_v15, %v577_v16 }
  0xa6   : > { %1355 = vmatpush1.bf16.msra.mxu0 %v1898_v23  ;;  %1408 = vmatpush1.bf16.msra.mxu1 %v1900_v24  ;;  %v568_v23 = vld [vmem:[%s2401_s5 + $0x370] sm:$0xff]  ;;  %v565_v24 = vld [vmem:[%s2401_s5 + $0x358] sm:$0xff] }
  0xa7   : > { %1356 = vmatprep.subr.bf16.mxu0 %v1891_v25  ;;  %1409 = vmatprep.subr.bf16.mxu1 %v1893_v26  ;;  %v569_v25 = vld [vmem:[%s2401_s5 + $0x378] sm:$0xff]  ;;  %v1962_v26 = vcombine.low %v572_v13, %v576_v14  ;;  %v1955_v28 = vcombine.high %v564_v22, %v568_v23 }
  0xa8   : > { %v1957_v29 = vcombine.high %v565_v24, %v569_v25  ;;  %v1956_v36 = vcombine.low %v565_v24, %v569_v25 }
  0xa9   : > { %1289 = vmatmul.mubr.bf16.gmra.mxu0 %v2499_v31  ;;  %1342 = vmatmul.mubr.bf16.gmra.mxu1 %v2499_v31 }
  0xaa   : > { %1357 = vmatpush1.bf16.msra.mxu0 %v1890_v32  ;;  %1410 = vmatpush1.bf16.msra.mxu1 %v1892_v33  ;;  %v560_v32 = vld [vmem:[%s2401_s5 + $0x330] sm:$0xff]  ;;  %v557_v33 = vld [vmem:[%s2401_s5 + $0x318] sm:$0xff] }
  0xab   : > { %1358 = vmatprep.subr.bf16.mxu0 %v1883_v34  ;;  %1411 = vmatprep.subr.bf16.mxu1 %v1885_v35  ;;  %v561_v34 = vld [vmem:[%s2401_s5 + $0x338] sm:$0xff]  ;;  %v1954_v35 = vcombine.low %v564_v22, %v568_v23  ;;  %v1947_v37 = vcombine.high %v556_v30, %v560_v32 }
  0xac   : > { %1384 = vmatprep.mubr.bf16.mxu0 %v2395_v0  ;;  %1437 = vmatprep.mubr.bf16.mxu1 %v2395_v0  ;;  %v1868_v0 = vcombine.low %v477_v46, %v481_v47  ;;  %v1949_v38 = vcombine.high %v557_v33, %v561_v34  ;;  %v1948_v44 = vcombine.low %v557_v33, %v561_v34  ;;  %v540_v47 = vld [vmem:[%s2401_s5 + $0x290] sm:$0xff] }
  0xae   : > { %1359 = vmatpush1.bf16.msra.mxu0 %v1882_v40  ;;  %1412 = vmatpush1.bf16.msra.mxu1 %v1884_v41  ;;  %v552_v40 = vld [vmem:[%s2401_s5 + $0x2f0] sm:$0xff]  ;;  %v549_v41 = vld [vmem:[%s2401_s5 + $0x2d8] sm:$0xff] }
  0xaf   : > { %1360 = vmatprep.subr.bf16.mxu0 %v1875_v42  ;;  %1413 = vmatprep.subr.bf16.mxu1 %v1877_v43  ;;  %v553_v42 = vld [vmem:[%s2401_s5 + $0x2f8] sm:$0xff]  ;;  %v1946_v43 = vcombine.low %v556_v30, %v560_v32  ;;  %v1939_v45 = vcombine.high %v548_v39, %v552_v40 }
  0xb0   : > { %v1941_v46 = vcombine.high %v549_v41, %v553_v42  ;;  %v1940_v52 = vcombine.low %v549_v41, %v553_v42 }
  0xb2   : > { %1361 = vmatpush1.bf16.msra.mxu0 %v1874_v48  ;;  %1414 = vmatpush1.bf16.msra.mxu1 %v1876_v49  ;;  %v544_v48 = vld [vmem:[%s2401_s5 + $0x2b0] sm:$0xff]  ;;  %v541_v49 = vld [vmem:[%s2401_s5 + $0x298] sm:$0xff] }
  0xb3   : > { %1362 = vmatprep.subr.bf16.mxu0 %v1867_v50  ;;  %1415 = vmatprep.subr.bf16.mxu1 %v1869_v51  ;;  %v545_v50 = vld [vmem:[%s2401_s5 + $0x2b8] sm:$0xff]  ;;  %v1938_v51 = vcombine.low %v548_v39, %v552_v40  ;;  %v1931_v53 = vcombine.high %v540_v47, %v544_v48 }
  0xb4   : > { %v1933_v54 = vcombine.high %v541_v49, %v545_v50  ;;  %v1932_v59 = vcombine.low %v541_v49, %v545_v50 }
  0xb6   : > { %1363 = vmatpush1.bf16.msra.mxu0 %v1866_v56  ;;  %1416 = vmatpush1.bf16.msra.mxu1 %v1868_v0  ;;  %v536_v56 = vld [vmem:[%s2401_s5 + $0x270] sm:$0xff]  ;;  %v533_v0 = vld [vmem:[%s2401_s5 + $0x258] sm:$0xff] }
  0xb7   : > { %1364 = vmatprep.subr.bf16.mxu0 %v1859_v57  ;;  %1417 = vmatprep.subr.bf16.mxu1 %v1861_v58  ;;  %v537_v57 = vld [vmem:[%s2401_s5 + $0x278] sm:$0xff]  ;;  %v1930_v58 = vcombine.low %v540_v47, %v544_v48  ;;  %v1923_v60 = vcombine.high %v532_v55, %v536_v56 }
  0xb8   : > { %v1925_v61 = vcombine.high %v533_v0, %v537_v57  ;;  %v1924_v4 = vcombine.low %v533_v0, %v537_v57 }
  0xba   : > { %1365 = vmatpush1.bf16.msra.mxu0 %v1858_v63  ;;  %1418 = vmatpush1.bf16.msra.mxu1 %v1860_v1  ;;  %v528_v63 = vld [vmem:[%s2401_s5 + $0x230] sm:$0xff]  ;;  %v525_v1 = vld [vmem:[%s2401_s5 + $0x218] sm:$0xff] }
  0xbb   : > { %1366 = vmatprep.subr.bf16.mxu0 %v1851_v2  ;;  %1419 = vmatprep.subr.bf16.mxu1 %v1853_v3  ;;  %v529_v2 = vld [vmem:[%s2401_s5 + $0x238] sm:$0xff]  ;;  %v1922_v3 = vcombine.low %v532_v55, %v536_v56  ;;  %v1915_v5 = vcombine.high %v524_v62, %v528_v63  ;;  %v1914_v7 = vcombine.low %v524_v62, %v528_v63 }
  0xbc   : > { %v1917_v6 = vcombine.high %v525_v1, %v529_v2 }
  0xbe   : > { %1367 = vmatpush1.bf16.msra.mxu0 %v1850_v8  ;;  %1420 = vmatpush1.bf16.msra.mxu1 %v1852_v9  ;;  %v1916_v8 = vcombine.low %v525_v1, %v529_v2 }
  0xbf   : > { %1368 = vmatprep.subr.bf16.mxu0 %v1971_v10  ;;  %1421 = vmatprep.subr.bf16.mxu1 %v1973_v12 }
  0xc2   : > { %1369 = vmatpush2.bf16.msra.mxu0 %v1970_v17  ;;  %1422 = vmatpush2.bf16.msra.mxu1 %v1972_v18 }
  0xc3   : > { %1370 = vmatprep.subr.bf16.mxu0 %v1963_v19  ;;  %1423 = vmatprep.subr.bf16.mxu1 %v1965_v21 }
  0xc6   : > { %1371 = vmatpush2.bf16.msra.mxu0 %v1962_v26  ;;  %1424 = vmatpush2.bf16.msra.mxu1 %v1964_v27 }
  0xc7   : > { %1372 = vmatprep.subr.bf16.mxu0 %v1955_v28  ;;  %1425 = vmatprep.subr.bf16.mxu1 %v1957_v29 }
  0xca   : > { %1373 = vmatpush2.bf16.msra.mxu0 %v1954_v35  ;;  %1426 = vmatpush2.bf16.msra.mxu1 %v1956_v36 }
  0xcb   : > { %1374 = vmatprep.subr.bf16.mxu0 %v1947_v37  ;;  %1427 = vmatprep.subr.bf16.mxu1 %v1949_v38 }
  0xce   : > { %1375 = vmatpush2.bf16.msra.mxu0 %v1946_v43  ;;  %1428 = vmatpush2.bf16.msra.mxu1 %v1948_v44 }
  0xcf   : > { %1376 = vmatprep.subr.bf16.mxu0 %v1939_v45  ;;  %1429 = vmatprep.subr.bf16.mxu1 %v1941_v46 }
  0xd2   : > { %1377 = vmatpush2.bf16.msra.mxu0 %v1938_v51  ;;  %1430 = vmatpush2.bf16.msra.mxu1 %v1940_v52 }
  0xd3   : > { %1378 = vmatprep.subr.bf16.mxu0 %v1931_v53  ;;  %1431 = vmatprep.subr.bf16.mxu1 %v1933_v54 }
  0xd6   : > { %1379 = vmatpush2.bf16.msra.mxu0 %v1930_v58  ;;  %1432 = vmatpush2.bf16.msra.mxu1 %v1932_v59 }
  0xd7   : > { %1380 = vmatprep.subr.bf16.mxu0 %v1923_v60  ;;  %1433 = vmatprep.subr.bf16.mxu1 %v1925_v61 }
  0xda   : > { %1381 = vmatpush2.bf16.msra.mxu0 %v1922_v3  ;;  %1434 = vmatpush2.bf16.msra.mxu1 %v1924_v4 }
  0xdb   : > { %1382 = vmatprep.subr.bf16.mxu0 %v1915_v5  ;;  %1435 = vmatprep.subr.bf16.mxu1 %v1917_v6 }
  0xde   : > { %1383 = vmatpush2.bf16.msra.mxu0 %v1914_v7  ;;  %1436 = vmatpush2.bf16.msra.mxu1 %v1916_v8 }
  0xe1   : > { %1385 = vmatmul.mubr.bf16.vlgmr.msra.gmra.mxu0 %v2476_v11  ;;  %1438 = vmatmul.mubr.bf16.vlgmr.msra.gmra.mxu1 %v2476_v11 }
  0xe2   : > { %1394 = vmatprep.mubr.bf16.mxu0 %v2485_v20  ;;  %1447 = vmatprep.mubr.bf16.mxu1 %v2485_v20 }
  0xe9   : > { %1395 = vmatmul.mubr.bf16.gmra.mxu0 %v2499_v31  ;;  %1448 = vmatmul.mubr.bf16.gmra.mxu1 %v2499_v31 }
 0x161   : > { %v1280_v9 = vpop.f32.mrf.mxu0  ;;  %v1333_v10 = vpop.f32.mrf.mxu1 }
 0x162   : > { %v1606_v43 = vmul.f32 %v1280_v9, %v1280_v9  ;;  %v1608_v48 = vmul.f32 %v1333_v10, %v1333_v10 }
 0x163   : > { %v1282_v12 = vpop.f32.mrf.mxu0  ;;  %v1335_v14 = vpop.f32.mrf.mxu1 }
 0x164   : > { %v1997_v13 = vpack.c.bf16 %v1282_v12, %v1280_v9  ;;  %v1998_v15 = vpack.c.bf16 %v1335_v14, %v1333_v10  ;;  %v1607_v44 = vmul.f32 %v1282_v12, %v1282_v12  ;;  %v1570_v46 = vadd.f32 %v1282_v12, %v1280_v9 }
 0x165   : > { %v1284_v16 = vpop.f32.mrf.mxu0  ;;  %v1337_v11 = vpop.f32.mrf.mxu1  ;;  %v1609_v55 = vmul.f32 %v1335_v14, %v1335_v14 }
 0x166   : > { %1554 = vst [vmem:[%s2562_s17] sm:$0xff] %v1997_v13  ;;  %1555 = vst [vmem:[%s2562_s17 + $0x8] sm:$0xff] %v1998_v15  ;;  %v1614_v47 = vmul.f32 %v1284_v16, %v1284_v16  ;;  %v1638_v49 = vadd.f32 %v1607_v44, %v1606_v43  ;;  %v1571_v51 = vadd.f32 %v1570_v46, %v1333_v10 }
 0x167   : > { %v1286_v20 = vpop.f32.mrf.mxu0  ;;  %v1339_v18 = vpop.f32.mrf.mxu1  ;;  %v1616_v52 = vmul.f32 %v1337_v11, %v1337_v11 }
 0x168   : > { %v2001_v31 = vpack.c.bf16 %v1286_v20, %v1284_v16  ;;  %v1579_v17 = vadd.f32 %v1286_v20, %v1284_v16  ;;  %v2002_v19 = vpack.c.bf16 %v1339_v18, %v1337_v11  ;;  %v1615_v45 = vmul.f32 %v1286_v20, %v1286_v20 }
 0x169   : > { %v1290_v21 = vpop.f32.mrf.mxu0  ;;  %v1343_v23 = vpop.f32.mrf.mxu1  ;;  %v1639_v56 = vadd.f32 %v1638_v49, %v1608_v48  ;;  %v1572_v58 = vadd.f32 %v1571_v51, %v1335_v14  ;;  %v1617_v59 = vmul.f32 %v1339_v18, %v1339_v18 }
 0x16a   : > { %1558 = vst [vmem:[%s2562_s17 + $0x20] sm:$0xff] %v2001_v31  ;;  %v1580_v22 = vadd.f32 %v1579_v17, %v1337_v11  ;;  %1559 = vst [vmem:[%s2562_s17 + $0x28] sm:$0xff] %v2002_v19  ;;  %v1647_v50 = vadd.f32 %v1615_v45, %v1614_v47  ;;  %v1622_v53 = vmul.f32 %v1290_v21, %v1290_v21 }
 0x16b   : > { %v1292_v24 = vpop.f32.mrf.mxu0  ;;  %v2568_v27 = vpop.f32.mrf.mxu1  ;;  %v1624_v61 = vmul.f32 %v1343_v23, %v1343_v23  ;;  %v1640_v1 = vadd.f32 %v1639_v56, %v1609_v55 }
 0x16c   : > { %v1581_v25 = vadd.f32 %v1580_v22, %v1339_v18  ;;  %v2005_v26 = vpack.c.bf16 %v1292_v24, %v1290_v21  ;;  %v2006_v29 = vpack.c.bf16 %v2568_v27, %v1343_v23  ;;  %v1623_v54 = vmul.f32 %v1292_v24, %v1292_v24 }
 0x16d   : > { %v1294_v28 = vpop.f32.mrf.mxu0  ;;  %v1347_v32 = vpop.f32.mrf.mxu1  ;;  %v1648_v0 = vadd.f32 %v1647_v50, %v1616_v52  ;;  %v1588_v57 = vadd.f32 %v1292_v24, %v1290_v21  ;;  %v1625_v7 = vmul.f32 %v2568_v27, %v2568_v27 }
 0x16e   : > { %1562 = vst [vmem:[%s2562_s17 + $0x40] sm:$0xff] %v2005_v26  ;;  %v1630_v30 = vmul.f32 %v1294_v28, %v1294_v28  ;;  %1563 = vst [vmem:[%s2562_s17 + $0x48] sm:$0xff] %v2006_v29  ;;  %v1632_v36 = vmul.f32 %v1347_v32, %v1347_v32  ;;  %v1656_v60 = vadd.f32 %v1623_v54, %v1622_v53 }
 0x16f   : > { %v1296_v33 = vpop.f32.mrf.mxu0  ;;  %v2573_v37 = vpop.f32.mrf.mxu1  ;;  %v1649_v5 = vadd.f32 %v1648_v0, %v1617_v59  ;;  %v1589_v6 = vadd.f32 %v1588_v57, %v1343_v23 }
 0x170   : > { %v2009_v34 = vpack.c.bf16 %v1296_v33, %v1294_v28  ;;  %v1631_v35 = vmul.f32 %v1296_v33, %v1296_v33  ;;  %v2010_v38 = vpack.c.bf16 %v2573_v37, %v1347_v32  ;;  %v1633_v40 = vmul.f32 %v2573_v37, %v2573_v37 }
 0x171   : > { %v1597_v62 = vadd.f32 %v1296_v33, %v1294_v28  ;;  %v1657_v15 = vadd.f32 %v1656_v60, %v1624_v61  ;;  %v1590_v23 = vadd.f32 %v1589_v6, %v2568_v27 }
 0x172   : > { %1566 = vst [vmem:[%s2562_s17 + $0x60] sm:$0xff] %v2009_v34  ;;  %v1665_v39 = vadd.f32 %v1631_v35, %v1630_v30  ;;  %1567 = vst [vmem:[%s2562_s17 + $0x68] sm:$0xff] %v2010_v38 }
 0x173   : > { %v1598_v16 = vadd.f32 %v1597_v62, %v1347_v32  ;;  %v1658_v33 = vadd.f32 %v1657_v15, %v1625_v7 }
 0x174   : > { %v1666_v41 = vadd.f32 %v1665_v39, %v1632_v36 }
 0x175   : > { %v1599_v38 = vadd.f32 %v1598_v16, %v2573_v37 }
 0x176   : > { %v2580_v42 = vadd.f32 %v1666_v41, %v1633_v40 }
 0x1a1   : > { %v1386_v63 = vpop.f32.mrf.mxu0  ;;  %v1439_v4 = vpop.f32.mrf.mxu1 }
 0x1a2   : > { %v1573_v2 = vadd.f32 %v1572_v58, %v1386_v63  ;;  %v1610_v3 = vmul.f32 %v1386_v63, %v1386_v63  ;;  %v1612_v11 = vmul.f32 %v1439_v4, %v1439_v4 }
 0x1a3   : > { %v1388_v8 = vpop.f32.mrf.mxu0  ;;  %v1441_v14 = vpop.f32.mrf.mxu1 }
 0x1a4   : > { %v1641_v9 = vadd.f32 %v1640_v1, %v1610_v3  ;;  %v1999_v10 = vpack.c.bf16 %v1388_v8, %v1386_v63  ;;  %v1574_v12 = vadd.f32 %v1573_v2, %v1388_v8  ;;  %v1611_v13 = vmul.f32 %v1388_v8, %v1388_v8 }
 0x1a5   : > { %v2000_v20 = vpack.c.bf16 %v1441_v14, %v1439_v4  ;;  %v1390_v31 = vpop.f32.mrf.mxu0  ;;  %v1443_v19 = vpop.f32.mrf.mxu1  ;;  %v1613_v45 = vmul.f32 %v1441_v14, %v1441_v14 }
 0x1a6   : > { %1556 = vst [vmem:[%s2562_s17 + $0x10] sm:$0xff] %v1999_v10  ;;  %v1582_v17 = vadd.f32 %v1581_v25, %v1390_v31  ;;  %v1618_v18 = vmul.f32 %v1390_v31, %v1390_v31  ;;  %v1575_v21 = vadd.f32 %v1574_v12, %v1439_v4  ;;  %v1642_v22 = vadd.f32 %v1641_v9, %v1611_v13 }
 0x1a7   : > { %1557 = vst [vmem:[%s2562_s17 + $0x18] sm:$0xff] %v2000_v20  ;;  %v1392_v24 = vpop.f32.mrf.mxu0  ;;  %v1445_v32 = vpop.f32.mrf.mxu1  ;;  %v1620_v43 = vmul.f32 %v1443_v19, %v1443_v19 }
 0x1a8   : > { %v1650_v26 = vadd.f32 %v1649_v5, %v1618_v18  ;;  %v2003_v28 = vpack.c.bf16 %v1392_v24, %v1390_v31  ;;  %v1583_v29 = vadd.f32 %v1582_v17, %v1392_v24  ;;  %v1619_v30 = vmul.f32 %v1392_v24, %v1392_v24 }
 0x1a9   : > { %v2004_v34 = vpack.c.bf16 %v1445_v32, %v1443_v19  ;;  %v1396_v35 = vpop.f32.mrf.mxu0  ;;  %v1576_v36 = vadd.f32 %v1575_v21, %v1441_v14  ;;  %v1643_v25 = vadd.f32 %v1642_v22, %v1612_v11  ;;  %v1449_v41 = vpop.f32.mrf.mxu1  ;;  %v1621_v46 = vmul.f32 %v1445_v32, %v1445_v32 }
 0x1aa   : > { %1560 = vst [vmem:[%s2562_s17 + $0x30] sm:$0xff] %v2003_v28  ;;  %v1591_v39 = vadd.f32 %v1590_v23, %v1396_v35  ;;  %v1626_v40 = vmul.f32 %v1396_v35, %v1396_v35  ;;  %v1651_v27 = vadd.f32 %v1650_v26, %v1619_v30  ;;  %v1584_v47 = vadd.f32 %v1583_v29, %v1443_v19  ;;  %v1711_v30 = vld [vmem:[%s2562_s17] sm:$0xff] (%p2119_p5) }
 0x1ab   : > { %1561 = vst [vmem:[%s2562_s17 + $0x38] sm:$0xff] %v2004_v34  ;;  %1577 = vadd.xlane.f32.xlu0 %v1576_v36  ;;  %v1398_v44 = vpop.f32.mrf.mxu0  ;;  %v1451_v52 = vpop.f32.mrf.mxu1  ;;  %v1628_v37 = vmul.f32 %v1449_v41, %v1449_v41  ;;  %v1644_v55 = vadd.f32 %v1643_v25, %v1613_v45  ;;  %v1721_v36 = vld [vmem:[%s2562_s17 + $0x28] sm:$0xff] (%p2119_p5)  ;;  %1712 = vst [vmem:[%s1698_s27] sm:$0xff] (%p2119_p5), %v1711_v30 }
 0x1ac   : > { %v1659_v48 = vadd.f32 %v1658_v33, %v1626_v40  ;;  %v2007_v49 = vpack.c.bf16 %v1398_v44, %v1396_v35  ;;  %v1592_v50 = vadd.f32 %v1591_v39, %v1398_v44  ;;  %v1627_v51 = vmul.f32 %v1398_v44, %v1398_v44  ;;  %v1719_v35 = vld [vmem:[%s2562_s17 + $0x20] sm:$0xff] (%p2119_p5)  ;;  %1722 = vst [vmem:[%s1698_s27 + $0x48] sm:$0xff] (%p2119_p5), %v1721_v36  ;;  %v1729_v40 = vld [vmem:[%s2562_s17 + $0x48] sm:$0xff] (%p2119_p5) }
 0x1ad   : > { %v2008_v53 = vpack.c.bf16 %v1451_v52, %v1449_v41  ;;  %v1400_v54 = vpop.f32.mrf.mxu0  ;;  %v1652_v56 = vadd.f32 %v1651_v27, %v1620_v43  ;;  %v1453_v58 = vpop.f32.mrf.mxu1  ;;  %v1585_v6 = vadd.f32 %v1584_v47, %v1445_v32  ;;  %v1629_v7 = vmul.f32 %v1451_v52, %v1451_v52  ;;  %v1713_v32 = vld [vmem:[%s2562_s17 + $0x8] sm:$0xff] (%p2119_p5)  ;;  %v1715_v33 = vld [vmem:[%s2562_s17 + $0x10] sm:$0xff] (%p2119_p5)  ;;  %1720 = vst [vmem:[%s1698_s27 + $0x40] sm:$0xff] (%p2119_p5), %v1719_v35  ;;  %v1727_v39 = vld [vmem:[%s2562_s17 + $0x40] sm:$0xff] (%p2119_p5) }
 0x1ae   : > { %1564 = vst [vmem:[%s2562_s17 + $0x50] sm:$0xff] %v2007_v49  ;;  %v1600_v0 = vadd.f32 %v1599_v38, %v1400_v54  ;;  %v1634_v57 = vmul.f32 %v1400_v54, %v1400_v54  ;;  %v1660_v59 = vadd.f32 %v1659_v48, %v1627_v51  ;;  %v1593_v62 = vadd.f32 %v1592_v50, %v1449_v41  ;;  %v1717_v34 = vld [vmem:[%s2562_s17 + $0x18] sm:$0xff] (%p2119_p5)  ;;  %v1735_v43 = vld [vmem:[%s2562_s17 + $0x60] sm:$0xff] (%p2119_p5)  ;;  %v1737_v44 = vld [vmem:[%s2562_s17 + $0x68] sm:$0xff] (%p2119_p5) }
 0x1af   : > { %1565 = vst [vmem:[%s2562_s17 + $0x58] sm:$0xff] %v2008_v53  ;;  %1645 = vadd.xlane.f32.xlu0 %v1644_v55  ;;  %v1402_v60 = vpop.f32.mrf.mxu0  ;;  %v1653_v61 = vadd.f32 %v1652_v56, %v1621_v46  ;;  %v1455_v4 = vpop.f32.mrf.mxu1  ;;  %v1636_v13 = vmul.f32 %v1453_v58, %v1453_v58  ;;  %1714 = vst [vmem:[%s1698_s27 + $0x8] sm:$0xff] (%p2119_p5), %v1713_v32 }
 0x1b0   : > { %v1668_v63 = vadd.f32 %v2580_v42, %v1634_v57  ;;  %v2011_v1 = vpack.c.bf16 %v1402_v60, %v1400_v54  ;;  %v1601_v2 = vadd.f32 %v1600_v0, %v1402_v60  ;;  %v1635_v3 = vmul.f32 %v1402_v60, %v1402_v60  ;;  %1716 = vst [vmem:[%s1698_s27 + $0x10] sm:$0xff] (%p2119_p5), %v1715_v33 }
 0x1b1   : > { %v2012_v5 = vpack.c.bf16 %v1455_v4, %v1453_v58  ;;  %1654 = vadd.xlane.f32.xlu1 %v1653_v61  ;;  %v1661_v8 = vadd.f32 %v1660_v59, %v1628_v37  ;;  %v1594_v10 = vadd.f32 %v1593_v62, %v1451_v52  ;;  %v1637_v16 = vmul.f32 %v1455_v4, %v1455_v4  ;;  %v1723_v25 = vld [vmem:[%s2562_s17 + $0x30] sm:$0xff] (%p2119_p5) }
 0x1b2   : > { %1568 = vst [vmem:[%s2562_s17 + $0x70] sm:$0xff] %v2011_v1  ;;  %v1669_v9 = vadd.f32 %v1668_v63, %v1635_v3  ;;  %v1602_v12 = vadd.f32 %v1601_v2, %v1453_v58  ;;  %1718 = vst [vmem:[%s1698_s27 + $0x18] sm:$0xff] (%p2119_p5), %v1717_v34  ;;  %v1725_v38 = vld [vmem:[%s2562_s17 + $0x38] sm:$0xff] (%p2119_p5) }
 0x1b3   : > { %1569 = vst [vmem:[%s2562_s17 + $0x78] sm:$0xff] %v2012_v5  ;;  %1586 = vadd.xlane.f32.xlu0 %v1585_v6  ;;  %v1662_v42 = vadd.f32 %v1661_v8, %v1629_v7  ;;  %1724 = vst [vmem:[%s1698_s27 + $0x50] sm:$0xff] (%p2119_p5), %v1723_v25 }
 0x1b4   : > { %v1603_v14 = vadd.f32 %v1602_v12, %v1455_v4  ;;  %v1670_v15 = vadd.f32 %v1669_v9, %v1636_v13  ;;  %1726 = vst [vmem:[%s1698_s27 + $0x58] sm:$0xff] (%p2119_p5), %v1725_v38  ;;  %1728 = vst [vmem:[%s1698_s27 + $0x80] sm:$0xff] (%p2119_p5), %v1727_v39 }
 0x1b5   : > { %1595 = vadd.xlane.f32.xlu1 %v1594_v10  ;;  %v1731_v41 = vld [vmem:[%s2562_s17 + $0x50] sm:$0xff] (%p2119_p5)  ;;  %1730 = vst [vmem:[%s1698_s27 + $0x88] sm:$0xff] (%p2119_p5), %v1729_v40  ;;  %1736 = vst [vmem:[%s1698_s27 + $0xc0] sm:$0xff] (%p2119_p5), %v1735_v43 }
 0x1b6   : > { %v1671_v11 = vadd.f32 %v1670_v15, %v1637_v16  ;;  %v1733_v27 = vld [vmem:[%s2562_s17 + $0x58] sm:$0xff] (%p2119_p5)  ;;  %1732 = vst [vmem:[%s1698_s27 + $0x90] sm:$0xff] (%p2119_p5), %v1731_v41  ;;  %1738 = vst [vmem:[%s1698_s27 + $0xc8] sm:$0xff] (%p2119_p5), %v1737_v44 }
 0x1b7   : > { %1663 = vadd.xlane.f32.xlu0 %v1662_v42  ;;  %1734 = vst [vmem:[%s1698_s27 + $0x98] sm:$0xff] (%p2119_p5), %v1733_v27 }
 0x1b9   : > { %1604 = vadd.xlane.f32.xlu1 %v1603_v14  ;;  %v1739_v45 = vld [vmem:[%s2562_s17 + $0x70] sm:$0xff] (%p2119_p5) }
 0x1ba   : > { %1740 = vst [vmem:[%s1698_s27 + $0xd0] sm:$0xff] (%p2119_p5), %v1739_v45  ;;  %v1741_v46 = vld [vmem:[%s2562_s17 + $0x78] sm:$0xff] (%p2119_p5) }
 0x1bb   : > { %1742 = vst [vmem:[%s1698_s27 + $0xd8] sm:$0xff] (%p2119_p5), %v1741_v46 }
 0x1bd   : > { %1672 = vadd.xlane.f32.xlu1 %v1671_v11 }
 0x234   : > { %v1578_v20 = vpop.xlane.xlu0 %1577 }
 0x238   : > { %v1646_v31 = vpop.xlane.xlu0 %1645 }
 0x239   : > { %v1675_v17 = vsel %vm1674_vm0, %v1578_v20, %v1646_v31 }
 0x23a   : > { %1680 = vst.msk [vmem:[%s453_s23] sm:$0xff] %vm1679_vm1, %v1675_v17  ;;  %v1655_v18 = vpop.xlane.xlu1 %1654 }
 0x23c   : > { %v1587_v19 = vpop.xlane.xlu0 %1586 }
 0x23d   : > { %v1676_v21 = vsel %vm1674_vm0, %v1587_v19, %v1655_v18 }
 0x23e   : > { %1681 = vst.msk [vmem:[%s453_s23 + $0x8] sm:$0xff] %vm1679_vm1, %v1676_v21  ;;  %v1596_v22 = vpop.xlane.xlu1 %1595 }
 0x240   : > { %v1664_v23 = vpop.xlane.xlu0 %1663 }
 0x241   : > { %v1677_v24 = vsel %vm1674_vm0, %v1596_v22, %v1664_v23 }
 0x242   : > { %1682 = vst.msk [vmem:[%s453_s23 + $0x10] sm:$0xff] %vm1679_vm1, %v1677_v24  ;;  %v1605_v26 = vpop.xlane.xlu1 %1604 }
 0x244   : > { %1695 = sbr.rel (!%p2119_p5) target bundleno = 585 (0x249), region = 55 }
 0x246   : > { %v1673_v28 = vpop.xlane.xlu1 %1672 }
 0x247   : > { %v1678_v29 = vsel %vm1674_vm0, %v1605_v26, %v1673_v28 }
 0x248   : > { %1683 = vst.msk [vmem:[%s453_s23 + $0x18] sm:$0xff] %vm1679_vm1, %v1678_v29 }
 0x249 PF: > { %p11_p11 = scmp.ge.s32.totalorder %s2107_s16, 4   ;;  %s2641_s12 = smov %s2062_s13 }
 0x24a   : > { %s2642_s13 = smov %s2117_s19  ;;  %s2643_s14 = smov %s2107_s16 }
 0x24b   :  { %13 = sbr.rel (!%p11_p11) target bundleno = 2 (0x2), region = 121 }

// kernel: discriminator_forward.7
= control target key start
LH: loop header
LB: loop body
LE: loop exit
PB: predicated region body
PF: predicated region fallthrough
CT: control target
= control target key end

     0   :  { %s1696_s12 = smov 0   ;;  %s1698_s13 = smov 0   ;;  %s2055_s0 = inlined_call_operand.vmem [shape: bf16[512,512], index: 0, kind: input, shape index: {}]   ;;  %s2056_s1 = inlined_call_operand.vmem [shape: bf16[64,512], index: 1, kind: input, shape index: {}]   ;;  %s2057_s2 = inlined_call_operand.vmem [shape: bf16[64,512], index: 2, kind: output, shape index: {0}]   ;;  %s2058_s3 = inlined_call_operand.vmem [shape: f32[2,64,2], index: 3, kind: output, shape index: {1}]  }
   0x1   :  { %s1700_s14 = smov 0  }
   0x2 LB: > { %s1712_s15 = sadd.s32 4294967295, %s1674_s14   ;;  %s1715_s16 = sadd.s32 1, %s1674_s14   ;;  %s1674_s14 = sphi %s1700_s14, %s2062_s14   ;;  %s1670_s13 = sphi %s1698_s13, %s2061_s13   ;;  %s1666_s12 = sphi %s1696_s12, %s2060_s12  }
   0x3   : > { %s18_s17 = ssub.s32 %s1674_s14, %s1715_s16  ;;  %s21_s18 = sadd.s32 1, %s1670_s13 }
   0x4   : > { %p19_p0 = scmp.eq.s32.totalorder %s18_s17, 0  ;;  %p28_p1 = scmp.ne.s32.totalorder %s1670_s13, %s1666_s12 }
   0x5   : > { %p29_p2 = scmp.eq.s32.totalorder %s1674_s14, 0  ;;  %p79_p3 = scmp.eq.s32.totalorder %s1712_s15, 1 }
   0x6   : > { %s1725_s19 = scalar_select %p19_p0, %s1670_s13, %s21_s18  }
   0x7   : > { %p30_p4 = por %p29_p2, %p28_p1  ;;  %p1727_p5 = por %p79_p3, %p28_p1 }
   0x8   : > { %p1395_p6 = scmp.ge.s32.totalorder %s1674_s14, 2 }
   0xa   : > { %130 = sbr.rel (%p1395_p6) target bundleno = 51 (0x33), region = 20 }
   0xf   : > { %133 = sbr.rel (!%p30_p4) target bundleno = 51 (0x33), region = 24  ;;  %s135_s21 = sand.u32 (%p30_p4), 1, %s1670_s13  }
  0x10   : > { %s1497_s22 = sshll.u32 (%p30_p4), %s1674_s14, 3  ;;  %s1396_s23 = sshll.u32 (%p30_p4), %s135_s21, 9 }
  0x11   : > { %s1737_s26 = scalar_lea.vmem (%p30_p4), %s2055_s0, %s1497_s22  ;;  %s1742_s27 = scalar_lea.vmem (%p30_p4), [#allocation2], %s1396_s23 }
  0x12   : > { %v295_v0 = vld [vmem:[%s1737_s26] sm:$0xff] (%p30_p4)  ;;  %v297_v1 = vld [vmem:[%s1737_s26 + $0x10] sm:$0xff] (%p30_p4) }
  0x13   : > { %v299_v2 = vld [vmem:[%s1737_s26 + $0x20] sm:$0xff] (%p30_p4)  ;;  %296 = vst [vmem:[%s1742_s27] sm:$0xff] (%p30_p4), %v295_v0  ;;  %298 = vst [vmem:[%s1742_s27 + $0x8] sm:$0xff] (%p30_p4), %v297_v1  ;;  %v301_v3 = vld [vmem:[%s1737_s26 + $0x30] sm:$0xff] (%p30_p4) }
  0x14   : > { %300 = vst [vmem:[%s1742_s27 + $0x10] sm:$0xff] %v299_v2  ;;  %v303_v4 = vld [vmem:[%s1737_s26 + $0x40] sm:$0xff]  ;;  %v305_v5 = vld [vmem:[%s1737_s26 + $0x50] sm:$0xff]  ;;  %302 = vst [vmem:[%s1742_s27 + $0x18] sm:$0xff] %v301_v3 }
  0x15   : > { %304 = vst [vmem:[%s1742_s27 + $0x20] sm:$0xff] %v303_v4  ;;  %306 = vst [vmem:[%s1742_s27 + $0x28] sm:$0xff] %v305_v5  ;;  %v307_v6 = vld [vmem:[%s1737_s26 + $0x60] sm:$0xff]  ;;  %v309_v7 = vld [vmem:[%s1737_s26 + $0x70] sm:$0xff] }
  0x16   : > { %v311_v8 = vld [vmem:[%s1737_s26 + $0x80] sm:$0xff]  ;;  %308 = vst [vmem:[%s1742_s27 + $0x30] sm:$0xff] %v307_v6  ;;  %310 = vst [vmem:[%s1742_s27 + $0x38] sm:$0xff] %v309_v7  ;;  %v313_v9 = vld [vmem:[%s1737_s26 + $0x90] sm:$0xff] }
  0x17   : > { %312 = vst [vmem:[%s1742_s27 + $0x40] sm:$0xff] %v311_v8  ;;  %v315_v10 = vld [vmem:[%s1737_s26 + $0xa0] sm:$0xff]  ;;  %v317_v11 = vld [vmem:[%s1737_s26 + $0xb0] sm:$0xff]  ;;  %314 = vst [vmem:[%s1742_s27 + $0x48] sm:$0xff] %v313_v9 }
  0x18   : > { %316 = vst [vmem:[%s1742_s27 + $0x50] sm:$0xff] %v315_v10  ;;  %318 = vst [vmem:[%s1742_s27 + $0x58] sm:$0xff] %v317_v11  ;;  %v319_v12 = vld [vmem:[%s1737_s26 + $0xc0] sm:$0xff]  ;;  %v321_v13 = vld [vmem:[%s1737_s26 + $0xd0] sm:$0xff] }
  0x19   : > { %v323_v14 = vld [vmem:[%s1737_s26 + $0xe0] sm:$0xff]  ;;  %320 = vst [vmem:[%s1742_s27 + $0x60] sm:$0xff] %v319_v12  ;;  %322 = vst [vmem:[%s1742_s27 + $0x68] sm:$0xff] %v321_v13  ;;  %v325_v15 = vld [vmem:[%s1737_s26 + $0xf0] sm:$0xff] }
  0x1a   : > { %324 = vst [vmem:[%s1742_s27 + $0x70] sm:$0xff] %v323_v14  ;;  %v327_v16 = vld [vmem:[%s1737_s26 + $0x100] sm:$0xff]  ;;  %v329_v17 = vld [vmem:[%s1737_s26 + $0x110] sm:$0xff]  ;;  %326 = vst [vmem:[%s1742_s27 + $0x78] sm:$0xff] %v325_v15 }
  0x1b   : > { %328 = vst [vmem:[%s1742_s27 + $0x80] sm:$0xff] %v327_v16  ;;  %330 = vst [vmem:[%s1742_s27 + $0x88] sm:$0xff] %v329_v17  ;;  %v331_v18 = vld [vmem:[%s1737_s26 + $0x120] sm:$0xff]  ;;  %v333_v19 = vld [vmem:[%s1737_s26 + $0x130] sm:$0xff] }
  0x1c   : > { %v335_v20 = vld [vmem:[%s1737_s26 + $0x140] sm:$0xff]  ;;  %332 = vst [vmem:[%s1742_s27 + $0x90] sm:$0xff] %v331_v18  ;;  %334 = vst [vmem:[%s1742_s27 + $0x98] sm:$0xff] %v333_v19  ;;  %v337_v21 = vld [vmem:[%s1737_s26 + $0x150] sm:$0xff] }
  0x1d   : > { %336 = vst [vmem:[%s1742_s27 + $0xa0] sm:$0xff] %v335_v20  ;;  %v339_v22 = vld [vmem:[%s1737_s26 + $0x160] sm:$0xff]  ;;  %v341_v23 = vld [vmem:[%s1737_s26 + $0x170] sm:$0xff]  ;;  %338 = vst [vmem:[%s1742_s27 + $0xa8] sm:$0xff] %v337_v21 }
  0x1e   : > { %340 = vst [vmem:[%s1742_s27 + $0xb0] sm:$0xff] %v339_v22  ;;  %342 = vst [vmem:[%s1742_s27 + $0xb8] sm:$0xff] %v341_v23  ;;  %v343_v24 = vld [vmem:[%s1737_s26 + $0x180] sm:$0xff]  ;;  %v345_v25 = vld [vmem:[%s1737_s26 + $0x190] sm:$0xff] }
  0x1f   : > { %v347_v26 = vld [vmem:[%s1737_s26 + $0x1a0] sm:$0xff]  ;;  %344 = vst [vmem:[%s1742_s27 + $0xc0] sm:$0xff] %v343_v24  ;;  %346 = vst [vmem:[%s1742_s27 + $0xc8] sm:$0xff] %v345_v25  ;;  %v349_v27 = vld [vmem:[%s1737_s26 + $0x1b0] sm:$0xff] }
  0x20   : > { %348 = vst [vmem:[%s1742_s27 + $0xd0] sm:$0xff] %v347_v26  ;;  %v351_v28 = vld [vmem:[%s1737_s26 + $0x1c0] sm:$0xff]  ;;  %v353_v29 = vld [vmem:[%s1737_s26 + $0x1d0] sm:$0xff]  ;;  %350 = vst [vmem:[%s1742_s27 + $0xd8] sm:$0xff] %v349_v27 }
  0x21   : > { %352 = vst [vmem:[%s1742_s27 + $0xe0] sm:$0xff] %v351_v28  ;;  %354 = vst [vmem:[%s1742_s27 + $0xe8] sm:$0xff] %v353_v29  ;;  %v355_v30 = vld [vmem:[%s1737_s26 + $0x1e0] sm:$0xff]  ;;  %v357_v31 = vld [vmem:[%s1737_s26 + $0x1f0] sm:$0xff] }
  0x22   : > { %v359_v32 = vld [vmem:[%s1737_s26 + $0x200] sm:$0xff]  ;;  %356 = vst [vmem:[%s1742_s27 + $0xf0] sm:$0xff] %v355_v30  ;;  %358 = vst [vmem:[%s1742_s27 + $0xf8] sm:$0xff] %v357_v31  ;;  %v361_v33 = vld [vmem:[%s1737_s26 + $0x210] sm:$0xff] }
  0x23   : > { %360 = vst [vmem:[%s1742_s27 + $0x100] sm:$0xff] %v359_v32  ;;  %v363_v34 = vld [vmem:[%s1737_s26 + $0x220] sm:$0xff]  ;;  %v365_v35 = vld [vmem:[%s1737_s26 + $0x230] sm:$0xff]  ;;  %362 = vst [vmem:[%s1742_s27 + $0x108] sm:$0xff] %v361_v33 }
  0x24   : > { %364 = vst [vmem:[%s1742_s27 + $0x110] sm:$0xff] %v363_v34  ;;  %366 = vst [vmem:[%s1742_s27 + $0x118] sm:$0xff] %v365_v35  ;;  %v367_v36 = vld [vmem:[%s1737_s26 + $0x240] sm:$0xff]  ;;  %v369_v37 = vld [vmem:[%s1737_s26 + $0x250] sm:$0xff] }
  0x25   : > { %v371_v38 = vld [vmem:[%s1737_s26 + $0x260] sm:$0xff]  ;;  %368 = vst [vmem:[%s1742_s27 + $0x120] sm:$0xff] %v367_v36  ;;  %370 = vst [vmem:[%s1742_s27 + $0x128] sm:$0xff] %v369_v37  ;;  %v373_v39 = vld [vmem:[%s1737_s26 + $0x270] sm:$0xff] }
  0x26   : > { %372 = vst [vmem:[%s1742_s27 + $0x130] sm:$0xff] %v371_v38  ;;  %v375_v40 = vld [vmem:[%s1737_s26 + $0x280] sm:$0xff]  ;;  %v377_v41 = vld [vmem:[%s1737_s26 + $0x290] sm:$0xff]  ;;  %374 = vst [vmem:[%s1742_s27 + $0x138] sm:$0xff] %v373_v39 }
  0x27   : > { %376 = vst [vmem:[%s1742_s27 + $0x140] sm:$0xff] %v375_v40  ;;  %378 = vst [vmem:[%s1742_s27 + $0x148] sm:$0xff] %v377_v41  ;;  %v379_v42 = vld [vmem:[%s1737_s26 + $0x2a0] sm:$0xff]  ;;  %v381_v43 = vld [vmem:[%s1737_s26 + $0x2b0] sm:$0xff] }
  0x28   : > { %v383_v44 = vld [vmem:[%s1737_s26 + $0x2c0] sm:$0xff]  ;;  %380 = vst [vmem:[%s1742_s27 + $0x150] sm:$0xff] %v379_v42  ;;  %382 = vst [vmem:[%s1742_s27 + $0x158] sm:$0xff] %v381_v43  ;;  %v385_v45 = vld [vmem:[%s1737_s26 + $0x2d0] sm:$0xff] }
  0x29   : > { %384 = vst [vmem:[%s1742_s27 + $0x160] sm:$0xff] %v383_v44  ;;  %v387_v46 = vld [vmem:[%s1737_s26 + $0x2e0] sm:$0xff]  ;;  %v389_v47 = vld [vmem:[%s1737_s26 + $0x2f0] sm:$0xff]  ;;  %386 = vst [vmem:[%s1742_s27 + $0x168] sm:$0xff] %v385_v45 }
  0x2a   : > { %388 = vst [vmem:[%s1742_s27 + $0x170] sm:$0xff] %v387_v46  ;;  %390 = vst [vmem:[%s1742_s27 + $0x178] sm:$0xff] %v389_v47  ;;  %v391_v48 = vld [vmem:[%s1737_s26 + $0x300] sm:$0xff]  ;;  %v393_v49 = vld [vmem:[%s1737_s26 + $0x310] sm:$0xff] }
  0x2b   : > { %v395_v50 = vld [vmem:[%s1737_s26 + $0x320] sm:$0xff]  ;;  %392 = vst [vmem:[%s1742_s27 + $0x180] sm:$0xff] %v391_v48  ;;  %394 = vst [vmem:[%s1742_s27 + $0x188] sm:$0xff] %v393_v49  ;;  %v397_v51 = vld [vmem:[%s1737_s26 + $0x330] sm:$0xff] }
  0x2c   : > { %396 = vst [vmem:[%s1742_s27 + $0x190] sm:$0xff] %v395_v50  ;;  %v399_v52 = vld [vmem:[%s1737_s26 + $0x340] sm:$0xff]  ;;  %v401_v53 = vld [vmem:[%s1737_s26 + $0x350] sm:$0xff]  ;;  %398 = vst [vmem:[%s1742_s27 + $0x198] sm:$0xff] %v397_v51 }
  0x2d   : > { %400 = vst [vmem:[%s1742_s27 + $0x1a0] sm:$0xff] %v399_v52  ;;  %402 = vst [vmem:[%s1742_s27 + $0x1a8] sm:$0xff] %v401_v53  ;;  %v403_v54 = vld [vmem:[%s1737_s26 + $0x360] sm:$0xff]  ;;  %v405_v55 = vld [vmem:[%s1737_s26 + $0x370] sm:$0xff] }
  0x2e   : > { %v407_v56 = vld [vmem:[%s1737_s26 + $0x380] sm:$0xff]  ;;  %404 = vst [vmem:[%s1742_s27 + $0x1b0] sm:$0xff] %v403_v54  ;;  %406 = vst [vmem:[%s1742_s27 + $0x1b8] sm:$0xff] %v405_v55  ;;  %v409_v57 = vld [vmem:[%s1737_s26 + $0x390] sm:$0xff] }
  0x2f   : > { %408 = vst [vmem:[%s1742_s27 + $0x1c0] sm:$0xff] %v407_v56  ;;  %v411_v58 = vld [vmem:[%s1737_s26 + $0x3a0] sm:$0xff]  ;;  %v413_v59 = vld [vmem:[%s1737_s26 + $0x3b0] sm:$0xff]  ;;  %410 = vst [vmem:[%s1742_s27 + $0x1c8] sm:$0xff] %v409_v57 }
  0x30   : > { %412 = vst [vmem:[%s1742_s27 + $0x1d0] sm:$0xff] %v411_v58  ;;  %414 = vst [vmem:[%s1742_s27 + $0x1d8] sm:$0xff] %v413_v59  ;;  %v415_v60 = vld [vmem:[%s1737_s26 + $0x3c0] sm:$0xff]  ;;  %v417_v61 = vld [vmem:[%s1737_s26 + $0x3d0] sm:$0xff] }
  0x31   : > { %v419_v62 = vld [vmem:[%s1737_s26 + $0x3e0] sm:$0xff]  ;;  %416 = vst [vmem:[%s1742_s27 + $0x1e0] sm:$0xff] %v415_v60  ;;  %418 = vst [vmem:[%s1742_s27 + $0x1e8] sm:$0xff] %v417_v61  ;;  %v421_v63 = vld [vmem:[%s1737_s26 + $0x3f0] sm:$0xff] }
  0x32   : > { %420 = vst [vmem:[%s1742_s27 + $0x1f0] sm:$0xff] %v419_v62  ;;  %422 = vst [vmem:[%s1742_s27 + $0x1f8] sm:$0xff] %v421_v63 }
  0x33 PF: > { %p1399_p7 = scmp.ge.s32.totalorder %s1674_s14, 1  ;;  %p427_p8 = scmp.lt.s32.totalorder %s1674_s14, 3 }
  0x35   : > { %p428_p9 = pnand %p1399_p7, %p427_p8 }
  0x36   : > { %s434_s28 = sand.u32 (!%p428_p9), 1, %s1666_s12   ;;  %p463_p10 = scmp.lt.s32.totalorder (!%p428_p9), %s1712_s15, 1 }
  0x37   : > { %431 = sbr.rel (%p428_p9) target bundleno = 500 (0x1f4), region = 62  ;;  %s1400_s29 = sshll.u32 (!%p428_p9), %s434_s28, 9 }
  0x38   : > { %s1880_s7 = scalar_lea.vmem (!%p428_p9), [#allocation2], %s1400_s29  ;;  %s1401_s22 = sshll.u32 (!%p428_p9), %s434_s28, 6 }
  0x39   : > { %s1990_s23 = scalar_lea.vmem (!%p428_p9), [#allocation3], %s1401_s22 }
  0x3c   : > { %v1630_v0 = vld [vmem:[%s2056_s1 + $0x4] ss:$16 sps:$4 sm:$0xff]   ;;  %v1633_v1 = vld [vmem:[%s2056_s1 + $0xc] ss:$16 sps:$4 sm:$0xff]   ;;  %v1536_v4 = vld [vmem:[%s1880_s7 + $0x70] ss:$8 sps:$4 sm:$0xff]  }
  0x3d   : > { %v1532_v2 = vld [vmem:[%s1880_s7 + $0x74] ss:$8 sps:$4 sm:$0xff]   ;;  %980 = vmatprep.mubr.bf16.mxu0 %v1630_v0  ;;  %1053 = vmatprep.mubr.bf16.mxu1 %v1633_v1  ;;  %v1537_v5 = vld [vmem:[%s1880_s7 + $0x170] ss:$8 sps:$4 sm:$0xff]   ;;  %v1538_v6 = vld [vmem:[%s1880_s7 + $0x64] ss:$8 sps:$4 sm:$0xff]  }
  0x3e   : > { %v1534_v3 = vld [vmem:[%s1880_s7 + $0x174] ss:$8 sps:$4 sm:$0xff]   ;;  %948 = vmatprep.subr.bf16.mxu0 %v1532_v2  ;;  %v1540_v7 = vld [vmem:[%s1880_s7 + $0x164] ss:$8 sps:$4 sm:$0xff]   ;;  %v1542_v8 = vld [vmem:[%s1880_s7 + $0x60] ss:$8 sps:$4 sm:$0xff]  }
  0x3f   : > { %1021 = vmatprep.subr.bf16.mxu1 %v1534_v3  ;;  %949 = vmatpush1.bf16.msra.mxu0 %v1536_v4  ;;  %v1543_v9 = vld [vmem:[%s1880_s7 + $0x160] ss:$8 sps:$4 sm:$0xff]   ;;  %v1544_v10 = vld [vmem:[%s1880_s7 + $0x54] ss:$8 sps:$4 sm:$0xff]   ;;  %v1548_v12 = vld [vmem:[%s1880_s7 + $0x50] ss:$8 sps:$4 sm:$0xff]  }
  0x40   : > { %1022 = vmatpush1.bf16.msra.mxu1 %v1537_v5  ;;  %950 = vmatprep.subr.bf16.mxu0 %v1538_v6  ;;  %v1546_v11 = vld [vmem:[%s1880_s7 + $0x154] ss:$8 sps:$4 sm:$0xff]   ;;  %v1549_v13 = vld [vmem:[%s1880_s7 + $0x150] ss:$8 sps:$4 sm:$0xff]   ;;  %v1550_v14 = vld [vmem:[%s1880_s7 + $0x44] ss:$8 sps:$4 sm:$0xff]  }
  0x41   : > { %1023 = vmatprep.subr.bf16.mxu1 %v1540_v7  ;;  %v1552_v15 = vld [vmem:[%s1880_s7 + $0x144] ss:$8 sps:$4 sm:$0xff]   ;;  %v1554_v16 = vld [vmem:[%s1880_s7 + $0x40] ss:$8 sps:$4 sm:$0xff]   ;;  %v1556_v18 = vld [vmem:[%s1880_s7 + $0x34] ss:$8 sps:$4 sm:$0xff]  }
  0x42   : > { %v1555_v17 = vld [vmem:[%s1880_s7 + $0x140] ss:$8 sps:$4 sm:$0xff]   ;;  %v1558_v19 = vld [vmem:[%s1880_s7 + $0x134] ss:$8 sps:$4 sm:$0xff]   ;;  %v1560_v20 = vld [vmem:[%s1880_s7 + $0x30] ss:$8 sps:$4 sm:$0xff]  }
  0x43   : > { %951 = vmatpush1.bf16.msra.mxu0 %v1542_v8  ;;  %v1561_v21 = vld [vmem:[%s1880_s7 + $0x130] ss:$8 sps:$4 sm:$0xff]   ;;  %v1562_v22 = vld [vmem:[%s1880_s7 + $0x24] ss:$8 sps:$4 sm:$0xff]   ;;  %v1566_v24 = vld [vmem:[%s1880_s7 + $0x20] ss:$8 sps:$4 sm:$0xff]  }
  0x44   : > { %1024 = vmatpush1.bf16.msra.mxu1 %v1543_v9  ;;  %952 = vmatprep.subr.bf16.mxu0 %v1544_v10  ;;  %v1564_v23 = vld [vmem:[%s1880_s7 + $0x124] ss:$8 sps:$4 sm:$0xff]   ;;  %v1567_v25 = vld [vmem:[%s1880_s7 + $0x120] ss:$8 sps:$4 sm:$0xff]   ;;  %v1568_v26 = vld [vmem:[%s1880_s7 + $0x14] ss:$8 sps:$4 sm:$0xff]  }
  0x45   : > { %1025 = vmatprep.subr.bf16.mxu1 %v1546_v11  ;;  %v1570_v27 = vld [vmem:[%s1880_s7 + $0x114] ss:$8 sps:$4 sm:$0xff]   ;;  %v1572_v28 = vld [vmem:[%s1880_s7 + $0x10] ss:$8 sps:$4 sm:$0xff]   ;;  %v1574_v30 = vld [vmem:[%s1880_s7 + $0x4] ss:$8 sps:$4 sm:$0xff]  }
  0x46   : > { %v1573_v29 = vld [vmem:[%s1880_s7 + $0x110] ss:$8 sps:$4 sm:$0xff]   ;;  %v1576_v31 = vld [vmem:[%s1880_s7 + $0x104] ss:$8 sps:$4 sm:$0xff]   ;;  %v1578_v32 = vld [vmem:[%s1880_s7] ss:$8 sps:$4 sm:$0xff]  }
  0x47   : > { %953 = vmatpush1.bf16.msra.mxu0 %v1548_v12  ;;  %v1579_v33 = vld [vmem:[%s1880_s7 + $0x100] ss:$8 sps:$4 sm:$0xff]   ;;  %v1580_v34 = vld [vmem:[%s1880_s7 + $0xf4] ss:$8 sps:$4 sm:$0xff]   ;;  %v1584_v36 = vld [vmem:[%s1880_s7 + $0xf0] ss:$8 sps:$4 sm:$0xff]  }
  0x48   : > { %1026 = vmatpush1.bf16.msra.mxu1 %v1549_v13  ;;  %954 = vmatprep.subr.bf16.mxu0 %v1550_v14  ;;  %v1582_v35 = vld [vmem:[%s1880_s7 + $0x1f4] ss:$8 sps:$4 sm:$0xff]   ;;  %v1585_v37 = vld [vmem:[%s1880_s7 + $0x1f0] ss:$8 sps:$4 sm:$0xff]   ;;  %v1586_v38 = vld [vmem:[%s1880_s7 + $0xe4] ss:$8 sps:$4 sm:$0xff]  }
  0x49   : > { %1027 = vmatprep.subr.bf16.mxu1 %v1552_v15  ;;  %v1588_v39 = vld [vmem:[%s1880_s7 + $0x1e4] ss:$8 sps:$4 sm:$0xff]   ;;  %v1590_v40 = vld [vmem:[%s1880_s7 + $0xe0] ss:$8 sps:$4 sm:$0xff]   ;;  %v1592_v42 = vld [vmem:[%s1880_s7 + $0xd4] ss:$8 sps:$4 sm:$0xff]  }
  0x4a   : > { %v1591_v41 = vld [vmem:[%s1880_s7 + $0x1e0] ss:$8 sps:$4 sm:$0xff]   ;;  %v1594_v43 = vld [vmem:[%s1880_s7 + $0x1d4] ss:$8 sps:$4 sm:$0xff]   ;;  %v1596_v44 = vld [vmem:[%s1880_s7 + $0xd0] ss:$8 sps:$4 sm:$0xff]  }
  0x4b   : > { %955 = vmatpush1.bf16.msra.mxu0 %v1554_v16  ;;  %v1597_v45 = vld [vmem:[%s1880_s7 + $0x1d0] ss:$8 sps:$4 sm:$0xff]   ;;  %v1598_v46 = vld [vmem:[%s1880_s7 + $0xc4] ss:$8 sps:$4 sm:$0xff]   ;;  %v1602_v48 = vld [vmem:[%s1880_s7 + $0xc0] ss:$8 sps:$4 sm:$0xff]  }
  0x4c   : > { %1028 = vmatpush1.bf16.msra.mxu1 %v1555_v17  ;;  %956 = vmatprep.subr.bf16.mxu0 %v1556_v18  ;;  %v1600_v47 = vld [vmem:[%s1880_s7 + $0x1c4] ss:$8 sps:$4 sm:$0xff]   ;;  %v1603_v49 = vld [vmem:[%s1880_s7 + $0x1c0] ss:$8 sps:$4 sm:$0xff]   ;;  %v1604_v50 = vld [vmem:[%s1880_s7 + $0xb4] ss:$8 sps:$4 sm:$0xff]  }
  0x4d   : > { %1029 = vmatprep.subr.bf16.mxu1 %v1558_v19  ;;  %v1606_v51 = vld [vmem:[%s1880_s7 + $0x1b4] ss:$8 sps:$4 sm:$0xff]   ;;  %v1608_v52 = vld [vmem:[%s1880_s7 + $0xb0] ss:$8 sps:$4 sm:$0xff]   ;;  %v1610_v54 = vld [vmem:[%s1880_s7 + $0xa4] ss:$8 sps:$4 sm:$0xff]  }
  0x4e   : > { %v1609_v53 = vld [vmem:[%s1880_s7 + $0x1b0] ss:$8 sps:$4 sm:$0xff]   ;;  %v1612_v55 = vld [vmem:[%s1880_s7 + $0x1a4] ss:$8 sps:$4 sm:$0xff]   ;;  %v1614_v56 = vld [vmem:[%s1880_s7 + $0xa0] ss:$8 sps:$4 sm:$0xff]  }
  0x4f   : > { %957 = vmatpush1.bf16.msra.mxu0 %v1560_v20  ;;  %v1615_v57 = vld [vmem:[%s1880_s7 + $0x1a0] ss:$8 sps:$4 sm:$0xff]   ;;  %v1616_v58 = vld [vmem:[%s1880_s7 + $0x94] ss:$8 sps:$4 sm:$0xff]   ;;  %v1620_v60 = vld [vmem:[%s1880_s7 + $0x90] ss:$8 sps:$4 sm:$0xff]  }
  0x50   : > { %1030 = vmatpush1.bf16.msra.mxu1 %v1561_v21  ;;  %958 = vmatprep.subr.bf16.mxu0 %v1562_v22  ;;  %v1618_v59 = vld [vmem:[%s1880_s7 + $0x194] ss:$8 sps:$4 sm:$0xff]   ;;  %v1621_v61 = vld [vmem:[%s1880_s7 + $0x190] ss:$8 sps:$4 sm:$0xff]   ;;  %v1622_v62 = vld [vmem:[%s1880_s7 + $0x84] ss:$8 sps:$4 sm:$0xff]  }
  0x51   : > { %1031 = vmatprep.subr.bf16.mxu1 %v1564_v23  ;;  %v1624_v63 = vld [vmem:[%s1880_s7 + $0x184] ss:$8 sps:$4 sm:$0xff]   ;;  %v1626_v0 = vld [vmem:[%s1880_s7 + $0x80] ss:$8 sps:$4 sm:$0xff]   ;;  %s464_s12 = scalar_select %p463_p10, %s1712_s15, 1  ;;  %vm1214_vm0 = vcmask 7168  }
  0x52   : > { %v1627_v1 = vld [vmem:[%s1880_s7 + $0x180] ss:$8 sps:$4 sm:$0xff]   ;;  %v1634_v4 = vld [vmem:[%s2056_s1 + $0x24] ss:$16 sps:$4 sm:$0xff]   ;;  %v1636_v5 = vld [vmem:[%s2056_s1 + $0x2c] ss:$16 sps:$4 sm:$0xff]  }
  0x53   : > { %959 = vmatpush1.bf16.msra.mxu0 %v1566_v24  ;;  %v1628_v2 = vld [vmem:[%s2056_s1] ss:$16 sps:$4 sm:$0xff]   ;;  %v1631_v3 = vld [vmem:[%s2056_s1 + $0x8] ss:$16 sps:$4 sm:$0xff]   ;;  %v1640_v8 = vld [vmem:[%s2056_s1 + $0x44] ss:$16 sps:$4 sm:$0xff]  }
  0x54   : > { %1032 = vmatpush1.bf16.msra.mxu1 %v1567_v25  ;;  %960 = vmatprep.subr.bf16.mxu0 %v1568_v26  ;;  %v1638_v6 = vld [vmem:[%s2056_s1 + $0x20] ss:$16 sps:$4 sm:$0xff]   ;;  %v1639_v7 = vld [vmem:[%s2056_s1 + $0x28] ss:$16 sps:$4 sm:$0xff]   ;;  %v1642_v9 = vld [vmem:[%s2056_s1 + $0x4c] ss:$16 sps:$4 sm:$0xff]  }
  0x55   : > { %1033 = vmatprep.subr.bf16.mxu1 %v1570_v27  ;;  %v1644_v10 = vld [vmem:[%s2056_s1 + $0x40] ss:$16 sps:$4 sm:$0xff]   ;;  %v1645_v11 = vld [vmem:[%s2056_s1 + $0x48] ss:$16 sps:$4 sm:$0xff]   ;;  %v1646_v12 = vld [vmem:[%s2056_s1 + $0x64] ss:$16 sps:$4 sm:$0xff]  }
  0x56   : > { %v1648_v13 = vld [vmem:[%s2056_s1 + $0x6c] ss:$16 sps:$4 sm:$0xff]   ;;  %v1650_v14 = vld [vmem:[%s2056_s1 + $0x60] ss:$16 sps:$4 sm:$0xff]   ;;  %v1651_v15 = vld [vmem:[%s2056_s1 + $0x68] ss:$16 sps:$4 sm:$0xff]  }
  0x57   : > { %961 = vmatpush1.bf16.msra.mxu0 %v1572_v28  ;;  %s1498_s28 = sshll.u32 %s464_s12, 6  ;;  %vm1223_vm1 = vcmask 15360   ;;  %s1507_s27 = sshll.u32 (%p1727_p5), %s1712_s15, 3 }
  0x58   : > { %1034 = vmatpush1.bf16.msra.mxu1 %v1573_v29  ;;  %962 = vmatprep.subr.bf16.mxu0 %v1574_v30  ;;  %s2005_s26 = scalar_lea.vmem %s2058_s3, %s1498_s28  ;;  %s1246_s4 = scalar_lea.vmem (%p1727_p5), %s2057_s2, %s1507_s27 }
  0x59   : > { %1035 = vmatprep.subr.bf16.mxu1 %v1576_v31 }
  0x5b   : > { %963 = vmatpush1.bf16.msra.mxu0 %v1578_v32 }
  0x5c   : > { %1036 = vmatpush1.bf16.msra.mxu1 %v1579_v33  ;;  %964 = vmatprep.subr.bf16.mxu0 %v1580_v34 }
  0x5d   : > { %1037 = vmatprep.subr.bf16.mxu1 %v1582_v35 }
  0x5f   : > { %965 = vmatpush2.bf16.msra.mxu0 %v1584_v36 }
  0x60   : > { %1038 = vmatpush2.bf16.msra.mxu1 %v1585_v37  ;;  %966 = vmatprep.subr.bf16.mxu0 %v1586_v38 }
  0x61   : > { %1039 = vmatprep.subr.bf16.mxu1 %v1588_v39 }
  0x63   : > { %967 = vmatpush2.bf16.msra.mxu0 %v1590_v40 }
  0x64   : > { %1040 = vmatpush2.bf16.msra.mxu1 %v1591_v41  ;;  %968 = vmatprep.subr.bf16.mxu0 %v1592_v42 }
  0x65   : > { %1041 = vmatprep.subr.bf16.mxu1 %v1594_v43 }
  0x67   : > { %969 = vmatpush2.bf16.msra.mxu0 %v1596_v44 }
  0x68   : > { %1042 = vmatpush2.bf16.msra.mxu1 %v1597_v45  ;;  %970 = vmatprep.subr.bf16.mxu0 %v1598_v46 }
  0x69   : > { %1043 = vmatprep.subr.bf16.mxu1 %v1600_v47 }
  0x6b   : > { %971 = vmatpush2.bf16.msra.mxu0 %v1602_v48 }
  0x6c   : > { %1044 = vmatpush2.bf16.msra.mxu1 %v1603_v49  ;;  %972 = vmatprep.subr.bf16.mxu0 %v1604_v50 }
  0x6d   : > { %1045 = vmatprep.subr.bf16.mxu1 %v1606_v51 }
  0x6f   : > { %973 = vmatpush2.bf16.msra.mxu0 %v1608_v52 }
  0x70   : > { %1046 = vmatpush2.bf16.msra.mxu1 %v1609_v53  ;;  %974 = vmatprep.subr.bf16.mxu0 %v1610_v54 }
  0x71   : > { %1047 = vmatprep.subr.bf16.mxu1 %v1612_v55 }
  0x73   : > { %975 = vmatpush2.bf16.msra.mxu0 %v1614_v56 }
  0x74   : > { %1048 = vmatpush2.bf16.msra.mxu1 %v1615_v57  ;;  %976 = vmatprep.subr.bf16.mxu0 %v1616_v58 }
  0x75   : > { %1049 = vmatprep.subr.bf16.mxu1 %v1618_v59 }
  0x77   : > { %977 = vmatpush2.bf16.msra.mxu0 %v1620_v60 }
  0x78   : > { %1050 = vmatpush2.bf16.msra.mxu1 %v1621_v61  ;;  %978 = vmatprep.subr.bf16.mxu0 %v1622_v62 }
  0x79   : > { %1051 = vmatprep.subr.bf16.mxu1 %v1624_v63 }
  0x7b   : > { %979 = vmatpush2.bf16.msra.mxu0 %v1626_v0 }
  0x7c   : > { %1052 = vmatpush2.bf16.msra.mxu1 %v1627_v1 }
  0x7e   : > { %981 = vmatmul.mubr.bf16.vlgmr.msra.gmra.mxu0 %v1628_v2 }
  0x7f   : > { %1054 = vmatmul.mubr.bf16.vlgmr.msra.gmra.mxu1 %v1631_v3  ;;  %990 = vmatprep.mubr.bf16.mxu0 %v1634_v4 }
  0x80   : > { %1063 = vmatprep.mubr.bf16.mxu1 %v1636_v5 }
  0x86   : > { %991 = vmatmul.mubr.bf16.gmra.mxu0 %v1638_v6 }
  0x87   : > { %1064 = vmatmul.mubr.bf16.gmra.mxu1 %v1639_v7  ;;  %1000 = vmatprep.mubr.bf16.mxu0 %v1640_v8 }
  0x88   : > { %1073 = vmatprep.mubr.bf16.mxu1 %v1642_v9 }
  0x8e   : > { %1001 = vmatmul.mubr.bf16.gmra.mxu0 %v1644_v10 }
  0x8f   : > { %1074 = vmatmul.mubr.bf16.gmra.mxu1 %v1645_v11  ;;  %1010 = vmatprep.mubr.bf16.mxu0 %v1646_v12 }
  0x90   : > { %1083 = vmatprep.mubr.bf16.mxu1 %v1648_v13 }
  0x96   : > { %1011 = vmatmul.mubr.bf16.gmra.mxu0 %v1650_v14 }
  0x97   : > { %1084 = vmatmul.mubr.bf16.gmra.mxu1 %v1651_v15 }
 0x13e   : > { %v982_v16 = vpop.f32.mrf.mxu0 }
 0x13f   : > { %v1055_v17 = vpop.f32.mrf.mxu1 }
 0x140   : > { %v1056_v18 = vadd.f32 %v1055_v17, %v982_v16  ;;  %v984_v19 = vpop.f32.mrf.mxu0 }
 0x141   : > { %v1057_v20 = vpop.f32.mrf.mxu1 }
 0x142   : > { %v1058_v21 = vadd.f32 %v1057_v20, %v984_v19  ;;  %v986_v22 = vpop.f32.mrf.mxu0  ;;  %v1174_v30 = vmul.f32 %v1056_v18, %v1056_v18 }
 0x143   : > { %v1059_v23 = vpop.f32.mrf.mxu1 }
 0x144   : > { %v1499_v24 = vpack.c.bf16 %v1058_v21, %v1056_v18  ;;  %v1060_v25 = vadd.f32 %v1059_v23, %v986_v22  ;;  %v1150_v26 = vadd.f32 %v1058_v21, %v1056_v18  ;;  %v1175_v27 = vmul.f32 %v1058_v21, %v1058_v21  ;;  %v988_v28 = vpop.f32.mrf.mxu0 }
 0x145   : > { %v1061_v29 = vpop.f32.mrf.mxu1 }
 0x146   : > { %1142 = vst [vmem:[%s1990_s23] sm:$0xff] %v1499_v24  ;;  %v1062_v31 = vadd.f32 %v1061_v29, %v988_v28  ;;  %1151 = vadd.xlane.f32.xlu0 %v1150_v26  ;;  %v992_v32 = vpop.f32.mrf.mxu0  ;;  %v1190_v34 = vadd.f32 %v1175_v27, %v1174_v30  ;;  %v1176_v37 = vmul.f32 %v1060_v25, %v1060_v25 }
 0x147   : > { %v1065_v33 = vpop.f32.mrf.mxu1 }
 0x148   : > { %v1500_v35 = vpack.c.bf16 %v1062_v31, %v1060_v25  ;;  %v1066_v36 = vadd.f32 %v1065_v33, %v992_v32  ;;  %v1177_v38 = vmul.f32 %v1062_v31, %v1062_v31  ;;  %v994_v39 = vpop.f32.mrf.mxu0  ;;  %v1153_v46 = vadd.f32 %v1062_v31, %v1060_v25 }
 0x149   : > { %v1067_v40 = vpop.f32.mrf.mxu1 }
 0x14a   : > { %1143 = vst [vmem:[%s1990_s23 + $0x8] sm:$0xff] %v1500_v35  ;;  %v1068_v41 = vadd.f32 %v1067_v40, %v994_v39  ;;  %1191 = vadd.xlane.f32.xlu0 %v1190_v34  ;;  %v1193_v42 = vadd.f32 %v1177_v38, %v1176_v37  ;;  %v996_v43 = vpop.f32.mrf.mxu0  ;;  %v1178_v47 = vmul.f32 %v1066_v36, %v1066_v36 }
 0x14b   : > { %v1069_v44 = vpop.f32.mrf.mxu1 }
 0x14c   : > { %v1501_v45 = vpack.c.bf16 %v1068_v41, %v1066_v36  ;;  %1194 = vadd.xlane.f32.xlu1 %v1193_v42  ;;  %v1179_v48 = vmul.f32 %v1068_v41, %v1068_v41  ;;  %v998_v49 = vpop.f32.mrf.mxu0  ;;  %v1070_v51 = vadd.f32 %v1069_v44, %v996_v43  ;;  %v1156_v53 = vadd.f32 %v1068_v41, %v1066_v36 }
 0x14d   : > { %v1071_v50 = vpop.f32.mrf.mxu1 }
 0x14e   : > { %1144 = vst [vmem:[%s1990_s23 + $0x10] sm:$0xff] %v1501_v45  ;;  %v1072_v52 = vadd.f32 %v1071_v50, %v998_v49  ;;  %1154 = vadd.xlane.f32.xlu0 %v1153_v46  ;;  %v1002_v54 = vpop.f32.mrf.mxu0  ;;  %v1196_v58 = vadd.f32 %v1179_v48, %v1178_v47  ;;  %v1180_v2 = vmul.f32 %v1070_v51, %v1070_v51 }
 0x14f   : > { %v1075_v55 = vpop.f32.mrf.mxu1 }
 0x150   : > { %v1502_v56 = vpack.c.bf16 %v1072_v52, %v1070_v51  ;;  %v1076_v57 = vadd.f32 %v1075_v55, %v1002_v54  ;;  %1157 = vadd.xlane.f32.xlu1 %v1156_v53  ;;  %v1004_v59 = vpop.f32.mrf.mxu0  ;;  %v1159_v62 = vadd.f32 %v1072_v52, %v1070_v51  ;;  %v1181_v63 = vmul.f32 %v1072_v52, %v1072_v52 }
 0x151   : > { %v1077_v60 = vpop.f32.mrf.mxu1 }
 0x152   : > { %1145 = vst [vmem:[%s1990_s23 + $0x18] sm:$0xff] %v1502_v56  ;;  %v1078_v61 = vadd.f32 %v1077_v60, %v1004_v59  ;;  %1197 = vadd.xlane.f32.xlu0 %v1196_v58  ;;  %v1006_v0 = vpop.f32.mrf.mxu0  ;;  %v1182_v5 = vmul.f32 %v1076_v57, %v1076_v57  ;;  %v1199_v11 = vadd.f32 %v1181_v63, %v1180_v2 }
 0x153   : > { %v1079_v1 = vpop.f32.mrf.mxu1 }
 0x154   : > { %v1503_v3 = vpack.c.bf16 %v1078_v61, %v1076_v57  ;;  %1160 = vadd.xlane.f32.xlu1 %v1159_v62  ;;  %v1162_v4 = vadd.f32 %v1078_v61, %v1076_v57  ;;  %v1183_v6 = vmul.f32 %v1078_v61, %v1078_v61  ;;  %v1008_v7 = vpop.f32.mrf.mxu0  ;;  %v1080_v9 = vadd.f32 %v1079_v1, %v1006_v0  ;;  %v1289_v0 = vld [vmem:[%s1990_s23] sm:$0xff] (%p1727_p5)  ;;  %v1291_v1 = vld [vmem:[%s1990_s23 + $0x8] sm:$0xff] (%p1727_p5) }
 0x155   : > { %v1081_v8 = vpop.f32.mrf.mxu1  ;;  %v1293_v2 = vld [vmem:[%s1990_s23 + $0x10] sm:$0xff] (%p1727_p5)  ;;  %1290 = vst [vmem:[%s1246_s4] sm:$0xff] (%p1727_p5), %v1289_v0  ;;  %1292 = vst [vmem:[%s1246_s4 + $0x10] sm:$0xff] (%p1727_p5), %v1291_v1 }
 0x156   : > { %1146 = vst [vmem:[%s1990_s23 + $0x20] sm:$0xff] %v1503_v3  ;;  %v1082_v10 = vadd.f32 %v1081_v8, %v1008_v7  ;;  %1163 = vadd.xlane.f32.xlu0 %v1162_v4  ;;  %v1012_v12 = vpop.f32.mrf.mxu0  ;;  %v1202_v16 = vadd.f32 %v1183_v6, %v1182_v5  ;;  %v1184_v24 = vmul.f32 %v1080_v9, %v1080_v9  ;;  %1294 = vst [vmem:[%s1246_s4 + $0x20] sm:$0xff] (%p1727_p5), %v1293_v2 }
 0x157   : > { %v1085_v13 = vpop.f32.mrf.mxu1 }
 0x158   : > { %v1504_v14 = vpack.c.bf16 %v1082_v10, %v1080_v9  ;;  %v1086_v15 = vadd.f32 %v1085_v13, %v1012_v12  ;;  %1200 = vadd.xlane.f32.xlu1 %v1199_v11  ;;  %v1014_v17 = vpop.f32.mrf.mxu0  ;;  %v1165_v20 = vadd.f32 %v1082_v10, %v1080_v9  ;;  %v1185_v21 = vmul.f32 %v1082_v10, %v1082_v10 }
 0x159   : > { %v1087_v18 = vpop.f32.mrf.mxu1  ;;  %v1295_v3 = vld [vmem:[%s1990_s23 + $0x18] sm:$0xff] (%p1727_p5) }
 0x15a   : > { %1147 = vst [vmem:[%s1990_s23 + $0x28] sm:$0xff] %v1504_v14  ;;  %v1088_v19 = vadd.f32 %v1087_v18, %v1014_v17  ;;  %1203 = vadd.xlane.f32.xlu0 %v1202_v16  ;;  %v1016_v22 = vpop.f32.mrf.mxu0  ;;  %v1186_v27 = vmul.f32 %v1086_v15, %v1086_v15  ;;  %v1205_v33 = vadd.f32 %v1185_v21, %v1184_v24  ;;  %1296 = vst [vmem:[%s1246_s4 + $0x30] sm:$0xff] (%p1727_p5), %v1295_v3 }
 0x15b   : > { %v1089_v23 = vpop.f32.mrf.mxu1 }
 0x15c   : > { %v1505_v25 = vpack.c.bf16 %v1088_v19, %v1086_v15  ;;  %1166 = vadd.xlane.f32.xlu1 %v1165_v20  ;;  %v1168_v26 = vadd.f32 %v1088_v19, %v1086_v15  ;;  %v1187_v28 = vmul.f32 %v1088_v19, %v1088_v19  ;;  %v1018_v29 = vpop.f32.mrf.mxu0  ;;  %v1090_v31 = vadd.f32 %v1089_v23, %v1016_v22 }
 0x15d   : > { %v1091_v30 = vpop.f32.mrf.mxu1  ;;  %v1297_v4 = vld [vmem:[%s1990_s23 + $0x20] sm:$0xff] (%p1727_p5) }
 0x15e   : > { %1148 = vst [vmem:[%s1990_s23 + $0x30] sm:$0xff] %v1505_v25  ;;  %v1092_v32 = vadd.f32 %v1091_v30, %v1018_v29  ;;  %1169 = vadd.xlane.f32.xlu0 %v1168_v26  ;;  %v1208_v35 = vadd.f32 %v1187_v28, %v1186_v27  ;;  %v1188_v38 = vmul.f32 %v1090_v31, %v1090_v31  ;;  %1298 = vst [vmem:[%s1246_s4 + $0x40] sm:$0xff] (%p1727_p5), %v1297_v4 }
 0x160   : > { %v1506_v34 = vpack.c.bf16 %v1092_v32, %v1090_v31  ;;  %1206 = vadd.xlane.f32.xlu1 %v1205_v33  ;;  %v1171_v36 = vadd.f32 %v1092_v32, %v1090_v31  ;;  %v1189_v37 = vmul.f32 %v1092_v32, %v1092_v32 }
 0x161   : > { %v1299_v5 = vld [vmem:[%s1990_s23 + $0x28] sm:$0xff] (%p1727_p5) }
 0x162   : > { %1149 = vst [vmem:[%s1990_s23 + $0x38] sm:$0xff] %v1506_v34  ;;  %1209 = vadd.xlane.f32.xlu0 %v1208_v35  ;;  %v1211_v39 = vadd.f32 %v1189_v37, %v1188_v38  ;;  %1300 = vst [vmem:[%s1246_s4 + $0x50] sm:$0xff] (%p1727_p5), %v1299_v5 }
 0x164   : > { %1172 = vadd.xlane.f32.xlu1 %v1171_v36 }
 0x165   : > { %v1301_v6 = vld [vmem:[%s1990_s23 + $0x30] sm:$0xff] (%p1727_p5) }
 0x166   : > { %1302 = vst [vmem:[%s1246_s4 + $0x60] sm:$0xff] (%p1727_p5), %v1301_v6 }
 0x168   : > { %1212 = vadd.xlane.f32.xlu1 %v1211_v39 }
 0x169   : > { %v1303_v7 = vld [vmem:[%s1990_s23 + $0x38] sm:$0xff] (%p1727_p5) }
 0x16a   : > { %1304 = vst [vmem:[%s1246_s4 + $0x70] sm:$0xff] (%p1727_p5), %v1303_v7 }
 0x1cf   : > { %v1152_v40 = vpop.xlane.xlu0 %1151 }
 0x1d3   : > { %v1192_v41 = vpop.xlane.xlu0 %1191 }
 0x1d4   : > { %v1215_v42 = vsel %vm1214_vm0, %v1152_v40, %v1192_v41 }
 0x1d5   : > { %1224 = vst.msk [vmem:[%s2005_s26] sm:$0xff] %vm1223_vm1, %v1215_v42  ;;  %v1195_v43 = vpop.xlane.xlu1 %1194 }
 0x1d7   : > { %v1155_v44 = vpop.xlane.xlu0 %1154 }
 0x1d8   : > { %v1216_v45 = vsel %vm1214_vm0, %v1155_v44, %v1195_v43 }
 0x1d9   : > { %1225 = vst.msk [vmem:[%s2005_s26 + $0x8] sm:$0xff] %vm1223_vm1, %v1216_v45  ;;  %v1158_v46 = vpop.xlane.xlu1 %1157 }
 0x1db   : > { %v1198_v47 = vpop.xlane.xlu0 %1197 }
 0x1dc   : > { %v1217_v48 = vsel %vm1214_vm0, %v1158_v46, %v1198_v47 }
 0x1dd   : > { %1226 = vst.msk [vmem:[%s2005_s26 + $0x10] sm:$0xff] %vm1223_vm1, %v1217_v48  ;;  %v1161_v49 = vpop.xlane.xlu1 %1160 }
 0x1df   : > { %v1164_v50 = vpop.xlane.xlu0 %1163 }
 0x1e1   : > { %v1201_v51 = vpop.xlane.xlu1 %1200 }
 0x1e2   : > { %v1218_v52 = vsel %vm1214_vm0, %v1161_v49, %v1201_v51 }
 0x1e3   : > { %1227 = vst.msk [vmem:[%s2005_s26 + $0x18] sm:$0xff] %vm1223_vm1, %v1218_v52  ;;  %v1204_v53 = vpop.xlane.xlu0 %1203 }
 0x1e4   : > { %v1219_v54 = vsel %vm1214_vm0, %v1164_v50, %v1204_v53 }
 0x1e5   : > { %1228 = vst.msk [vmem:[%s2005_s26 + $0x20] sm:$0xff] %vm1223_vm1, %v1219_v54  ;;  %v1167_v55 = vpop.xlane.xlu1 %1166 }
 0x1e7   : > { %v1170_v56 = vpop.xlane.xlu0 %1169 }
 0x1e9   : > { %v1207_v57 = vpop.xlane.xlu1 %1206 }
 0x1ea   : > { %v1220_v58 = vsel %vm1214_vm0, %v1167_v55, %v1207_v57 }
 0x1eb   : > { %1229 = vst.msk [vmem:[%s2005_s26 + $0x28] sm:$0xff] %vm1223_vm1, %v1220_v58  ;;  %v1210_v59 = vpop.xlane.xlu0 %1209 }
 0x1ec   : > { %v1221_v60 = vsel %vm1214_vm0, %v1170_v56, %v1210_v59 }
 0x1ed   : > { %1230 = vst.msk [vmem:[%s2005_s26 + $0x30] sm:$0xff] %vm1223_vm1, %v1221_v60  ;;  %v1173_v61 = vpop.xlane.xlu1 %1172 }
 0x1ef   : > { %1243 = sbr.rel (!%p1727_p5) target bundleno = 500 (0x1f4), region = 70 }
 0x1f1   : > { %v1213_v62 = vpop.xlane.xlu1 %1212 }
 0x1f2   : > { %v1222_v63 = vsel %vm1214_vm0, %v1173_v61, %v1213_v62 }
 0x1f3   : > { %1231 = vst.msk [vmem:[%s2005_s26 + $0x38] sm:$0xff] %vm1223_vm1, %v1222_v63 }
 0x1f4 PF: > { %p11_p11 = scmp.ge.s32.totalorder %s1715_s16, 4   ;;  %s2060_s12 = smov %s1670_s13 }
 0x1f5   : > { %s2061_s13 = smov %s1725_s19  ;;  %s2062_s14 = smov %s1715_s16 }
 0x1f6   :  { %13 = sbr.rel (!%p11_p11) target bundleno = 2 (0x2), region = 151 }

</bundles_post_ra>
